<compile_context>
chip_gen: v7x
topology: tpu7x:2x2x1
jax: 0.10.0
libtpu: 0.0.40
codegen_flags: <defaults>
</compile_context>

<pallas_src>
import jax
import jax.numpy as jnp
from jax.experimental import pallas as pl
from jax.experimental.pallas import tpu as pltpu


def _seg_kernel(x_ref, halo_ref, w3_ref, scale_ref, shift_ref, w1_ref, b1_ref,
                out_ref, xext_ref, ymid_ref):
    """One (image, H-tile) grid step: conv3x3 -> BN -> ReLU -> conv1x1.

    x_ref:    (1, Cin, TH, W)        VMEM tile of the input (NCHW)
    halo_ref: (1, Cin, 1, 2, W)      row above / below the tile (zeros at border)
    w3_ref:   (9*Cin*Cmid,)  SMEM    flat HWIO weights, idx=((dy*3+dx)*Cin+ci)*Cmid+co
    scale/shift: (Cmid,)     SMEM    folded BatchNorm affine
    w1_ref:   (Cmid*Cout,)   SMEM    flat 1x1 weights, idx=co*Cout+do
    b1_ref:   (Cout,)        SMEM    1x1 bias
    out_ref:  (1, Cout, TH, W)       VMEM output tile (NCHW)
    xext_ref: (Cin, TH+2, W+2) f32   zero-padded input tile (scratch)
    ymid_ref: (Cmid, TH, W)    f32   ReLU(BN(conv3x3)) activations (scratch)
    """
    _, Cin, TH, W = x_ref.shape
    Cout = out_ref.shape[1]
    Cmid = scale_ref.shape[0]
    f32 = jnp.float32

    # ---- Build the zero-padded (halo'd) input tile in VMEM scratch. ----
    # Lane-aligned full-width stores; the left/right zero columns are added by
    # concatenating along the lane axis in registers.
    zc_main = jnp.zeros((Cin, TH, 1), f32)
    zc_halo = jnp.zeros((Cin, 1, 1), f32)
    main = x_ref[0].astype(f32)                        # (Cin, TH, W)
    top = halo_ref[0, :, 0, 0:1, :].astype(f32)        # (Cin, 1, W)
    bot = halo_ref[0, :, 0, 1:2, :].astype(f32)        # (Cin, 1, W)
    xext_ref[:, 0:1, :] = jnp.concatenate([zc_halo, top, zc_halo], axis=2)
    xext_ref[:, 1:TH + 1, :] = jnp.concatenate([zc_main, main, zc_main], axis=2)
    xext_ref[:, TH + 1:TH + 2, :] = jnp.concatenate([zc_halo, bot, zc_halo], axis=2)

    # ---- 3x3 conv (no bias) + folded BN + ReLU, one mid channel at a time ----
    # (keeps exactly one (TH, W) f32 accumulator live in vregs).
    for co in range(Cmid):
        acc = jnp.zeros((TH, W), f32)
        for ci in range(Cin):
            for dy in range(3):
                for dx in range(3):
                    w = w3_ref[((dy * 3 + dx) * Cin + ci) * Cmid + co]
                    acc = acc + w * xext_ref[ci, dy:dy + TH, dx:dx + W]
        ymid_ref[co] = jnp.maximum(acc * scale_ref[co] + shift_ref[co], 0.0)

    # ---- 1x1 conv with bias. ----
    for do in range(Cout):
        z = jnp.zeros((TH, W), f32)
        for co in range(Cmid):
            z = z + w1_ref[co * Cout + do] * ymid_ref[co]
        out_ref[0, do] = (z + b1_ref[do]).astype(out_ref.dtype)


def _choose_tile_h(H):
    for cand in (64, 32, 16, 8):
        if H % cand == 0:
            return cand
    return H  # fallback: single tile (block dim == full dim is always legal)


def segmentation_module_forward(x_nchw, params, *, stride=1, upsampling=1,
                                eps=1e-5, tile_h=None):
    """Forward pass matching the PyTorch SegmentationModule (eval-mode BN)."""
    if stride != 1:
        # TODO(synk): stride > 1 not implemented in the kernel.
        raise NotImplementedError("stride > 1 not implemented in the kernel")

    N, Cin, H, W = x_nchw.shape
    w3 = params["w3"]                                    # (3, 3, Cin, Cmid) HWIO
    w1 = params["w1"]                                    # (Cmid, Cout)
    Cmid = w3.shape[-1]
    Cout = w1.shape[-1]

    TH = tile_h if (tile_h is not None and H % tile_h == 0) else _choose_tile_h(H)
    n_h = H // TH

    # Per-tile halo rows (row above / below each H tile; zeros at the image
    # border). Tiny compared with the activation: (N, Cin, n_h, 2, W).
    dt = x_nchw.dtype
    zrow = jnp.zeros((N, Cin, 1, W), dt)
    top_rows = x_nchw[:, :, TH - 1:H - 1:TH, :]          # rows TH-1, 2TH-1, ... (n_h-1 rows)
    bot_rows = x_nchw[:, :, TH:H:TH, :]                  # rows TH, 2TH, ...     (n_h-1 rows)
    top = jnp.concatenate([zrow, top_rows], axis=2)      # (N, Cin, n_h, W)
    bot = jnp.concatenate([bot_rows, zrow], axis=2)      # (N, Cin, n_h, W)
    halo = jnp.stack([top, bot], axis=3)                 # (N, Cin, n_h, 2, W)

    # Fold BatchNorm running stats into scale/shift; flatten small params for SMEM.
    scale = (params["gamma"] / jnp.sqrt(params["var"] + eps)).astype(jnp.float32)
    shift = (params["beta"] - params["mean"] * scale).astype(jnp.float32)
    w3_flat = w3.astype(jnp.float32).reshape(-1)         # ((dy*3+dx)*Cin+ci)*Cmid+co
    w1_flat = w1.astype(jnp.float32).reshape(-1)         # co*Cout + do
    b1_flat = params["b1"].astype(jnp.float32).reshape(-1)

    smem = pl.BlockSpec(memory_space=pltpu.MemorySpace.SMEM)

    out = pl.pallas_call(
        _seg_kernel,
        out_shape=jax.ShapeDtypeStruct((N, Cout, H, W), jnp.float32),
        grid=(N, n_h),
        in_specs=[
            pl.BlockSpec((1, Cin, TH, W), lambda n, h: (n, 0, h, 0)),
            pl.BlockSpec((1, Cin, 1, 2, W), lambda n, h: (n, 0, h, 0, 0)),
            smem, smem, smem, smem, smem,
        ],
        out_specs=pl.BlockSpec((1, Cout, TH, W), lambda n, h: (n, 0, h, 0)),
        scratch_shapes=[
            pltpu.VMEM((Cin, TH + 2, W + 2), jnp.float32),
            pltpu.VMEM((Cmid, TH, W), jnp.float32),
        ],
        compiler_params=pltpu.CompilerParams(
            dimension_semantics=("parallel", "parallel"),
            vmem_limit_bytes=32 * 1024 * 1024,
        ),
    )(x_nchw, halo, w3_flat, scale, shift, w1_flat, b1_flat)

    if upsampling > 1:
        # TODO(synk): fuse integer-factor bilinear upsample into the kernel
        # epilogue instead of this extra HBM round trip.
        out = jax.image.resize(out, (N, Cout, H * upsampling, W * upsampling),
                               method="bilinear")
    return out


def _reference_forward(x_nchw, params, eps=1e-5):
    """Plain-JAX reference (mirrors PyTorch forward, eval-mode BN)."""
    x = jnp.transpose(x_nchw, (0, 2, 3, 1)).astype(jnp.float32)
    y = jax.lax.conv_general_dilated(
        x, params["w3"].astype(jnp.float32),
        window_strides=(1, 1), padding="SAME",
        dimension_numbers=("NHWC", "HWIO", "NHWC"))
    scale = params["gamma"] / jnp.sqrt(params["var"] + eps)
    shift = params["beta"] - params["mean"] * scale
    y = jnp.maximum(y * scale + shift, 0.0)
    z = jnp.einsum("nhwc,cd->nhwd", y, params["w1"]) + params["b1"]
    return jnp.transpose(z, (0, 3, 1, 2))


if __name__ == "__main__":
    inplanes, interplanes, outplanes = 4, 8, 3
    N, H, W = 2, 16, 16

    key = jax.random.PRNGKey(0)
    ks = jax.random.split(key, 8)

    x = jax.random.normal(ks[0], (N, inplanes, H, W), jnp.float32)
    params = {
        # Conv2d(inplanes, interplanes, k=3, padding=1, bias=False) -> HWIO
        "w3": 0.1 * jax.random.normal(ks[1], (3, 3, inplanes, interplanes),
                                      jnp.float32),
        # BatchNorm2d(interplanes), eval-mode running stats
        "gamma": jax.random.uniform(ks[2], (interplanes,), jnp.float32, 0.5, 1.5),
        "beta": 0.1 * jax.random.normal(ks[3], (interplanes,), jnp.float32),
        "mean": 0.1 * jax.random.normal(ks[4], (interplanes,), jnp.float32),
        "var": jax.random.uniform(ks[5], (interplanes,), jnp.float32, 0.5, 1.5),
        # Conv2d(interplanes, outplanes, k=1, bias=True)
        "w1": 0.1 * jax.random.normal(ks[6], (interplanes, outplanes),
                                      jnp.float32),
        "b1": 0.1 * jax.random.normal(ks[7], (outplanes,), jnp.float32),
    }

    ref = jax.block_until_ready(_reference_forward(x, params))

    # Multi-tile path (tile_h=8 -> 2 H-tiles per image): exercises the halo exchange.
    out_tiled = jax.block_until_ready(
        segmentation_module_forward(x, params, stride=1, upsampling=1, tile_h=8))
    assert out_tiled.shape == (N, outplanes, H, W), out_tiled.shape
    assert jnp.allclose(out_tiled, ref, atol=1e-4, rtol=1e-4), \
        float(jnp.max(jnp.abs(out_tiled - ref)))

    # Default auto-tile path.
    out_auto = jax.block_until_ready(
        segmentation_module_forward(x, params, stride=1, upsampling=1))
    assert jnp.allclose(out_auto, ref, atol=1e-4, rtol=1e-4), \
        float(jnp.max(jnp.abs(out_auto - ref)))

    print("KERNEL_OK")
</pallas_src>

<mosaic_0001>
module attributes {stable_mosaic.version = 11 : i64} {
  func.func @_seg_kernel(%arg0: i32, %arg1: i32, %arg2: memref<1x4x8x16xf32, #tpu.memory_space<vmem>>, %arg3: memref<1x4x1x2x16xf32, #tpu.memory_space<vmem>>, %arg4: memref<288xf32, #tpu.memory_space<smem>>, %arg5: memref<8xf32, #tpu.memory_space<smem>>, %arg6: memref<8xf32, #tpu.memory_space<smem>>, %arg7: memref<24xf32, #tpu.memory_space<smem>>, %arg8: memref<3xf32, #tpu.memory_space<smem>>, %arg9: memref<1x3x8x16xf32, #tpu.memory_space<vmem>>, %arg10: memref<4x10x18xf32, #tpu.memory_space<vmem>>, %arg11: memref<8x8x16xf32, #tpu.memory_space<vmem>>) attributes {dimension_semantics = [#tpu.dimension_semantics<parallel>, #tpu.dimension_semantics<parallel>], iteration_bounds = array<i64: 2, 2>, scalar_prefetch = 0 : i64, scratch_operands = 2 : i64, tpu.core_type = #tpu.core_type<tc>, window_params = [{transform_indices = @transform_0, window_bounds = array<i64: 1, 4, 8, 16>}, {transform_indices = @transform_1, window_bounds = array<i64: 1, 4, 1, 2, 16>}, {transform_indices = @transform_2, window_bounds = array<i64: 288>}, {transform_indices = @transform_3, window_bounds = array<i64: 8>}, {transform_indices = @transform_4, window_bounds = array<i64: 8>}, {transform_indices = @transform_5, window_bounds = array<i64: 24>}, {transform_indices = @transform_6, window_bounds = array<i64: 3>}, {transform_indices = @transform_7, window_bounds = array<i64: 1, 3, 8, 16>}]} {
    %cst = arith.constant 0.000000e+00 : f32
    %0 = vector.broadcast %cst : f32 to vector<4x8x1xf32>
    %cst_0 = arith.constant 0.000000e+00 : f32
    %1 = vector.broadcast %cst_0 : f32 to vector<4x1x1xf32>
    %c0 = arith.constant 0 : index
    %c0_1 = arith.constant 0 : index
    %c0_2 = arith.constant 0 : index
    %c0_3 = arith.constant 0 : index
    %2 = vector.load %arg2[%c0, %c0_1, %c0_2, %c0_3] : memref<1x4x8x16xf32, #tpu.memory_space<vmem>>, vector<1x4x8x16xf32>
    %3 = vector.shape_cast %2 : vector<1x4x8x16xf32> to vector<4x8x16xf32>
    %c0_4 = arith.constant 0 : index
    %c0_5 = arith.constant 0 : index
    %c0_6 = arith.constant 0 : index
    %c0_7 = arith.constant 0 : index
    %c0_8 = arith.constant 0 : index
    %4 = vector.load %arg3[%c0_4, %c0_5, %c0_6, %c0_7, %c0_8] : memref<1x4x1x2x16xf32, #tpu.memory_space<vmem>>, vector<1x4x1x1x16xf32>
    %5 = vector.shape_cast %4 : vector<1x4x1x1x16xf32> to vector<4x1x16xf32>
    %c0_9 = arith.constant 0 : index
    %c0_10 = arith.constant 0 : index
    %c0_11 = arith.constant 0 : index
    %c1 = arith.constant 1 : index
    %c0_12 = arith.constant 0 : index
    %6 = vector.load %arg3[%c0_9, %c0_10, %c0_11, %c1, %c0_12] : memref<1x4x1x2x16xf32, #tpu.memory_space<vmem>>, vector<1x4x1x1x16xf32>
    %7 = vector.shape_cast %6 : vector<1x4x1x1x16xf32> to vector<4x1x16xf32>
    %8 = tpu.concatenate %1, %5, %1 in 2 : vector<4x1x1xf32>, vector<4x1x16xf32>, vector<4x1x1xf32> -> vector<4x1x18xf32>
    %c0_13 = arith.constant 0 : index
    %c0_14 = arith.constant 0 : index
    %c0_15 = arith.constant 0 : index
    %9 = vector.load %arg10[%c0_13, %c0_14, %c0_15] : memref<4x10x18xf32, #tpu.memory_space<vmem>>, vector<4x1x18xf32>
    tpu.vector_store %arg10[%c0_13, %c0_14, %c0_15], %8 {strides = array<i32>} : memref<4x10x18xf32, #tpu.memory_space<vmem>>, vector<4x1x18xf32>,
    %10 = tpu.concatenate %0, %3, %0 in 2 : vector<4x8x1xf32>, vector<4x8x16xf32>, vector<4x8x1xf32> -> vector<4x8x18xf32>
    %c0_16 = arith.constant 0 : index
    %c1_17 = arith.constant 1 : index
    %c0_18 = arith.constant 0 : index
    %11 = vector.load %arg10[%c0_16, %c1_17, %c0_18] : memref<4x10x18xf32, #tpu.memory_space<vmem>>, vector<4x8x18xf32>
    tpu.vector_store %arg10[%c0_16, %c1_17, %c0_18], %10 {strides = array<i32>} : memref<4x10x18xf32, #tpu.memory_space<vmem>>, vector<4x8x18xf32>,
    %12 = tpu.concatenate %1, %7, %1 in 2 : vector<4x1x1xf32>, vector<4x1x16xf32>, vector<4x1x1xf32> -> vector<4x1x18xf32>
    %c0_19 = arith.constant 0 : index
    %c9 = arith.constant 9 : index
    %c0_20 = arith.constant 0 : index
    %13 = vector.load %arg10[%c0_19, %c9, %c0_20] : memref<4x10x18xf32, #tpu.memory_space<vmem>>, vector<4x1x18xf32>
    tpu.vector_store %arg10[%c0_19, %c9, %c0_20], %12 {strides = array<i32>} : memref<4x10x18xf32, #tpu.memory_space<vmem>>, vector<4x1x18xf32>,
    %cst_21 = arith.constant 0.000000e+00 : f32
    %14 = vector.broadcast %cst_21 : f32 to vector<8x16xf32>
    %c0_22 = arith.constant 0 : index
    %15 = memref.load %arg4[%c0_22] : memref<288xf32, #tpu.memory_space<smem>>
    %c0_23 = arith.constant 0 : index
    %c0_24 = arith.constant 0 : index
    %c0_25 = arith.constant 0 : index
    %16 = vector.load %arg10[%c0_23, %c0_24, %c0_25] : memref<4x10x18xf32, #tpu.memory_space<vmem>>, vector<1x8x16xf32>
    %17 = vector.shape_cast %16 : vector<1x8x16xf32> to vector<8x16xf32>
    %18 = vector.broadcast %15 : f32 to vector<8x16xf32>
    %19 = arith.mulf %18, %17 : vector<8x16xf32>
    %20 = arith.addf %14, %19 : vector<8x16xf32>
    %c32 = arith.constant 32 : index
    %21 = memref.load %arg4[%c32] : memref<288xf32, #tpu.memory_space<smem>>
    %c0_26 = arith.constant 0 : index
    %c0_27 = arith.constant 0 : index
    %c1_28 = arith.constant 1 : index
    %22 = vector.load %arg10[%c0_26, %c0_27, %c1_28] : memref<4x10x18xf32, #tpu.memory_space<vmem>>, vector<1x8x16xf32>
    %23 = vector.shape_cast %22 : vector<1x8x16xf32> to vector<8x16xf32>
    %24 = vector.broadcast %21 : f32 to vector<8x16xf32>
    %25 = arith.mulf %24, %23 : vector<8x16xf32>
    %26 = arith.addf %20, %25 : vector<8x16xf32>
    %c64 = arith.constant 64 : index
    %27 = memref.load %arg4[%c64] : memref<288xf32, #tpu.memory_space<smem>>
    %c0_29 = arith.constant 0 : index
    %c0_30 = arith.constant 0 : index
    %c2 = arith.constant 2 : index
    %28 = vector.load %arg10[%c0_29, %c0_30, %c2] : memref<4x10x18xf32, #tpu.memory_space<vmem>>, vector<1x8x16xf32>
    %29 = vector.shape_cast %28 : vector<1x8x16xf32> to vector<8x16xf32>
    %30 = vector.broadcast %27 : f32 to vector<8x16xf32>
    %31 = arith.mulf %30, %29 : vector<8x16xf32>
    %32 = arith.addf %26, %31 : vector<8x16xf32>
    %c96 = arith.constant 96 : index
    %33 = memref.load %arg4[%c96] : memref<288xf32, #tpu.memory_space<smem>>
    %c0_31 = arith.constant 0 : index
    %c1_32 = arith.constant 1 : index
    %c0_33 = arith.constant 0 : index
    %34 = vector.load %arg10[%c0_31, %c1_32, %c0_33] : memref<4x10x18xf32, #tpu.memory_space<vmem>>, vector<1x8x16xf32>
    %35 = vector.shape_cast %34 : vector<1x8x16xf32> to vector<8x16xf32>
    %36 = vector.broadcast %33 : f32 to vector<8x16xf32>
    %37 = arith.mulf %36, %35 : vector<8x16xf32>
    %38 = arith.addf %32, %37 : vector<8x16xf32>
    %c128 = arith.constant 128 : index
    %39 = memref.load %arg4[%c128] : memref<288xf32, #tpu.memory_space<smem>>
    %c0_34 = arith.constant 0 : index
    %c1_35 = arith.constant 1 : index
    %c1_36 = arith.constant 1 : index
    %40 = vector.load %arg10[%c0_34, %c1_35, %c1_36] : memref<4x10x18xf32, #tpu.memory_space<vmem>>, vector<1x8x16xf32>
    %41 = vector.shape_cast %40 : vector<1x8x16xf32> to vector<8x16xf32>
    %42 = vector.broadcast %39 : f32 to vector<8x16xf32>
    %43 = arith.mulf %42, %41 : vector<8x16xf32>
    %44 = arith.addf %38, %43 : vector<8x16xf32>
    %c160 = arith.constant 160 : index
    %45 = memref.load %arg4[%c160] : memref<288xf32, #tpu.memory_space<smem>>
    %c0_37 = arith.constant 0 : index
    %c1_38 = arith.constant 1 : index
    %c2_39 = arith.constant 2 : index
    %46 = vector.load %arg10[%c0_37, %c1_38, %c2_39] : memref<4x10x18xf32, #tpu.memory_space<vmem>>, vector<1x8x16xf32>
    %47 = vector.shape_cast %46 : vector<1x8x16xf32> to vector<8x16xf32>
    %48 = vector.broadcast %45 : f32 to vector<8x16xf32>
    %49 = arith.mulf %48, %47 : vector<8x16xf32>
    %50 = arith.addf %44, %49 : vector<8x16xf32>
    %c192 = arith.constant 192 : index
    %51 = memref.load %arg4[%c192] : memref<288xf32, #tpu.memory_space<smem>>
    %c0_40 = arith.constant 0 : index
    %c2_41 = arith.constant 2 : index
    %c0_42 = arith.constant 0 : index
    %52 = vector.load %arg10[%c0_40, %c2_41, %c0_42] : memref<4x10x18xf32, #tpu.memory_space<vmem>>, vector<1x8x16xf32>
    %53 = vector.shape_cast %52 : vector<1x8x16xf32> to vector<8x16xf32>
    %54 = vector.broadcast %51 : f32 to vector<8x16xf32>
    %55 = arith.mulf %54, %53 : vector<8x16xf32>
    %56 = arith.addf %50, %55 : vector<8x16xf32>
    %c224 = arith.constant 224 : index
    %57 = memref.load %arg4[%c224] : memref<288xf32, #tpu.memory_space<smem>>
    %c0_43 = arith.constant 0 : index
    %c2_44 = arith.constant 2 : index
    %c1_45 = arith.constant 1 : index
    %58 = vector.load %arg10[%c0_43, %c2_44, %c1_45] : memref<4x10x18xf32, #tpu.memory_space<vmem>>, vector<1x8x16xf32>
    %59 = vector.shape_cast %58 : vector<1x8x16xf32> to vector<8x16xf32>
    %60 = vector.broadcast %57 : f32 to vector<8x16xf32>
    %61 = arith.mulf %60, %59 : vector<8x16xf32>
    %62 = arith.addf %56, %61 : vector<8x16xf32>
    %c256 = arith.constant 256 : index
    %63 = memref.load %arg4[%c256] : memref<288xf32, #tpu.memory_space<smem>>
    %c0_46 = arith.constant 0 : index
    %c2_47 = arith.constant 2 : index
    %c2_48 = arith.constant 2 : index
    %64 = vector.load %arg10[%c0_46, %c2_47, %c2_48] : memref<4x10x18xf32, #tpu.memory_space<vmem>>, vector<1x8x16xf32>
    %65 = vector.shape_cast %64 : vector<1x8x16xf32> to vector<8x16xf32>
    %66 = vector.broadcast %63 : f32 to vector<8x16xf32>
    %67 = arith.mulf %66, %65 : vector<8x16xf32>
    %68 = arith.addf %62, %67 : vector<8x16xf32>
    %c8 = arith.constant 8 : index
    %69 = memref.load %arg4[%c8] : memref<288xf32, #tpu.memory_space<smem>>
    %c1_49 = arith.constant 1 : index
    %c0_50 = arith.constant 0 : index
    %c0_51 = arith.constant 0 : index
    %70 = vector.load %arg10[%c1_49, %c0_50, %c0_51] : memref<4x10x18xf32, #tpu.memory_space<vmem>>, vector<1x8x16xf32>
    %71 = vector.shape_cast %70 : vector<1x8x16xf32> to vector<8x16xf32>
    %72 = vector.broadcast %69 : f32 to vector<8x16xf32>
    %73 = arith.mulf %72, %71 : vector<8x16xf32>
    %74 = arith.addf %68, %73 : vector<8x16xf32>
    %c40 = arith.constant 40 : index
    %75 = memref.load %arg4[%c40] : memref<288xf32, #tpu.memory_space<smem>>
    %c1_52 = arith.constant 1 : index
    %c0_53 = arith.constant 0 : index
    %c1_54 = arith.constant 1 : index
    %76 = vector.load %arg10[%c1_52, %c0_53, %c1_54] : memref<4x10x18xf32, #tpu.memory_space<vmem>>, vector<1x8x16xf32>
    %77 = vector.shape_cast %76 : vector<1x8x16xf32> to vector<8x16xf32>
    %78 = vector.broadcast %75 : f32 to vector<8x16xf32>
    %79 = arith.mulf %78, %77 : vector<8x16xf32>
    %80 = arith.addf %74, %79 : vector<8x16xf32>
    %c72 = arith.constant 72 : index
    %81 = memref.load %arg4[%c72] : memref<288xf32, #tpu.memory_space<smem>>
    %c1_55 = arith.constant 1 : index
    %c0_56 = arith.constant 0 : index
    %c2_57 = arith.constant 2 : index
    %82 = vector.load %arg10[%c1_55, %c0_56, %c2_57] : memref<4x10x18xf32, #tpu.memory_space<vmem>>, vector<1x8x16xf32>
    %83 = vector.shape_cast %82 : vector<1x8x16xf32> to vector<8x16xf32>
    %84 = vector.broadcast %81 : f32 to vector<8x16xf32>
    %85 = arith.mulf %84, %83 : vector<8x16xf32>
    %86 = arith.addf %80, %85 : vector<8x16xf32>
    %c104 = arith.constant 104 : index
    %87 = memref.load %arg4[%c104] : memref<288xf32, #tpu.memory_space<smem>>
    %c1_58 = arith.constant 1 : index
    %c1_59 = arith.constant 1 : index
    %c0_60 = arith.constant 0 : index
    %88 = vector.load %arg10[%c1_58, %c1_59, %c0_60] : memref<4x10x18xf32, #tpu.memory_space<vmem>>, vector<1x8x16xf32>
    %89 = vector.shape_cast %88 : vector<1x8x16xf32> to vector<8x16xf32>
    %90 = vector.broadcast %87 : f32 to vector<8x16xf32>
    %91 = arith.mulf %90, %89 : vector<8x16xf32>
    %92 = arith.addf %86, %91 : vector<8x16xf32>
    %c136 = arith.constant 136 : index
    %93 = memref.load %arg4[%c136] : memref<288xf32, #tpu.memory_space<smem>>
    %c1_61 = arith.constant 1 : index
    %c1_62 = arith.constant 1 : index
    %c1_63 = arith.constant 1 : index
    %94 = vector.load %arg10[%c1_61, %c1_62, %c1_63] : memref<4x10x18xf32, #tpu.memory_space<vmem>>, vector<1x8x16xf32>
    %95 = vector.shape_cast %94 : vector<1x8x16xf32> to vector<8x16xf32>
    %96 = vector.broadcast %93 : f32 to vector<8x16xf32>
    %97 = arith.mulf %96, %95 : vector<8x16xf32>
    %98 = arith.addf %92, %97 : vector<8x16xf32>
    %c168 = arith.constant 168 : index
    %99 = memref.load %arg4[%c168] : memref<288xf32, #tpu.memory_space<smem>>
    %c1_64 = arith.constant 1 : index
    %c1_65 = arith.constant 1 : index
    %c2_66 = arith.constant 2 : index
    %100 = vector.load %arg10[%c1_64, %c1_65, %c2_66] : memref<4x10x18xf32, #tpu.memory_space<vmem>>, vector<1x8x16xf32>
    %101 = vector.shape_cast %100 : vector<1x8x16xf32> to vector<8x16xf32>
    %102 = vector.broadcast %99 : f32 to vector<8x16xf32>
    %103 = arith.mulf %102, %101 : vector<8x16xf32>
    %104 = arith.addf %98, %103 : vector<8x16xf32>
    %c200 = arith.constant 200 : index
    %105 = memref.load %arg4[%c200] : memref<288xf32, #tpu.memory_space<smem>>
    %c1_67 = arith.constant 1 : index
    %c2_68 = arith.constant 2 : index
    %c0_69 = arith.constant 0 : index
    %106 = vector.load %arg10[%c1_67, %c2_68, %c0_69] : memref<4x10x18xf32, #tpu.memory_space<vmem>>, vector<1x8x16xf32>
    %107 = vector.shape_cast %106 : vector<1x8x16xf32> to vector<8x16xf32>
    %108 = vector.broadcast %105 : f32 to vector<8x16xf32>
    %109 = arith.mulf %108, %107 : vector<8x16xf32>
    %110 = arith.addf %104, %109 : vector<8x16xf32>
    %c232 = arith.constant 232 : index
    %111 = memref.load %arg4[%c232] : memref<288xf32, #tpu.memory_space<smem>>
    %c1_70 = arith.constant 1 : index
    %c2_71 = arith.constant 2 : index
    %c1_72 = arith.constant 1 : index
    %112 = vector.load %arg10[%c1_70, %c2_71, %c1_72] : memref<4x10x18xf32, #tpu.memory_space<vmem>>, vector<1x8x16xf32>
    %113 = vector.shape_cast %112 : vector<1x8x16xf32> to vector<8x16xf32>
    %114 = vector.broadcast %111 : f32 to vector<8x16xf32>
    %115 = arith.mulf %114, %113 : vector<8x16xf32>
    %116 = arith.addf %110, %115 : vector<8x16xf32>
    %c264 = arith.constant 264 : index
    %117 = memref.load %arg4[%c264] : memref<288xf32, #tpu.memory_space<smem>>
    %c1_73 = arith.constant 1 : index
    %c2_74 = arith.constant 2 : index
    %c2_75 = arith.constant 2 : index
    %118 = vector.load %arg10[%c1_73, %c2_74, %c2_75] : memref<4x10x18xf32, #tpu.memory_space<vmem>>, vector<1x8x16xf32>
    %119 = vector.shape_cast %118 : vector<1x8x16xf32> to vector<8x16xf32>
    %120 = vector.broadcast %117 : f32 to vector<8x16xf32>
    %121 = arith.mulf %120, %119 : vector<8x16xf32>
    %122 = arith.addf %116, %121 : vector<8x16xf32>
    %c16 = arith.constant 16 : index
    %123 = memref.load %arg4[%c16] : memref<288xf32, #tpu.memory_space<smem>>
    %c2_76 = arith.constant 2 : index
    %c0_77 = arith.constant 0 : index
    %c0_78 = arith.constant 0 : index
    %124 = vector.load %arg10[%c2_76, %c0_77, %c0_78] : memref<4x10x18xf32, #tpu.memory_space<vmem>>, vector<1x8x16xf32>
    %125 = vector.shape_cast %124 : vector<1x8x16xf32> to vector<8x16xf32>
    %126 = vector.broadcast %123 : f32 to vector<8x16xf32>
    %127 = arith.mulf %126, %125 : vector<8x16xf32>
    %128 = arith.addf %122, %127 : vector<8x16xf32>
    %c48 = arith.constant 48 : index
    %129 = memref.load %arg4[%c48] : memref<288xf32, #tpu.memory_space<smem>>
    %c2_79 = arith.constant 2 : index
    %c0_80 = arith.constant 0 : index
    %c1_81 = arith.constant 1 : index
    %130 = vector.load %arg10[%c2_79, %c0_80, %c1_81] : memref<4x10x18xf32, #tpu.memory_space<vmem>>, vector<1x8x16xf32>
    %131 = vector.shape_cast %130 : vector<1x8x16xf32> to vector<8x16xf32>
    %132 = vector.broadcast %129 : f32 to vector<8x16xf32>
    %133 = arith.mulf %132, %131 : vector<8x16xf32>
    %134 = arith.addf %128, %133 : vector<8x16xf32>
    %c80 = arith.constant 80 : index
    %135 = memref.load %arg4[%c80] : memref<288xf32, #tpu.memory_space<smem>>
    %c2_82 = arith.constant 2 : index
    %c0_83 = arith.constant 0 : index
    %c2_84 = arith.constant 2 : index
    %136 = vector.load %arg10[%c2_82, %c0_83, %c2_84] : memref<4x10x18xf32, #tpu.memory_space<vmem>>, vector<1x8x16xf32>
    %137 = vector.shape_cast %136 : vector<1x8x16xf32> to vector<8x16xf32>
    %138 = vector.broadcast %135 : f32 to vector<8x16xf32>
    %139 = arith.mulf %138, %137 : vector<8x16xf32>
    %140 = arith.addf %134, %139 : vector<8x16xf32>
    %c112 = arith.constant 112 : index
    %141 = memref.load %arg4[%c112] : memref<288xf32, #tpu.memory_space<smem>>
    %c2_85 = arith.constant 2 : index
    %c1_86 = arith.constant 1 : index
    %c0_87 = arith.constant 0 : index
    %142 = vector.load %arg10[%c2_85, %c1_86, %c0_87] : memref<4x10x18xf32, #tpu.memory_space<vmem>>, vector<1x8x16xf32>
    %143 = vector.shape_cast %142 : vector<1x8x16xf32> to vector<8x16xf32>
    %144 = vector.broadcast %141 : f32 to vector<8x16xf32>
    %145 = arith.mulf %144, %143 : vector<8x16xf32>
    %146 = arith.addf %140, %145 : vector<8x16xf32>
    %c144 = arith.constant 144 : index
    %147 = memref.load %arg4[%c144] : memref<288xf32, #tpu.memory_space<smem>>
    %c2_88 = arith.constant 2 : index
    %c1_89 = arith.constant 1 : index
    %c1_90 = arith.constant 1 : index
    %148 = vector.load %arg10[%c2_88, %c1_89, %c1_90] : memref<4x10x18xf32, #tpu.memory_space<vmem>>, vector<1x8x16xf32>
    %149 = vector.shape_cast %148 : vector<1x8x16xf32> to vector<8x16xf32>
    %150 = vector.broadcast %147 : f32 to vector<8x16xf32>
    %151 = arith.mulf %150, %149 : vector<8x16xf32>
    %152 = arith.addf %146, %151 : vector<8x16xf32>
    %c176 = arith.constant 176 : index
    %153 = memref.load %arg4[%c176] : memref<288xf32, #tpu.memory_space<smem>>
    %c2_91 = arith.constant 2 : index
    %c1_92 = arith.constant 1 : index
    %c2_93 = arith.constant 2 : index
    %154 = vector.load %arg10[%c2_91, %c1_92, %c2_93] : memref<4x10x18xf32, #tpu.memory_space<vmem>>, vector<1x8x16xf32>
    %155 = vector.shape_cast %154 : vector<1x8x16xf32> to vector<8x16xf32>
    %156 = vector.broadcast %153 : f32 to vector<8x16xf32>
    %157 = arith.mulf %156, %155 : vector<8x16xf32>
    %158 = arith.addf %152, %157 : vector<8x16xf32>
    %c208 = arith.constant 208 : index
    %159 = memref.load %arg4[%c208] : memref<288xf32, #tpu.memory_space<smem>>
    %c2_94 = arith.constant 2 : index
    %c2_95 = arith.constant 2 : index
    %c0_96 = arith.constant 0 : index
    %160 = vector.load %arg10[%c2_94, %c2_95, %c0_96] : memref<4x10x18xf32, #tpu.memory_space<vmem>>, vector<1x8x16xf32>
    %161 = vector.shape_cast %160 : vector<1x8x16xf32> to vector<8x16xf32>
    %162 = vector.broadcast %159 : f32 to vector<8x16xf32>
    %163 = arith.mulf %162, %161 : vector<8x16xf32>
    %164 = arith.addf %158, %163 : vector<8x16xf32>
    %c240 = arith.constant 240 : index
    %165 = memref.load %arg4[%c240] : memref<288xf32, #tpu.memory_space<smem>>
    %c2_97 = arith.constant 2 : index
    %c2_98 = arith.constant 2 : index
    %c1_99 = arith.constant 1 : index
    %166 = vector.load %arg10[%c2_97, %c2_98, %c1_99] : memref<4x10x18xf32, #tpu.memory_space<vmem>>, vector<1x8x16xf32>
    %167 = vector.shape_cast %166 : vector<1x8x16xf32> to vector<8x16xf32>
    %168 = vector.broadcast %165 : f32 to vector<8x16xf32>
    %169 = arith.mulf %168, %167 : vector<8x16xf32>
    %170 = arith.addf %164, %169 : vector<8x16xf32>
    %c272 = arith.constant 272 : index
    %171 = memref.load %arg4[%c272] : memref<288xf32, #tpu.memory_space<smem>>
    %c2_100 = arith.constant 2 : index
    %c2_101 = arith.constant 2 : index
    %c2_102 = arith.constant 2 : index
    %172 = vector.load %arg10[%c2_100, %c2_101, %c2_102] : memref<4x10x18xf32, #tpu.memory_space<vmem>>, vector<1x8x16xf32>
    %173 = vector.shape_cast %172 : vector<1x8x16xf32> to vector<8x16xf32>
    %174 = vector.broadcast %171 : f32 to vector<8x16xf32>
    %175 = arith.mulf %174, %173 : vector<8x16xf32>
    %176 = arith.addf %170, %175 : vector<8x16xf32>
    %c24 = arith.constant 24 : index
    %177 = memref.load %arg4[%c24] : memref<288xf32, #tpu.memory_space<smem>>
    %c3 = arith.constant 3 : index
    %c0_103 = arith.constant 0 : index
    %c0_104 = arith.constant 0 : index
    %178 = vector.load %arg10[%c3, %c0_103, %c0_104] : memref<4x10x18xf32, #tpu.memory_space<vmem>>, vector<1x8x16xf32>
    %179 = vector.shape_cast %178 : vector<1x8x16xf32> to vector<8x16xf32>
    %180 = vector.broadcast %177 : f32 to vector<8x16xf32>
    %181 = arith.mulf %180, %179 : vector<8x16xf32>
    %182 = arith.addf %176, %181 : vector<8x16xf32>
    %c56 = arith.constant 56 : index
    %183 = memref.load %arg4[%c56] : memref<288xf32, #tpu.memory_space<smem>>
    %c3_105 = arith.constant 3 : index
    %c0_106 = arith.constant 0 : index
    %c1_107 = arith.constant 1 : index
    %184 = vector.load %arg10[%c3_105, %c0_106, %c1_107] : memref<4x10x18xf32, #tpu.memory_space<vmem>>, vector<1x8x16xf32>
    %185 = vector.shape_cast %184 : vector<1x8x16xf32> to vector<8x16xf32>
    %186 = vector.broadcast %183 : f32 to vector<8x16xf32>
    %187 = arith.mulf %186, %185 : vector<8x16xf32>
    %188 = arith.addf %182, %187 : vector<8x16xf32>
    %c88 = arith.constant 88 : index
    %189 = memref.load %arg4[%c88] : memref<288xf32, #tpu.memory_space<smem>>
    %c3_108 = arith.constant 3 : index
    %c0_109 = arith.constant 0 : index
    %c2_110 = arith.constant 2 : index
    %190 = vector.load %arg10[%c3_108, %c0_109, %c2_110] : memref<4x10x18xf32, #tpu.memory_space<vmem>>, vector<1x8x16xf32>
    %191 = vector.shape_cast %190 : vector<1x8x16xf32> to vector<8x16xf32>
    %192 = vector.broadcast %189 : f32 to vector<8x16xf32>
    %193 = arith.mulf %192, %191 : vector<8x16xf32>
    %194 = arith.addf %188, %193 : vector<8x16xf32>
    %c120 = arith.constant 120 : index
    %195 = memref.load %arg4[%c120] : memref<288xf32, #tpu.memory_space<smem>>
    %c3_111 = arith.constant 3 : index
    %c1_112 = arith.constant 1 : index
    %c0_113 = arith.constant 0 : index
    %196 = vector.load %arg10[%c3_111, %c1_112, %c0_113] : memref<4x10x18xf32, #tpu.memory_space<vmem>>, vector<1x8x16xf32>
    %197 = vector.shape_cast %196 : vector<1x8x16xf32> to vector<8x16xf32>
    %198 = vector.broadcast %195 : f32 to vector<8x16xf32>
    %199 = arith.mulf %198, %197 : vector<8x16xf32>
    %200 = arith.addf %194, %199 : vector<8x16xf32>
    %c152 = arith.constant 152 : index
    %201 = memref.load %arg4[%c152] : memref<288xf32, #tpu.memory_space<smem>>
    %c3_114 = arith.constant 3 : index
    %c1_115 = arith.constant 1 : index
    %c1_116 = arith.constant 1 : index
    %202 = vector.load %arg10[%c3_114, %c1_115, %c1_116] : memref<4x10x18xf32, #tpu.memory_space<vmem>>, vector<1x8x16xf32>
    %203 = vector.shape_cast %202 : vector<1x8x16xf32> to vector<8x16xf32>
    %204 = vector.broadcast %201 : f32 to vector<8x16xf32>
    %205 = arith.mulf %204, %203 : vector<8x16xf32>
    %206 = arith.addf %200, %205 : vector<8x16xf32>
    %c184 = arith.constant 184 : index
    %207 = memref.load %arg4[%c184] : memref<288xf32, #tpu.memory_space<smem>>
    %c3_117 = arith.constant 3 : index
    %c1_118 = arith.constant 1 : index
    %c2_119 = arith.constant 2 : index
    %208 = vector.load %arg10[%c3_117, %c1_118, %c2_119] : memref<4x10x18xf32, #tpu.memory_space<vmem>>, vector<1x8x16xf32>
    %209 = vector.shape_cast %208 : vector<1x8x16xf32> to vector<8x16xf32>
    %210 = vector.broadcast %207 : f32 to vector<8x16xf32>
    %211 = arith.mulf %210, %209 : vector<8x16xf32>
    %212 = arith.addf %206, %211 : vector<8x16xf32>
    %c216 = arith.constant 216 : index
    %213 = memref.load %arg4[%c216] : memref<288xf32, #tpu.memory_space<smem>>
    %c3_120 = arith.constant 3 : index
    %c2_121 = arith.constant 2 : index
    %c0_122 = arith.constant 0 : index
    %214 = vector.load %arg10[%c3_120, %c2_121, %c0_122] : memref<4x10x18xf32, #tpu.memory_space<vmem>>, vector<1x8x16xf32>
    %215 = vector.shape_cast %214 : vector<1x8x16xf32> to vector<8x16xf32>
    %216 = vector.broadcast %213 : f32 to vector<8x16xf32>
    %217 = arith.mulf %216, %215 : vector<8x16xf32>
    %218 = arith.addf %212, %217 : vector<8x16xf32>
    %c248 = arith.constant 248 : index
    %219 = memref.load %arg4[%c248] : memref<288xf32, #tpu.memory_space<smem>>
    %c3_123 = arith.constant 3 : index
    %c2_124 = arith.constant 2 : index
    %c1_125 = arith.constant 1 : index
    %220 = vector.load %arg10[%c3_123, %c2_124, %c1_125] : memref<4x10x18xf32, #tpu.memory_space<vmem>>, vector<1x8x16xf32>
    %221 = vector.shape_cast %220 : vector<1x8x16xf32> to vector<8x16xf32>
    %222 = vector.broadcast %219 : f32 to vector<8x16xf32>
    %223 = arith.mulf %222, %221 : vector<8x16xf32>
    %224 = arith.addf %218, %223 : vector<8x16xf32>
    %c280 = arith.constant 280 : index
    %225 = memref.load %arg4[%c280] : memref<288xf32, #tpu.memory_space<smem>>
    %c3_126 = arith.constant 3 : index
    %c2_127 = arith.constant 2 : index
    %c2_128 = arith.constant 2 : index
    %226 = vector.load %arg10[%c3_126, %c2_127, %c2_128] : memref<4x10x18xf32, #tpu.memory_space<vmem>>, vector<1x8x16xf32>
    %227 = vector.shape_cast %226 : vector<1x8x16xf32> to vector<8x16xf32>
    %228 = vector.broadcast %225 : f32 to vector<8x16xf32>
    %229 = arith.mulf %228, %227 : vector<8x16xf32>
    %230 = arith.addf %224, %229 : vector<8x16xf32>
    %c0_129 = arith.constant 0 : index
    %231 = memref.load %arg5[%c0_129] : memref<8xf32, #tpu.memory_space<smem>>
    %232 = vector.broadcast %231 : f32 to vector<8x16xf32>
    %233 = arith.mulf %230, %232 : vector<8x16xf32>
    %c0_130 = arith.constant 0 : index
    %234 = memref.load %arg6[%c0_130] : memref<8xf32, #tpu.memory_space<smem>>
    %235 = vector.broadcast %234 : f32 to vector<8x16xf32>
    %236 = arith.addf %233, %235 : vector<8x16xf32>
    %cst_131 = arith.constant 0.000000e+00 : f32
    %237 = vector.broadcast %cst_131 : f32 to vector<8x16xf32>
    %238 = arith.maximumf %236, %237 : vector<8x16xf32>
    %c0_132 = arith.constant 0 : index
    %c0_133 = arith.constant 0 : index
    %c0_134 = arith.constant 0 : index
    %239 = vector.load %arg11[%c0_132, %c0_133, %c0_134] : memref<8x8x16xf32, #tpu.memory_space<vmem>>, vector<1x8x16xf32>
    %240 = vector.shape_cast %239 : vector<1x8x16xf32> to vector<8x16xf32>
    %241 = vector.shape_cast %238 : vector<8x16xf32> to vector<1x8x16xf32>
    tpu.vector_store %arg11[%c0_132, %c0_133, %c0_134], %241 {strides = array<i32>} : memref<8x8x16xf32, #tpu.memory_space<vmem>>, vector<1x8x16xf32>,
    %cst_135 = arith.constant 0.000000e+00 : f32
    %242 = vector.broadcast %cst_135 : f32 to vector<8x16xf32>
    %c1_136 = arith.constant 1 : index
    %243 = memref.load %arg4[%c1_136] : memref<288xf32, #tpu.memory_space<smem>>
    %c0_137 = arith.constant 0 : index
    %c0_138 = arith.constant 0 : index
    %c0_139 = arith.constant 0 : index
    %244 = vector.load %arg10[%c0_137, %c0_138, %c0_139] : memref<4x10x18xf32, #tpu.memory_space<vmem>>, vector<1x8x16xf32>
    %245 = vector.shape_cast %244 : vector<1x8x16xf32> to vector<8x16xf32>
    %246 = vector.broadcast %243 : f32 to vector<8x16xf32>
    %247 = arith.mulf %246, %245 : vector<8x16xf32>
    %248 = arith.addf %242, %247 : vector<8x16xf32>
    %c33 = arith.constant 33 : index
    %249 = memref.load %arg4[%c33] : memref<288xf32, #tpu.memory_space<smem>>
    %c0_140 = arith.constant 0 : index
    %c0_141 = arith.constant 0 : index
    %c1_142 = arith.constant 1 : index
    %250 = vector.load %arg10[%c0_140, %c0_141, %c1_142] : memref<4x10x18xf32, #tpu.memory_space<vmem>>, vector<1x8x16xf32>
    %251 = vector.shape_cast %250 : vector<1x8x16xf32> to vector<8x16xf32>
    %252 = vector.broadcast %249 : f32 to vector<8x16xf32>
    %253 = arith.mulf %252, %251 : vector<8x16xf32>
    %254 = arith.addf %248, %253 : vector<8x16xf32>
    %c65 = arith.constant 65 : index
    %255 = memref.load %arg4[%c65] : memref<288xf32, #tpu.memory_space<smem>>
    %c0_143 = arith.constant 0 : index
    %c0_144 = arith.constant 0 : index
    %c2_145 = arith.constant 2 : index
    %256 = vector.load %arg10[%c0_143, %c0_144, %c2_145] : memref<4x10x18xf32, #tpu.memory_space<vmem>>, vector<1x8x16xf32>
    %257 = vector.shape_cast %256 : vector<1x8x16xf32> to vector<8x16xf32>
    %258 = vector.broadcast %255 : f32 to vector<8x16xf32>
    %259 = arith.mulf %258, %257 : vector<8x16xf32>
    %260 = arith.addf %254, %259 : vector<8x16xf32>
    %c97 = arith.constant 97 : index
    %261 = memref.load %arg4[%c97] : memref<288xf32, #tpu.memory_space<smem>>
    %c0_146 = arith.constant 0 : index
    %c1_147 = arith.constant 1 : index
    %c0_148 = arith.constant 0 : index
    %262 = vector.load %arg10[%c0_146, %c1_147, %c0_148] : memref<4x10x18xf32, #tpu.memory_space<vmem>>, vector<1x8x16xf32>
    %263 = vector.shape_cast %262 : vector<1x8x16xf32> to vector<8x16xf32>
    %264 = vector.broadcast %261 : f32 to vector<8x16xf32>
    %265 = arith.mulf %264, %263 : vector<8x16xf32>
    %266 = arith.addf %260, %265 : vector<8x16xf32>
    %c129 = arith.constant 129 : index
    %267 = memref.load %arg4[%c129] : memref<288xf32, #tpu.memory_space<smem>>
    %c0_149 = arith.constant 0 : index
    %c1_150 = arith.constant 1 : index
    %c1_151 = arith.constant 1 : index
    %268 = vector.load %arg10[%c0_149, %c1_150, %c1_151] : memref<4x10x18xf32, #tpu.memory_space<vmem>>, vector<1x8x16xf32>
    %269 = vector.shape_cast %268 : vector<1x8x16xf32> to vector<8x16xf32>
    %270 = vector.broadcast %267 : f32 to vector<8x16xf32>
    %271 = arith.mulf %270, %269 : vector<8x16xf32>
    %272 = arith.addf %266, %271 : vector<8x16xf32>
    %c161 = arith.constant 161 : index
    %273 = memref.load %arg4[%c161] : memref<288xf32, #tpu.memory_space<smem>>
    %c0_152 = arith.constant 0 : index
    %c1_153 = arith.constant 1 : index
    %c2_154 = arith.constant 2 : index
    %274 = vector.load %arg10[%c0_152, %c1_153, %c2_154] : memref<4x10x18xf32, #tpu.memory_space<vmem>>, vector<1x8x16xf32>
    %275 = vector.shape_cast %274 : vector<1x8x16xf32> to vector<8x16xf32>
    %276 = vector.broadcast %273 : f32 to vector<8x16xf32>
    %277 = arith.mulf %276, %275 : vector<8x16xf32>
    %278 = arith.addf %272, %277 : vector<8x16xf32>
    %c193 = arith.constant 193 : index
    %279 = memref.load %arg4[%c193] : memref<288xf32, #tpu.memory_space<smem>>
    %c0_155 = arith.constant 0 : index
    %c2_156 = arith.constant 2 : index
    %c0_157 = arith.constant 0 : index
    %280 = vector.load %arg10[%c0_155, %c2_156, %c0_157] : memref<4x10x18xf32, #tpu.memory_space<vmem>>, vector<1x8x16xf32>
    %281 = vector.shape_cast %280 : vector<1x8x16xf32> to vector<8x16xf32>
    %282 = vector.broadcast %279 : f32 to vector<8x16xf32>
    %283 = arith.mulf %282, %281 : vector<8x16xf32>
    %284 = arith.addf %278, %283 : vector<8x16xf32>
    %c225 = arith.constant 225 : index
    %285 = memref.load %arg4[%c225] : memref<288xf32, #tpu.memory_space<smem>>
    %c0_158 = arith.constant 0 : index
    %c2_159 = arith.constant 2 : index
    %c1_160 = arith.constant 1 : index
    %286 = vector.load %arg10[%c0_158, %c2_159, %c1_160] : memref<4x10x18xf32, #tpu.memory_space<vmem>>, vector<1x8x16xf32>
    %287 = vector.shape_cast %286 : vector<1x8x16xf32> to vector<8x16xf32>
    %288 = vector.broadcast %285 : f32 to vector<8x16xf32>
    %289 = arith.mulf %288, %287 : vector<8x16xf32>
    %290 = arith.addf %284, %289 : vector<8x16xf32>
    %c257 = arith.constant 257 : index
    %291 = memref.load %arg4[%c257] : memref<288xf32, #tpu.memory_space<smem>>
    %c0_161 = arith.constant 0 : index
    %c2_162 = arith.constant 2 : index
    %c2_163 = arith.constant 2 : index
    %292 = vector.load %arg10[%c0_161, %c2_162, %c2_163] : memref<4x10x18xf32, #tpu.memory_space<vmem>>, vector<1x8x16xf32>
    %293 = vector.shape_cast %292 : vector<1x8x16xf32> to vector<8x16xf32>
    %294 = vector.broadcast %291 : f32 to vector<8x16xf32>
    %295 = arith.mulf %294, %293 : vector<8x16xf32>
    %296 = arith.addf %290, %295 : vector<8x16xf32>
    %c9_164 = arith.constant 9 : index
    %297 = memref.load %arg4[%c9_164] : memref<288xf32, #tpu.memory_space<smem>>
    %c1_165 = arith.constant 1 : index
    %c0_166 = arith.constant 0 : index
    %c0_167 = arith.constant 0 : index
    %298 = vector.load %arg10[%c1_165, %c0_166, %c0_167] : memref<4x10x18xf32, #tpu.memory_space<vmem>>, vector<1x8x16xf32>
    %299 = vector.shape_cast %298 : vector<1x8x16xf32> to vector<8x16xf32>
    %300 = vector.broadcast %297 : f32 to vector<8x16xf32>
    %301 = arith.mulf %300, %299 : vector<8x16xf32>
    %302 = arith.addf %296, %301 : vector<8x16xf32>
    %c41 = arith.constant 41 : index
    %303 = memref.load %arg4[%c41] : memref<288xf32, #tpu.memory_space<smem>>
    %c1_168 = arith.constant 1 : index
    %c0_169 = arith.constant 0 : index
    %c1_170 = arith.constant 1 : index
    %304 = vector.load %arg10[%c1_168, %c0_169, %c1_170] : memref<4x10x18xf32, #tpu.memory_space<vmem>>, vector<1x8x16xf32>
    %305 = vector.shape_cast %304 : vector<1x8x16xf32> to vector<8x16xf32>
    %306 = vector.broadcast %303 : f32 to vector<8x16xf32>
    %307 = arith.mulf %306, %305 : vector<8x16xf32>
    %308 = arith.addf %302, %307 : vector<8x16xf32>
    %c73 = arith.constant 73 : index
    %309 = memref.load %arg4[%c73] : memref<288xf32, #tpu.memory_space<smem>>
    %c1_171 = arith.constant 1 : index
    %c0_172 = arith.constant 0 : index
    %c2_173 = arith.constant 2 : index
    %310 = vector.load %arg10[%c1_171, %c0_172, %c2_173] : memref<4x10x18xf32, #tpu.memory_space<vmem>>, vector<1x8x16xf32>
    %311 = vector.shape_cast %310 : vector<1x8x16xf32> to vector<8x16xf32>
    %312 = vector.broadcast %309 : f32 to vector<8x16xf32>
    %313 = arith.mulf %312, %311 : vector<8x16xf32>
    %314 = arith.addf %308, %313 : vector<8x16xf32>
    %c105 = arith.constant 105 : index
    %315 = memref.load %arg4[%c105] : memref<288xf32, #tpu.memory_space<smem>>
    %c1_174 = arith.constant 1 : index
    %c1_175 = arith.constant 1 : index
    %c0_176 = arith.constant 0 : index
    %316 = vector.load %arg10[%c1_174, %c1_175, %c0_176] : memref<4x10x18xf32, #tpu.memory_space<vmem>>, vector<1x8x16xf32>
    %317 = vector.shape_cast %316 : vector<1x8x16xf32> to vector<8x16xf32>
    %318 = vector.broadcast %315 : f32 to vector<8x16xf32>
    %319 = arith.mulf %318, %317 : vector<8x16xf32>
    %320 = arith.addf %314, %319 : vector<8x16xf32>
    %c137 = arith.constant 137 : index
    %321 = memref.load %arg4[%c137] : memref<288xf32, #tpu.memory_space<smem>>
    %c1_177 = arith.constant 1 : index
    %c1_178 = arith.constant 1 : index
    %c1_179 = arith.constant 1 : index
    %322 = vector.load %arg10[%c1_177, %c1_178, %c1_179] : memref<4x10x18xf32, #tpu.memory_space<vmem>>, vector<1x8x16xf32>
    %323 = vector.shape_cast %322 : vector<1x8x16xf32> to vector<8x16xf32>
    %324 = vector.broadcast %321 : f32 to vector<8x16xf32>
    %325 = arith.mulf %324, %323 : vector<8x16xf32>
    %326 = arith.addf %320, %325 : vector<8x16xf32>
    %c169 = arith.constant 169 : index
    %327 = memref.load %arg4[%c169] : memref<288xf32, #tpu.memory_space<smem>>
    %c1_180 = arith.constant 1 : index
    %c1_181 = arith.constant 1 : index
    %c2_182 = arith.constant 2 : index
    %328 = vector.load %arg10[%c1_180, %c1_181, %c2_182] : memref<4x10x18xf32, #tpu.memory_space<vmem>>, vector<1x8x16xf32>
    %329 = vector.shape_cast %328 : vector<1x8x16xf32> to vector<8x16xf32>
    %330 = vector.broadcast %327 : f32 to vector<8x16xf32>
    %331 = arith.mulf %330, %329 : vector<8x16xf32>
    %332 = arith.addf %326, %331 : vector<8x16xf32>
    %c201 = arith.constant 201 : index
    %333 = memref.load %arg4[%c201] : memref<288xf32, #tpu.memory_space<smem>>
    %c1_183 = arith.constant 1 : index
    %c2_184 = arith.constant 2 : index
    %c0_185 = arith.constant 0 : index
    %334 = vector.load %arg10[%c1_183, %c2_184, %c0_185] : memref<4x10x18xf32, #tpu.memory_space<vmem>>, vector<1x8x16xf32>
    %335 = vector.shape_cast %334 : vector<1x8x16xf32> to vector<8x16xf32>
    %336 = vector.broadcast %333 : f32 to vector<8x16xf32>
    %337 = arith.mulf %336, %335 : vector<8x16xf32>
    %338 = arith.addf %332, %337 : vector<8x16xf32>
    %c233 = arith.constant 233 : index
    %339 = memref.load %arg4[%c233] : memref<288xf32, #tpu.memory_space<smem>>
    %c1_186 = arith.constant 1 : index
    %c2_187 = arith.constant 2 : index
    %c1_188 = arith.constant 1 : index
    %340 = vector.load %arg10[%c1_186, %c2_187, %c1_188] : memref<4x10x18xf32, #tpu.memory_space<vmem>>, vector<1x8x16xf32>
    %341 = vector.shape_cast %340 : vector<1x8x16xf32> to vector<8x16xf32>
    %342 = vector.broadcast %339 : f32 to vector<8x16xf32>
    %343 = arith.mulf %342, %341 : vector<8x16xf32>
    %344 = arith.addf %338, %343 : vector<8x16xf32>
    %c265 = arith.constant 265 : index
    %345 = memref.load %arg4[%c265] : memref<288xf32, #tpu.memory_space<smem>>
    %c1_189 = arith.constant 1 : index
    %c2_190 = arith.constant 2 : index
    %c2_191 = arith.constant 2 : index
    %346 = vector.load %arg10[%c1_189, %c2_190, %c2_191] : memref<4x10x18xf32, #tpu.memory_space<vmem>>, vector<1x8x16xf32>
    %347 = vector.shape_cast %346 : vector<1x8x16xf32> to vector<8x16xf32>
    %348 = vector.broadcast %345 : f32 to vector<8x16xf32>
    %349 = arith.mulf %348, %347 : vector<8x16xf32>
    %350 = arith.addf %344, %349 : vector<8x16xf32>
    %c17 = arith.constant 17 : index
    %351 = memref.load %arg4[%c17] : memref<288xf32, #tpu.memory_space<smem>>
    %c2_192 = arith.constant 2 : index
    %c0_193 = arith.constant 0 : index
    %c0_194 = arith.constant 0 : index
    %352 = vector.load %arg10[%c2_192, %c0_193, %c0_194] : memref<4x10x18xf32, #tpu.memory_space<vmem>>, vector<1x8x16xf32>
    %353 = vector.shape_cast %352 : vector<1x8x16xf32> to vector<8x16xf32>
    %354 = vector.broadcast %351 : f32 to vector<8x16xf32>
    %355 = arith.mulf %354, %353 : vector<8x16xf32>
    %356 = arith.addf %350, %355 : vector<8x16xf32>
    %c49 = arith.constant 49 : index
    %357 = memref.load %arg4[%c49] : memref<288xf32, #tpu.memory_space<smem>>
    %c2_195 = arith.constant 2 : index
    %c0_196 = arith.constant 0 : index
    %c1_197 = arith.constant 1 : index
    %358 = vector.load %arg10[%c2_195, %c0_196, %c1_197] : memref<4x10x18xf32, #tpu.memory_space<vmem>>, vector<1x8x16xf32>
    %359 = vector.shape_cast %358 : vector<1x8x16xf32> to vector<8x16xf32>
    %360 = vector.broadcast %357 : f32 to vector<8x16xf32>
    %361 = arith.mulf %360, %359 : vector<8x16xf32>
    %362 = arith.addf %356, %361 : vector<8x16xf32>
    %c81 = arith.constant 81 : index
    %363 = memref.load %arg4[%c81] : memref<288xf32, #tpu.memory_space<smem>>
    %c2_198 = arith.constant 2 : index
    %c0_199 = arith.constant 0 : index
    %c2_200 = arith.constant 2 : index
    %364 = vector.load %arg10[%c2_198, %c0_199, %c2_200] : memref<4x10x18xf32, #tpu.memory_space<vmem>>, vector<1x8x16xf32>
    %365 = vector.shape_cast %364 : vector<1x8x16xf32> to vector<8x16xf32>
    %366 = vector.broadcast %363 : f32 to vector<8x16xf32>
    %367 = arith.mulf %366, %365 : vector<8x16xf32>
    %368 = arith.addf %362, %367 : vector<8x16xf32>
    %c113 = arith.constant 113 : index
    %369 = memref.load %arg4[%c113] : memref<288xf32, #tpu.memory_space<smem>>
    %c2_201 = arith.constant 2 : index
    %c1_202 = arith.constant 1 : index
    %c0_203 = arith.constant 0 : index
    %370 = vector.load %arg10[%c2_201, %c1_202, %c0_203] : memref<4x10x18xf32, #tpu.memory_space<vmem>>, vector<1x8x16xf32>
    %371 = vector.shape_cast %370 : vector<1x8x16xf32> to vector<8x16xf32>
    %372 = vector.broadcast %369 : f32 to vector<8x16xf32>
    %373 = arith.mulf %372, %371 : vector<8x16xf32>
    %374 = arith.addf %368, %373 : vector<8x16xf32>
    %c145 = arith.constant 145 : index
    %375 = memref.load %arg4[%c145] : memref<288xf32, #tpu.memory_space<smem>>
    %c2_204 = arith.constant 2 : index
    %c1_205 = arith.constant 1 : index
    %c1_206 = arith.constant 1 : index
    %376 = vector.load %arg10[%c2_204, %c1_205, %c1_206] : memref<4x10x18xf32, #tpu.memory_space<vmem>>, vector<1x8x16xf32>
    %377 = vector.shape_cast %376 : vector<1x8x16xf32> to vector<8x16xf32>
    %378 = vector.broadcast %375 : f32 to vector<8x16xf32>
    %379 = arith.mulf %378, %377 : vector<8x16xf32>
    %380 = arith.addf %374, %379 : vector<8x16xf32>
    %c177 = arith.constant 177 : index
    %381 = memref.load %arg4[%c177] : memref<288xf32, #tpu.memory_space<smem>>
    %c2_207 = arith.constant 2 : index
    %c1_208 = arith.constant 1 : index
    %c2_209 = arith.constant 2 : index
    %382 = vector.load %arg10[%c2_207, %c1_208, %c2_209] : memref<4x10x18xf32, #tpu.memory_space<vmem>>, vector<1x8x16xf32>
    %383 = vector.shape_cast %382 : vector<1x8x16xf32> to vector<8x16xf32>
    %384 = vector.broadcast %381 : f32 to vector<8x16xf32>
    %385 = arith.mulf %384, %383 : vector<8x16xf32>
    %386 = arith.addf %380, %385 : vector<8x16xf32>
    %c209 = arith.constant 209 : index
    %387 = memref.load %arg4[%c209] : memref<288xf32, #tpu.memory_space<smem>>
    %c2_210 = arith.constant 2 : index
    %c2_211 = arith.constant 2 : index
    %c0_212 = arith.constant 0 : index
    %388 = vector.load %arg10[%c2_210, %c2_211, %c0_212] : memref<4x10x18xf32, #tpu.memory_space<vmem>>, vector<1x8x16xf32>
    %389 = vector.shape_cast %388 : vector<1x8x16xf32> to vector<8x16xf32>
    %390 = vector.broadcast %387 : f32 to vector<8x16xf32>
    %391 = arith.mulf %390, %389 : vector<8x16xf32>
    %392 = arith.addf %386, %391 : vector<8x16xf32>
    %c241 = arith.constant 241 : index
    %393 = memref.load %arg4[%c241] : memref<288xf32, #tpu.memory_space<smem>>
    %c2_213 = arith.constant 2 : index
    %c2_214 = arith.constant 2 : index
    %c1_215 = arith.constant 1 : index
    %394 = vector.load %arg10[%c2_213, %c2_214, %c1_215] : memref<4x10x18xf32, #tpu.memory_space<vmem>>, vector<1x8x16xf32>
    %395 = vector.shape_cast %394 : vector<1x8x16xf32> to vector<8x16xf32>
    %396 = vector.broadcast %393 : f32 to vector<8x16xf32>
    %397 = arith.mulf %396, %395 : vector<8x16xf32>
    %398 = arith.addf %392, %397 : vector<8x16xf32>
    %c273 = arith.constant 273 : index
    %399 = memref.load %arg4[%c273] : memref<288xf32, #tpu.memory_space<smem>>
    %c2_216 = arith.constant 2 : index
    %c2_217 = arith.constant 2 : index
    %c2_218 = arith.constant 2 : index
    %400 = vector.load %arg10[%c2_216, %c2_217, %c2_218] : memref<4x10x18xf32, #tpu.memory_space<vmem>>, vector<1x8x16xf32>
    %401 = vector.shape_cast %400 : vector<1x8x16xf32> to vector<8x16xf32>
    %402 = vector.broadcast %399 : f32 to vector<8x16xf32>
    %403 = arith.mulf %402, %401 : vector<8x16xf32>
    %404 = arith.addf %398, %403 : vector<8x16xf32>
    %c25 = arith.constant 25 : index
    %405 = memref.load %arg4[%c25] : memref<288xf32, #tpu.memory_space<smem>>
    %c3_219 = arith.constant 3 : index
    %c0_220 = arith.constant 0 : index
    %c0_221 = arith.constant 0 : index
    %406 = vector.load %arg10[%c3_219, %c0_220, %c0_221] : memref<4x10x18xf32, #tpu.memory_space<vmem>>, vector<1x8x16xf32>
    %407 = vector.shape_cast %406 : vector<1x8x16xf32> to vector<8x16xf32>
    %408 = vector.broadcast %405 : f32 to vector<8x16xf32>
    %409 = arith.mulf %408, %407 : vector<8x16xf32>
    %410 = arith.addf %404, %409 : vector<8x16xf32>
    %c57 = arith.constant 57 : index
    %411 = memref.load %arg4[%c57] : memref<288xf32, #tpu.memory_space<smem>>
    %c3_222 = arith.constant 3 : index
    %c0_223 = arith.constant 0 : index
    %c1_224 = arith.constant 1 : index
    %412 = vector.load %arg10[%c3_222, %c0_223, %c1_224] : memref<4x10x18xf32, #tpu.memory_space<vmem>>, vector<1x8x16xf32>
    %413 = vector.shape_cast %412 : vector<1x8x16xf32> to vector<8x16xf32>
    %414 = vector.broadcast %411 : f32 to vector<8x16xf32>
    %415 = arith.mulf %414, %413 : vector<8x16xf32>
    %416 = arith.addf %410, %415 : vector<8x16xf32>
    %c89 = arith.constant 89 : index
    %417 = memref.load %arg4[%c89] : memref<288xf32, #tpu.memory_space<smem>>
    %c3_225 = arith.constant 3 : index
    %c0_226 = arith.constant 0 : index
    %c2_227 = arith.constant 2 : index
    %418 = vector.load %arg10[%c3_225, %c0_226, %c2_227] : memref<4x10x18xf32, #tpu.memory_space<vmem>>, vector<1x8x16xf32>
    %419 = vector.shape_cast %418 : vector<1x8x16xf32> to vector<8x16xf32>
    %420 = vector.broadcast %417 : f32 to vector<8x16xf32>
    %421 = arith.mulf %420, %419 : vector<8x16xf32>
    %422 = arith.addf %416, %421 : vector<8x16xf32>
    %c121 = arith.constant 121 : index
    %423 = memref.load %arg4[%c121] : memref<288xf32, #tpu.memory_space<smem>>
    %c3_228 = arith.constant 3 : index
    %c1_229 = arith.constant 1 : index
    %c0_230 = arith.constant 0 : index
    %424 = vector.load %arg10[%c3_228, %c1_229, %c0_230] : memref<4x10x18xf32, #tpu.memory_space<vmem>>, vector<1x8x16xf32>
    %425 = vector.shape_cast %424 : vector<1x8x16xf32> to vector<8x16xf32>
    %426 = vector.broadcast %423 : f32 to vector<8x16xf32>
    %427 = arith.mulf %426, %425 : vector<8x16xf32>
    %428 = arith.addf %422, %427 : vector<8x16xf32>
    %c153 = arith.constant 153 : index
    %429 = memref.load %arg4[%c153] : memref<288xf32, #tpu.memory_space<smem>>
    %c3_231 = arith.constant 3 : index
    %c1_232 = arith.constant 1 : index
    %c1_233 = arith.constant 1 : index
    %430 = vector.load %arg10[%c3_231, %c1_232, %c1_233] : memref<4x10x18xf32, #tpu.memory_space<vmem>>, vector<1x8x16xf32>
    %431 = vector.shape_cast %430 : vector<1x8x16xf32> to vector<8x16xf32>
    %432 = vector.broadcast %429 : f32 to vector<8x16xf32>
    %433 = arith.mulf %432, %431 : vector<8x16xf32>
    %434 = arith.addf %428, %433 : vector<8x16xf32>
    %c185 = arith.constant 185 : index
    %435 = memref.load %arg4[%c185] : memref<288xf32, #tpu.memory_space<smem>>
    %c3_234 = arith.constant 3 : index
    %c1_235 = arith.constant 1 : index
    %c2_236 = arith.constant 2 : index
    %436 = vector.load %arg10[%c3_234, %c1_235, %c2_236] : memref<4x10x18xf32, #tpu.memory_space<vmem>>, vector<1x8x16xf32>
    %437 = vector.shape_cast %436 : vector<1x8x16xf32> to vector<8x16xf32>
    %438 = vector.broadcast %435 : f32 to vector<8x16xf32>
    %439 = arith.mulf %438, %437 : vector<8x16xf32>
    %440 = arith.addf %434, %439 : vector<8x16xf32>
    %c217 = arith.constant 217 : index
    %441 = memref.load %arg4[%c217] : memref<288xf32, #tpu.memory_space<smem>>
    %c3_237 = arith.constant 3 : index
    %c2_238 = arith.constant 2 : index
    %c0_239 = arith.constant 0 : index
    %442 = vector.load %arg10[%c3_237, %c2_238, %c0_239] : memref<4x10x18xf32, #tpu.memory_space<vmem>>, vector<1x8x16xf32>
    %443 = vector.shape_cast %442 : vector<1x8x16xf32> to vector<8x16xf32>
    %444 = vector.broadcast %441 : f32 to vector<8x16xf32>
    %445 = arith.mulf %444, %443 : vector<8x16xf32>
    %446 = arith.addf %440, %445 : vector<8x16xf32>
    %c249 = arith.constant 249 : index
    %447 = memref.load %arg4[%c249] : memref<288xf32, #tpu.memory_space<smem>>
    %c3_240 = arith.constant 3 : index
    %c2_241 = arith.constant 2 : index
    %c1_242 = arith.constant 1 : index
    %448 = vector.load %arg10[%c3_240, %c2_241, %c1_242] : memref<4x10x18xf32, #tpu.memory_space<vmem>>, vector<1x8x16xf32>
    %449 = vector.shape_cast %448 : vector<1x8x16xf32> to vector<8x16xf32>
    %450 = vector.broadcast %447 : f32 to vector<8x16xf32>
    %451 = arith.mulf %450, %449 : vector<8x16xf32>
    %452 = arith.addf %446, %451 : vector<8x16xf32>
    %c281 = arith.constant 281 : index
    %453 = memref.load %arg4[%c281] : memref<288xf32, #tpu.memory_space<smem>>
    %c3_243 = arith.constant 3 : index
    %c2_244 = arith.constant 2 : index
    %c2_245 = arith.constant 2 : index
    %454 = vector.load %arg10[%c3_243, %c2_244, %c2_245] : memref<4x10x18xf32, #tpu.memory_space<vmem>>, vector<1x8x16xf32>
    %455 = vector.shape_cast %454 : vector<1x8x16xf32> to vector<8x16xf32>
    %456 = vector.broadcast %453 : f32 to vector<8x16xf32>
    %457 = arith.mulf %456, %455 : vector<8x16xf32>
    %458 = arith.addf %452, %457 : vector<8x16xf32>
    %c1_246 = arith.constant 1 : index
    %459 = memref.load %arg5[%c1_246] : memref<8xf32, #tpu.memory_space<smem>>
    %460 = vector.broadcast %459 : f32 to vector<8x16xf32>
    %461 = arith.mulf %458, %460 : vector<8x16xf32>
    %c1_247 = arith.constant 1 : index
    %462 = memref.load %arg6[%c1_247] : memref<8xf32, #tpu.memory_space<smem>>
    %463 = vector.broadcast %462 : f32 to vector<8x16xf32>
    %464 = arith.addf %461, %463 : vector<8x16xf32>
    %cst_248 = arith.constant 0.000000e+00 : f32
    %465 = vector.broadcast %cst_248 : f32 to vector<8x16xf32>
    %466 = arith.maximumf %464, %465 : vector<8x16xf32>
    %c1_249 = arith.constant 1 : index
    %c0_250 = arith.constant 0 : index
    %c0_251 = arith.constant 0 : index
    %467 = vector.load %arg11[%c1_249, %c0_250, %c0_251] : memref<8x8x16xf32, #tpu.memory_space<vmem>>, vector<1x8x16xf32>
    %468 = vector.shape_cast %467 : vector<1x8x16xf32> to vector<8x16xf32>
    %469 = vector.shape_cast %466 : vector<8x16xf32> to vector<1x8x16xf32>
    tpu.vector_store %arg11[%c1_249, %c0_250, %c0_251], %469 {strides = array<i32>} : memref<8x8x16xf32, #tpu.memory_space<vmem>>, vector<1x8x16xf32>,
    %cst_252 = arith.constant 0.000000e+00 : f32
    %470 = vector.broadcast %cst_252 : f32 to vector<8x16xf32>
    %c2_253 = arith.constant 2 : index
    %471 = memref.load %arg4[%c2_253] : memref<288xf32, #tpu.memory_space<smem>>
    %c0_254 = arith.constant 0 : index
    %c0_255 = arith.constant 0 : index
    %c0_256 = arith.constant 0 : index
    %472 = vector.load %arg10[%c0_254, %c0_255, %c0_256] : memref<4x10x18xf32, #tpu.memory_space<vmem>>, vector<1x8x16xf32>
    %473 = vector.shape_cast %472 : vector<1x8x16xf32> to vector<8x16xf32>
    %474 = vector.broadcast %471 : f32 to vector<8x16xf32>
    %475 = arith.mulf %474, %473 : vector<8x16xf32>
    %476 = arith.addf %470, %475 : vector<8x16xf32>
    %c34 = arith.constant 34 : index
    %477 = memref.load %arg4[%c34] : memref<288xf32, #tpu.memory_space<smem>>
    %c0_257 = arith.constant 0 : index
    %c0_258 = arith.constant 0 : index
    %c1_259 = arith.constant 1 : index
    %478 = vector.load %arg10[%c0_257, %c0_258, %c1_259] : memref<4x10x18xf32, #tpu.memory_space<vmem>>, vector<1x8x16xf32>
    %479 = vector.shape_cast %478 : vector<1x8x16xf32> to vector<8x16xf32>
    %480 = vector.broadcast %477 : f32 to vector<8x16xf32>
    %481 = arith.mulf %480, %479 : vector<8x16xf32>
    %482 = arith.addf %476, %481 : vector<8x16xf32>
    %c66 = arith.constant 66 : index
    %483 = memref.load %arg4[%c66] : memref<288xf32, #tpu.memory_space<smem>>
    %c0_260 = arith.constant 0 : index
    %c0_261 = arith.constant 0 : index
    %c2_262 = arith.constant 2 : index
    %484 = vector.load %arg10[%c0_260, %c0_261, %c2_262] : memref<4x10x18xf32, #tpu.memory_space<vmem>>, vector<1x8x16xf32>
    %485 = vector.shape_cast %484 : vector<1x8x16xf32> to vector<8x16xf32>
    %486 = vector.broadcast %483 : f32 to vector<8x16xf32>
    %487 = arith.mulf %486, %485 : vector<8x16xf32>
    %488 = arith.addf %482, %487 : vector<8x16xf32>
    %c98 = arith.constant 98 : index
    %489 = memref.load %arg4[%c98] : memref<288xf32, #tpu.memory_space<smem>>
    %c0_263 = arith.constant 0 : index
    %c1_264 = arith.constant 1 : index
    %c0_265 = arith.constant 0 : index
    %490 = vector.load %arg10[%c0_263, %c1_264, %c0_265] : memref<4x10x18xf32, #tpu.memory_space<vmem>>, vector<1x8x16xf32>
    %491 = vector.shape_cast %490 : vector<1x8x16xf32> to vector<8x16xf32>
    %492 = vector.broadcast %489 : f32 to vector<8x16xf32>
    %493 = arith.mulf %492, %491 : vector<8x16xf32>
    %494 = arith.addf %488, %493 : vector<8x16xf32>
    %c130 = arith.constant 130 : index
    %495 = memref.load %arg4[%c130] : memref<288xf32, #tpu.memory_space<smem>>
    %c0_266 = arith.constant 0 : index
    %c1_267 = arith.constant 1 : index
    %c1_268 = arith.constant 1 : index
    %496 = vector.load %arg10[%c0_266, %c1_267, %c1_268] : memref<4x10x18xf32, #tpu.memory_space<vmem>>, vector<1x8x16xf32>
    %497 = vector.shape_cast %496 : vector<1x8x16xf32> to vector<8x16xf32>
    %498 = vector.broadcast %495 : f32 to vector<8x16xf32>
    %499 = arith.mulf %498, %497 : vector<8x16xf32>
    %500 = arith.addf %494, %499 : vector<8x16xf32>
    %c162 = arith.constant 162 : index
    %501 = memref.load %arg4[%c162] : memref<288xf32, #tpu.memory_space<smem>>
    %c0_269 = arith.constant 0 : index
    %c1_270 = arith.constant 1 : index
    %c2_271 = arith.constant 2 : index
    %502 = vector.load %arg10[%c0_269, %c1_270, %c2_271] : memref<4x10x18xf32, #tpu.memory_space<vmem>>, vector<1x8x16xf32>
    %503 = vector.shape_cast %502 : vector<1x8x16xf32> to vector<8x16xf32>
    %504 = vector.broadcast %501 : f32 to vector<8x16xf32>
    %505 = arith.mulf %504, %503 : vector<8x16xf32>
    %506 = arith.addf %500, %505 : vector<8x16xf32>
    %c194 = arith.constant 194 : index
    %507 = memref.load %arg4[%c194] : memref<288xf32, #tpu.memory_space<smem>>
    %c0_272 = arith.constant 0 : index
    %c2_273 = arith.constant 2 : index
    %c0_274 = arith.constant 0 : index
    %508 = vector.load %arg10[%c0_272, %c2_273, %c0_274] : memref<4x10x18xf32, #tpu.memory_space<vmem>>, vector<1x8x16xf32>
    %509 = vector.shape_cast %508 : vector<1x8x16xf32> to vector<8x16xf32>
    %510 = vector.broadcast %507 : f32 to vector<8x16xf32>
    %511 = arith.mulf %510, %509 : vector<8x16xf32>
    %512 = arith.addf %506, %511 : vector<8x16xf32>
    %c226 = arith.constant 226 : index
    %513 = memref.load %arg4[%c226] : memref<288xf32, #tpu.memory_space<smem>>
    %c0_275 = arith.constant 0 : index
    %c2_276 = arith.constant 2 : index
    %c1_277 = arith.constant 1 : index
    %514 = vector.load %arg10[%c0_275, %c2_276, %c1_277] : memref<4x10x18xf32, #tpu.memory_space<vmem>>, vector<1x8x16xf32>
    %515 = vector.shape_cast %514 : vector<1x8x16xf32> to vector<8x16xf32>
    %516 = vector.broadcast %513 : f32 to vector<8x16xf32>
    %517 = arith.mulf %516, %515 : vector<8x16xf32>
    %518 = arith.addf %512, %517 : vector<8x16xf32>
    %c258 = arith.constant 258 : index
    %519 = memref.load %arg4[%c258] : memref<288xf32, #tpu.memory_space<smem>>
    %c0_278 = arith.constant 0 : index
    %c2_279 = arith.constant 2 : index
    %c2_280 = arith.constant 2 : index
    %520 = vector.load %arg10[%c0_278, %c2_279, %c2_280] : memref<4x10x18xf32, #tpu.memory_space<vmem>>, vector<1x8x16xf32>
    %521 = vector.shape_cast %520 : vector<1x8x16xf32> to vector<8x16xf32>
    %522 = vector.broadcast %519 : f32 to vector<8x16xf32>
    %523 = arith.mulf %522, %521 : vector<8x16xf32>
    %524 = arith.addf %518, %523 : vector<8x16xf32>
    %c10 = arith.constant 10 : index
    %525 = memref.load %arg4[%c10] : memref<288xf32, #tpu.memory_space<smem>>
    %c1_281 = arith.constant 1 : index
    %c0_282 = arith.constant 0 : index
    %c0_283 = arith.constant 0 : index
    %526 = vector.load %arg10[%c1_281, %c0_282, %c0_283] : memref<4x10x18xf32, #tpu.memory_space<vmem>>, vector<1x8x16xf32>
    %527 = vector.shape_cast %526 : vector<1x8x16xf32> to vector<8x16xf32>
    %528 = vector.broadcast %525 : f32 to vector<8x16xf32>
    %529 = arith.mulf %528, %527 : vector<8x16xf32>
    %530 = arith.addf %524, %529 : vector<8x16xf32>
    %c42 = arith.constant 42 : index
    %531 = memref.load %arg4[%c42] : memref<288xf32, #tpu.memory_space<smem>>
    %c1_284 = arith.constant 1 : index
    %c0_285 = arith.constant 0 : index
    %c1_286 = arith.constant 1 : index
    %532 = vector.load %arg10[%c1_284, %c0_285, %c1_286] : memref<4x10x18xf32, #tpu.memory_space<vmem>>, vector<1x8x16xf32>
    %533 = vector.shape_cast %532 : vector<1x8x16xf32> to vector<8x16xf32>
    %534 = vector.broadcast %531 : f32 to vector<8x16xf32>
    %535 = arith.mulf %534, %533 : vector<8x16xf32>
    %536 = arith.addf %530, %535 : vector<8x16xf32>
    %c74 = arith.constant 74 : index
    %537 = memref.load %arg4[%c74] : memref<288xf32, #tpu.memory_space<smem>>
    %c1_287 = arith.constant 1 : index
    %c0_288 = arith.constant 0 : index
    %c2_289 = arith.constant 2 : index
    %538 = vector.load %arg10[%c1_287, %c0_288, %c2_289] : memref<4x10x18xf32, #tpu.memory_space<vmem>>, vector<1x8x16xf32>
    %539 = vector.shape_cast %538 : vector<1x8x16xf32> to vector<8x16xf32>
    %540 = vector.broadcast %537 : f32 to vector<8x16xf32>
    %541 = arith.mulf %540, %539 : vector<8x16xf32>
    %542 = arith.addf %536, %541 : vector<8x16xf32>
    %c106 = arith.constant 106 : index
    %543 = memref.load %arg4[%c106] : memref<288xf32, #tpu.memory_space<smem>>
    %c1_290 = arith.constant 1 : index
    %c1_291 = arith.constant 1 : index
    %c0_292 = arith.constant 0 : index
    %544 = vector.load %arg10[%c1_290, %c1_291, %c0_292] : memref<4x10x18xf32, #tpu.memory_space<vmem>>, vector<1x8x16xf32>
    %545 = vector.shape_cast %544 : vector<1x8x16xf32> to vector<8x16xf32>
    %546 = vector.broadcast %543 : f32 to vector<8x16xf32>
    %547 = arith.mulf %546, %545 : vector<8x16xf32>
    %548 = arith.addf %542, %547 : vector<8x16xf32>
    %c138 = arith.constant 138 : index
    %549 = memref.load %arg4[%c138] : memref<288xf32, #tpu.memory_space<smem>>
    %c1_293 = arith.constant 1 : index
    %c1_294 = arith.constant 1 : index
    %c1_295 = arith.constant 1 : index
    %550 = vector.load %arg10[%c1_293, %c1_294, %c1_295] : memref<4x10x18xf32, #tpu.memory_space<vmem>>, vector<1x8x16xf32>
    %551 = vector.shape_cast %550 : vector<1x8x16xf32> to vector<8x16xf32>
    %552 = vector.broadcast %549 : f32 to vector<8x16xf32>
    %553 = arith.mulf %552, %551 : vector<8x16xf32>
    %554 = arith.addf %548, %553 : vector<8x16xf32>
    %c170 = arith.constant 170 : index
    %555 = memref.load %arg4[%c170] : memref<288xf32, #tpu.memory_space<smem>>
    %c1_296 = arith.constant 1 : index
    %c1_297 = arith.constant 1 : index
    %c2_298 = arith.constant 2 : index
    %556 = vector.load %arg10[%c1_296, %c1_297, %c2_298] : memref<4x10x18xf32, #tpu.memory_space<vmem>>, vector<1x8x16xf32>
    %557 = vector.shape_cast %556 : vector<1x8x16xf32> to vector<8x16xf32>
    %558 = vector.broadcast %555 : f32 to vector<8x16xf32>
    %559 = arith.mulf %558, %557 : vector<8x16xf32>
    %560 = arith.addf %554, %559 : vector<8x16xf32>
    %c202 = arith.constant 202 : index
    %561 = memref.load %arg4[%c202] : memref<288xf32, #tpu.memory_space<smem>>
    %c1_299 = arith.constant 1 : index
    %c2_300 = arith.constant 2 : index
    %c0_301 = arith.constant 0 : index
    %562 = vector.load %arg10[%c1_299, %c2_300, %c0_301] : memref<4x10x18xf32, #tpu.memory_space<vmem>>, vector<1x8x16xf32>
    %563 = vector.shape_cast %562 : vector<1x8x16xf32> to vector<8x16xf32>
    %564 = vector.broadcast %561 : f32 to vector<8x16xf32>
    %565 = arith.mulf %564, %563 : vector<8x16xf32>
    %566 = arith.addf %560, %565 : vector<8x16xf32>
    %c234 = arith.constant 234 : index
    %567 = memref.load %arg4[%c234] : memref<288xf32, #tpu.memory_space<smem>>
    %c1_302 = arith.constant 1 : index
    %c2_303 = arith.constant 2 : index
    %c1_304 = arith.constant 1 : index
    %568 = vector.load %arg10[%c1_302, %c2_303, %c1_304] : memref<4x10x18xf32, #tpu.memory_space<vmem>>, vector<1x8x16xf32>
    %569 = vector.shape_cast %568 : vector<1x8x16xf32> to vector<8x16xf32>
    %570 = vector.broadcast %567 : f32 to vector<8x16xf32>
    %571 = arith.mulf %570, %569 : vector<8x16xf32>
    %572 = arith.addf %566, %571 : vector<8x16xf32>
    %c266 = arith.constant 266 : index
    %573 = memref.load %arg4[%c266] : memref<288xf32, #tpu.memory_space<smem>>
    %c1_305 = arith.constant 1 : index
    %c2_306 = arith.constant 2 : index
    %c2_307 = arith.constant 2 : index
    %574 = vector.load %arg10[%c1_305, %c2_306, %c2_307] : memref<4x10x18xf32, #tpu.memory_space<vmem>>, vector<1x8x16xf32>
    %575 = vector.shape_cast %574 : vector<1x8x16xf32> to vector<8x16xf32>
    %576 = vector.broadcast %573 : f32 to vector<8x16xf32>
    %577 = arith.mulf %576, %575 : vector<8x16xf32>
    %578 = arith.addf %572, %577 : vector<8x16xf32>
    %c18 = arith.constant 18 : index
    %579 = memref.load %arg4[%c18] : memref<288xf32, #tpu.memory_space<smem>>
    %c2_308 = arith.constant 2 : index
    %c0_309 = arith.constant 0 : index
    %c0_310 = arith.constant 0 : index
    %580 = vector.load %arg10[%c2_308, %c0_309, %c0_310] : memref<4x10x18xf32, #tpu.memory_space<vmem>>, vector<1x8x16xf32>
    %581 = vector.shape_cast %580 : vector<1x8x16xf32> to vector<8x16xf32>
    %582 = vector.broadcast %579 : f32 to vector<8x16xf32>
    %583 = arith.mulf %582, %581 : vector<8x16xf32>
    %584 = arith.addf %578, %583 : vector<8x16xf32>
    %c50 = arith.constant 50 : index
    %585 = memref.load %arg4[%c50] : memref<288xf32, #tpu.memory_space<smem>>
    %c2_311 = arith.constant 2 : index
    %c0_312 = arith.constant 0 : index
    %c1_313 = arith.constant 1 : index
    %586 = vector.load %arg10[%c2_311, %c0_312, %c1_313] : memref<4x10x18xf32, #tpu.memory_space<vmem>>, vector<1x8x16xf32>
    %587 = vector.shape_cast %586 : vector<1x8x16xf32> to vector<8x16xf32>
    %588 = vector.broadcast %585 : f32 to vector<8x16xf32>
    %589 = arith.mulf %588, %587 : vector<8x16xf32>
    %590 = arith.addf %584, %589 : vector<8x16xf32>
    %c82 = arith.constant 82 : index
    %591 = memref.load %arg4[%c82] : memref<288xf32, #tpu.memory_space<smem>>
    %c2_314 = arith.constant 2 : index
    %c0_315 = arith.constant 0 : index
    %c2_316 = arith.constant 2 : index
    %592 = vector.load %arg10[%c2_314, %c0_315, %c2_316] : memref<4x10x18xf32, #tpu.memory_space<vmem>>, vector<1x8x16xf32>
    %593 = vector.shape_cast %592 : vector<1x8x16xf32> to vector<8x16xf32>
    %594 = vector.broadcast %591 : f32 to vector<8x16xf32>
    %595 = arith.mulf %594, %593 : vector<8x16xf32>
    %596 = arith.addf %590, %595 : vector<8x16xf32>
    %c114 = arith.constant 114 : index
    %597 = memref.load %arg4[%c114] : memref<288xf32, #tpu.memory_space<smem>>
    %c2_317 = arith.constant 2 : index
    %c1_318 = arith.constant 1 : index
    %c0_319 = arith.constant 0 : index
    %598 = vector.load %arg10[%c2_317, %c1_318, %c0_319] : memref<4x10x18xf32, #tpu.memory_space<vmem>>, vector<1x8x16xf32>
    %599 = vector.shape_cast %598 : vector<1x8x16xf32> to vector<8x16xf32>
    %600 = vector.broadcast %597 : f32 to vector<8x16xf32>
    %601 = arith.mulf %600, %599 : vector<8x16xf32>
    %602 = arith.addf %596, %601 : vector<8x16xf32>
    %c146 = arith.constant 146 : index
    %603 = memref.load %arg4[%c146] : memref<288xf32, #tpu.memory_space<smem>>
    %c2_320 = arith.constant 2 : index
    %c1_321 = arith.constant 1 : index
    %c1_322 = arith.constant 1 : index
    %604 = vector.load %arg10[%c2_320, %c1_321, %c1_322] : memref<4x10x18xf32, #tpu.memory_space<vmem>>, vector<1x8x16xf32>
    %605 = vector.shape_cast %604 : vector<1x8x16xf32> to vector<8x16xf32>
    %606 = vector.broadcast %603 : f32 to vector<8x16xf32>
    %607 = arith.mulf %606, %605 : vector<8x16xf32>
    %608 = arith.addf %602, %607 : vector<8x16xf32>
    %c178 = arith.constant 178 : index
    %609 = memref.load %arg4[%c178] : memref<288xf32, #tpu.memory_space<smem>>
    %c2_323 = arith.constant 2 : index
    %c1_324 = arith.constant 1 : index
    %c2_325 = arith.constant 2 : index
    %610 = vector.load %arg10[%c2_323, %c1_324, %c2_325] : memref<4x10x18xf32, #tpu.memory_space<vmem>>, vector<1x8x16xf32>
    %611 = vector.shape_cast %610 : vector<1x8x16xf32> to vector<8x16xf32>
    %612 = vector.broadcast %609 : f32 to vector<8x16xf32>
    %613 = arith.mulf %612, %611 : vector<8x16xf32>
    %614 = arith.addf %608, %613 : vector<8x16xf32>
    %c210 = arith.constant 210 : index
    %615 = memref.load %arg4[%c210] : memref<288xf32, #tpu.memory_space<smem>>
    %c2_326 = arith.constant 2 : index
    %c2_327 = arith.constant 2 : index
    %c0_328 = arith.constant 0 : index
    %616 = vector.load %arg10[%c2_326, %c2_327, %c0_328] : memref<4x10x18xf32, #tpu.memory_space<vmem>>, vector<1x8x16xf32>
    %617 = vector.shape_cast %616 : vector<1x8x16xf32> to vector<8x16xf32>
    %618 = vector.broadcast %615 : f32 to vector<8x16xf32>
    %619 = arith.mulf %618, %617 : vector<8x16xf32>
    %620 = arith.addf %614, %619 : vector<8x16xf32>
    %c242 = arith.constant 242 : index
    %621 = memref.load %arg4[%c242] : memref<288xf32, #tpu.memory_space<smem>>
    %c2_329 = arith.constant 2 : index
    %c2_330 = arith.constant 2 : index
    %c1_331 = arith.constant 1 : index
    %622 = vector.load %arg10[%c2_329, %c2_330, %c1_331] : memref<4x10x18xf32, #tpu.memory_space<vmem>>, vector<1x8x16xf32>
    %623 = vector.shape_cast %622 : vector<1x8x16xf32> to vector<8x16xf32>
    %624 = vector.broadcast %621 : f32 to vector<8x16xf32>
    %625 = arith.mulf %624, %623 : vector<8x16xf32>
    %626 = arith.addf %620, %625 : vector<8x16xf32>
    %c274 = arith.constant 274 : index
    %627 = memref.load %arg4[%c274] : memref<288xf32, #tpu.memory_space<smem>>
    %c2_332 = arith.constant 2 : index
    %c2_333 = arith.constant 2 : index
    %c2_334 = arith.constant 2 : index
    %628 = vector.load %arg10[%c2_332, %c2_333, %c2_334] : memref<4x10x18xf32, #tpu.memory_space<vmem>>, vector<1x8x16xf32>
    %629 = vector.shape_cast %628 : vector<1x8x16xf32> to vector<8x16xf32>
    %630 = vector.broadcast %627 : f32 to vector<8x16xf32>
    %631 = arith.mulf %630, %629 : vector<8x16xf32>
    %632 = arith.addf %626, %631 : vector<8x16xf32>
    %c26 = arith.constant 26 : index
    %633 = memref.load %arg4[%c26] : memref<288xf32, #tpu.memory_space<smem>>
    %c3_335 = arith.constant 3 : index
    %c0_336 = arith.constant 0 : index
    %c0_337 = arith.constant 0 : index
    %634 = vector.load %arg10[%c3_335, %c0_336, %c0_337] : memref<4x10x18xf32, #tpu.memory_space<vmem>>, vector<1x8x16xf32>
    %635 = vector.shape_cast %634 : vector<1x8x16xf32> to vector<8x16xf32>
    %636 = vector.broadcast %633 : f32 to vector<8x16xf32>
    %637 = arith.mulf %636, %635 : vector<8x16xf32>
    %638 = arith.addf %632, %637 : vector<8x16xf32>
    %c58 = arith.constant 58 : index
    %639 = memref.load %arg4[%c58] : memref<288xf32, #tpu.memory_space<smem>>
    %c3_338 = arith.constant 3 : index
    %c0_339 = arith.constant 0 : index
    %c1_340 = arith.constant 1 : index
    %640 = vector.load %arg10[%c3_338, %c0_339, %c1_340] : memref<4x10x18xf32, #tpu.memory_space<vmem>>, vector<1x8x16xf32>
    %641 = vector.shape_cast %640 : vector<1x8x16xf32> to vector<8x16xf32>
    %642 = vector.broadcast %639 : f32 to vector<8x16xf32>
    %643 = arith.mulf %642, %641 : vector<8x16xf32>
    %644 = arith.addf %638, %643 : vector<8x16xf32>
    %c90 = arith.constant 90 : index
    %645 = memref.load %arg4[%c90] : memref<288xf32, #tpu.memory_space<smem>>
    %c3_341 = arith.constant 3 : index
    %c0_342 = arith.constant 0 : index
    %c2_343 = arith.constant 2 : index
    %646 = vector.load %arg10[%c3_341, %c0_342, %c2_343] : memref<4x10x18xf32, #tpu.memory_space<vmem>>, vector<1x8x16xf32>
    %647 = vector.shape_cast %646 : vector<1x8x16xf32> to vector<8x16xf32>
    %648 = vector.broadcast %645 : f32 to vector<8x16xf32>
    %649 = arith.mulf %648, %647 : vector<8x16xf32>
    %650 = arith.addf %644, %649 : vector<8x16xf32>
    %c122 = arith.constant 122 : index
    %651 = memref.load %arg4[%c122] : memref<288xf32, #tpu.memory_space<smem>>
    %c3_344 = arith.constant 3 : index
    %c1_345 = arith.constant 1 : index
    %c0_346 = arith.constant 0 : index
    %652 = vector.load %arg10[%c3_344, %c1_345, %c0_346] : memref<4x10x18xf32, #tpu.memory_space<vmem>>, vector<1x8x16xf32>
    %653 = vector.shape_cast %652 : vector<1x8x16xf32> to vector<8x16xf32>
    %654 = vector.broadcast %651 : f32 to vector<8x16xf32>
    %655 = arith.mulf %654, %653 : vector<8x16xf32>
    %656 = arith.addf %650, %655 : vector<8x16xf32>
    %c154 = arith.constant 154 : index
    %657 = memref.load %arg4[%c154] : memref<288xf32, #tpu.memory_space<smem>>
    %c3_347 = arith.constant 3 : index
    %c1_348 = arith.constant 1 : index
    %c1_349 = arith.constant 1 : index
    %658 = vector.load %arg10[%c3_347, %c1_348, %c1_349] : memref<4x10x18xf32, #tpu.memory_space<vmem>>, vector<1x8x16xf32>
    %659 = vector.shape_cast %658 : vector<1x8x16xf32> to vector<8x16xf32>
    %660 = vector.broadcast %657 : f32 to vector<8x16xf32>
    %661 = arith.mulf %660, %659 : vector<8x16xf32>
    %662 = arith.addf %656, %661 : vector<8x16xf32>
    %c186 = arith.constant 186 : index
    %663 = memref.load %arg4[%c186] : memref<288xf32, #tpu.memory_space<smem>>
    %c3_350 = arith.constant 3 : index
    %c1_351 = arith.constant 1 : index
    %c2_352 = arith.constant 2 : index
    %664 = vector.load %arg10[%c3_350, %c1_351, %c2_352] : memref<4x10x18xf32, #tpu.memory_space<vmem>>, vector<1x8x16xf32>
    %665 = vector.shape_cast %664 : vector<1x8x16xf32> to vector<8x16xf32>
    %666 = vector.broadcast %663 : f32 to vector<8x16xf32>
    %667 = arith.mulf %666, %665 : vector<8x16xf32>
    %668 = arith.addf %662, %667 : vector<8x16xf32>
    %c218 = arith.constant 218 : index
    %669 = memref.load %arg4[%c218] : memref<288xf32, #tpu.memory_space<smem>>
    %c3_353 = arith.constant 3 : index
    %c2_354 = arith.constant 2 : index
    %c0_355 = arith.constant 0 : index
    %670 = vector.load %arg10[%c3_353, %c2_354, %c0_355] : memref<4x10x18xf32, #tpu.memory_space<vmem>>, vector<1x8x16xf32>
    %671 = vector.shape_cast %670 : vector<1x8x16xf32> to vector<8x16xf32>
    %672 = vector.broadcast %669 : f32 to vector<8x16xf32>
    %673 = arith.mulf %672, %671 : vector<8x16xf32>
    %674 = arith.addf %668, %673 : vector<8x16xf32>
    %c250 = arith.constant 250 : index
    %675 = memref.load %arg4[%c250] : memref<288xf32, #tpu.memory_space<smem>>
    %c3_356 = arith.constant 3 : index
    %c2_357 = arith.constant 2 : index
    %c1_358 = arith.constant 1 : index
    %676 = vector.load %arg10[%c3_356, %c2_357, %c1_358] : memref<4x10x18xf32, #tpu.memory_space<vmem>>, vector<1x8x16xf32>
    %677 = vector.shape_cast %676 : vector<1x8x16xf32> to vector<8x16xf32>
    %678 = vector.broadcast %675 : f32 to vector<8x16xf32>
    %679 = arith.mulf %678, %677 : vector<8x16xf32>
    %680 = arith.addf %674, %679 : vector<8x16xf32>
    %c282 = arith.constant 282 : index
    %681 = memref.load %arg4[%c282] : memref<288xf32, #tpu.memory_space<smem>>
    %c3_359 = arith.constant 3 : index
    %c2_360 = arith.constant 2 : index
    %c2_361 = arith.constant 2 : index
    %682 = vector.load %arg10[%c3_359, %c2_360, %c2_361] : memref<4x10x18xf32, #tpu.memory_space<vmem>>, vector<1x8x16xf32>
    %683 = vector.shape_cast %682 : vector<1x8x16xf32> to vector<8x16xf32>
    %684 = vector.broadcast %681 : f32 to vector<8x16xf32>
    %685 = arith.mulf %684, %683 : vector<8x16xf32>
    %686 = arith.addf %680, %685 : vector<8x16xf32>
    %c2_362 = arith.constant 2 : index
    %687 = memref.load %arg5[%c2_362] : memref<8xf32, #tpu.memory_space<smem>>
    %688 = vector.broadcast %687 : f32 to vector<8x16xf32>
    %689 = arith.mulf %686, %688 : vector<8x16xf32>
    %c2_363 = arith.constant 2 : index
    %690 = memref.load %arg6[%c2_363] : memref<8xf32, #tpu.memory_space<smem>>
    %691 = vector.broadcast %690 : f32 to vector<8x16xf32>
    %692 = arith.addf %689, %691 : vector<8x16xf32>
    %cst_364 = arith.constant 0.000000e+00 : f32
    %693 = vector.broadcast %cst_364 : f32 to vector<8x16xf32>
    %694 = arith.maximumf %692, %693 : vector<8x16xf32>
    %c2_365 = arith.constant 2 : index
    %c0_366 = arith.constant 0 : index
    %c0_367 = arith.constant 0 : index
    %695 = vector.load %arg11[%c2_365, %c0_366, %c0_367] : memref<8x8x16xf32, #tpu.memory_space<vmem>>, vector<1x8x16xf32>
    %696 = vector.shape_cast %695 : vector<1x8x16xf32> to vector<8x16xf32>
    %697 = vector.shape_cast %694 : vector<8x16xf32> to vector<1x8x16xf32>
    tpu.vector_store %arg11[%c2_365, %c0_366, %c0_367], %697 {strides = array<i32>} : memref<8x8x16xf32, #tpu.memory_space<vmem>>, vector<1x8x16xf32>,
    %cst_368 = arith.constant 0.000000e+00 : f32
    %698 = vector.broadcast %cst_368 : f32 to vector<8x16xf32>
    %c3_369 = arith.constant 3 : index
    %699 = memref.load %arg4[%c3_369] : memref<288xf32, #tpu.memory_space<smem>>
    %c0_370 = arith.constant 0 : index
    %c0_371 = arith.constant 0 : index
    %c0_372 = arith.constant 0 : index
    %700 = vector.load %arg10[%c0_370, %c0_371, %c0_372] : memref<4x10x18xf32, #tpu.memory_space<vmem>>, vector<1x8x16xf32>
    %701 = vector.shape_cast %700 : vector<1x8x16xf32> to vector<8x16xf32>
    %702 = vector.broadcast %699 : f32 to vector<8x16xf32>
    %703 = arith.mulf %702, %701 : vector<8x16xf32>
    %704 = arith.addf %698, %703 : vector<8x16xf32>
    %c35 = arith.constant 35 : index
    %705 = memref.load %arg4[%c35] : memref<288xf32, #tpu.memory_space<smem>>
    %c0_373 = arith.constant 0 : index
    %c0_374 = arith.constant 0 : index
    %c1_375 = arith.constant 1 : index
    %706 = vector.load %arg10[%c0_373, %c0_374, %c1_375] : memref<4x10x18xf32, #tpu.memory_space<vmem>>, vector<1x8x16xf32>
    %707 = vector.shape_cast %706 : vector<1x8x16xf32> to vector<8x16xf32>
    %708 = vector.broadcast %705 : f32 to vector<8x16xf32>
    %709 = arith.mulf %708, %707 : vector<8x16xf32>
    %710 = arith.addf %704, %709 : vector<8x16xf32>
    %c67 = arith.constant 67 : index
    %711 = memref.load %arg4[%c67] : memref<288xf32, #tpu.memory_space<smem>>
    %c0_376 = arith.constant 0 : index
    %c0_377 = arith.constant 0 : index
    %c2_378 = arith.constant 2 : index
    %712 = vector.load %arg10[%c0_376, %c0_377, %c2_378] : memref<4x10x18xf32, #tpu.memory_space<vmem>>, vector<1x8x16xf32>
    %713 = vector.shape_cast %712 : vector<1x8x16xf32> to vector<8x16xf32>
    %714 = vector.broadcast %711 : f32 to vector<8x16xf32>
    %715 = arith.mulf %714, %713 : vector<8x16xf32>
    %716 = arith.addf %710, %715 : vector<8x16xf32>
    %c99 = arith.constant 99 : index
    %717 = memref.load %arg4[%c99] : memref<288xf32, #tpu.memory_space<smem>>
    %c0_379 = arith.constant 0 : index
    %c1_380 = arith.constant 1 : index
    %c0_381 = arith.constant 0 : index
    %718 = vector.load %arg10[%c0_379, %c1_380, %c0_381] : memref<4x10x18xf32, #tpu.memory_space<vmem>>, vector<1x8x16xf32>
    %719 = vector.shape_cast %718 : vector<1x8x16xf32> to vector<8x16xf32>
    %720 = vector.broadcast %717 : f32 to vector<8x16xf32>
    %721 = arith.mulf %720, %719 : vector<8x16xf32>
    %722 = arith.addf %716, %721 : vector<8x16xf32>
    %c131 = arith.constant 131 : index
    %723 = memref.load %arg4[%c131] : memref<288xf32, #tpu.memory_space<smem>>
    %c0_382 = arith.constant 0 : index
    %c1_383 = arith.constant 1 : index
    %c1_384 = arith.constant 1 : index
    %724 = vector.load %arg10[%c0_382, %c1_383, %c1_384] : memref<4x10x18xf32, #tpu.memory_space<vmem>>, vector<1x8x16xf32>
    %725 = vector.shape_cast %724 : vector<1x8x16xf32> to vector<8x16xf32>
    %726 = vector.broadcast %723 : f32 to vector<8x16xf32>
    %727 = arith.mulf %726, %725 : vector<8x16xf32>
    %728 = arith.addf %722, %727 : vector<8x16xf32>
    %c163 = arith.constant 163 : index
    %729 = memref.load %arg4[%c163] : memref<288xf32, #tpu.memory_space<smem>>
    %c0_385 = arith.constant 0 : index
    %c1_386 = arith.constant 1 : index
    %c2_387 = arith.constant 2 : index
    %730 = vector.load %arg10[%c0_385, %c1_386, %c2_387] : memref<4x10x18xf32, #tpu.memory_space<vmem>>, vector<1x8x16xf32>
    %731 = vector.shape_cast %730 : vector<1x8x16xf32> to vector<8x16xf32>
    %732 = vector.broadcast %729 : f32 to vector<8x16xf32>
    %733 = arith.mulf %732, %731 : vector<8x16xf32>
    %734 = arith.addf %728, %733 : vector<8x16xf32>
    %c195 = arith.constant 195 : index
    %735 = memref.load %arg4[%c195] : memref<288xf32, #tpu.memory_space<smem>>
    %c0_388 = arith.constant 0 : index
    %c2_389 = arith.constant 2 : index
    %c0_390 = arith.constant 0 : index
    %736 = vector.load %arg10[%c0_388, %c2_389, %c0_390] : memref<4x10x18xf32, #tpu.memory_space<vmem>>, vector<1x8x16xf32>
    %737 = vector.shape_cast %736 : vector<1x8x16xf32> to vector<8x16xf32>
    %738 = vector.broadcast %735 : f32 to vector<8x16xf32>
    %739 = arith.mulf %738, %737 : vector<8x16xf32>
    %740 = arith.addf %734, %739 : vector<8x16xf32>
    %c227 = arith.constant 227 : index
    %741 = memref.load %arg4[%c227] : memref<288xf32, #tpu.memory_space<smem>>
    %c0_391 = arith.constant 0 : index
    %c2_392 = arith.constant 2 : index
    %c1_393 = arith.constant 1 : index
    %742 = vector.load %arg10[%c0_391, %c2_392, %c1_393] : memref<4x10x18xf32, #tpu.memory_space<vmem>>, vector<1x8x16xf32>
    %743 = vector.shape_cast %742 : vector<1x8x16xf32> to vector<8x16xf32>
    %744 = vector.broadcast %741 : f32 to vector<8x16xf32>
    %745 = arith.mulf %744, %743 : vector<8x16xf32>
    %746 = arith.addf %740, %745 : vector<8x16xf32>
    %c259 = arith.constant 259 : index
    %747 = memref.load %arg4[%c259] : memref<288xf32, #tpu.memory_space<smem>>
    %c0_394 = arith.constant 0 : index
    %c2_395 = arith.constant 2 : index
    %c2_396 = arith.constant 2 : index
    %748 = vector.load %arg10[%c0_394, %c2_395, %c2_396] : memref<4x10x18xf32, #tpu.memory_space<vmem>>, vector<1x8x16xf32>
    %749 = vector.shape_cast %748 : vector<1x8x16xf32> to vector<8x16xf32>
    %750 = vector.broadcast %747 : f32 to vector<8x16xf32>
    %751 = arith.mulf %750, %749 : vector<8x16xf32>
    %752 = arith.addf %746, %751 : vector<8x16xf32>
    %c11 = arith.constant 11 : index
    %753 = memref.load %arg4[%c11] : memref<288xf32, #tpu.memory_space<smem>>
    %c1_397 = arith.constant 1 : index
    %c0_398 = arith.constant 0 : index
    %c0_399 = arith.constant 0 : index
    %754 = vector.load %arg10[%c1_397, %c0_398, %c0_399] : memref<4x10x18xf32, #tpu.memory_space<vmem>>, vector<1x8x16xf32>
    %755 = vector.shape_cast %754 : vector<1x8x16xf32> to vector<8x16xf32>
    %756 = vector.broadcast %753 : f32 to vector<8x16xf32>
    %757 = arith.mulf %756, %755 : vector<8x16xf32>
    %758 = arith.addf %752, %757 : vector<8x16xf32>
    %c43 = arith.constant 43 : index
    %759 = memref.load %arg4[%c43] : memref<288xf32, #tpu.memory_space<smem>>
    %c1_400 = arith.constant 1 : index
    %c0_401 = arith.constant 0 : index
    %c1_402 = arith.constant 1 : index
    %760 = vector.load %arg10[%c1_400, %c0_401, %c1_402] : memref<4x10x18xf32, #tpu.memory_space<vmem>>, vector<1x8x16xf32>
    %761 = vector.shape_cast %760 : vector<1x8x16xf32> to vector<8x16xf32>
    %762 = vector.broadcast %759 : f32 to vector<8x16xf32>
    %763 = arith.mulf %762, %761 : vector<8x16xf32>
    %764 = arith.addf %758, %763 : vector<8x16xf32>
    %c75 = arith.constant 75 : index
    %765 = memref.load %arg4[%c75] : memref<288xf32, #tpu.memory_space<smem>>
    %c1_403 = arith.constant 1 : index
    %c0_404 = arith.constant 0 : index
    %c2_405 = arith.constant 2 : index
    %766 = vector.load %arg10[%c1_403, %c0_404, %c2_405] : memref<4x10x18xf32, #tpu.memory_space<vmem>>, vector<1x8x16xf32>
    %767 = vector.shape_cast %766 : vector<1x8x16xf32> to vector<8x16xf32>
    %768 = vector.broadcast %765 : f32 to vector<8x16xf32>
    %769 = arith.mulf %768, %767 : vector<8x16xf32>
    %770 = arith.addf %764, %769 : vector<8x16xf32>
    %c107 = arith.constant 107 : index
    %771 = memref.load %arg4[%c107] : memref<288xf32, #tpu.memory_space<smem>>
    %c1_406 = arith.constant 1 : index
    %c1_407 = arith.constant 1 : index
    %c0_408 = arith.constant 0 : index
    %772 = vector.load %arg10[%c1_406, %c1_407, %c0_408] : memref<4x10x18xf32, #tpu.memory_space<vmem>>, vector<1x8x16xf32>
    %773 = vector.shape_cast %772 : vector<1x8x16xf32> to vector<8x16xf32>
    %774 = vector.broadcast %771 : f32 to vector<8x16xf32>
    %775 = arith.mulf %774, %773 : vector<8x16xf32>
    %776 = arith.addf %770, %775 : vector<8x16xf32>
    %c139 = arith.constant 139 : index
    %777 = memref.load %arg4[%c139] : memref<288xf32, #tpu.memory_space<smem>>
    %c1_409 = arith.constant 1 : index
    %c1_410 = arith.constant 1 : index
    %c1_411 = arith.constant 1 : index
    %778 = vector.load %arg10[%c1_409, %c1_410, %c1_411] : memref<4x10x18xf32, #tpu.memory_space<vmem>>, vector<1x8x16xf32>
    %779 = vector.shape_cast %778 : vector<1x8x16xf32> to vector<8x16xf32>
    %780 = vector.broadcast %777 : f32 to vector<8x16xf32>
    %781 = arith.mulf %780, %779 : vector<8x16xf32>
    %782 = arith.addf %776, %781 : vector<8x16xf32>
    %c171 = arith.constant 171 : index
    %783 = memref.load %arg4[%c171] : memref<288xf32, #tpu.memory_space<smem>>
    %c1_412 = arith.constant 1 : index
    %c1_413 = arith.constant 1 : index
    %c2_414 = arith.constant 2 : index
    %784 = vector.load %arg10[%c1_412, %c1_413, %c2_414] : memref<4x10x18xf32, #tpu.memory_space<vmem>>, vector<1x8x16xf32>
    %785 = vector.shape_cast %784 : vector<1x8x16xf32> to vector<8x16xf32>
    %786 = vector.broadcast %783 : f32 to vector<8x16xf32>
    %787 = arith.mulf %786, %785 : vector<8x16xf32>
    %788 = arith.addf %782, %787 : vector<8x16xf32>
    %c203 = arith.constant 203 : index
    %789 = memref.load %arg4[%c203] : memref<288xf32, #tpu.memory_space<smem>>
    %c1_415 = arith.constant 1 : index
    %c2_416 = arith.constant 2 : index
    %c0_417 = arith.constant 0 : index
    %790 = vector.load %arg10[%c1_415, %c2_416, %c0_417] : memref<4x10x18xf32, #tpu.memory_space<vmem>>, vector<1x8x16xf32>
    %791 = vector.shape_cast %790 : vector<1x8x16xf32> to vector<8x16xf32>
    %792 = vector.broadcast %789 : f32 to vector<8x16xf32>
    %793 = arith.mulf %792, %791 : vector<8x16xf32>
    %794 = arith.addf %788, %793 : vector<8x16xf32>
    %c235 = arith.constant 235 : index
    %795 = memref.load %arg4[%c235] : memref<288xf32, #tpu.memory_space<smem>>
    %c1_418 = arith.constant 1 : index
    %c2_419 = arith.constant 2 : index
    %c1_420 = arith.constant 1 : index
    %796 = vector.load %arg10[%c1_418, %c2_419, %c1_420] : memref<4x10x18xf32, #tpu.memory_space<vmem>>, vector<1x8x16xf32>
    %797 = vector.shape_cast %796 : vector<1x8x16xf32> to vector<8x16xf32>
    %798 = vector.broadcast %795 : f32 to vector<8x16xf32>
    %799 = arith.mulf %798, %797 : vector<8x16xf32>
    %800 = arith.addf %794, %799 : vector<8x16xf32>
    %c267 = arith.constant 267 : index
    %801 = memref.load %arg4[%c267] : memref<288xf32, #tpu.memory_space<smem>>
    %c1_421 = arith.constant 1 : index
    %c2_422 = arith.constant 2 : index
    %c2_423 = arith.constant 2 : index
    %802 = vector.load %arg10[%c1_421, %c2_422, %c2_423] : memref<4x10x18xf32, #tpu.memory_space<vmem>>, vector<1x8x16xf32>
    %803 = vector.shape_cast %802 : vector<1x8x16xf32> to vector<8x16xf32>
    %804 = vector.broadcast %801 : f32 to vector<8x16xf32>
    %805 = arith.mulf %804, %803 : vector<8x16xf32>
    %806 = arith.addf %800, %805 : vector<8x16xf32>
    %c19 = arith.constant 19 : index
    %807 = memref.load %arg4[%c19] : memref<288xf32, #tpu.memory_space<smem>>
    %c2_424 = arith.constant 2 : index
    %c0_425 = arith.constant 0 : index
    %c0_426 = arith.constant 0 : index
    %808 = vector.load %arg10[%c2_424, %c0_425, %c0_426] : memref<4x10x18xf32, #tpu.memory_space<vmem>>, vector<1x8x16xf32>
    %809 = vector.shape_cast %808 : vector<1x8x16xf32> to vector<8x16xf32>
    %810 = vector.broadcast %807 : f32 to vector<8x16xf32>
    %811 = arith.mulf %810, %809 : vector<8x16xf32>
    %812 = arith.addf %806, %811 : vector<8x16xf32>
    %c51 = arith.constant 51 : index
    %813 = memref.load %arg4[%c51] : memref<288xf32, #tpu.memory_space<smem>>
    %c2_427 = arith.constant 2 : index
    %c0_428 = arith.constant 0 : index
    %c1_429 = arith.constant 1 : index
    %814 = vector.load %arg10[%c2_427, %c0_428, %c1_429] : memref<4x10x18xf32, #tpu.memory_space<vmem>>, vector<1x8x16xf32>
    %815 = vector.shape_cast %814 : vector<1x8x16xf32> to vector<8x16xf32>
    %816 = vector.broadcast %813 : f32 to vector<8x16xf32>
    %817 = arith.mulf %816, %815 : vector<8x16xf32>
    %818 = arith.addf %812, %817 : vector<8x16xf32>
    %c83 = arith.constant 83 : index
    %819 = memref.load %arg4[%c83] : memref<288xf32, #tpu.memory_space<smem>>
    %c2_430 = arith.constant 2 : index
    %c0_431 = arith.constant 0 : index
    %c2_432 = arith.constant 2 : index
    %820 = vector.load %arg10[%c2_430, %c0_431, %c2_432] : memref<4x10x18xf32, #tpu.memory_space<vmem>>, vector<1x8x16xf32>
    %821 = vector.shape_cast %820 : vector<1x8x16xf32> to vector<8x16xf32>
    %822 = vector.broadcast %819 : f32 to vector<8x16xf32>
    %823 = arith.mulf %822, %821 : vector<8x16xf32>
    %824 = arith.addf %818, %823 : vector<8x16xf32>
    %c115 = arith.constant 115 : index
    %825 = memref.load %arg4[%c115] : memref<288xf32, #tpu.memory_space<smem>>
    %c2_433 = arith.constant 2 : index
    %c1_434 = arith.constant 1 : index
    %c0_435 = arith.constant 0 : index
    %826 = vector.load %arg10[%c2_433, %c1_434, %c0_435] : memref<4x10x18xf32, #tpu.memory_space<vmem>>, vector<1x8x16xf32>
    %827 = vector.shape_cast %826 : vector<1x8x16xf32> to vector<8x16xf32>
    %828 = vector.broadcast %825 : f32 to vector<8x16xf32>
    %829 = arith.mulf %828, %827 : vector<8x16xf32>
    %830 = arith.addf %824, %829 : vector<8x16xf32>
    %c147 = arith.constant 147 : index
    %831 = memref.load %arg4[%c147] : memref<288xf32, #tpu.memory_space<smem>>
    %c2_436 = arith.constant 2 : index
    %c1_437 = arith.constant 1 : index
    %c1_438 = arith.constant 1 : index
    %832 = vector.load %arg10[%c2_436, %c1_437, %c1_438] : memref<4x10x18xf32, #tpu.memory_space<vmem>>, vector<1x8x16xf32>
    %833 = vector.shape_cast %832 : vector<1x8x16xf32> to vector<8x16xf32>
    %834 = vector.broadcast %831 : f32 to vector<8x16xf32>
    %835 = arith.mulf %834, %833 : vector<8x16xf32>
    %836 = arith.addf %830, %835 : vector<8x16xf32>
    %c179 = arith.constant 179 : index
    %837 = memref.load %arg4[%c179] : memref<288xf32, #tpu.memory_space<smem>>
    %c2_439 = arith.constant 2 : index
    %c1_440 = arith.constant 1 : index
    %c2_441 = arith.constant 2 : index
    %838 = vector.load %arg10[%c2_439, %c1_440, %c2_441] : memref<4x10x18xf32, #tpu.memory_space<vmem>>, vector<1x8x16xf32>
    %839 = vector.shape_cast %838 : vector<1x8x16xf32> to vector<8x16xf32>
    %840 = vector.broadcast %837 : f32 to vector<8x16xf32>
    %841 = arith.mulf %840, %839 : vector<8x16xf32>
    %842 = arith.addf %836, %841 : vector<8x16xf32>
    %c211 = arith.constant 211 : index
    %843 = memref.load %arg4[%c211] : memref<288xf32, #tpu.memory_space<smem>>
    %c2_442 = arith.constant 2 : index
    %c2_443 = arith.constant 2 : index
    %c0_444 = arith.constant 0 : index
    %844 = vector.load %arg10[%c2_442, %c2_443, %c0_444] : memref<4x10x18xf32, #tpu.memory_space<vmem>>, vector<1x8x16xf32>
    %845 = vector.shape_cast %844 : vector<1x8x16xf32> to vector<8x16xf32>
    %846 = vector.broadcast %843 : f32 to vector<8x16xf32>
    %847 = arith.mulf %846, %845 : vector<8x16xf32>
    %848 = arith.addf %842, %847 : vector<8x16xf32>
    %c243 = arith.constant 243 : index
    %849 = memref.load %arg4[%c243] : memref<288xf32, #tpu.memory_space<smem>>
    %c2_445 = arith.constant 2 : index
    %c2_446 = arith.constant 2 : index
    %c1_447 = arith.constant 1 : index
    %850 = vector.load %arg10[%c2_445, %c2_446, %c1_447] : memref<4x10x18xf32, #tpu.memory_space<vmem>>, vector<1x8x16xf32>
    %851 = vector.shape_cast %850 : vector<1x8x16xf32> to vector<8x16xf32>
    %852 = vector.broadcast %849 : f32 to vector<8x16xf32>
    %853 = arith.mulf %852, %851 : vector<8x16xf32>
    %854 = arith.addf %848, %853 : vector<8x16xf32>
    %c275 = arith.constant 275 : index
    %855 = memref.load %arg4[%c275] : memref<288xf32, #tpu.memory_space<smem>>
    %c2_448 = arith.constant 2 : index
    %c2_449 = arith.constant 2 : index
    %c2_450 = arith.constant 2 : index
    %856 = vector.load %arg10[%c2_448, %c2_449, %c2_450] : memref<4x10x18xf32, #tpu.memory_space<vmem>>, vector<1x8x16xf32>
    %857 = vector.shape_cast %856 : vector<1x8x16xf32> to vector<8x16xf32>
    %858 = vector.broadcast %855 : f32 to vector<8x16xf32>
    %859 = arith.mulf %858, %857 : vector<8x16xf32>
    %860 = arith.addf %854, %859 : vector<8x16xf32>
    %c27 = arith.constant 27 : index
    %861 = memref.load %arg4[%c27] : memref<288xf32, #tpu.memory_space<smem>>
    %c3_451 = arith.constant 3 : index
    %c0_452 = arith.constant 0 : index
    %c0_453 = arith.constant 0 : index
    %862 = vector.load %arg10[%c3_451, %c0_452, %c0_453] : memref<4x10x18xf32, #tpu.memory_space<vmem>>, vector<1x8x16xf32>
    %863 = vector.shape_cast %862 : vector<1x8x16xf32> to vector<8x16xf32>
    %864 = vector.broadcast %861 : f32 to vector<8x16xf32>
    %865 = arith.mulf %864, %863 : vector<8x16xf32>
    %866 = arith.addf %860, %865 : vector<8x16xf32>
    %c59 = arith.constant 59 : index
    %867 = memref.load %arg4[%c59] : memref<288xf32, #tpu.memory_space<smem>>
    %c3_454 = arith.constant 3 : index
    %c0_455 = arith.constant 0 : index
    %c1_456 = arith.constant 1 : index
    %868 = vector.load %arg10[%c3_454, %c0_455, %c1_456] : memref<4x10x18xf32, #tpu.memory_space<vmem>>, vector<1x8x16xf32>
    %869 = vector.shape_cast %868 : vector<1x8x16xf32> to vector<8x16xf32>
    %870 = vector.broadcast %867 : f32 to vector<8x16xf32>
    %871 = arith.mulf %870, %869 : vector<8x16xf32>
    %872 = arith.addf %866, %871 : vector<8x16xf32>
    %c91 = arith.constant 91 : index
    %873 = memref.load %arg4[%c91] : memref<288xf32, #tpu.memory_space<smem>>
    %c3_457 = arith.constant 3 : index
    %c0_458 = arith.constant 0 : index
    %c2_459 = arith.constant 2 : index
    %874 = vector.load %arg10[%c3_457, %c0_458, %c2_459] : memref<4x10x18xf32, #tpu.memory_space<vmem>>, vector<1x8x16xf32>
    %875 = vector.shape_cast %874 : vector<1x8x16xf32> to vector<8x16xf32>
    %876 = vector.broadcast %873 : f32 to vector<8x16xf32>
    %877 = arith.mulf %876, %875 : vector<8x16xf32>
    %878 = arith.addf %872, %877 : vector<8x16xf32>
    %c123 = arith.constant 123 : index
    %879 = memref.load %arg4[%c123] : memref<288xf32, #tpu.memory_space<smem>>
    %c3_460 = arith.constant 3 : index
    %c1_461 = arith.constant 1 : index
    %c0_462 = arith.constant 0 : index
    %880 = vector.load %arg10[%c3_460, %c1_461, %c0_462] : memref<4x10x18xf32, #tpu.memory_space<vmem>>, vector<1x8x16xf32>
    %881 = vector.shape_cast %880 : vector<1x8x16xf32> to vector<8x16xf32>
    %882 = vector.broadcast %879 : f32 to vector<8x16xf32>
    %883 = arith.mulf %882, %881 : vector<8x16xf32>
    %884 = arith.addf %878, %883 : vector<8x16xf32>
    %c155 = arith.constant 155 : index
    %885 = memref.load %arg4[%c155] : memref<288xf32, #tpu.memory_space<smem>>
    %c3_463 = arith.constant 3 : index
    %c1_464 = arith.constant 1 : index
    %c1_465 = arith.constant 1 : index
    %886 = vector.load %arg10[%c3_463, %c1_464, %c1_465] : memref<4x10x18xf32, #tpu.memory_space<vmem>>, vector<1x8x16xf32>
    %887 = vector.shape_cast %886 : vector<1x8x16xf32> to vector<8x16xf32>
    %888 = vector.broadcast %885 : f32 to vector<8x16xf32>
    %889 = arith.mulf %888, %887 : vector<8x16xf32>
    %890 = arith.addf %884, %889 : vector<8x16xf32>
    %c187 = arith.constant 187 : index
    %891 = memref.load %arg4[%c187] : memref<288xf32, #tpu.memory_space<smem>>
    %c3_466 = arith.constant 3 : index
    %c1_467 = arith.constant 1 : index
    %c2_468 = arith.constant 2 : index
    %892 = vector.load %arg10[%c3_466, %c1_467, %c2_468] : memref<4x10x18xf32, #tpu.memory_space<vmem>>, vector<1x8x16xf32>
    %893 = vector.shape_cast %892 : vector<1x8x16xf32> to vector<8x16xf32>
    %894 = vector.broadcast %891 : f32 to vector<8x16xf32>
    %895 = arith.mulf %894, %893 : vector<8x16xf32>
    %896 = arith.addf %890, %895 : vector<8x16xf32>
    %c219 = arith.constant 219 : index
    %897 = memref.load %arg4[%c219] : memref<288xf32, #tpu.memory_space<smem>>
    %c3_469 = arith.constant 3 : index
    %c2_470 = arith.constant 2 : index
    %c0_471 = arith.constant 0 : index
    %898 = vector.load %arg10[%c3_469, %c2_470, %c0_471] : memref<4x10x18xf32, #tpu.memory_space<vmem>>, vector<1x8x16xf32>
    %899 = vector.shape_cast %898 : vector<1x8x16xf32> to vector<8x16xf32>
    %900 = vector.broadcast %897 : f32 to vector<8x16xf32>
    %901 = arith.mulf %900, %899 : vector<8x16xf32>
    %902 = arith.addf %896, %901 : vector<8x16xf32>
    %c251 = arith.constant 251 : index
    %903 = memref.load %arg4[%c251] : memref<288xf32, #tpu.memory_space<smem>>
    %c3_472 = arith.constant 3 : index
    %c2_473 = arith.constant 2 : index
    %c1_474 = arith.constant 1 : index
    %904 = vector.load %arg10[%c3_472, %c2_473, %c1_474] : memref<4x10x18xf32, #tpu.memory_space<vmem>>, vector<1x8x16xf32>
    %905 = vector.shape_cast %904 : vector<1x8x16xf32> to vector<8x16xf32>
    %906 = vector.broadcast %903 : f32 to vector<8x16xf32>
    %907 = arith.mulf %906, %905 : vector<8x16xf32>
    %908 = arith.addf %902, %907 : vector<8x16xf32>
    %c283 = arith.constant 283 : index
    %909 = memref.load %arg4[%c283] : memref<288xf32, #tpu.memory_space<smem>>
    %c3_475 = arith.constant 3 : index
    %c2_476 = arith.constant 2 : index
    %c2_477 = arith.constant 2 : index
    %910 = vector.load %arg10[%c3_475, %c2_476, %c2_477] : memref<4x10x18xf32, #tpu.memory_space<vmem>>, vector<1x8x16xf32>
    %911 = vector.shape_cast %910 : vector<1x8x16xf32> to vector<8x16xf32>
    %912 = vector.broadcast %909 : f32 to vector<8x16xf32>
    %913 = arith.mulf %912, %911 : vector<8x16xf32>
    %914 = arith.addf %908, %913 : vector<8x16xf32>
    %c3_478 = arith.constant 3 : index
    %915 = memref.load %arg5[%c3_478] : memref<8xf32, #tpu.memory_space<smem>>
    %916 = vector.broadcast %915 : f32 to vector<8x16xf32>
    %917 = arith.mulf %914, %916 : vector<8x16xf32>
    %c3_479 = arith.constant 3 : index
    %918 = memref.load %arg6[%c3_479] : memref<8xf32, #tpu.memory_space<smem>>
    %919 = vector.broadcast %918 : f32 to vector<8x16xf32>
    %920 = arith.addf %917, %919 : vector<8x16xf32>
    %cst_480 = arith.constant 0.000000e+00 : f32
    %921 = vector.broadcast %cst_480 : f32 to vector<8x16xf32>
    %922 = arith.maximumf %920, %921 : vector<8x16xf32>
    %c3_481 = arith.constant 3 : index
    %c0_482 = arith.constant 0 : index
    %c0_483 = arith.constant 0 : index
    %923 = vector.load %arg11[%c3_481, %c0_482, %c0_483] : memref<8x8x16xf32, #tpu.memory_space<vmem>>, vector<1x8x16xf32>
    %924 = vector.shape_cast %923 : vector<1x8x16xf32> to vector<8x16xf32>
    %925 = vector.shape_cast %922 : vector<8x16xf32> to vector<1x8x16xf32>
    tpu.vector_store %arg11[%c3_481, %c0_482, %c0_483], %925 {strides = array<i32>} : memref<8x8x16xf32, #tpu.memory_space<vmem>>, vector<1x8x16xf32>,
    %cst_484 = arith.constant 0.000000e+00 : f32
    %926 = vector.broadcast %cst_484 : f32 to vector<8x16xf32>
    %c4 = arith.constant 4 : index
    %927 = memref.load %arg4[%c4] : memref<288xf32, #tpu.memory_space<smem>>
    %c0_485 = arith.constant 0 : index
    %c0_486 = arith.constant 0 : index
    %c0_487 = arith.constant 0 : index
    %928 = vector.load %arg10[%c0_485, %c0_486, %c0_487] : memref<4x10x18xf32, #tpu.memory_space<vmem>>, vector<1x8x16xf32>
    %929 = vector.shape_cast %928 : vector<1x8x16xf32> to vector<8x16xf32>
    %930 = vector.broadcast %927 : f32 to vector<8x16xf32>
    %931 = arith.mulf %930, %929 : vector<8x16xf32>
    %932 = arith.addf %926, %931 : vector<8x16xf32>
    %c36 = arith.constant 36 : index
    %933 = memref.load %arg4[%c36] : memref<288xf32, #tpu.memory_space<smem>>
    %c0_488 = arith.constant 0 : index
    %c0_489 = arith.constant 0 : index
    %c1_490 = arith.constant 1 : index
    %934 = vector.load %arg10[%c0_488, %c0_489, %c1_490] : memref<4x10x18xf32, #tpu.memory_space<vmem>>, vector<1x8x16xf32>
    %935 = vector.shape_cast %934 : vector<1x8x16xf32> to vector<8x16xf32>
    %936 = vector.broadcast %933 : f32 to vector<8x16xf32>
    %937 = arith.mulf %936, %935 : vector<8x16xf32>
    %938 = arith.addf %932, %937 : vector<8x16xf32>
    %c68 = arith.constant 68 : index
    %939 = memref.load %arg4[%c68] : memref<288xf32, #tpu.memory_space<smem>>
    %c0_491 = arith.constant 0 : index
    %c0_492 = arith.constant 0 : index
    %c2_493 = arith.constant 2 : index
    %940 = vector.load %arg10[%c0_491, %c0_492, %c2_493] : memref<4x10x18xf32, #tpu.memory_space<vmem>>, vector<1x8x16xf32>
    %941 = vector.shape_cast %940 : vector<1x8x16xf32> to vector<8x16xf32>
    %942 = vector.broadcast %939 : f32 to vector<8x16xf32>
    %943 = arith.mulf %942, %941 : vector<8x16xf32>
    %944 = arith.addf %938, %943 : vector<8x16xf32>
    %c100 = arith.constant 100 : index
    %945 = memref.load %arg4[%c100] : memref<288xf32, #tpu.memory_space<smem>>
    %c0_494 = arith.constant 0 : index
    %c1_495 = arith.constant 1 : index
    %c0_496 = arith.constant 0 : index
    %946 = vector.load %arg10[%c0_494, %c1_495, %c0_496] : memref<4x10x18xf32, #tpu.memory_space<vmem>>, vector<1x8x16xf32>
    %947 = vector.shape_cast %946 : vector<1x8x16xf32> to vector<8x16xf32>
    %948 = vector.broadcast %945 : f32 to vector<8x16xf32>
    %949 = arith.mulf %948, %947 : vector<8x16xf32>
    %950 = arith.addf %944, %949 : vector<8x16xf32>
    %c132 = arith.constant 132 : index
    %951 = memref.load %arg4[%c132] : memref<288xf32, #tpu.memory_space<smem>>
    %c0_497 = arith.constant 0 : index
    %c1_498 = arith.constant 1 : index
    %c1_499 = arith.constant 1 : index
    %952 = vector.load %arg10[%c0_497, %c1_498, %c1_499] : memref<4x10x18xf32, #tpu.memory_space<vmem>>, vector<1x8x16xf32>
    %953 = vector.shape_cast %952 : vector<1x8x16xf32> to vector<8x16xf32>
    %954 = vector.broadcast %951 : f32 to vector<8x16xf32>
    %955 = arith.mulf %954, %953 : vector<8x16xf32>
    %956 = arith.addf %950, %955 : vector<8x16xf32>
    %c164 = arith.constant 164 : index
    %957 = memref.load %arg4[%c164] : memref<288xf32, #tpu.memory_space<smem>>
    %c0_500 = arith.constant 0 : index
    %c1_501 = arith.constant 1 : index
    %c2_502 = arith.constant 2 : index
    %958 = vector.load %arg10[%c0_500, %c1_501, %c2_502] : memref<4x10x18xf32, #tpu.memory_space<vmem>>, vector<1x8x16xf32>
    %959 = vector.shape_cast %958 : vector<1x8x16xf32> to vector<8x16xf32>
    %960 = vector.broadcast %957 : f32 to vector<8x16xf32>
    %961 = arith.mulf %960, %959 : vector<8x16xf32>
    %962 = arith.addf %956, %961 : vector<8x16xf32>
    %c196 = arith.constant 196 : index
    %963 = memref.load %arg4[%c196] : memref<288xf32, #tpu.memory_space<smem>>
    %c0_503 = arith.constant 0 : index
    %c2_504 = arith.constant 2 : index
    %c0_505 = arith.constant 0 : index
    %964 = vector.load %arg10[%c0_503, %c2_504, %c0_505] : memref<4x10x18xf32, #tpu.memory_space<vmem>>, vector<1x8x16xf32>
    %965 = vector.shape_cast %964 : vector<1x8x16xf32> to vector<8x16xf32>
    %966 = vector.broadcast %963 : f32 to vector<8x16xf32>
    %967 = arith.mulf %966, %965 : vector<8x16xf32>
    %968 = arith.addf %962, %967 : vector<8x16xf32>
    %c228 = arith.constant 228 : index
    %969 = memref.load %arg4[%c228] : memref<288xf32, #tpu.memory_space<smem>>
    %c0_506 = arith.constant 0 : index
    %c2_507 = arith.constant 2 : index
    %c1_508 = arith.constant 1 : index
    %970 = vector.load %arg10[%c0_506, %c2_507, %c1_508] : memref<4x10x18xf32, #tpu.memory_space<vmem>>, vector<1x8x16xf32>
    %971 = vector.shape_cast %970 : vector<1x8x16xf32> to vector<8x16xf32>
    %972 = vector.broadcast %969 : f32 to vector<8x16xf32>
    %973 = arith.mulf %972, %971 : vector<8x16xf32>
    %974 = arith.addf %968, %973 : vector<8x16xf32>
    %c260 = arith.constant 260 : index
    %975 = memref.load %arg4[%c260] : memref<288xf32, #tpu.memory_space<smem>>
    %c0_509 = arith.constant 0 : index
    %c2_510 = arith.constant 2 : index
    %c2_511 = arith.constant 2 : index
    %976 = vector.load %arg10[%c0_509, %c2_510, %c2_511] : memref<4x10x18xf32, #tpu.memory_space<vmem>>, vector<1x8x16xf32>
    %977 = vector.shape_cast %976 : vector<1x8x16xf32> to vector<8x16xf32>
    %978 = vector.broadcast %975 : f32 to vector<8x16xf32>
    %979 = arith.mulf %978, %977 : vector<8x16xf32>
    %980 = arith.addf %974, %979 : vector<8x16xf32>
    %c12 = arith.constant 12 : index
    %981 = memref.load %arg4[%c12] : memref<288xf32, #tpu.memory_space<smem>>
    %c1_512 = arith.constant 1 : index
    %c0_513 = arith.constant 0 : index
    %c0_514 = arith.constant 0 : index
    %982 = vector.load %arg10[%c1_512, %c0_513, %c0_514] : memref<4x10x18xf32, #tpu.memory_space<vmem>>, vector<1x8x16xf32>
    %983 = vector.shape_cast %982 : vector<1x8x16xf32> to vector<8x16xf32>
    %984 = vector.broadcast %981 : f32 to vector<8x16xf32>
    %985 = arith.mulf %984, %983 : vector<8x16xf32>
    %986 = arith.addf %980, %985 : vector<8x16xf32>
    %c44 = arith.constant 44 : index
    %987 = memref.load %arg4[%c44] : memref<288xf32, #tpu.memory_space<smem>>
    %c1_515 = arith.constant 1 : index
    %c0_516 = arith.constant 0 : index
    %c1_517 = arith.constant 1 : index
    %988 = vector.load %arg10[%c1_515, %c0_516, %c1_517] : memref<4x10x18xf32, #tpu.memory_space<vmem>>, vector<1x8x16xf32>
    %989 = vector.shape_cast %988 : vector<1x8x16xf32> to vector<8x16xf32>
    %990 = vector.broadcast %987 : f32 to vector<8x16xf32>
    %991 = arith.mulf %990, %989 : vector<8x16xf32>
    %992 = arith.addf %986, %991 : vector<8x16xf32>
    %c76 = arith.constant 76 : index
    %993 = memref.load %arg4[%c76] : memref<288xf32, #tpu.memory_space<smem>>
    %c1_518 = arith.constant 1 : index
    %c0_519 = arith.constant 0 : index
    %c2_520 = arith.constant 2 : index
    %994 = vector.load %arg10[%c1_518, %c0_519, %c2_520] : memref<4x10x18xf32, #tpu.memory_space<vmem>>, vector<1x8x16xf32>
    %995 = vector.shape_cast %994 : vector<1x8x16xf32> to vector<8x16xf32>
    %996 = vector.broadcast %993 : f32 to vector<8x16xf32>
    %997 = arith.mulf %996, %995 : vector<8x16xf32>
    %998 = arith.addf %992, %997 : vector<8x16xf32>
    %c108 = arith.constant 108 : index
    %999 = memref.load %arg4[%c108] : memref<288xf32, #tpu.memory_space<smem>>
    %c1_521 = arith.constant 1 : index
    %c1_522 = arith.constant 1 : index
    %c0_523 = arith.constant 0 : index
    %1000 = vector.load %arg10[%c1_521, %c1_522, %c0_523] : memref<4x10x18xf32, #tpu.memory_space<vmem>>, vector<1x8x16xf32>
    %1001 = vector.shape_cast %1000 : vector<1x8x16xf32> to vector<8x16xf32>
    %1002 = vector.broadcast %999 : f32 to vector<8x16xf32>
    %1003 = arith.mulf %1002, %1001 : vector<8x16xf32>
    %1004 = arith.addf %998, %1003 : vector<8x16xf32>
    %c140 = arith.constant 140 : index
    %1005 = memref.load %arg4[%c140] : memref<288xf32, #tpu.memory_space<smem>>
    %c1_524 = arith.constant 1 : index
    %c1_525 = arith.constant 1 : index
    %c1_526 = arith.constant 1 : index
    %1006 = vector.load %arg10[%c1_524, %c1_525, %c1_526] : memref<4x10x18xf32, #tpu.memory_space<vmem>>, vector<1x8x16xf32>
    %1007 = vector.shape_cast %1006 : vector<1x8x16xf32> to vector<8x16xf32>
    %1008 = vector.broadcast %1005 : f32 to vector<8x16xf32>
    %1009 = arith.mulf %1008, %1007 : vector<8x16xf32>
    %1010 = arith.addf %1004, %1009 : vector<8x16xf32>
    %c172 = arith.constant 172 : index
    %1011 = memref.load %arg4[%c172] : memref<288xf32, #tpu.memory_space<smem>>
    %c1_527 = arith.constant 1 : index
    %c1_528 = arith.constant 1 : index
    %c2_529 = arith.constant 2 : index
    %1012 = vector.load %arg10[%c1_527, %c1_528, %c2_529] : memref<4x10x18xf32, #tpu.memory_space<vmem>>, vector<1x8x16xf32>
    %1013 = vector.shape_cast %1012 : vector<1x8x16xf32> to vector<8x16xf32>
    %1014 = vector.broadcast %1011 : f32 to vector<8x16xf32>
    %1015 = arith.mulf %1014, %1013 : vector<8x16xf32>
    %1016 = arith.addf %1010, %1015 : vector<8x16xf32>
    %c204 = arith.constant 204 : index
    %1017 = memref.load %arg4[%c204] : memref<288xf32, #tpu.memory_space<smem>>
    %c1_530 = arith.constant 1 : index
    %c2_531 = arith.constant 2 : index
    %c0_532 = arith.constant 0 : index
    %1018 = vector.load %arg10[%c1_530, %c2_531, %c0_532] : memref<4x10x18xf32, #tpu.memory_space<vmem>>, vector<1x8x16xf32>
    %1019 = vector.shape_cast %1018 : vector<1x8x16xf32> to vector<8x16xf32>
    %1020 = vector.broadcast %1017 : f32 to vector<8x16xf32>
    %1021 = arith.mulf %1020, %1019 : vector<8x16xf32>
    %1022 = arith.addf %1016, %1021 : vector<8x16xf32>
    %c236 = arith.constant 236 : index
    %1023 = memref.load %arg4[%c236] : memref<288xf32, #tpu.memory_space<smem>>
    %c1_533 = arith.constant 1 : index
    %c2_534 = arith.constant 2 : index
    %c1_535 = arith.constant 1 : index
    %1024 = vector.load %arg10[%c1_533, %c2_534, %c1_535] : memref<4x10x18xf32, #tpu.memory_space<vmem>>, vector<1x8x16xf32>
    %1025 = vector.shape_cast %1024 : vector<1x8x16xf32> to vector<8x16xf32>
    %1026 = vector.broadcast %1023 : f32 to vector<8x16xf32>
    %1027 = arith.mulf %1026, %1025 : vector<8x16xf32>
    %1028 = arith.addf %1022, %1027 : vector<8x16xf32>
    %c268 = arith.constant 268 : index
    %1029 = memref.load %arg4[%c268] : memref<288xf32, #tpu.memory_space<smem>>
    %c1_536 = arith.constant 1 : index
    %c2_537 = arith.constant 2 : index
    %c2_538 = arith.constant 2 : index
    %1030 = vector.load %arg10[%c1_536, %c2_537, %c2_538] : memref<4x10x18xf32, #tpu.memory_space<vmem>>, vector<1x8x16xf32>
    %1031 = vector.shape_cast %1030 : vector<1x8x16xf32> to vector<8x16xf32>
    %1032 = vector.broadcast %1029 : f32 to vector<8x16xf32>
    %1033 = arith.mulf %1032, %1031 : vector<8x16xf32>
    %1034 = arith.addf %1028, %1033 : vector<8x16xf32>
    %c20 = arith.constant 20 : index
    %1035 = memref.load %arg4[%c20] : memref<288xf32, #tpu.memory_space<smem>>
    %c2_539 = arith.constant 2 : index
    %c0_540 = arith.constant 0 : index
    %c0_541 = arith.constant 0 : index
    %1036 = vector.load %arg10[%c2_539, %c0_540, %c0_541] : memref<4x10x18xf32, #tpu.memory_space<vmem>>, vector<1x8x16xf32>
    %1037 = vector.shape_cast %1036 : vector<1x8x16xf32> to vector<8x16xf32>
    %1038 = vector.broadcast %1035 : f32 to vector<8x16xf32>
    %1039 = arith.mulf %1038, %1037 : vector<8x16xf32>
    %1040 = arith.addf %1034, %1039 : vector<8x16xf32>
    %c52 = arith.constant 52 : index
    %1041 = memref.load %arg4[%c52] : memref<288xf32, #tpu.memory_space<smem>>
    %c2_542 = arith.constant 2 : index
    %c0_543 = arith.constant 0 : index
    %c1_544 = arith.constant 1 : index
    %1042 = vector.load %arg10[%c2_542, %c0_543, %c1_544] : memref<4x10x18xf32, #tpu.memory_space<vmem>>, vector<1x8x16xf32>
    %1043 = vector.shape_cast %1042 : vector<1x8x16xf32> to vector<8x16xf32>
    %1044 = vector.broadcast %1041 : f32 to vector<8x16xf32>
    %1045 = arith.mulf %1044, %1043 : vector<8x16xf32>
    %1046 = arith.addf %1040, %1045 : vector<8x16xf32>
    %c84 = arith.constant 84 : index
    %1047 = memref.load %arg4[%c84] : memref<288xf32, #tpu.memory_space<smem>>
    %c2_545 = arith.constant 2 : index
    %c0_546 = arith.constant 0 : index
    %c2_547 = arith.constant 2 : index
    %1048 = vector.load %arg10[%c2_545, %c0_546, %c2_547] : memref<4x10x18xf32, #tpu.memory_space<vmem>>, vector<1x8x16xf32>
    %1049 = vector.shape_cast %1048 : vector<1x8x16xf32> to vector<8x16xf32>
    %1050 = vector.broadcast %1047 : f32 to vector<8x16xf32>
    %1051 = arith.mulf %1050, %1049 : vector<8x16xf32>
    %1052 = arith.addf %1046, %1051 : vector<8x16xf32>
    %c116 = arith.constant 116 : index
    %1053 = memref.load %arg4[%c116] : memref<288xf32, #tpu.memory_space<smem>>
    %c2_548 = arith.constant 2 : index
    %c1_549 = arith.constant 1 : index
    %c0_550 = arith.constant 0 : index
    %1054 = vector.load %arg10[%c2_548, %c1_549, %c0_550] : memref<4x10x18xf32, #tpu.memory_space<vmem>>, vector<1x8x16xf32>
    %1055 = vector.shape_cast %1054 : vector<1x8x16xf32> to vector<8x16xf32>
    %1056 = vector.broadcast %1053 : f32 to vector<8x16xf32>
    %1057 = arith.mulf %1056, %1055 : vector<8x16xf32>
    %1058 = arith.addf %1052, %1057 : vector<8x16xf32>
    %c148 = arith.constant 148 : index
    %1059 = memref.load %arg4[%c148] : memref<288xf32, #tpu.memory_space<smem>>
    %c2_551 = arith.constant 2 : index
    %c1_552 = arith.constant 1 : index
    %c1_553 = arith.constant 1 : index
    %1060 = vector.load %arg10[%c2_551, %c1_552, %c1_553] : memref<4x10x18xf32, #tpu.memory_space<vmem>>, vector<1x8x16xf32>
    %1061 = vector.shape_cast %1060 : vector<1x8x16xf32> to vector<8x16xf32>
    %1062 = vector.broadcast %1059 : f32 to vector<8x16xf32>
    %1063 = arith.mulf %1062, %1061 : vector<8x16xf32>
    %1064 = arith.addf %1058, %1063 : vector<8x16xf32>
    %c180 = arith.constant 180 : index
    %1065 = memref.load %arg4[%c180] : memref<288xf32, #tpu.memory_space<smem>>
    %c2_554 = arith.constant 2 : index
    %c1_555 = arith.constant 1 : index
    %c2_556 = arith.constant 2 : index
    %1066 = vector.load %arg10[%c2_554, %c1_555, %c2_556] : memref<4x10x18xf32, #tpu.memory_space<vmem>>, vector<1x8x16xf32>
    %1067 = vector.shape_cast %1066 : vector<1x8x16xf32> to vector<8x16xf32>
    %1068 = vector.broadcast %1065 : f32 to vector<8x16xf32>
    %1069 = arith.mulf %1068, %1067 : vector<8x16xf32>
    %1070 = arith.addf %1064, %1069 : vector<8x16xf32>
    %c212 = arith.constant 212 : index
    %1071 = memref.load %arg4[%c212] : memref<288xf32, #tpu.memory_space<smem>>
    %c2_557 = arith.constant 2 : index
    %c2_558 = arith.constant 2 : index
    %c0_559 = arith.constant 0 : index
    %1072 = vector.load %arg10[%c2_557, %c2_558, %c0_559] : memref<4x10x18xf32, #tpu.memory_space<vmem>>, vector<1x8x16xf32>
    %1073 = vector.shape_cast %1072 : vector<1x8x16xf32> to vector<8x16xf32>
    %1074 = vector.broadcast %1071 : f32 to vector<8x16xf32>
    %1075 = arith.mulf %1074, %1073 : vector<8x16xf32>
    %1076 = arith.addf %1070, %1075 : vector<8x16xf32>
    %c244 = arith.constant 244 : index
    %1077 = memref.load %arg4[%c244] : memref<288xf32, #tpu.memory_space<smem>>
    %c2_560 = arith.constant 2 : index
    %c2_561 = arith.constant 2 : index
    %c1_562 = arith.constant 1 : index
    %1078 = vector.load %arg10[%c2_560, %c2_561, %c1_562] : memref<4x10x18xf32, #tpu.memory_space<vmem>>, vector<1x8x16xf32>
    %1079 = vector.shape_cast %1078 : vector<1x8x16xf32> to vector<8x16xf32>
    %1080 = vector.broadcast %1077 : f32 to vector<8x16xf32>
    %1081 = arith.mulf %1080, %1079 : vector<8x16xf32>
    %1082 = arith.addf %1076, %1081 : vector<8x16xf32>
    %c276 = arith.constant 276 : index
    %1083 = memref.load %arg4[%c276] : memref<288xf32, #tpu.memory_space<smem>>
    %c2_563 = arith.constant 2 : index
    %c2_564 = arith.constant 2 : index
    %c2_565 = arith.constant 2 : index
    %1084 = vector.load %arg10[%c2_563, %c2_564, %c2_565] : memref<4x10x18xf32, #tpu.memory_space<vmem>>, vector<1x8x16xf32>
    %1085 = vector.shape_cast %1084 : vector<1x8x16xf32> to vector<8x16xf32>
    %1086 = vector.broadcast %1083 : f32 to vector<8x16xf32>
    %1087 = arith.mulf %1086, %1085 : vector<8x16xf32>
    %1088 = arith.addf %1082, %1087 : vector<8x16xf32>
    %c28 = arith.constant 28 : index
    %1089 = memref.load %arg4[%c28] : memref<288xf32, #tpu.memory_space<smem>>
    %c3_566 = arith.constant 3 : index
    %c0_567 = arith.constant 0 : index
    %c0_568 = arith.constant 0 : index
    %1090 = vector.load %arg10[%c3_566, %c0_567, %c0_568] : memref<4x10x18xf32, #tpu.memory_space<vmem>>, vector<1x8x16xf32>
    %1091 = vector.shape_cast %1090 : vector<1x8x16xf32> to vector<8x16xf32>
    %1092 = vector.broadcast %1089 : f32 to vector<8x16xf32>
    %1093 = arith.mulf %1092, %1091 : vector<8x16xf32>
    %1094 = arith.addf %1088, %1093 : vector<8x16xf32>
    %c60 = arith.constant 60 : index
    %1095 = memref.load %arg4[%c60] : memref<288xf32, #tpu.memory_space<smem>>
    %c3_569 = arith.constant 3 : index
    %c0_570 = arith.constant 0 : index
    %c1_571 = arith.constant 1 : index
    %1096 = vector.load %arg10[%c3_569, %c0_570, %c1_571] : memref<4x10x18xf32, #tpu.memory_space<vmem>>, vector<1x8x16xf32>
    %1097 = vector.shape_cast %1096 : vector<1x8x16xf32> to vector<8x16xf32>
    %1098 = vector.broadcast %1095 : f32 to vector<8x16xf32>
    %1099 = arith.mulf %1098, %1097 : vector<8x16xf32>
    %1100 = arith.addf %1094, %1099 : vector<8x16xf32>
    %c92 = arith.constant 92 : index
    %1101 = memref.load %arg4[%c92] : memref<288xf32, #tpu.memory_space<smem>>
    %c3_572 = arith.constant 3 : index
    %c0_573 = arith.constant 0 : index
    %c2_574 = arith.constant 2 : index
    %1102 = vector.load %arg10[%c3_572, %c0_573, %c2_574] : memref<4x10x18xf32, #tpu.memory_space<vmem>>, vector<1x8x16xf32>
    %1103 = vector.shape_cast %1102 : vector<1x8x16xf32> to vector<8x16xf32>
    %1104 = vector.broadcast %1101 : f32 to vector<8x16xf32>
    %1105 = arith.mulf %1104, %1103 : vector<8x16xf32>
    %1106 = arith.addf %1100, %1105 : vector<8x16xf32>
    %c124 = arith.constant 124 : index
    %1107 = memref.load %arg4[%c124] : memref<288xf32, #tpu.memory_space<smem>>
    %c3_575 = arith.constant 3 : index
    %c1_576 = arith.constant 1 : index
    %c0_577 = arith.constant 0 : index
    %1108 = vector.load %arg10[%c3_575, %c1_576, %c0_577] : memref<4x10x18xf32, #tpu.memory_space<vmem>>, vector<1x8x16xf32>
    %1109 = vector.shape_cast %1108 : vector<1x8x16xf32> to vector<8x16xf32>
    %1110 = vector.broadcast %1107 : f32 to vector<8x16xf32>
    %1111 = arith.mulf %1110, %1109 : vector<8x16xf32>
    %1112 = arith.addf %1106, %1111 : vector<8x16xf32>
    %c156 = arith.constant 156 : index
    %1113 = memref.load %arg4[%c156] : memref<288xf32, #tpu.memory_space<smem>>
    %c3_578 = arith.constant 3 : index
    %c1_579 = arith.constant 1 : index
    %c1_580 = arith.constant 1 : index
    %1114 = vector.load %arg10[%c3_578, %c1_579, %c1_580] : memref<4x10x18xf32, #tpu.memory_space<vmem>>, vector<1x8x16xf32>
    %1115 = vector.shape_cast %1114 : vector<1x8x16xf32> to vector<8x16xf32>
    %1116 = vector.broadcast %1113 : f32 to vector<8x16xf32>
    %1117 = arith.mulf %1116, %1115 : vector<8x16xf32>
    %1118 = arith.addf %1112, %1117 : vector<8x16xf32>
    %c188 = arith.constant 188 : index
    %1119 = memref.load %arg4[%c188] : memref<288xf32, #tpu.memory_space<smem>>
    %c3_581 = arith.constant 3 : index
    %c1_582 = arith.constant 1 : index
    %c2_583 = arith.constant 2 : index
    %1120 = vector.load %arg10[%c3_581, %c1_582, %c2_583] : memref<4x10x18xf32, #tpu.memory_space<vmem>>, vector<1x8x16xf32>
    %1121 = vector.shape_cast %1120 : vector<1x8x16xf32> to vector<8x16xf32>
    %1122 = vector.broadcast %1119 : f32 to vector<8x16xf32>
    %1123 = arith.mulf %1122, %1121 : vector<8x16xf32>
    %1124 = arith.addf %1118, %1123 : vector<8x16xf32>
    %c220 = arith.constant 220 : index
    %1125 = memref.load %arg4[%c220] : memref<288xf32, #tpu.memory_space<smem>>
    %c3_584 = arith.constant 3 : index
    %c2_585 = arith.constant 2 : index
    %c0_586 = arith.constant 0 : index
    %1126 = vector.load %arg10[%c3_584, %c2_585, %c0_586] : memref<4x10x18xf32, #tpu.memory_space<vmem>>, vector<1x8x16xf32>
    %1127 = vector.shape_cast %1126 : vector<1x8x16xf32> to vector<8x16xf32>
    %1128 = vector.broadcast %1125 : f32 to vector<8x16xf32>
    %1129 = arith.mulf %1128, %1127 : vector<8x16xf32>
    %1130 = arith.addf %1124, %1129 : vector<8x16xf32>
    %c252 = arith.constant 252 : index
    %1131 = memref.load %arg4[%c252] : memref<288xf32, #tpu.memory_space<smem>>
    %c3_587 = arith.constant 3 : index
    %c2_588 = arith.constant 2 : index
    %c1_589 = arith.constant 1 : index
    %1132 = vector.load %arg10[%c3_587, %c2_588, %c1_589] : memref<4x10x18xf32, #tpu.memory_space<vmem>>, vector<1x8x16xf32>
    %1133 = vector.shape_cast %1132 : vector<1x8x16xf32> to vector<8x16xf32>
    %1134 = vector.broadcast %1131 : f32 to vector<8x16xf32>
    %1135 = arith.mulf %1134, %1133 : vector<8x16xf32>
    %1136 = arith.addf %1130, %1135 : vector<8x16xf32>
    %c284 = arith.constant 284 : index
    %1137 = memref.load %arg4[%c284] : memref<288xf32, #tpu.memory_space<smem>>
    %c3_590 = arith.constant 3 : index
    %c2_591 = arith.constant 2 : index
    %c2_592 = arith.constant 2 : index
    %1138 = vector.load %arg10[%c3_590, %c2_591, %c2_592] : memref<4x10x18xf32, #tpu.memory_space<vmem>>, vector<1x8x16xf32>
    %1139 = vector.shape_cast %1138 : vector<1x8x16xf32> to vector<8x16xf32>
    %1140 = vector.broadcast %1137 : f32 to vector<8x16xf32>
    %1141 = arith.mulf %1140, %1139 : vector<8x16xf32>
    %1142 = arith.addf %1136, %1141 : vector<8x16xf32>
    %c4_593 = arith.constant 4 : index
    %1143 = memref.load %arg5[%c4_593] : memref<8xf32, #tpu.memory_space<smem>>
    %1144 = vector.broadcast %1143 : f32 to vector<8x16xf32>
    %1145 = arith.mulf %1142, %1144 : vector<8x16xf32>
    %c4_594 = arith.constant 4 : index
    %1146 = memref.load %arg6[%c4_594] : memref<8xf32, #tpu.memory_space<smem>>
    %1147 = vector.broadcast %1146 : f32 to vector<8x16xf32>
    %1148 = arith.addf %1145, %1147 : vector<8x16xf32>
    %cst_595 = arith.constant 0.000000e+00 : f32
    %1149 = vector.broadcast %cst_595 : f32 to vector<8x16xf32>
    %1150 = arith.maximumf %1148, %1149 : vector<8x16xf32>
    %c4_596 = arith.constant 4 : index
    %c0_597 = arith.constant 0 : index
    %c0_598 = arith.constant 0 : index
    %1151 = vector.load %arg11[%c4_596, %c0_597, %c0_598] : memref<8x8x16xf32, #tpu.memory_space<vmem>>, vector<1x8x16xf32>
    %1152 = vector.shape_cast %1151 : vector<1x8x16xf32> to vector<8x16xf32>
    %1153 = vector.shape_cast %1150 : vector<8x16xf32> to vector<1x8x16xf32>
    tpu.vector_store %arg11[%c4_596, %c0_597, %c0_598], %1153 {strides = array<i32>} : memref<8x8x16xf32, #tpu.memory_space<vmem>>, vector<1x8x16xf32>,
    %cst_599 = arith.constant 0.000000e+00 : f32
    %1154 = vector.broadcast %cst_599 : f32 to vector<8x16xf32>
    %c5 = arith.constant 5 : index
    %1155 = memref.load %arg4[%c5] : memref<288xf32, #tpu.memory_space<smem>>
    %c0_600 = arith.constant 0 : index
    %c0_601 = arith.constant 0 : index
    %c0_602 = arith.constant 0 : index
    %1156 = vector.load %arg10[%c0_600, %c0_601, %c0_602] : memref<4x10x18xf32, #tpu.memory_space<vmem>>, vector<1x8x16xf32>
    %1157 = vector.shape_cast %1156 : vector<1x8x16xf32> to vector<8x16xf32>
    %1158 = vector.broadcast %1155 : f32 to vector<8x16xf32>
    %1159 = arith.mulf %1158, %1157 : vector<8x16xf32>
    %1160 = arith.addf %1154, %1159 : vector<8x16xf32>
    %c37 = arith.constant 37 : index
    %1161 = memref.load %arg4[%c37] : memref<288xf32, #tpu.memory_space<smem>>
    %c0_603 = arith.constant 0 : index
    %c0_604 = arith.constant 0 : index
    %c1_605 = arith.constant 1 : index
    %1162 = vector.load %arg10[%c0_603, %c0_604, %c1_605] : memref<4x10x18xf32, #tpu.memory_space<vmem>>, vector<1x8x16xf32>
    %1163 = vector.shape_cast %1162 : vector<1x8x16xf32> to vector<8x16xf32>
    %1164 = vector.broadcast %1161 : f32 to vector<8x16xf32>
    %1165 = arith.mulf %1164, %1163 : vector<8x16xf32>
    %1166 = arith.addf %1160, %1165 : vector<8x16xf32>
    %c69 = arith.constant 69 : index
    %1167 = memref.load %arg4[%c69] : memref<288xf32, #tpu.memory_space<smem>>
    %c0_606 = arith.constant 0 : index
    %c0_607 = arith.constant 0 : index
    %c2_608 = arith.constant 2 : index
    %1168 = vector.load %arg10[%c0_606, %c0_607, %c2_608] : memref<4x10x18xf32, #tpu.memory_space<vmem>>, vector<1x8x16xf32>
    %1169 = vector.shape_cast %1168 : vector<1x8x16xf32> to vector<8x16xf32>
    %1170 = vector.broadcast %1167 : f32 to vector<8x16xf32>
    %1171 = arith.mulf %1170, %1169 : vector<8x16xf32>
    %1172 = arith.addf %1166, %1171 : vector<8x16xf32>
    %c101 = arith.constant 101 : index
    %1173 = memref.load %arg4[%c101] : memref<288xf32, #tpu.memory_space<smem>>
    %c0_609 = arith.constant 0 : index
    %c1_610 = arith.constant 1 : index
    %c0_611 = arith.constant 0 : index
    %1174 = vector.load %arg10[%c0_609, %c1_610, %c0_611] : memref<4x10x18xf32, #tpu.memory_space<vmem>>, vector<1x8x16xf32>
    %1175 = vector.shape_cast %1174 : vector<1x8x16xf32> to vector<8x16xf32>
    %1176 = vector.broadcast %1173 : f32 to vector<8x16xf32>
    %1177 = arith.mulf %1176, %1175 : vector<8x16xf32>
    %1178 = arith.addf %1172, %1177 : vector<8x16xf32>
    %c133 = arith.constant 133 : index
    %1179 = memref.load %arg4[%c133] : memref<288xf32, #tpu.memory_space<smem>>
    %c0_612 = arith.constant 0 : index
    %c1_613 = arith.constant 1 : index
    %c1_614 = arith.constant 1 : index
    %1180 = vector.load %arg10[%c0_612, %c1_613, %c1_614] : memref<4x10x18xf32, #tpu.memory_space<vmem>>, vector<1x8x16xf32>
    %1181 = vector.shape_cast %1180 : vector<1x8x16xf32> to vector<8x16xf32>
    %1182 = vector.broadcast %1179 : f32 to vector<8x16xf32>
    %1183 = arith.mulf %1182, %1181 : vector<8x16xf32>
    %1184 = arith.addf %1178, %1183 : vector<8x16xf32>
    %c165 = arith.constant 165 : index
    %1185 = memref.load %arg4[%c165] : memref<288xf32, #tpu.memory_space<smem>>
    %c0_615 = arith.constant 0 : index
    %c1_616 = arith.constant 1 : index
    %c2_617 = arith.constant 2 : index
    %1186 = vector.load %arg10[%c0_615, %c1_616, %c2_617] : memref<4x10x18xf32, #tpu.memory_space<vmem>>, vector<1x8x16xf32>
    %1187 = vector.shape_cast %1186 : vector<1x8x16xf32> to vector<8x16xf32>
    %1188 = vector.broadcast %1185 : f32 to vector<8x16xf32>
    %1189 = arith.mulf %1188, %1187 : vector<8x16xf32>
    %1190 = arith.addf %1184, %1189 : vector<8x16xf32>
    %c197 = arith.constant 197 : index
    %1191 = memref.load %arg4[%c197] : memref<288xf32, #tpu.memory_space<smem>>
    %c0_618 = arith.constant 0 : index
    %c2_619 = arith.constant 2 : index
    %c0_620 = arith.constant 0 : index
    %1192 = vector.load %arg10[%c0_618, %c2_619, %c0_620] : memref<4x10x18xf32, #tpu.memory_space<vmem>>, vector<1x8x16xf32>
    %1193 = vector.shape_cast %1192 : vector<1x8x16xf32> to vector<8x16xf32>
    %1194 = vector.broadcast %1191 : f32 to vector<8x16xf32>
    %1195 = arith.mulf %1194, %1193 : vector<8x16xf32>
    %1196 = arith.addf %1190, %1195 : vector<8x16xf32>
    %c229 = arith.constant 229 : index
    %1197 = memref.load %arg4[%c229] : memref<288xf32, #tpu.memory_space<smem>>
    %c0_621 = arith.constant 0 : index
    %c2_622 = arith.constant 2 : index
    %c1_623 = arith.constant 1 : index
    %1198 = vector.load %arg10[%c0_621, %c2_622, %c1_623] : memref<4x10x18xf32, #tpu.memory_space<vmem>>, vector<1x8x16xf32>
    %1199 = vector.shape_cast %1198 : vector<1x8x16xf32> to vector<8x16xf32>
    %1200 = vector.broadcast %1197 : f32 to vector<8x16xf32>
    %1201 = arith.mulf %1200, %1199 : vector<8x16xf32>
    %1202 = arith.addf %1196, %1201 : vector<8x16xf32>
    %c261 = arith.constant 261 : index
    %1203 = memref.load %arg4[%c261] : memref<288xf32, #tpu.memory_space<smem>>
    %c0_624 = arith.constant 0 : index
    %c2_625 = arith.constant 2 : index
    %c2_626 = arith.constant 2 : index
    %1204 = vector.load %arg10[%c0_624, %c2_625, %c2_626] : memref<4x10x18xf32, #tpu.memory_space<vmem>>, vector<1x8x16xf32>
    %1205 = vector.shape_cast %1204 : vector<1x8x16xf32> to vector<8x16xf32>
    %1206 = vector.broadcast %1203 : f32 to vector<8x16xf32>
    %1207 = arith.mulf %1206, %1205 : vector<8x16xf32>
    %1208 = arith.addf %1202, %1207 : vector<8x16xf32>
    %c13 = arith.constant 13 : index
    %1209 = memref.load %arg4[%c13] : memref<288xf32, #tpu.memory_space<smem>>
    %c1_627 = arith.constant 1 : index
    %c0_628 = arith.constant 0 : index
    %c0_629 = arith.constant 0 : index
    %1210 = vector.load %arg10[%c1_627, %c0_628, %c0_629] : memref<4x10x18xf32, #tpu.memory_space<vmem>>, vector<1x8x16xf32>
    %1211 = vector.shape_cast %1210 : vector<1x8x16xf32> to vector<8x16xf32>
    %1212 = vector.broadcast %1209 : f32 to vector<8x16xf32>
    %1213 = arith.mulf %1212, %1211 : vector<8x16xf32>
    %1214 = arith.addf %1208, %1213 : vector<8x16xf32>
    %c45 = arith.constant 45 : index
    %1215 = memref.load %arg4[%c45] : memref<288xf32, #tpu.memory_space<smem>>
    %c1_630 = arith.constant 1 : index
    %c0_631 = arith.constant 0 : index
    %c1_632 = arith.constant 1 : index
    %1216 = vector.load %arg10[%c1_630, %c0_631, %c1_632] : memref<4x10x18xf32, #tpu.memory_space<vmem>>, vector<1x8x16xf32>
    %1217 = vector.shape_cast %1216 : vector<1x8x16xf32> to vector<8x16xf32>
    %1218 = vector.broadcast %1215 : f32 to vector<8x16xf32>
    %1219 = arith.mulf %1218, %1217 : vector<8x16xf32>
    %1220 = arith.addf %1214, %1219 : vector<8x16xf32>
    %c77 = arith.constant 77 : index
    %1221 = memref.load %arg4[%c77] : memref<288xf32, #tpu.memory_space<smem>>
    %c1_633 = arith.constant 1 : index
    %c0_634 = arith.constant 0 : index
    %c2_635 = arith.constant 2 : index
    %1222 = vector.load %arg10[%c1_633, %c0_634, %c2_635] : memref<4x10x18xf32, #tpu.memory_space<vmem>>, vector<1x8x16xf32>
    %1223 = vector.shape_cast %1222 : vector<1x8x16xf32> to vector<8x16xf32>
    %1224 = vector.broadcast %1221 : f32 to vector<8x16xf32>
    %1225 = arith.mulf %1224, %1223 : vector<8x16xf32>
    %1226 = arith.addf %1220, %1225 : vector<8x16xf32>
    %c109 = arith.constant 109 : index
    %1227 = memref.load %arg4[%c109] : memref<288xf32, #tpu.memory_space<smem>>
    %c1_636 = arith.constant 1 : index
    %c1_637 = arith.constant 1 : index
    %c0_638 = arith.constant 0 : index
    %1228 = vector.load %arg10[%c1_636, %c1_637, %c0_638] : memref<4x10x18xf32, #tpu.memory_space<vmem>>, vector<1x8x16xf32>
    %1229 = vector.shape_cast %1228 : vector<1x8x16xf32> to vector<8x16xf32>
    %1230 = vector.broadcast %1227 : f32 to vector<8x16xf32>
    %1231 = arith.mulf %1230, %1229 : vector<8x16xf32>
    %1232 = arith.addf %1226, %1231 : vector<8x16xf32>
    %c141 = arith.constant 141 : index
    %1233 = memref.load %arg4[%c141] : memref<288xf32, #tpu.memory_space<smem>>
    %c1_639 = arith.constant 1 : index
    %c1_640 = arith.constant 1 : index
    %c1_641 = arith.constant 1 : index
    %1234 = vector.load %arg10[%c1_639, %c1_640, %c1_641] : memref<4x10x18xf32, #tpu.memory_space<vmem>>, vector<1x8x16xf32>
    %1235 = vector.shape_cast %1234 : vector<1x8x16xf32> to vector<8x16xf32>
    %1236 = vector.broadcast %1233 : f32 to vector<8x16xf32>
    %1237 = arith.mulf %1236, %1235 : vector<8x16xf32>
    %1238 = arith.addf %1232, %1237 : vector<8x16xf32>
    %c173 = arith.constant 173 : index
    %1239 = memref.load %arg4[%c173] : memref<288xf32, #tpu.memory_space<smem>>
    %c1_642 = arith.constant 1 : index
    %c1_643 = arith.constant 1 : index
    %c2_644 = arith.constant 2 : index
    %1240 = vector.load %arg10[%c1_642, %c1_643, %c2_644] : memref<4x10x18xf32, #tpu.memory_space<vmem>>, vector<1x8x16xf32>
    %1241 = vector.shape_cast %1240 : vector<1x8x16xf32> to vector<8x16xf32>
    %1242 = vector.broadcast %1239 : f32 to vector<8x16xf32>
    %1243 = arith.mulf %1242, %1241 : vector<8x16xf32>
    %1244 = arith.addf %1238, %1243 : vector<8x16xf32>
    %c205 = arith.constant 205 : index
    %1245 = memref.load %arg4[%c205] : memref<288xf32, #tpu.memory_space<smem>>
    %c1_645 = arith.constant 1 : index
    %c2_646 = arith.constant 2 : index
    %c0_647 = arith.constant 0 : index
    %1246 = vector.load %arg10[%c1_645, %c2_646, %c0_647] : memref<4x10x18xf32, #tpu.memory_space<vmem>>, vector<1x8x16xf32>
    %1247 = vector.shape_cast %1246 : vector<1x8x16xf32> to vector<8x16xf32>
    %1248 = vector.broadcast %1245 : f32 to vector<8x16xf32>
    %1249 = arith.mulf %1248, %1247 : vector<8x16xf32>
    %1250 = arith.addf %1244, %1249 : vector<8x16xf32>
    %c237 = arith.constant 237 : index
    %1251 = memref.load %arg4[%c237] : memref<288xf32, #tpu.memory_space<smem>>
    %c1_648 = arith.constant 1 : index
    %c2_649 = arith.constant 2 : index
    %c1_650 = arith.constant 1 : index
    %1252 = vector.load %arg10[%c1_648, %c2_649, %c1_650] : memref<4x10x18xf32, #tpu.memory_space<vmem>>, vector<1x8x16xf32>
    %1253 = vector.shape_cast %1252 : vector<1x8x16xf32> to vector<8x16xf32>
    %1254 = vector.broadcast %1251 : f32 to vector<8x16xf32>
    %1255 = arith.mulf %1254, %1253 : vector<8x16xf32>
    %1256 = arith.addf %1250, %1255 : vector<8x16xf32>
    %c269 = arith.constant 269 : index
    %1257 = memref.load %arg4[%c269] : memref<288xf32, #tpu.memory_space<smem>>
    %c1_651 = arith.constant 1 : index
    %c2_652 = arith.constant 2 : index
    %c2_653 = arith.constant 2 : index
    %1258 = vector.load %arg10[%c1_651, %c2_652, %c2_653] : memref<4x10x18xf32, #tpu.memory_space<vmem>>, vector<1x8x16xf32>
    %1259 = vector.shape_cast %1258 : vector<1x8x16xf32> to vector<8x16xf32>
    %1260 = vector.broadcast %1257 : f32 to vector<8x16xf32>
    %1261 = arith.mulf %1260, %1259 : vector<8x16xf32>
    %1262 = arith.addf %1256, %1261 : vector<8x16xf32>
    %c21 = arith.constant 21 : index
    %1263 = memref.load %arg4[%c21] : memref<288xf32, #tpu.memory_space<smem>>
    %c2_654 = arith.constant 2 : index
    %c0_655 = arith.constant 0 : index
    %c0_656 = arith.constant 0 : index
    %1264 = vector.load %arg10[%c2_654, %c0_655, %c0_656] : memref<4x10x18xf32, #tpu.memory_space<vmem>>, vector<1x8x16xf32>
    %1265 = vector.shape_cast %1264 : vector<1x8x16xf32> to vector<8x16xf32>
    %1266 = vector.broadcast %1263 : f32 to vector<8x16xf32>
    %1267 = arith.mulf %1266, %1265 : vector<8x16xf32>
    %1268 = arith.addf %1262, %1267 : vector<8x16xf32>
    %c53 = arith.constant 53 : index
    %1269 = memref.load %arg4[%c53] : memref<288xf32, #tpu.memory_space<smem>>
    %c2_657 = arith.constant 2 : index
    %c0_658 = arith.constant 0 : index
    %c1_659 = arith.constant 1 : index
    %1270 = vector.load %arg10[%c2_657, %c0_658, %c1_659] : memref<4x10x18xf32, #tpu.memory_space<vmem>>, vector<1x8x16xf32>
    %1271 = vector.shape_cast %1270 : vector<1x8x16xf32> to vector<8x16xf32>
    %1272 = vector.broadcast %1269 : f32 to vector<8x16xf32>
    %1273 = arith.mulf %1272, %1271 : vector<8x16xf32>
    %1274 = arith.addf %1268, %1273 : vector<8x16xf32>
    %c85 = arith.constant 85 : index
    %1275 = memref.load %arg4[%c85] : memref<288xf32, #tpu.memory_space<smem>>
    %c2_660 = arith.constant 2 : index
    %c0_661 = arith.constant 0 : index
    %c2_662 = arith.constant 2 : index
    %1276 = vector.load %arg10[%c2_660, %c0_661, %c2_662] : memref<4x10x18xf32, #tpu.memory_space<vmem>>, vector<1x8x16xf32>
    %1277 = vector.shape_cast %1276 : vector<1x8x16xf32> to vector<8x16xf32>
    %1278 = vector.broadcast %1275 : f32 to vector<8x16xf32>
    %1279 = arith.mulf %1278, %1277 : vector<8x16xf32>
    %1280 = arith.addf %1274, %1279 : vector<8x16xf32>
    %c117 = arith.constant 117 : index
    %1281 = memref.load %arg4[%c117] : memref<288xf32, #tpu.memory_space<smem>>
    %c2_663 = arith.constant 2 : index
    %c1_664 = arith.constant 1 : index
    %c0_665 = arith.constant 0 : index
    %1282 = vector.load %arg10[%c2_663, %c1_664, %c0_665] : memref<4x10x18xf32, #tpu.memory_space<vmem>>, vector<1x8x16xf32>
    %1283 = vector.shape_cast %1282 : vector<1x8x16xf32> to vector<8x16xf32>
    %1284 = vector.broadcast %1281 : f32 to vector<8x16xf32>
    %1285 = arith.mulf %1284, %1283 : vector<8x16xf32>
    %1286 = arith.addf %1280, %1285 : vector<8x16xf32>
    %c149 = arith.constant 149 : index
    %1287 = memref.load %arg4[%c149] : memref<288xf32, #tpu.memory_space<smem>>
    %c2_666 = arith.constant 2 : index
    %c1_667 = arith.constant 1 : index
    %c1_668 = arith.constant 1 : index
    %1288 = vector.load %arg10[%c2_666, %c1_667, %c1_668] : memref<4x10x18xf32, #tpu.memory_space<vmem>>, vector<1x8x16xf32>
    %1289 = vector.shape_cast %1288 : vector<1x8x16xf32> to vector<8x16xf32>
    %1290 = vector.broadcast %1287 : f32 to vector<8x16xf32>
    %1291 = arith.mulf %1290, %1289 : vector<8x16xf32>
    %1292 = arith.addf %1286, %1291 : vector<8x16xf32>
    %c181 = arith.constant 181 : index
    %1293 = memref.load %arg4[%c181] : memref<288xf32, #tpu.memory_space<smem>>
    %c2_669 = arith.constant 2 : index
    %c1_670 = arith.constant 1 : index
    %c2_671 = arith.constant 2 : index
    %1294 = vector.load %arg10[%c2_669, %c1_670, %c2_671] : memref<4x10x18xf32, #tpu.memory_space<vmem>>, vector<1x8x16xf32>
    %1295 = vector.shape_cast %1294 : vector<1x8x16xf32> to vector<8x16xf32>
    %1296 = vector.broadcast %1293 : f32 to vector<8x16xf32>
    %1297 = arith.mulf %1296, %1295 : vector<8x16xf32>
    %1298 = arith.addf %1292, %1297 : vector<8x16xf32>
    %c213 = arith.constant 213 : index
    %1299 = memref.load %arg4[%c213] : memref<288xf32, #tpu.memory_space<smem>>
    %c2_672 = arith.constant 2 : index
    %c2_673 = arith.constant 2 : index
    %c0_674 = arith.constant 0 : index
    %1300 = vector.load %arg10[%c2_672, %c2_673, %c0_674] : memref<4x10x18xf32, #tpu.memory_space<vmem>>, vector<1x8x16xf32>
    %1301 = vector.shape_cast %1300 : vector<1x8x16xf32> to vector<8x16xf32>
    %1302 = vector.broadcast %1299 : f32 to vector<8x16xf32>
    %1303 = arith.mulf %1302, %1301 : vector<8x16xf32>
    %1304 = arith.addf %1298, %1303 : vector<8x16xf32>
    %c245 = arith.constant 245 : index
    %1305 = memref.load %arg4[%c245] : memref<288xf32, #tpu.memory_space<smem>>
    %c2_675 = arith.constant 2 : index
    %c2_676 = arith.constant 2 : index
    %c1_677 = arith.constant 1 : index
    %1306 = vector.load %arg10[%c2_675, %c2_676, %c1_677] : memref<4x10x18xf32, #tpu.memory_space<vmem>>, vector<1x8x16xf32>
    %1307 = vector.shape_cast %1306 : vector<1x8x16xf32> to vector<8x16xf32>
    %1308 = vector.broadcast %1305 : f32 to vector<8x16xf32>
    %1309 = arith.mulf %1308, %1307 : vector<8x16xf32>
    %1310 = arith.addf %1304, %1309 : vector<8x16xf32>
    %c277 = arith.constant 277 : index
    %1311 = memref.load %arg4[%c277] : memref<288xf32, #tpu.memory_space<smem>>
    %c2_678 = arith.constant 2 : index
    %c2_679 = arith.constant 2 : index
    %c2_680 = arith.constant 2 : index
    %1312 = vector.load %arg10[%c2_678, %c2_679, %c2_680] : memref<4x10x18xf32, #tpu.memory_space<vmem>>, vector<1x8x16xf32>
    %1313 = vector.shape_cast %1312 : vector<1x8x16xf32> to vector<8x16xf32>
    %1314 = vector.broadcast %1311 : f32 to vector<8x16xf32>
    %1315 = arith.mulf %1314, %1313 : vector<8x16xf32>
    %1316 = arith.addf %1310, %1315 : vector<8x16xf32>
    %c29 = arith.constant 29 : index
    %1317 = memref.load %arg4[%c29] : memref<288xf32, #tpu.memory_space<smem>>
    %c3_681 = arith.constant 3 : index
    %c0_682 = arith.constant 0 : index
    %c0_683 = arith.constant 0 : index
    %1318 = vector.load %arg10[%c3_681, %c0_682, %c0_683] : memref<4x10x18xf32, #tpu.memory_space<vmem>>, vector<1x8x16xf32>
    %1319 = vector.shape_cast %1318 : vector<1x8x16xf32> to vector<8x16xf32>
    %1320 = vector.broadcast %1317 : f32 to vector<8x16xf32>
    %1321 = arith.mulf %1320, %1319 : vector<8x16xf32>
    %1322 = arith.addf %1316, %1321 : vector<8x16xf32>
    %c61 = arith.constant 61 : index
    %1323 = memref.load %arg4[%c61] : memref<288xf32, #tpu.memory_space<smem>>
    %c3_684 = arith.constant 3 : index
    %c0_685 = arith.constant 0 : index
    %c1_686 = arith.constant 1 : index
    %1324 = vector.load %arg10[%c3_684, %c0_685, %c1_686] : memref<4x10x18xf32, #tpu.memory_space<vmem>>, vector<1x8x16xf32>
    %1325 = vector.shape_cast %1324 : vector<1x8x16xf32> to vector<8x16xf32>
    %1326 = vector.broadcast %1323 : f32 to vector<8x16xf32>
    %1327 = arith.mulf %1326, %1325 : vector<8x16xf32>
    %1328 = arith.addf %1322, %1327 : vector<8x16xf32>
    %c93 = arith.constant 93 : index
    %1329 = memref.load %arg4[%c93] : memref<288xf32, #tpu.memory_space<smem>>
    %c3_687 = arith.constant 3 : index
    %c0_688 = arith.constant 0 : index
    %c2_689 = arith.constant 2 : index
    %1330 = vector.load %arg10[%c3_687, %c0_688, %c2_689] : memref<4x10x18xf32, #tpu.memory_space<vmem>>, vector<1x8x16xf32>
    %1331 = vector.shape_cast %1330 : vector<1x8x16xf32> to vector<8x16xf32>
    %1332 = vector.broadcast %1329 : f32 to vector<8x16xf32>
    %1333 = arith.mulf %1332, %1331 : vector<8x16xf32>
    %1334 = arith.addf %1328, %1333 : vector<8x16xf32>
    %c125 = arith.constant 125 : index
    %1335 = memref.load %arg4[%c125] : memref<288xf32, #tpu.memory_space<smem>>
    %c3_690 = arith.constant 3 : index
    %c1_691 = arith.constant 1 : index
    %c0_692 = arith.constant 0 : index
    %1336 = vector.load %arg10[%c3_690, %c1_691, %c0_692] : memref<4x10x18xf32, #tpu.memory_space<vmem>>, vector<1x8x16xf32>
    %1337 = vector.shape_cast %1336 : vector<1x8x16xf32> to vector<8x16xf32>
    %1338 = vector.broadcast %1335 : f32 to vector<8x16xf32>
    %1339 = arith.mulf %1338, %1337 : vector<8x16xf32>
    %1340 = arith.addf %1334, %1339 : vector<8x16xf32>
    %c157 = arith.constant 157 : index
    %1341 = memref.load %arg4[%c157] : memref<288xf32, #tpu.memory_space<smem>>
    %c3_693 = arith.constant 3 : index
    %c1_694 = arith.constant 1 : index
    %c1_695 = arith.constant 1 : index
    %1342 = vector.load %arg10[%c3_693, %c1_694, %c1_695] : memref<4x10x18xf32, #tpu.memory_space<vmem>>, vector<1x8x16xf32>
    %1343 = vector.shape_cast %1342 : vector<1x8x16xf32> to vector<8x16xf32>
    %1344 = vector.broadcast %1341 : f32 to vector<8x16xf32>
    %1345 = arith.mulf %1344, %1343 : vector<8x16xf32>
    %1346 = arith.addf %1340, %1345 : vector<8x16xf32>
    %c189 = arith.constant 189 : index
    %1347 = memref.load %arg4[%c189] : memref<288xf32, #tpu.memory_space<smem>>
    %c3_696 = arith.constant 3 : index
    %c1_697 = arith.constant 1 : index
    %c2_698 = arith.constant 2 : index
    %1348 = vector.load %arg10[%c3_696, %c1_697, %c2_698] : memref<4x10x18xf32, #tpu.memory_space<vmem>>, vector<1x8x16xf32>
    %1349 = vector.shape_cast %1348 : vector<1x8x16xf32> to vector<8x16xf32>
    %1350 = vector.broadcast %1347 : f32 to vector<8x16xf32>
    %1351 = arith.mulf %1350, %1349 : vector<8x16xf32>
    %1352 = arith.addf %1346, %1351 : vector<8x16xf32>
    %c221 = arith.constant 221 : index
    %1353 = memref.load %arg4[%c221] : memref<288xf32, #tpu.memory_space<smem>>
    %c3_699 = arith.constant 3 : index
    %c2_700 = arith.constant 2 : index
    %c0_701 = arith.constant 0 : index
    %1354 = vector.load %arg10[%c3_699, %c2_700, %c0_701] : memref<4x10x18xf32, #tpu.memory_space<vmem>>, vector<1x8x16xf32>
    %1355 = vector.shape_cast %1354 : vector<1x8x16xf32> to vector<8x16xf32>
    %1356 = vector.broadcast %1353 : f32 to vector<8x16xf32>
    %1357 = arith.mulf %1356, %1355 : vector<8x16xf32>
    %1358 = arith.addf %1352, %1357 : vector<8x16xf32>
    %c253 = arith.constant 253 : index
    %1359 = memref.load %arg4[%c253] : memref<288xf32, #tpu.memory_space<smem>>
    %c3_702 = arith.constant 3 : index
    %c2_703 = arith.constant 2 : index
    %c1_704 = arith.constant 1 : index
    %1360 = vector.load %arg10[%c3_702, %c2_703, %c1_704] : memref<4x10x18xf32, #tpu.memory_space<vmem>>, vector<1x8x16xf32>
    %1361 = vector.shape_cast %1360 : vector<1x8x16xf32> to vector<8x16xf32>
    %1362 = vector.broadcast %1359 : f32 to vector<8x16xf32>
    %1363 = arith.mulf %1362, %1361 : vector<8x16xf32>
    %1364 = arith.addf %1358, %1363 : vector<8x16xf32>
    %c285 = arith.constant 285 : index
    %1365 = memref.load %arg4[%c285] : memref<288xf32, #tpu.memory_space<smem>>
    %c3_705 = arith.constant 3 : index
    %c2_706 = arith.constant 2 : index
    %c2_707 = arith.constant 2 : index
    %1366 = vector.load %arg10[%c3_705, %c2_706, %c2_707] : memref<4x10x18xf32, #tpu.memory_space<vmem>>, vector<1x8x16xf32>
    %1367 = vector.shape_cast %1366 : vector<1x8x16xf32> to vector<8x16xf32>
    %1368 = vector.broadcast %1365 : f32 to vector<8x16xf32>
    %1369 = arith.mulf %1368, %1367 : vector<8x16xf32>
    %1370 = arith.addf %1364, %1369 : vector<8x16xf32>
    %c5_708 = arith.constant 5 : index
    %1371 = memref.load %arg5[%c5_708] : memref<8xf32, #tpu.memory_space<smem>>
    %1372 = vector.broadcast %1371 : f32 to vector<8x16xf32>
    %1373 = arith.mulf %1370, %1372 : vector<8x16xf32>
    %c5_709 = arith.constant 5 : index
    %1374 = memref.load %arg6[%c5_709] : memref<8xf32, #tpu.memory_space<smem>>
    %1375 = vector.broadcast %1374 : f32 to vector<8x16xf32>
    %1376 = arith.addf %1373, %1375 : vector<8x16xf32>
    %cst_710 = arith.constant 0.000000e+00 : f32
    %1377 = vector.broadcast %cst_710 : f32 to vector<8x16xf32>
    %1378 = arith.maximumf %1376, %1377 : vector<8x16xf32>
    %c5_711 = arith.constant 5 : index
    %c0_712 = arith.constant 0 : index
    %c0_713 = arith.constant 0 : index
    %1379 = vector.load %arg11[%c5_711, %c0_712, %c0_713] : memref<8x8x16xf32, #tpu.memory_space<vmem>>, vector<1x8x16xf32>
    %1380 = vector.shape_cast %1379 : vector<1x8x16xf32> to vector<8x16xf32>
    %1381 = vector.shape_cast %1378 : vector<8x16xf32> to vector<1x8x16xf32>
    tpu.vector_store %arg11[%c5_711, %c0_712, %c0_713], %1381 {strides = array<i32>} : memref<8x8x16xf32, #tpu.memory_space<vmem>>, vector<1x8x16xf32>,
    %cst_714 = arith.constant 0.000000e+00 : f32
    %1382 = vector.broadcast %cst_714 : f32 to vector<8x16xf32>
    %c6 = arith.constant 6 : index
    %1383 = memref.load %arg4[%c6] : memref<288xf32, #tpu.memory_space<smem>>
    %c0_715 = arith.constant 0 : index
    %c0_716 = arith.constant 0 : index
    %c0_717 = arith.constant 0 : index
    %1384 = vector.load %arg10[%c0_715, %c0_716, %c0_717] : memref<4x10x18xf32, #tpu.memory_space<vmem>>, vector<1x8x16xf32>
    %1385 = vector.shape_cast %1384 : vector<1x8x16xf32> to vector<8x16xf32>
    %1386 = vector.broadcast %1383 : f32 to vector<8x16xf32>
    %1387 = arith.mulf %1386, %1385 : vector<8x16xf32>
    %1388 = arith.addf %1382, %1387 : vector<8x16xf32>
    %c38 = arith.constant 38 : index
    %1389 = memref.load %arg4[%c38] : memref<288xf32, #tpu.memory_space<smem>>
    %c0_718 = arith.constant 0 : index
    %c0_719 = arith.constant 0 : index
    %c1_720 = arith.constant 1 : index
    %1390 = vector.load %arg10[%c0_718, %c0_719, %c1_720] : memref<4x10x18xf32, #tpu.memory_space<vmem>>, vector<1x8x16xf32>
    %1391 = vector.shape_cast %1390 : vector<1x8x16xf32> to vector<8x16xf32>
    %1392 = vector.broadcast %1389 : f32 to vector<8x16xf32>
    %1393 = arith.mulf %1392, %1391 : vector<8x16xf32>
    %1394 = arith.addf %1388, %1393 : vector<8x16xf32>
    %c70 = arith.constant 70 : index
    %1395 = memref.load %arg4[%c70] : memref<288xf32, #tpu.memory_space<smem>>
    %c0_721 = arith.constant 0 : index
    %c0_722 = arith.constant 0 : index
    %c2_723 = arith.constant 2 : index
    %1396 = vector.load %arg10[%c0_721, %c0_722, %c2_723] : memref<4x10x18xf32, #tpu.memory_space<vmem>>, vector<1x8x16xf32>
    %1397 = vector.shape_cast %1396 : vector<1x8x16xf32> to vector<8x16xf32>
    %1398 = vector.broadcast %1395 : f32 to vector<8x16xf32>
    %1399 = arith.mulf %1398, %1397 : vector<8x16xf32>
    %1400 = arith.addf %1394, %1399 : vector<8x16xf32>
    %c102 = arith.constant 102 : index
    %1401 = memref.load %arg4[%c102] : memref<288xf32, #tpu.memory_space<smem>>
    %c0_724 = arith.constant 0 : index
    %c1_725 = arith.constant 1 : index
    %c0_726 = arith.constant 0 : index
    %1402 = vector.load %arg10[%c0_724, %c1_725, %c0_726] : memref<4x10x18xf32, #tpu.memory_space<vmem>>, vector<1x8x16xf32>
    %1403 = vector.shape_cast %1402 : vector<1x8x16xf32> to vector<8x16xf32>
    %1404 = vector.broadcast %1401 : f32 to vector<8x16xf32>
    %1405 = arith.mulf %1404, %1403 : vector<8x16xf32>
    %1406 = arith.addf %1400, %1405 : vector<8x16xf32>
    %c134 = arith.constant 134 : index
    %1407 = memref.load %arg4[%c134] : memref<288xf32, #tpu.memory_space<smem>>
    %c0_727 = arith.constant 0 : index
    %c1_728 = arith.constant 1 : index
    %c1_729 = arith.constant 1 : index
    %1408 = vector.load %arg10[%c0_727, %c1_728, %c1_729] : memref<4x10x18xf32, #tpu.memory_space<vmem>>, vector<1x8x16xf32>
    %1409 = vector.shape_cast %1408 : vector<1x8x16xf32> to vector<8x16xf32>
    %1410 = vector.broadcast %1407 : f32 to vector<8x16xf32>
    %1411 = arith.mulf %1410, %1409 : vector<8x16xf32>
    %1412 = arith.addf %1406, %1411 : vector<8x16xf32>
    %c166 = arith.constant 166 : index
    %1413 = memref.load %arg4[%c166] : memref<288xf32, #tpu.memory_space<smem>>
    %c0_730 = arith.constant 0 : index
    %c1_731 = arith.constant 1 : index
    %c2_732 = arith.constant 2 : index
    %1414 = vector.load %arg10[%c0_730, %c1_731, %c2_732] : memref<4x10x18xf32, #tpu.memory_space<vmem>>, vector<1x8x16xf32>
    %1415 = vector.shape_cast %1414 : vector<1x8x16xf32> to vector<8x16xf32>
    %1416 = vector.broadcast %1413 : f32 to vector<8x16xf32>
    %1417 = arith.mulf %1416, %1415 : vector<8x16xf32>
    %1418 = arith.addf %1412, %1417 : vector<8x16xf32>
    %c198 = arith.constant 198 : index
    %1419 = memref.load %arg4[%c198] : memref<288xf32, #tpu.memory_space<smem>>
    %c0_733 = arith.constant 0 : index
    %c2_734 = arith.constant 2 : index
    %c0_735 = arith.constant 0 : index
    %1420 = vector.load %arg10[%c0_733, %c2_734, %c0_735] : memref<4x10x18xf32, #tpu.memory_space<vmem>>, vector<1x8x16xf32>
    %1421 = vector.shape_cast %1420 : vector<1x8x16xf32> to vector<8x16xf32>
    %1422 = vector.broadcast %1419 : f32 to vector<8x16xf32>
    %1423 = arith.mulf %1422, %1421 : vector<8x16xf32>
    %1424 = arith.addf %1418, %1423 : vector<8x16xf32>
    %c230 = arith.constant 230 : index
    %1425 = memref.load %arg4[%c230] : memref<288xf32, #tpu.memory_space<smem>>
    %c0_736 = arith.constant 0 : index
    %c2_737 = arith.constant 2 : index
    %c1_738 = arith.constant 1 : index
    %1426 = vector.load %arg10[%c0_736, %c2_737, %c1_738] : memref<4x10x18xf32, #tpu.memory_space<vmem>>, vector<1x8x16xf32>
    %1427 = vector.shape_cast %1426 : vector<1x8x16xf32> to vector<8x16xf32>
    %1428 = vector.broadcast %1425 : f32 to vector<8x16xf32>
    %1429 = arith.mulf %1428, %1427 : vector<8x16xf32>
    %1430 = arith.addf %1424, %1429 : vector<8x16xf32>
    %c262 = arith.constant 262 : index
    %1431 = memref.load %arg4[%c262] : memref<288xf32, #tpu.memory_space<smem>>
    %c0_739 = arith.constant 0 : index
    %c2_740 = arith.constant 2 : index
    %c2_741 = arith.constant 2 : index
    %1432 = vector.load %arg10[%c0_739, %c2_740, %c2_741] : memref<4x10x18xf32, #tpu.memory_space<vmem>>, vector<1x8x16xf32>
    %1433 = vector.shape_cast %1432 : vector<1x8x16xf32> to vector<8x16xf32>
    %1434 = vector.broadcast %1431 : f32 to vector<8x16xf32>
    %1435 = arith.mulf %1434, %1433 : vector<8x16xf32>
    %1436 = arith.addf %1430, %1435 : vector<8x16xf32>
    %c14 = arith.constant 14 : index
    %1437 = memref.load %arg4[%c14] : memref<288xf32, #tpu.memory_space<smem>>
    %c1_742 = arith.constant 1 : index
    %c0_743 = arith.constant 0 : index
    %c0_744 = arith.constant 0 : index
    %1438 = vector.load %arg10[%c1_742, %c0_743, %c0_744] : memref<4x10x18xf32, #tpu.memory_space<vmem>>, vector<1x8x16xf32>
    %1439 = vector.shape_cast %1438 : vector<1x8x16xf32> to vector<8x16xf32>
    %1440 = vector.broadcast %1437 : f32 to vector<8x16xf32>
    %1441 = arith.mulf %1440, %1439 : vector<8x16xf32>
    %1442 = arith.addf %1436, %1441 : vector<8x16xf32>
    %c46 = arith.constant 46 : index
    %1443 = memref.load %arg4[%c46] : memref<288xf32, #tpu.memory_space<smem>>
    %c1_745 = arith.constant 1 : index
    %c0_746 = arith.constant 0 : index
    %c1_747 = arith.constant 1 : index
    %1444 = vector.load %arg10[%c1_745, %c0_746, %c1_747] : memref<4x10x18xf32, #tpu.memory_space<vmem>>, vector<1x8x16xf32>
    %1445 = vector.shape_cast %1444 : vector<1x8x16xf32> to vector<8x16xf32>
    %1446 = vector.broadcast %1443 : f32 to vector<8x16xf32>
    %1447 = arith.mulf %1446, %1445 : vector<8x16xf32>
    %1448 = arith.addf %1442, %1447 : vector<8x16xf32>
    %c78 = arith.constant 78 : index
    %1449 = memref.load %arg4[%c78] : memref<288xf32, #tpu.memory_space<smem>>
    %c1_748 = arith.constant 1 : index
    %c0_749 = arith.constant 0 : index
    %c2_750 = arith.constant 2 : index
    %1450 = vector.load %arg10[%c1_748, %c0_749, %c2_750] : memref<4x10x18xf32, #tpu.memory_space<vmem>>, vector<1x8x16xf32>
    %1451 = vector.shape_cast %1450 : vector<1x8x16xf32> to vector<8x16xf32>
    %1452 = vector.broadcast %1449 : f32 to vector<8x16xf32>
    %1453 = arith.mulf %1452, %1451 : vector<8x16xf32>
    %1454 = arith.addf %1448, %1453 : vector<8x16xf32>
    %c110 = arith.constant 110 : index
    %1455 = memref.load %arg4[%c110] : memref<288xf32, #tpu.memory_space<smem>>
    %c1_751 = arith.constant 1 : index
    %c1_752 = arith.constant 1 : index
    %c0_753 = arith.constant 0 : index
    %1456 = vector.load %arg10[%c1_751, %c1_752, %c0_753] : memref<4x10x18xf32, #tpu.memory_space<vmem>>, vector<1x8x16xf32>
    %1457 = vector.shape_cast %1456 : vector<1x8x16xf32> to vector<8x16xf32>
    %1458 = vector.broadcast %1455 : f32 to vector<8x16xf32>
    %1459 = arith.mulf %1458, %1457 : vector<8x16xf32>
    %1460 = arith.addf %1454, %1459 : vector<8x16xf32>
    %c142 = arith.constant 142 : index
    %1461 = memref.load %arg4[%c142] : memref<288xf32, #tpu.memory_space<smem>>
    %c1_754 = arith.constant 1 : index
    %c1_755 = arith.constant 1 : index
    %c1_756 = arith.constant 1 : index
    %1462 = vector.load %arg10[%c1_754, %c1_755, %c1_756] : memref<4x10x18xf32, #tpu.memory_space<vmem>>, vector<1x8x16xf32>
    %1463 = vector.shape_cast %1462 : vector<1x8x16xf32> to vector<8x16xf32>
    %1464 = vector.broadcast %1461 : f32 to vector<8x16xf32>
    %1465 = arith.mulf %1464, %1463 : vector<8x16xf32>
    %1466 = arith.addf %1460, %1465 : vector<8x16xf32>
    %c174 = arith.constant 174 : index
    %1467 = memref.load %arg4[%c174] : memref<288xf32, #tpu.memory_space<smem>>
    %c1_757 = arith.constant 1 : index
    %c1_758 = arith.constant 1 : index
    %c2_759 = arith.constant 2 : index
    %1468 = vector.load %arg10[%c1_757, %c1_758, %c2_759] : memref<4x10x18xf32, #tpu.memory_space<vmem>>, vector<1x8x16xf32>
    %1469 = vector.shape_cast %1468 : vector<1x8x16xf32> to vector<8x16xf32>
    %1470 = vector.broadcast %1467 : f32 to vector<8x16xf32>
    %1471 = arith.mulf %1470, %1469 : vector<8x16xf32>
    %1472 = arith.addf %1466, %1471 : vector<8x16xf32>
    %c206 = arith.constant 206 : index
    %1473 = memref.load %arg4[%c206] : memref<288xf32, #tpu.memory_space<smem>>
    %c1_760 = arith.constant 1 : index
    %c2_761 = arith.constant 2 : index
    %c0_762 = arith.constant 0 : index
    %1474 = vector.load %arg10[%c1_760, %c2_761, %c0_762] : memref<4x10x18xf32, #tpu.memory_space<vmem>>, vector<1x8x16xf32>
    %1475 = vector.shape_cast %1474 : vector<1x8x16xf32> to vector<8x16xf32>
    %1476 = vector.broadcast %1473 : f32 to vector<8x16xf32>
    %1477 = arith.mulf %1476, %1475 : vector<8x16xf32>
    %1478 = arith.addf %1472, %1477 : vector<8x16xf32>
    %c238 = arith.constant 238 : index
    %1479 = memref.load %arg4[%c238] : memref<288xf32, #tpu.memory_space<smem>>
    %c1_763 = arith.constant 1 : index
    %c2_764 = arith.constant 2 : index
    %c1_765 = arith.constant 1 : index
    %1480 = vector.load %arg10[%c1_763, %c2_764, %c1_765] : memref<4x10x18xf32, #tpu.memory_space<vmem>>, vector<1x8x16xf32>
    %1481 = vector.shape_cast %1480 : vector<1x8x16xf32> to vector<8x16xf32>
    %1482 = vector.broadcast %1479 : f32 to vector<8x16xf32>
    %1483 = arith.mulf %1482, %1481 : vector<8x16xf32>
    %1484 = arith.addf %1478, %1483 : vector<8x16xf32>
    %c270 = arith.constant 270 : index
    %1485 = memref.load %arg4[%c270] : memref<288xf32, #tpu.memory_space<smem>>
    %c1_766 = arith.constant 1 : index
    %c2_767 = arith.constant 2 : index
    %c2_768 = arith.constant 2 : index
    %1486 = vector.load %arg10[%c1_766, %c2_767, %c2_768] : memref<4x10x18xf32, #tpu.memory_space<vmem>>, vector<1x8x16xf32>
    %1487 = vector.shape_cast %1486 : vector<1x8x16xf32> to vector<8x16xf32>
    %1488 = vector.broadcast %1485 : f32 to vector<8x16xf32>
    %1489 = arith.mulf %1488, %1487 : vector<8x16xf32>
    %1490 = arith.addf %1484, %1489 : vector<8x16xf32>
    %c22 = arith.constant 22 : index
    %1491 = memref.load %arg4[%c22] : memref<288xf32, #tpu.memory_space<smem>>
    %c2_769 = arith.constant 2 : index
    %c0_770 = arith.constant 0 : index
    %c0_771 = arith.constant 0 : index
    %1492 = vector.load %arg10[%c2_769, %c0_770, %c0_771] : memref<4x10x18xf32, #tpu.memory_space<vmem>>, vector<1x8x16xf32>
    %1493 = vector.shape_cast %1492 : vector<1x8x16xf32> to vector<8x16xf32>
    %1494 = vector.broadcast %1491 : f32 to vector<8x16xf32>
    %1495 = arith.mulf %1494, %1493 : vector<8x16xf32>
    %1496 = arith.addf %1490, %1495 : vector<8x16xf32>
    %c54 = arith.constant 54 : index
    %1497 = memref.load %arg4[%c54] : memref<288xf32, #tpu.memory_space<smem>>
    %c2_772 = arith.constant 2 : index
    %c0_773 = arith.constant 0 : index
    %c1_774 = arith.constant 1 : index
    %1498 = vector.load %arg10[%c2_772, %c0_773, %c1_774] : memref<4x10x18xf32, #tpu.memory_space<vmem>>, vector<1x8x16xf32>
    %1499 = vector.shape_cast %1498 : vector<1x8x16xf32> to vector<8x16xf32>
    %1500 = vector.broadcast %1497 : f32 to vector<8x16xf32>
    %1501 = arith.mulf %1500, %1499 : vector<8x16xf32>
    %1502 = arith.addf %1496, %1501 : vector<8x16xf32>
    %c86 = arith.constant 86 : index
    %1503 = memref.load %arg4[%c86] : memref<288xf32, #tpu.memory_space<smem>>
    %c2_775 = arith.constant 2 : index
    %c0_776 = arith.constant 0 : index
    %c2_777 = arith.constant 2 : index
    %1504 = vector.load %arg10[%c2_775, %c0_776, %c2_777] : memref<4x10x18xf32, #tpu.memory_space<vmem>>, vector<1x8x16xf32>
    %1505 = vector.shape_cast %1504 : vector<1x8x16xf32> to vector<8x16xf32>
    %1506 = vector.broadcast %1503 : f32 to vector<8x16xf32>
    %1507 = arith.mulf %1506, %1505 : vector<8x16xf32>
    %1508 = arith.addf %1502, %1507 : vector<8x16xf32>
    %c118 = arith.constant 118 : index
    %1509 = memref.load %arg4[%c118] : memref<288xf32, #tpu.memory_space<smem>>
    %c2_778 = arith.constant 2 : index
    %c1_779 = arith.constant 1 : index
    %c0_780 = arith.constant 0 : index
    %1510 = vector.load %arg10[%c2_778, %c1_779, %c0_780] : memref<4x10x18xf32, #tpu.memory_space<vmem>>, vector<1x8x16xf32>
    %1511 = vector.shape_cast %1510 : vector<1x8x16xf32> to vector<8x16xf32>
    %1512 = vector.broadcast %1509 : f32 to vector<8x16xf32>
    %1513 = arith.mulf %1512, %1511 : vector<8x16xf32>
    %1514 = arith.addf %1508, %1513 : vector<8x16xf32>
    %c150 = arith.constant 150 : index
    %1515 = memref.load %arg4[%c150] : memref<288xf32, #tpu.memory_space<smem>>
    %c2_781 = arith.constant 2 : index
    %c1_782 = arith.constant 1 : index
    %c1_783 = arith.constant 1 : index
    %1516 = vector.load %arg10[%c2_781, %c1_782, %c1_783] : memref<4x10x18xf32, #tpu.memory_space<vmem>>, vector<1x8x16xf32>
    %1517 = vector.shape_cast %1516 : vector<1x8x16xf32> to vector<8x16xf32>
    %1518 = vector.broadcast %1515 : f32 to vector<8x16xf32>
    %1519 = arith.mulf %1518, %1517 : vector<8x16xf32>
    %1520 = arith.addf %1514, %1519 : vector<8x16xf32>
    %c182 = arith.constant 182 : index
    %1521 = memref.load %arg4[%c182] : memref<288xf32, #tpu.memory_space<smem>>
    %c2_784 = arith.constant 2 : index
    %c1_785 = arith.constant 1 : index
    %c2_786 = arith.constant 2 : index
    %1522 = vector.load %arg10[%c2_784, %c1_785, %c2_786] : memref<4x10x18xf32, #tpu.memory_space<vmem>>, vector<1x8x16xf32>
    %1523 = vector.shape_cast %1522 : vector<1x8x16xf32> to vector<8x16xf32>
    %1524 = vector.broadcast %1521 : f32 to vector<8x16xf32>
    %1525 = arith.mulf %1524, %1523 : vector<8x16xf32>
    %1526 = arith.addf %1520, %1525 : vector<8x16xf32>
    %c214 = arith.constant 214 : index
    %1527 = memref.load %arg4[%c214] : memref<288xf32, #tpu.memory_space<smem>>
    %c2_787 = arith.constant 2 : index
    %c2_788 = arith.constant 2 : index
    %c0_789 = arith.constant 0 : index
    %1528 = vector.load %arg10[%c2_787, %c2_788, %c0_789] : memref<4x10x18xf32, #tpu.memory_space<vmem>>, vector<1x8x16xf32>
    %1529 = vector.shape_cast %1528 : vector<1x8x16xf32> to vector<8x16xf32>
    %1530 = vector.broadcast %1527 : f32 to vector<8x16xf32>
    %1531 = arith.mulf %1530, %1529 : vector<8x16xf32>
    %1532 = arith.addf %1526, %1531 : vector<8x16xf32>
    %c246 = arith.constant 246 : index
    %1533 = memref.load %arg4[%c246] : memref<288xf32, #tpu.memory_space<smem>>
    %c2_790 = arith.constant 2 : index
    %c2_791 = arith.constant 2 : index
    %c1_792 = arith.constant 1 : index
    %1534 = vector.load %arg10[%c2_790, %c2_791, %c1_792] : memref<4x10x18xf32, #tpu.memory_space<vmem>>, vector<1x8x16xf32>
    %1535 = vector.shape_cast %1534 : vector<1x8x16xf32> to vector<8x16xf32>
    %1536 = vector.broadcast %1533 : f32 to vector<8x16xf32>
    %1537 = arith.mulf %1536, %1535 : vector<8x16xf32>
    %1538 = arith.addf %1532, %1537 : vector<8x16xf32>
    %c278 = arith.constant 278 : index
    %1539 = memref.load %arg4[%c278] : memref<288xf32, #tpu.memory_space<smem>>
    %c2_793 = arith.constant 2 : index
    %c2_794 = arith.constant 2 : index
    %c2_795 = arith.constant 2 : index
    %1540 = vector.load %arg10[%c2_793, %c2_794, %c2_795] : memref<4x10x18xf32, #tpu.memory_space<vmem>>, vector<1x8x16xf32>
    %1541 = vector.shape_cast %1540 : vector<1x8x16xf32> to vector<8x16xf32>
    %1542 = vector.broadcast %1539 : f32 to vector<8x16xf32>
    %1543 = arith.mulf %1542, %1541 : vector<8x16xf32>
    %1544 = arith.addf %1538, %1543 : vector<8x16xf32>
    %c30 = arith.constant 30 : index
    %1545 = memref.load %arg4[%c30] : memref<288xf32, #tpu.memory_space<smem>>
    %c3_796 = arith.constant 3 : index
    %c0_797 = arith.constant 0 : index
    %c0_798 = arith.constant 0 : index
    %1546 = vector.load %arg10[%c3_796, %c0_797, %c0_798] : memref<4x10x18xf32, #tpu.memory_space<vmem>>, vector<1x8x16xf32>
    %1547 = vector.shape_cast %1546 : vector<1x8x16xf32> to vector<8x16xf32>
    %1548 = vector.broadcast %1545 : f32 to vector<8x16xf32>
    %1549 = arith.mulf %1548, %1547 : vector<8x16xf32>
    %1550 = arith.addf %1544, %1549 : vector<8x16xf32>
    %c62 = arith.constant 62 : index
    %1551 = memref.load %arg4[%c62] : memref<288xf32, #tpu.memory_space<smem>>
    %c3_799 = arith.constant 3 : index
    %c0_800 = arith.constant 0 : index
    %c1_801 = arith.constant 1 : index
    %1552 = vector.load %arg10[%c3_799, %c0_800, %c1_801] : memref<4x10x18xf32, #tpu.memory_space<vmem>>, vector<1x8x16xf32>
    %1553 = vector.shape_cast %1552 : vector<1x8x16xf32> to vector<8x16xf32>
    %1554 = vector.broadcast %1551 : f32 to vector<8x16xf32>
    %1555 = arith.mulf %1554, %1553 : vector<8x16xf32>
    %1556 = arith.addf %1550, %1555 : vector<8x16xf32>
    %c94 = arith.constant 94 : index
    %1557 = memref.load %arg4[%c94] : memref<288xf32, #tpu.memory_space<smem>>
    %c3_802 = arith.constant 3 : index
    %c0_803 = arith.constant 0 : index
    %c2_804 = arith.constant 2 : index
    %1558 = vector.load %arg10[%c3_802, %c0_803, %c2_804] : memref<4x10x18xf32, #tpu.memory_space<vmem>>, vector<1x8x16xf32>
    %1559 = vector.shape_cast %1558 : vector<1x8x16xf32> to vector<8x16xf32>
    %1560 = vector.broadcast %1557 : f32 to vector<8x16xf32>
    %1561 = arith.mulf %1560, %1559 : vector<8x16xf32>
    %1562 = arith.addf %1556, %1561 : vector<8x16xf32>
    %c126 = arith.constant 126 : index
    %1563 = memref.load %arg4[%c126] : memref<288xf32, #tpu.memory_space<smem>>
    %c3_805 = arith.constant 3 : index
    %c1_806 = arith.constant 1 : index
    %c0_807 = arith.constant 0 : index
    %1564 = vector.load %arg10[%c3_805, %c1_806, %c0_807] : memref<4x10x18xf32, #tpu.memory_space<vmem>>, vector<1x8x16xf32>
    %1565 = vector.shape_cast %1564 : vector<1x8x16xf32> to vector<8x16xf32>
    %1566 = vector.broadcast %1563 : f32 to vector<8x16xf32>
    %1567 = arith.mulf %1566, %1565 : vector<8x16xf32>
    %1568 = arith.addf %1562, %1567 : vector<8x16xf32>
    %c158 = arith.constant 158 : index
    %1569 = memref.load %arg4[%c158] : memref<288xf32, #tpu.memory_space<smem>>
    %c3_808 = arith.constant 3 : index
    %c1_809 = arith.constant 1 : index
    %c1_810 = arith.constant 1 : index
    %1570 = vector.load %arg10[%c3_808, %c1_809, %c1_810] : memref<4x10x18xf32, #tpu.memory_space<vmem>>, vector<1x8x16xf32>
    %1571 = vector.shape_cast %1570 : vector<1x8x16xf32> to vector<8x16xf32>
    %1572 = vector.broadcast %1569 : f32 to vector<8x16xf32>
    %1573 = arith.mulf %1572, %1571 : vector<8x16xf32>
    %1574 = arith.addf %1568, %1573 : vector<8x16xf32>
    %c190 = arith.constant 190 : index
    %1575 = memref.load %arg4[%c190] : memref<288xf32, #tpu.memory_space<smem>>
    %c3_811 = arith.constant 3 : index
    %c1_812 = arith.constant 1 : index
    %c2_813 = arith.constant 2 : index
    %1576 = vector.load %arg10[%c3_811, %c1_812, %c2_813] : memref<4x10x18xf32, #tpu.memory_space<vmem>>, vector<1x8x16xf32>
    %1577 = vector.shape_cast %1576 : vector<1x8x16xf32> to vector<8x16xf32>
    %1578 = vector.broadcast %1575 : f32 to vector<8x16xf32>
    %1579 = arith.mulf %1578, %1577 : vector<8x16xf32>
    %1580 = arith.addf %1574, %1579 : vector<8x16xf32>
    %c222 = arith.constant 222 : index
    %1581 = memref.load %arg4[%c222] : memref<288xf32, #tpu.memory_space<smem>>
    %c3_814 = arith.constant 3 : index
    %c2_815 = arith.constant 2 : index
    %c0_816 = arith.constant 0 : index
    %1582 = vector.load %arg10[%c3_814, %c2_815, %c0_816] : memref<4x10x18xf32, #tpu.memory_space<vmem>>, vector<1x8x16xf32>
    %1583 = vector.shape_cast %1582 : vector<1x8x16xf32> to vector<8x16xf32>
    %1584 = vector.broadcast %1581 : f32 to vector<8x16xf32>
    %1585 = arith.mulf %1584, %1583 : vector<8x16xf32>
    %1586 = arith.addf %1580, %1585 : vector<8x16xf32>
    %c254 = arith.constant 254 : index
    %1587 = memref.load %arg4[%c254] : memref<288xf32, #tpu.memory_space<smem>>
    %c3_817 = arith.constant 3 : index
    %c2_818 = arith.constant 2 : index
    %c1_819 = arith.constant 1 : index
    %1588 = vector.load %arg10[%c3_817, %c2_818, %c1_819] : memref<4x10x18xf32, #tpu.memory_space<vmem>>, vector<1x8x16xf32>
    %1589 = vector.shape_cast %1588 : vector<1x8x16xf32> to vector<8x16xf32>
    %1590 = vector.broadcast %1587 : f32 to vector<8x16xf32>
    %1591 = arith.mulf %1590, %1589 : vector<8x16xf32>
    %1592 = arith.addf %1586, %1591 : vector<8x16xf32>
    %c286 = arith.constant 286 : index
    %1593 = memref.load %arg4[%c286] : memref<288xf32, #tpu.memory_space<smem>>
    %c3_820 = arith.constant 3 : index
    %c2_821 = arith.constant 2 : index
    %c2_822 = arith.constant 2 : index
    %1594 = vector.load %arg10[%c3_820, %c2_821, %c2_822] : memref<4x10x18xf32, #tpu.memory_space<vmem>>, vector<1x8x16xf32>
    %1595 = vector.shape_cast %1594 : vector<1x8x16xf32> to vector<8x16xf32>
    %1596 = vector.broadcast %1593 : f32 to vector<8x16xf32>
    %1597 = arith.mulf %1596, %1595 : vector<8x16xf32>
    %1598 = arith.addf %1592, %1597 : vector<8x16xf32>
    %c6_823 = arith.constant 6 : index
    %1599 = memref.load %arg5[%c6_823] : memref<8xf32, #tpu.memory_space<smem>>
    %1600 = vector.broadcast %1599 : f32 to vector<8x16xf32>
    %1601 = arith.mulf %1598, %1600 : vector<8x16xf32>
    %c6_824 = arith.constant 6 : index
    %1602 = memref.load %arg6[%c6_824] : memref<8xf32, #tpu.memory_space<smem>>
    %1603 = vector.broadcast %1602 : f32 to vector<8x16xf32>
    %1604 = arith.addf %1601, %1603 : vector<8x16xf32>
    %cst_825 = arith.constant 0.000000e+00 : f32
    %1605 = vector.broadcast %cst_825 : f32 to vector<8x16xf32>
    %1606 = arith.maximumf %1604, %1605 : vector<8x16xf32>
    %c6_826 = arith.constant 6 : index
    %c0_827 = arith.constant 0 : index
    %c0_828 = arith.constant 0 : index
    %1607 = vector.load %arg11[%c6_826, %c0_827, %c0_828] : memref<8x8x16xf32, #tpu.memory_space<vmem>>, vector<1x8x16xf32>
    %1608 = vector.shape_cast %1607 : vector<1x8x16xf32> to vector<8x16xf32>
    %1609 = vector.shape_cast %1606 : vector<8x16xf32> to vector<1x8x16xf32>
    tpu.vector_store %arg11[%c6_826, %c0_827, %c0_828], %1609 {strides = array<i32>} : memref<8x8x16xf32, #tpu.memory_space<vmem>>, vector<1x8x16xf32>,
    %cst_829 = arith.constant 0.000000e+00 : f32
    %1610 = vector.broadcast %cst_829 : f32 to vector<8x16xf32>
    %c7 = arith.constant 7 : index
    %1611 = memref.load %arg4[%c7] : memref<288xf32, #tpu.memory_space<smem>>
    %c0_830 = arith.constant 0 : index
    %c0_831 = arith.constant 0 : index
    %c0_832 = arith.constant 0 : index
    %1612 = vector.load %arg10[%c0_830, %c0_831, %c0_832] : memref<4x10x18xf32, #tpu.memory_space<vmem>>, vector<1x8x16xf32>
    %1613 = vector.shape_cast %1612 : vector<1x8x16xf32> to vector<8x16xf32>
    %1614 = vector.broadcast %1611 : f32 to vector<8x16xf32>
    %1615 = arith.mulf %1614, %1613 : vector<8x16xf32>
    %1616 = arith.addf %1610, %1615 : vector<8x16xf32>
    %c39 = arith.constant 39 : index
    %1617 = memref.load %arg4[%c39] : memref<288xf32, #tpu.memory_space<smem>>
    %c0_833 = arith.constant 0 : index
    %c0_834 = arith.constant 0 : index
    %c1_835 = arith.constant 1 : index
    %1618 = vector.load %arg10[%c0_833, %c0_834, %c1_835] : memref<4x10x18xf32, #tpu.memory_space<vmem>>, vector<1x8x16xf32>
    %1619 = vector.shape_cast %1618 : vector<1x8x16xf32> to vector<8x16xf32>
    %1620 = vector.broadcast %1617 : f32 to vector<8x16xf32>
    %1621 = arith.mulf %1620, %1619 : vector<8x16xf32>
    %1622 = arith.addf %1616, %1621 : vector<8x16xf32>
    %c71 = arith.constant 71 : index
    %1623 = memref.load %arg4[%c71] : memref<288xf32, #tpu.memory_space<smem>>
    %c0_836 = arith.constant 0 : index
    %c0_837 = arith.constant 0 : index
    %c2_838 = arith.constant 2 : index
    %1624 = vector.load %arg10[%c0_836, %c0_837, %c2_838] : memref<4x10x18xf32, #tpu.memory_space<vmem>>, vector<1x8x16xf32>
    %1625 = vector.shape_cast %1624 : vector<1x8x16xf32> to vector<8x16xf32>
    %1626 = vector.broadcast %1623 : f32 to vector<8x16xf32>
    %1627 = arith.mulf %1626, %1625 : vector<8x16xf32>
    %1628 = arith.addf %1622, %1627 : vector<8x16xf32>
    %c103 = arith.constant 103 : index
    %1629 = memref.load %arg4[%c103] : memref<288xf32, #tpu.memory_space<smem>>
    %c0_839 = arith.constant 0 : index
    %c1_840 = arith.constant 1 : index
    %c0_841 = arith.constant 0 : index
    %1630 = vector.load %arg10[%c0_839, %c1_840, %c0_841] : memref<4x10x18xf32, #tpu.memory_space<vmem>>, vector<1x8x16xf32>
    %1631 = vector.shape_cast %1630 : vector<1x8x16xf32> to vector<8x16xf32>
    %1632 = vector.broadcast %1629 : f32 to vector<8x16xf32>
    %1633 = arith.mulf %1632, %1631 : vector<8x16xf32>
    %1634 = arith.addf %1628, %1633 : vector<8x16xf32>
    %c135 = arith.constant 135 : index
    %1635 = memref.load %arg4[%c135] : memref<288xf32, #tpu.memory_space<smem>>
    %c0_842 = arith.constant 0 : index
    %c1_843 = arith.constant 1 : index
    %c1_844 = arith.constant 1 : index
    %1636 = vector.load %arg10[%c0_842, %c1_843, %c1_844] : memref<4x10x18xf32, #tpu.memory_space<vmem>>, vector<1x8x16xf32>
    %1637 = vector.shape_cast %1636 : vector<1x8x16xf32> to vector<8x16xf32>
    %1638 = vector.broadcast %1635 : f32 to vector<8x16xf32>
    %1639 = arith.mulf %1638, %1637 : vector<8x16xf32>
    %1640 = arith.addf %1634, %1639 : vector<8x16xf32>
    %c167 = arith.constant 167 : index
    %1641 = memref.load %arg4[%c167] : memref<288xf32, #tpu.memory_space<smem>>
    %c0_845 = arith.constant 0 : index
    %c1_846 = arith.constant 1 : index
    %c2_847 = arith.constant 2 : index
    %1642 = vector.load %arg10[%c0_845, %c1_846, %c2_847] : memref<4x10x18xf32, #tpu.memory_space<vmem>>, vector<1x8x16xf32>
    %1643 = vector.shape_cast %1642 : vector<1x8x16xf32> to vector<8x16xf32>
    %1644 = vector.broadcast %1641 : f32 to vector<8x16xf32>
    %1645 = arith.mulf %1644, %1643 : vector<8x16xf32>
    %1646 = arith.addf %1640, %1645 : vector<8x16xf32>
    %c199 = arith.constant 199 : index
    %1647 = memref.load %arg4[%c199] : memref<288xf32, #tpu.memory_space<smem>>
    %c0_848 = arith.constant 0 : index
    %c2_849 = arith.constant 2 : index
    %c0_850 = arith.constant 0 : index
    %1648 = vector.load %arg10[%c0_848, %c2_849, %c0_850] : memref<4x10x18xf32, #tpu.memory_space<vmem>>, vector<1x8x16xf32>
    %1649 = vector.shape_cast %1648 : vector<1x8x16xf32> to vector<8x16xf32>
    %1650 = vector.broadcast %1647 : f32 to vector<8x16xf32>
    %1651 = arith.mulf %1650, %1649 : vector<8x16xf32>
    %1652 = arith.addf %1646, %1651 : vector<8x16xf32>
    %c231 = arith.constant 231 : index
    %1653 = memref.load %arg4[%c231] : memref<288xf32, #tpu.memory_space<smem>>
    %c0_851 = arith.constant 0 : index
    %c2_852 = arith.constant 2 : index
    %c1_853 = arith.constant 1 : index
    %1654 = vector.load %arg10[%c0_851, %c2_852, %c1_853] : memref<4x10x18xf32, #tpu.memory_space<vmem>>, vector<1x8x16xf32>
    %1655 = vector.shape_cast %1654 : vector<1x8x16xf32> to vector<8x16xf32>
    %1656 = vector.broadcast %1653 : f32 to vector<8x16xf32>
    %1657 = arith.mulf %1656, %1655 : vector<8x16xf32>
    %1658 = arith.addf %1652, %1657 : vector<8x16xf32>
    %c263 = arith.constant 263 : index
    %1659 = memref.load %arg4[%c263] : memref<288xf32, #tpu.memory_space<smem>>
    %c0_854 = arith.constant 0 : index
    %c2_855 = arith.constant 2 : index
    %c2_856 = arith.constant 2 : index
    %1660 = vector.load %arg10[%c0_854, %c2_855, %c2_856] : memref<4x10x18xf32, #tpu.memory_space<vmem>>, vector<1x8x16xf32>
    %1661 = vector.shape_cast %1660 : vector<1x8x16xf32> to vector<8x16xf32>
    %1662 = vector.broadcast %1659 : f32 to vector<8x16xf32>
    %1663 = arith.mulf %1662, %1661 : vector<8x16xf32>
    %1664 = arith.addf %1658, %1663 : vector<8x16xf32>
    %c15 = arith.constant 15 : index
    %1665 = memref.load %arg4[%c15] : memref<288xf32, #tpu.memory_space<smem>>
    %c1_857 = arith.constant 1 : index
    %c0_858 = arith.constant 0 : index
    %c0_859 = arith.constant 0 : index
    %1666 = vector.load %arg10[%c1_857, %c0_858, %c0_859] : memref<4x10x18xf32, #tpu.memory_space<vmem>>, vector<1x8x16xf32>
    %1667 = vector.shape_cast %1666 : vector<1x8x16xf32> to vector<8x16xf32>
    %1668 = vector.broadcast %1665 : f32 to vector<8x16xf32>
    %1669 = arith.mulf %1668, %1667 : vector<8x16xf32>
    %1670 = arith.addf %1664, %1669 : vector<8x16xf32>
    %c47 = arith.constant 47 : index
    %1671 = memref.load %arg4[%c47] : memref<288xf32, #tpu.memory_space<smem>>
    %c1_860 = arith.constant 1 : index
    %c0_861 = arith.constant 0 : index
    %c1_862 = arith.constant 1 : index
    %1672 = vector.load %arg10[%c1_860, %c0_861, %c1_862] : memref<4x10x18xf32, #tpu.memory_space<vmem>>, vector<1x8x16xf32>
    %1673 = vector.shape_cast %1672 : vector<1x8x16xf32> to vector<8x16xf32>
    %1674 = vector.broadcast %1671 : f32 to vector<8x16xf32>
    %1675 = arith.mulf %1674, %1673 : vector<8x16xf32>
    %1676 = arith.addf %1670, %1675 : vector<8x16xf32>
    %c79 = arith.constant 79 : index
    %1677 = memref.load %arg4[%c79] : memref<288xf32, #tpu.memory_space<smem>>
    %c1_863 = arith.constant 1 : index
    %c0_864 = arith.constant 0 : index
    %c2_865 = arith.constant 2 : index
    %1678 = vector.load %arg10[%c1_863, %c0_864, %c2_865] : memref<4x10x18xf32, #tpu.memory_space<vmem>>, vector<1x8x16xf32>
    %1679 = vector.shape_cast %1678 : vector<1x8x16xf32> to vector<8x16xf32>
    %1680 = vector.broadcast %1677 : f32 to vector<8x16xf32>
    %1681 = arith.mulf %1680, %1679 : vector<8x16xf32>
    %1682 = arith.addf %1676, %1681 : vector<8x16xf32>
    %c111 = arith.constant 111 : index
    %1683 = memref.load %arg4[%c111] : memref<288xf32, #tpu.memory_space<smem>>
    %c1_866 = arith.constant 1 : index
    %c1_867 = arith.constant 1 : index
    %c0_868 = arith.constant 0 : index
    %1684 = vector.load %arg10[%c1_866, %c1_867, %c0_868] : memref<4x10x18xf32, #tpu.memory_space<vmem>>, vector<1x8x16xf32>
    %1685 = vector.shape_cast %1684 : vector<1x8x16xf32> to vector<8x16xf32>
    %1686 = vector.broadcast %1683 : f32 to vector<8x16xf32>
    %1687 = arith.mulf %1686, %1685 : vector<8x16xf32>
    %1688 = arith.addf %1682, %1687 : vector<8x16xf32>
    %c143 = arith.constant 143 : index
    %1689 = memref.load %arg4[%c143] : memref<288xf32, #tpu.memory_space<smem>>
    %c1_869 = arith.constant 1 : index
    %c1_870 = arith.constant 1 : index
    %c1_871 = arith.constant 1 : index
    %1690 = vector.load %arg10[%c1_869, %c1_870, %c1_871] : memref<4x10x18xf32, #tpu.memory_space<vmem>>, vector<1x8x16xf32>
    %1691 = vector.shape_cast %1690 : vector<1x8x16xf32> to vector<8x16xf32>
    %1692 = vector.broadcast %1689 : f32 to vector<8x16xf32>
    %1693 = arith.mulf %1692, %1691 : vector<8x16xf32>
    %1694 = arith.addf %1688, %1693 : vector<8x16xf32>
    %c175 = arith.constant 175 : index
    %1695 = memref.load %arg4[%c175] : memref<288xf32, #tpu.memory_space<smem>>
    %c1_872 = arith.constant 1 : index
    %c1_873 = arith.constant 1 : index
    %c2_874 = arith.constant 2 : index
    %1696 = vector.load %arg10[%c1_872, %c1_873, %c2_874] : memref<4x10x18xf32, #tpu.memory_space<vmem>>, vector<1x8x16xf32>
    %1697 = vector.shape_cast %1696 : vector<1x8x16xf32> to vector<8x16xf32>
    %1698 = vector.broadcast %1695 : f32 to vector<8x16xf32>
    %1699 = arith.mulf %1698, %1697 : vector<8x16xf32>
    %1700 = arith.addf %1694, %1699 : vector<8x16xf32>
    %c207 = arith.constant 207 : index
    %1701 = memref.load %arg4[%c207] : memref<288xf32, #tpu.memory_space<smem>>
    %c1_875 = arith.constant 1 : index
    %c2_876 = arith.constant 2 : index
    %c0_877 = arith.constant 0 : index
    %1702 = vector.load %arg10[%c1_875, %c2_876, %c0_877] : memref<4x10x18xf32, #tpu.memory_space<vmem>>, vector<1x8x16xf32>
    %1703 = vector.shape_cast %1702 : vector<1x8x16xf32> to vector<8x16xf32>
    %1704 = vector.broadcast %1701 : f32 to vector<8x16xf32>
    %1705 = arith.mulf %1704, %1703 : vector<8x16xf32>
    %1706 = arith.addf %1700, %1705 : vector<8x16xf32>
    %c239 = arith.constant 239 : index
    %1707 = memref.load %arg4[%c239] : memref<288xf32, #tpu.memory_space<smem>>
    %c1_878 = arith.constant 1 : index
    %c2_879 = arith.constant 2 : index
    %c1_880 = arith.constant 1 : index
    %1708 = vector.load %arg10[%c1_878, %c2_879, %c1_880] : memref<4x10x18xf32, #tpu.memory_space<vmem>>, vector<1x8x16xf32>
    %1709 = vector.shape_cast %1708 : vector<1x8x16xf32> to vector<8x16xf32>
    %1710 = vector.broadcast %1707 : f32 to vector<8x16xf32>
    %1711 = arith.mulf %1710, %1709 : vector<8x16xf32>
    %1712 = arith.addf %1706, %1711 : vector<8x16xf32>
    %c271 = arith.constant 271 : index
    %1713 = memref.load %arg4[%c271] : memref<288xf32, #tpu.memory_space<smem>>
    %c1_881 = arith.constant 1 : index
    %c2_882 = arith.constant 2 : index
    %c2_883 = arith.constant 2 : index
    %1714 = vector.load %arg10[%c1_881, %c2_882, %c2_883] : memref<4x10x18xf32, #tpu.memory_space<vmem>>, vector<1x8x16xf32>
    %1715 = vector.shape_cast %1714 : vector<1x8x16xf32> to vector<8x16xf32>
    %1716 = vector.broadcast %1713 : f32 to vector<8x16xf32>
    %1717 = arith.mulf %1716, %1715 : vector<8x16xf32>
    %1718 = arith.addf %1712, %1717 : vector<8x16xf32>
    %c23 = arith.constant 23 : index
    %1719 = memref.load %arg4[%c23] : memref<288xf32, #tpu.memory_space<smem>>
    %c2_884 = arith.constant 2 : index
    %c0_885 = arith.constant 0 : index
    %c0_886 = arith.constant 0 : index
    %1720 = vector.load %arg10[%c2_884, %c0_885, %c0_886] : memref<4x10x18xf32, #tpu.memory_space<vmem>>, vector<1x8x16xf32>
    %1721 = vector.shape_cast %1720 : vector<1x8x16xf32> to vector<8x16xf32>
    %1722 = vector.broadcast %1719 : f32 to vector<8x16xf32>
    %1723 = arith.mulf %1722, %1721 : vector<8x16xf32>
    %1724 = arith.addf %1718, %1723 : vector<8x16xf32>
    %c55 = arith.constant 55 : index
    %1725 = memref.load %arg4[%c55] : memref<288xf32, #tpu.memory_space<smem>>
    %c2_887 = arith.constant 2 : index
    %c0_888 = arith.constant 0 : index
    %c1_889 = arith.constant 1 : index
    %1726 = vector.load %arg10[%c2_887, %c0_888, %c1_889] : memref<4x10x18xf32, #tpu.memory_space<vmem>>, vector<1x8x16xf32>
    %1727 = vector.shape_cast %1726 : vector<1x8x16xf32> to vector<8x16xf32>
    %1728 = vector.broadcast %1725 : f32 to vector<8x16xf32>
    %1729 = arith.mulf %1728, %1727 : vector<8x16xf32>
    %1730 = arith.addf %1724, %1729 : vector<8x16xf32>
    %c87 = arith.constant 87 : index
    %1731 = memref.load %arg4[%c87] : memref<288xf32, #tpu.memory_space<smem>>
    %c2_890 = arith.constant 2 : index
    %c0_891 = arith.constant 0 : index
    %c2_892 = arith.constant 2 : index
    %1732 = vector.load %arg10[%c2_890, %c0_891, %c2_892] : memref<4x10x18xf32, #tpu.memory_space<vmem>>, vector<1x8x16xf32>
    %1733 = vector.shape_cast %1732 : vector<1x8x16xf32> to vector<8x16xf32>
    %1734 = vector.broadcast %1731 : f32 to vector<8x16xf32>
    %1735 = arith.mulf %1734, %1733 : vector<8x16xf32>
    %1736 = arith.addf %1730, %1735 : vector<8x16xf32>
    %c119 = arith.constant 119 : index
    %1737 = memref.load %arg4[%c119] : memref<288xf32, #tpu.memory_space<smem>>
    %c2_893 = arith.constant 2 : index
    %c1_894 = arith.constant 1 : index
    %c0_895 = arith.constant 0 : index
    %1738 = vector.load %arg10[%c2_893, %c1_894, %c0_895] : memref<4x10x18xf32, #tpu.memory_space<vmem>>, vector<1x8x16xf32>
    %1739 = vector.shape_cast %1738 : vector<1x8x16xf32> to vector<8x16xf32>
    %1740 = vector.broadcast %1737 : f32 to vector<8x16xf32>
    %1741 = arith.mulf %1740, %1739 : vector<8x16xf32>
    %1742 = arith.addf %1736, %1741 : vector<8x16xf32>
    %c151 = arith.constant 151 : index
    %1743 = memref.load %arg4[%c151] : memref<288xf32, #tpu.memory_space<smem>>
    %c2_896 = arith.constant 2 : index
    %c1_897 = arith.constant 1 : index
    %c1_898 = arith.constant 1 : index
    %1744 = vector.load %arg10[%c2_896, %c1_897, %c1_898] : memref<4x10x18xf32, #tpu.memory_space<vmem>>, vector<1x8x16xf32>
    %1745 = vector.shape_cast %1744 : vector<1x8x16xf32> to vector<8x16xf32>
    %1746 = vector.broadcast %1743 : f32 to vector<8x16xf32>
    %1747 = arith.mulf %1746, %1745 : vector<8x16xf32>
    %1748 = arith.addf %1742, %1747 : vector<8x16xf32>
    %c183 = arith.constant 183 : index
    %1749 = memref.load %arg4[%c183] : memref<288xf32, #tpu.memory_space<smem>>
    %c2_899 = arith.constant 2 : index
    %c1_900 = arith.constant 1 : index
    %c2_901 = arith.constant 2 : index
    %1750 = vector.load %arg10[%c2_899, %c1_900, %c2_901] : memref<4x10x18xf32, #tpu.memory_space<vmem>>, vector<1x8x16xf32>
    %1751 = vector.shape_cast %1750 : vector<1x8x16xf32> to vector<8x16xf32>
    %1752 = vector.broadcast %1749 : f32 to vector<8x16xf32>
    %1753 = arith.mulf %1752, %1751 : vector<8x16xf32>
    %1754 = arith.addf %1748, %1753 : vector<8x16xf32>
    %c215 = arith.constant 215 : index
    %1755 = memref.load %arg4[%c215] : memref<288xf32, #tpu.memory_space<smem>>
    %c2_902 = arith.constant 2 : index
    %c2_903 = arith.constant 2 : index
    %c0_904 = arith.constant 0 : index
    %1756 = vector.load %arg10[%c2_902, %c2_903, %c0_904] : memref<4x10x18xf32, #tpu.memory_space<vmem>>, vector<1x8x16xf32>
    %1757 = vector.shape_cast %1756 : vector<1x8x16xf32> to vector<8x16xf32>
    %1758 = vector.broadcast %1755 : f32 to vector<8x16xf32>
    %1759 = arith.mulf %1758, %1757 : vector<8x16xf32>
    %1760 = arith.addf %1754, %1759 : vector<8x16xf32>
    %c247 = arith.constant 247 : index
    %1761 = memref.load %arg4[%c247] : memref<288xf32, #tpu.memory_space<smem>>
    %c2_905 = arith.constant 2 : index
    %c2_906 = arith.constant 2 : index
    %c1_907 = arith.constant 1 : index
    %1762 = vector.load %arg10[%c2_905, %c2_906, %c1_907] : memref<4x10x18xf32, #tpu.memory_space<vmem>>, vector<1x8x16xf32>
    %1763 = vector.shape_cast %1762 : vector<1x8x16xf32> to vector<8x16xf32>
    %1764 = vector.broadcast %1761 : f32 to vector<8x16xf32>
    %1765 = arith.mulf %1764, %1763 : vector<8x16xf32>
    %1766 = arith.addf %1760, %1765 : vector<8x16xf32>
    %c279 = arith.constant 279 : index
    %1767 = memref.load %arg4[%c279] : memref<288xf32, #tpu.memory_space<smem>>
    %c2_908 = arith.constant 2 : index
    %c2_909 = arith.constant 2 : index
    %c2_910 = arith.constant 2 : index
    %1768 = vector.load %arg10[%c2_908, %c2_909, %c2_910] : memref<4x10x18xf32, #tpu.memory_space<vmem>>, vector<1x8x16xf32>
    %1769 = vector.shape_cast %1768 : vector<1x8x16xf32> to vector<8x16xf32>
    %1770 = vector.broadcast %1767 : f32 to vector<8x16xf32>
    %1771 = arith.mulf %1770, %1769 : vector<8x16xf32>
    %1772 = arith.addf %1766, %1771 : vector<8x16xf32>
    %c31 = arith.constant 31 : index
    %1773 = memref.load %arg4[%c31] : memref<288xf32, #tpu.memory_space<smem>>
    %c3_911 = arith.constant 3 : index
    %c0_912 = arith.constant 0 : index
    %c0_913 = arith.constant 0 : index
    %1774 = vector.load %arg10[%c3_911, %c0_912, %c0_913] : memref<4x10x18xf32, #tpu.memory_space<vmem>>, vector<1x8x16xf32>
    %1775 = vector.shape_cast %1774 : vector<1x8x16xf32> to vector<8x16xf32>
    %1776 = vector.broadcast %1773 : f32 to vector<8x16xf32>
    %1777 = arith.mulf %1776, %1775 : vector<8x16xf32>
    %1778 = arith.addf %1772, %1777 : vector<8x16xf32>
    %c63 = arith.constant 63 : index
    %1779 = memref.load %arg4[%c63] : memref<288xf32, #tpu.memory_space<smem>>
    %c3_914 = arith.constant 3 : index
    %c0_915 = arith.constant 0 : index
    %c1_916 = arith.constant 1 : index
    %1780 = vector.load %arg10[%c3_914, %c0_915, %c1_916] : memref<4x10x18xf32, #tpu.memory_space<vmem>>, vector<1x8x16xf32>
    %1781 = vector.shape_cast %1780 : vector<1x8x16xf32> to vector<8x16xf32>
    %1782 = vector.broadcast %1779 : f32 to vector<8x16xf32>
    %1783 = arith.mulf %1782, %1781 : vector<8x16xf32>
    %1784 = arith.addf %1778, %1783 : vector<8x16xf32>
    %c95 = arith.constant 95 : index
    %1785 = memref.load %arg4[%c95] : memref<288xf32, #tpu.memory_space<smem>>
    %c3_917 = arith.constant 3 : index
    %c0_918 = arith.constant 0 : index
    %c2_919 = arith.constant 2 : index
    %1786 = vector.load %arg10[%c3_917, %c0_918, %c2_919] : memref<4x10x18xf32, #tpu.memory_space<vmem>>, vector<1x8x16xf32>
    %1787 = vector.shape_cast %1786 : vector<1x8x16xf32> to vector<8x16xf32>
    %1788 = vector.broadcast %1785 : f32 to vector<8x16xf32>
    %1789 = arith.mulf %1788, %1787 : vector<8x16xf32>
    %1790 = arith.addf %1784, %1789 : vector<8x16xf32>
    %c127 = arith.constant 127 : index
    %1791 = memref.load %arg4[%c127] : memref<288xf32, #tpu.memory_space<smem>>
    %c3_920 = arith.constant 3 : index
    %c1_921 = arith.constant 1 : index
    %c0_922 = arith.constant 0 : index
    %1792 = vector.load %arg10[%c3_920, %c1_921, %c0_922] : memref<4x10x18xf32, #tpu.memory_space<vmem>>, vector<1x8x16xf32>
    %1793 = vector.shape_cast %1792 : vector<1x8x16xf32> to vector<8x16xf32>
    %1794 = vector.broadcast %1791 : f32 to vector<8x16xf32>
    %1795 = arith.mulf %1794, %1793 : vector<8x16xf32>
    %1796 = arith.addf %1790, %1795 : vector<8x16xf32>
    %c159 = arith.constant 159 : index
    %1797 = memref.load %arg4[%c159] : memref<288xf32, #tpu.memory_space<smem>>
    %c3_923 = arith.constant 3 : index
    %c1_924 = arith.constant 1 : index
    %c1_925 = arith.constant 1 : index
    %1798 = vector.load %arg10[%c3_923, %c1_924, %c1_925] : memref<4x10x18xf32, #tpu.memory_space<vmem>>, vector<1x8x16xf32>
    %1799 = vector.shape_cast %1798 : vector<1x8x16xf32> to vector<8x16xf32>
    %1800 = vector.broadcast %1797 : f32 to vector<8x16xf32>
    %1801 = arith.mulf %1800, %1799 : vector<8x16xf32>
    %1802 = arith.addf %1796, %1801 : vector<8x16xf32>
    %c191 = arith.constant 191 : index
    %1803 = memref.load %arg4[%c191] : memref<288xf32, #tpu.memory_space<smem>>
    %c3_926 = arith.constant 3 : index
    %c1_927 = arith.constant 1 : index
    %c2_928 = arith.constant 2 : index
    %1804 = vector.load %arg10[%c3_926, %c1_927, %c2_928] : memref<4x10x18xf32, #tpu.memory_space<vmem>>, vector<1x8x16xf32>
    %1805 = vector.shape_cast %1804 : vector<1x8x16xf32> to vector<8x16xf32>
    %1806 = vector.broadcast %1803 : f32 to vector<8x16xf32>
    %1807 = arith.mulf %1806, %1805 : vector<8x16xf32>
    %1808 = arith.addf %1802, %1807 : vector<8x16xf32>
    %c223 = arith.constant 223 : index
    %1809 = memref.load %arg4[%c223] : memref<288xf32, #tpu.memory_space<smem>>
    %c3_929 = arith.constant 3 : index
    %c2_930 = arith.constant 2 : index
    %c0_931 = arith.constant 0 : index
    %1810 = vector.load %arg10[%c3_929, %c2_930, %c0_931] : memref<4x10x18xf32, #tpu.memory_space<vmem>>, vector<1x8x16xf32>
    %1811 = vector.shape_cast %1810 : vector<1x8x16xf32> to vector<8x16xf32>
    %1812 = vector.broadcast %1809 : f32 to vector<8x16xf32>
    %1813 = arith.mulf %1812, %1811 : vector<8x16xf32>
    %1814 = arith.addf %1808, %1813 : vector<8x16xf32>
    %c255 = arith.constant 255 : index
    %1815 = memref.load %arg4[%c255] : memref<288xf32, #tpu.memory_space<smem>>
    %c3_932 = arith.constant 3 : index
    %c2_933 = arith.constant 2 : index
    %c1_934 = arith.constant 1 : index
    %1816 = vector.load %arg10[%c3_932, %c2_933, %c1_934] : memref<4x10x18xf32, #tpu.memory_space<vmem>>, vector<1x8x16xf32>
    %1817 = vector.shape_cast %1816 : vector<1x8x16xf32> to vector<8x16xf32>
    %1818 = vector.broadcast %1815 : f32 to vector<8x16xf32>
    %1819 = arith.mulf %1818, %1817 : vector<8x16xf32>
    %1820 = arith.addf %1814, %1819 : vector<8x16xf32>
    %c287 = arith.constant 287 : index
    %1821 = memref.load %arg4[%c287] : memref<288xf32, #tpu.memory_space<smem>>
    %c3_935 = arith.constant 3 : index
    %c2_936 = arith.constant 2 : index
    %c2_937 = arith.constant 2 : index
    %1822 = vector.load %arg10[%c3_935, %c2_936, %c2_937] : memref<4x10x18xf32, #tpu.memory_space<vmem>>, vector<1x8x16xf32>
    %1823 = vector.shape_cast %1822 : vector<1x8x16xf32> to vector<8x16xf32>
    %1824 = vector.broadcast %1821 : f32 to vector<8x16xf32>
    %1825 = arith.mulf %1824, %1823 : vector<8x16xf32>
    %1826 = arith.addf %1820, %1825 : vector<8x16xf32>
    %c7_938 = arith.constant 7 : index
    %1827 = memref.load %arg5[%c7_938] : memref<8xf32, #tpu.memory_space<smem>>
    %1828 = vector.broadcast %1827 : f32 to vector<8x16xf32>
    %1829 = arith.mulf %1826, %1828 : vector<8x16xf32>
    %c7_939 = arith.constant 7 : index
    %1830 = memref.load %arg6[%c7_939] : memref<8xf32, #tpu.memory_space<smem>>
    %1831 = vector.broadcast %1830 : f32 to vector<8x16xf32>
    %1832 = arith.addf %1829, %1831 : vector<8x16xf32>
    %cst_940 = arith.constant 0.000000e+00 : f32
    %1833 = vector.broadcast %cst_940 : f32 to vector<8x16xf32>
    %1834 = arith.maximumf %1832, %1833 : vector<8x16xf32>
    %c7_941 = arith.constant 7 : index
    %c0_942 = arith.constant 0 : index
    %c0_943 = arith.constant 0 : index
    %1835 = vector.load %arg11[%c7_941, %c0_942, %c0_943] : memref<8x8x16xf32, #tpu.memory_space<vmem>>, vector<1x8x16xf32>
    %1836 = vector.shape_cast %1835 : vector<1x8x16xf32> to vector<8x16xf32>
    %1837 = vector.shape_cast %1834 : vector<8x16xf32> to vector<1x8x16xf32>
    tpu.vector_store %arg11[%c7_941, %c0_942, %c0_943], %1837 {strides = array<i32>} : memref<8x8x16xf32, #tpu.memory_space<vmem>>, vector<1x8x16xf32>,
    %cst_944 = arith.constant 0.000000e+00 : f32
    %1838 = vector.broadcast %cst_944 : f32 to vector<8x16xf32>
    %c0_945 = arith.constant 0 : index
    %1839 = memref.load %arg7[%c0_945] : memref<24xf32, #tpu.memory_space<smem>>
    %c0_946 = arith.constant 0 : index
    %c0_947 = arith.constant 0 : index
    %c0_948 = arith.constant 0 : index
    %1840 = vector.load %arg11[%c0_946, %c0_947, %c0_948] : memref<8x8x16xf32, #tpu.memory_space<vmem>>, vector<1x8x16xf32>
    %1841 = vector.shape_cast %1840 : vector<1x8x16xf32> to vector<8x16xf32>
    %1842 = vector.broadcast %1839 : f32 to vector<8x16xf32>
    %1843 = arith.mulf %1842, %1841 : vector<8x16xf32>
    %1844 = arith.addf %1838, %1843 : vector<8x16xf32>
    %c3_949 = arith.constant 3 : index
    %1845 = memref.load %arg7[%c3_949] : memref<24xf32, #tpu.memory_space<smem>>
    %c1_950 = arith.constant 1 : index
    %c0_951 = arith.constant 0 : index
    %c0_952 = arith.constant 0 : index
    %1846 = vector.load %arg11[%c1_950, %c0_951, %c0_952] : memref<8x8x16xf32, #tpu.memory_space<vmem>>, vector<1x8x16xf32>
    %1847 = vector.shape_cast %1846 : vector<1x8x16xf32> to vector<8x16xf32>
    %1848 = vector.broadcast %1845 : f32 to vector<8x16xf32>
    %1849 = arith.mulf %1848, %1847 : vector<8x16xf32>
    %1850 = arith.addf %1844, %1849 : vector<8x16xf32>
    %c6_953 = arith.constant 6 : index
    %1851 = memref.load %arg7[%c6_953] : memref<24xf32, #tpu.memory_space<smem>>
    %c2_954 = arith.constant 2 : index
    %c0_955 = arith.constant 0 : index
    %c0_956 = arith.constant 0 : index
    %1852 = vector.load %arg11[%c2_954, %c0_955, %c0_956] : memref<8x8x16xf32, #tpu.memory_space<vmem>>, vector<1x8x16xf32>
    %1853 = vector.shape_cast %1852 : vector<1x8x16xf32> to vector<8x16xf32>
    %1854 = vector.broadcast %1851 : f32 to vector<8x16xf32>
    %1855 = arith.mulf %1854, %1853 : vector<8x16xf32>
    %1856 = arith.addf %1850, %1855 : vector<8x16xf32>
    %c9_957 = arith.constant 9 : index
    %1857 = memref.load %arg7[%c9_957] : memref<24xf32, #tpu.memory_space<smem>>
    %c3_958 = arith.constant 3 : index
    %c0_959 = arith.constant 0 : index
    %c0_960 = arith.constant 0 : index
    %1858 = vector.load %arg11[%c3_958, %c0_959, %c0_960] : memref<8x8x16xf32, #tpu.memory_space<vmem>>, vector<1x8x16xf32>
    %1859 = vector.shape_cast %1858 : vector<1x8x16xf32> to vector<8x16xf32>
    %1860 = vector.broadcast %1857 : f32 to vector<8x16xf32>
    %1861 = arith.mulf %1860, %1859 : vector<8x16xf32>
    %1862 = arith.addf %1856, %1861 : vector<8x16xf32>
    %c12_961 = arith.constant 12 : index
    %1863 = memref.load %arg7[%c12_961] : memref<24xf32, #tpu.memory_space<smem>>
    %c4_962 = arith.constant 4 : index
    %c0_963 = arith.constant 0 : index
    %c0_964 = arith.constant 0 : index
    %1864 = vector.load %arg11[%c4_962, %c0_963, %c0_964] : memref<8x8x16xf32, #tpu.memory_space<vmem>>, vector<1x8x16xf32>
    %1865 = vector.shape_cast %1864 : vector<1x8x16xf32> to vector<8x16xf32>
    %1866 = vector.broadcast %1863 : f32 to vector<8x16xf32>
    %1867 = arith.mulf %1866, %1865 : vector<8x16xf32>
    %1868 = arith.addf %1862, %1867 : vector<8x16xf32>
    %c15_965 = arith.constant 15 : index
    %1869 = memref.load %arg7[%c15_965] : memref<24xf32, #tpu.memory_space<smem>>
    %c5_966 = arith.constant 5 : index
    %c0_967 = arith.constant 0 : index
    %c0_968 = arith.constant 0 : index
    %1870 = vector.load %arg11[%c5_966, %c0_967, %c0_968] : memref<8x8x16xf32, #tpu.memory_space<vmem>>, vector<1x8x16xf32>
    %1871 = vector.shape_cast %1870 : vector<1x8x16xf32> to vector<8x16xf32>
    %1872 = vector.broadcast %1869 : f32 to vector<8x16xf32>
    %1873 = arith.mulf %1872, %1871 : vector<8x16xf32>
    %1874 = arith.addf %1868, %1873 : vector<8x16xf32>
    %c18_969 = arith.constant 18 : index
    %1875 = memref.load %arg7[%c18_969] : memref<24xf32, #tpu.memory_space<smem>>
    %c6_970 = arith.constant 6 : index
    %c0_971 = arith.constant 0 : index
    %c0_972 = arith.constant 0 : index
    %1876 = vector.load %arg11[%c6_970, %c0_971, %c0_972] : memref<8x8x16xf32, #tpu.memory_space<vmem>>, vector<1x8x16xf32>
    %1877 = vector.shape_cast %1876 : vector<1x8x16xf32> to vector<8x16xf32>
    %1878 = vector.broadcast %1875 : f32 to vector<8x16xf32>
    %1879 = arith.mulf %1878, %1877 : vector<8x16xf32>
    %1880 = arith.addf %1874, %1879 : vector<8x16xf32>
    %c21_973 = arith.constant 21 : index
    %1881 = memref.load %arg7[%c21_973] : memref<24xf32, #tpu.memory_space<smem>>
    %c7_974 = arith.constant 7 : index
    %c0_975 = arith.constant 0 : index
    %c0_976 = arith.constant 0 : index
    %1882 = vector.load %arg11[%c7_974, %c0_975, %c0_976] : memref<8x8x16xf32, #tpu.memory_space<vmem>>, vector<1x8x16xf32>
    %1883 = vector.shape_cast %1882 : vector<1x8x16xf32> to vector<8x16xf32>
    %1884 = vector.broadcast %1881 : f32 to vector<8x16xf32>
    %1885 = arith.mulf %1884, %1883 : vector<8x16xf32>
    %1886 = arith.addf %1880, %1885 : vector<8x16xf32>
    %c0_977 = arith.constant 0 : index
    %1887 = memref.load %arg8[%c0_977] : memref<3xf32, #tpu.memory_space<smem>>
    %1888 = vector.broadcast %1887 : f32 to vector<8x16xf32>
    %1889 = arith.addf %1886, %1888 : vector<8x16xf32>
    %c0_978 = arith.constant 0 : index
    %c0_979 = arith.constant 0 : index
    %c0_980 = arith.constant 0 : index
    %c0_981 = arith.constant 0 : index
    %1890 = vector.load %arg9[%c0_978, %c0_979, %c0_980, %c0_981] : memref<1x3x8x16xf32, #tpu.memory_space<vmem>>, vector<1x1x8x16xf32>
    %1891 = vector.shape_cast %1890 : vector<1x1x8x16xf32> to vector<8x16xf32>
    %1892 = vector.shape_cast %1889 : vector<8x16xf32> to vector<1x1x8x16xf32>
    tpu.vector_store %arg9[%c0_978, %c0_979, %c0_980, %c0_981], %1892 {strides = array<i32>} : memref<1x3x8x16xf32, #tpu.memory_space<vmem>>, vector<1x1x8x16xf32>,
    %cst_982 = arith.constant 0.000000e+00 : f32
    %1893 = vector.broadcast %cst_982 : f32 to vector<8x16xf32>
    %c1_983 = arith.constant 1 : index
    %1894 = memref.load %arg7[%c1_983] : memref<24xf32, #tpu.memory_space<smem>>
    %c0_984 = arith.constant 0 : index
    %c0_985 = arith.constant 0 : index
    %c0_986 = arith.constant 0 : index
    %1895 = vector.load %arg11[%c0_984, %c0_985, %c0_986] : memref<8x8x16xf32, #tpu.memory_space<vmem>>, vector<1x8x16xf32>
    %1896 = vector.shape_cast %1895 : vector<1x8x16xf32> to vector<8x16xf32>
    %1897 = vector.broadcast %1894 : f32 to vector<8x16xf32>
    %1898 = arith.mulf %1897, %1896 : vector<8x16xf32>
    %1899 = arith.addf %1893, %1898 : vector<8x16xf32>
    %c4_987 = arith.constant 4 : index
    %1900 = memref.load %arg7[%c4_987] : memref<24xf32, #tpu.memory_space<smem>>
    %c1_988 = arith.constant 1 : index
    %c0_989 = arith.constant 0 : index
    %c0_990 = arith.constant 0 : index
    %1901 = vector.load %arg11[%c1_988, %c0_989, %c0_990] : memref<8x8x16xf32, #tpu.memory_space<vmem>>, vector<1x8x16xf32>
    %1902 = vector.shape_cast %1901 : vector<1x8x16xf32> to vector<8x16xf32>
    %1903 = vector.broadcast %1900 : f32 to vector<8x16xf32>
    %1904 = arith.mulf %1903, %1902 : vector<8x16xf32>
    %1905 = arith.addf %1899, %1904 : vector<8x16xf32>
    %c7_991 = arith.constant 7 : index
    %1906 = memref.load %arg7[%c7_991] : memref<24xf32, #tpu.memory_space<smem>>
    %c2_992 = arith.constant 2 : index
    %c0_993 = arith.constant 0 : index
    %c0_994 = arith.constant 0 : index
    %1907 = vector.load %arg11[%c2_992, %c0_993, %c0_994] : memref<8x8x16xf32, #tpu.memory_space<vmem>>, vector<1x8x16xf32>
    %1908 = vector.shape_cast %1907 : vector<1x8x16xf32> to vector<8x16xf32>
    %1909 = vector.broadcast %1906 : f32 to vector<8x16xf32>
    %1910 = arith.mulf %1909, %1908 : vector<8x16xf32>
    %1911 = arith.addf %1905, %1910 : vector<8x16xf32>
    %c10_995 = arith.constant 10 : index
    %1912 = memref.load %arg7[%c10_995] : memref<24xf32, #tpu.memory_space<smem>>
    %c3_996 = arith.constant 3 : index
    %c0_997 = arith.constant 0 : index
    %c0_998 = arith.constant 0 : index
    %1913 = vector.load %arg11[%c3_996, %c0_997, %c0_998] : memref<8x8x16xf32, #tpu.memory_space<vmem>>, vector<1x8x16xf32>
    %1914 = vector.shape_cast %1913 : vector<1x8x16xf32> to vector<8x16xf32>
    %1915 = vector.broadcast %1912 : f32 to vector<8x16xf32>
    %1916 = arith.mulf %1915, %1914 : vector<8x16xf32>
    %1917 = arith.addf %1911, %1916 : vector<8x16xf32>
    %c13_999 = arith.constant 13 : index
    %1918 = memref.load %arg7[%c13_999] : memref<24xf32, #tpu.memory_space<smem>>
    %c4_1000 = arith.constant 4 : index
    %c0_1001 = arith.constant 0 : index
    %c0_1002 = arith.constant 0 : index
    %1919 = vector.load %arg11[%c4_1000, %c0_1001, %c0_1002] : memref<8x8x16xf32, #tpu.memory_space<vmem>>, vector<1x8x16xf32>
    %1920 = vector.shape_cast %1919 : vector<1x8x16xf32> to vector<8x16xf32>
    %1921 = vector.broadcast %1918 : f32 to vector<8x16xf32>
    %1922 = arith.mulf %1921, %1920 : vector<8x16xf32>
    %1923 = arith.addf %1917, %1922 : vector<8x16xf32>
    %c16_1003 = arith.constant 16 : index
    %1924 = memref.load %arg7[%c16_1003] : memref<24xf32, #tpu.memory_space<smem>>
    %c5_1004 = arith.constant 5 : index
    %c0_1005 = arith.constant 0 : index
    %c0_1006 = arith.constant 0 : index
    %1925 = vector.load %arg11[%c5_1004, %c0_1005, %c0_1006] : memref<8x8x16xf32, #tpu.memory_space<vmem>>, vector<1x8x16xf32>
    %1926 = vector.shape_cast %1925 : vector<1x8x16xf32> to vector<8x16xf32>
    %1927 = vector.broadcast %1924 : f32 to vector<8x16xf32>
    %1928 = arith.mulf %1927, %1926 : vector<8x16xf32>
    %1929 = arith.addf %1923, %1928 : vector<8x16xf32>
    %c19_1007 = arith.constant 19 : index
    %1930 = memref.load %arg7[%c19_1007] : memref<24xf32, #tpu.memory_space<smem>>
    %c6_1008 = arith.constant 6 : index
    %c0_1009 = arith.constant 0 : index
    %c0_1010 = arith.constant 0 : index
    %1931 = vector.load %arg11[%c6_1008, %c0_1009, %c0_1010] : memref<8x8x16xf32, #tpu.memory_space<vmem>>, vector<1x8x16xf32>
    %1932 = vector.shape_cast %1931 : vector<1x8x16xf32> to vector<8x16xf32>
    %1933 = vector.broadcast %1930 : f32 to vector<8x16xf32>
    %1934 = arith.mulf %1933, %1932 : vector<8x16xf32>
    %1935 = arith.addf %1929, %1934 : vector<8x16xf32>
    %c22_1011 = arith.constant 22 : index
    %1936 = memref.load %arg7[%c22_1011] : memref<24xf32, #tpu.memory_space<smem>>
    %c7_1012 = arith.constant 7 : index
    %c0_1013 = arith.constant 0 : index
    %c0_1014 = arith.constant 0 : index
    %1937 = vector.load %arg11[%c7_1012, %c0_1013, %c0_1014] : memref<8x8x16xf32, #tpu.memory_space<vmem>>, vector<1x8x16xf32>
    %1938 = vector.shape_cast %1937 : vector<1x8x16xf32> to vector<8x16xf32>
    %1939 = vector.broadcast %1936 : f32 to vector<8x16xf32>
    %1940 = arith.mulf %1939, %1938 : vector<8x16xf32>
    %1941 = arith.addf %1935, %1940 : vector<8x16xf32>
    %c1_1015 = arith.constant 1 : index
    %1942 = memref.load %arg8[%c1_1015] : memref<3xf32, #tpu.memory_space<smem>>
    %1943 = vector.broadcast %1942 : f32 to vector<8x16xf32>
    %1944 = arith.addf %1941, %1943 : vector<8x16xf32>
    %c0_1016 = arith.constant 0 : index
    %c1_1017 = arith.constant 1 : index
    %c0_1018 = arith.constant 0 : index
    %c0_1019 = arith.constant 0 : index
    %1945 = vector.load %arg9[%c0_1016, %c1_1017, %c0_1018, %c0_1019] : memref<1x3x8x16xf32, #tpu.memory_space<vmem>>, vector<1x1x8x16xf32>
    %1946 = vector.shape_cast %1945 : vector<1x1x8x16xf32> to vector<8x16xf32>
    %1947 = vector.shape_cast %1944 : vector<8x16xf32> to vector<1x1x8x16xf32>
    tpu.vector_store %arg9[%c0_1016, %c1_1017, %c0_1018, %c0_1019], %1947 {strides = array<i32>} : memref<1x3x8x16xf32, #tpu.memory_space<vmem>>, vector<1x1x8x16xf32>,
    %cst_1020 = arith.constant 0.000000e+00 : f32
    %1948 = vector.broadcast %cst_1020 : f32 to vector<8x16xf32>
    %c2_1021 = arith.constant 2 : index
    %1949 = memref.load %arg7[%c2_1021] : memref<24xf32, #tpu.memory_space<smem>>
    %c0_1022 = arith.constant 0 : index
    %c0_1023 = arith.constant 0 : index
    %c0_1024 = arith.constant 0 : index
    %1950 = vector.load %arg11[%c0_1022, %c0_1023, %c0_1024] : memref<8x8x16xf32, #tpu.memory_space<vmem>>, vector<1x8x16xf32>
    %1951 = vector.shape_cast %1950 : vector<1x8x16xf32> to vector<8x16xf32>
    %1952 = vector.broadcast %1949 : f32 to vector<8x16xf32>
    %1953 = arith.mulf %1952, %1951 : vector<8x16xf32>
    %1954 = arith.addf %1948, %1953 : vector<8x16xf32>
    %c5_1025 = arith.constant 5 : index
    %1955 = memref.load %arg7[%c5_1025] : memref<24xf32, #tpu.memory_space<smem>>
    %c1_1026 = arith.constant 1 : index
    %c0_1027 = arith.constant 0 : index
    %c0_1028 = arith.constant 0 : index
    %1956 = vector.load %arg11[%c1_1026, %c0_1027, %c0_1028] : memref<8x8x16xf32, #tpu.memory_space<vmem>>, vector<1x8x16xf32>
    %1957 = vector.shape_cast %1956 : vector<1x8x16xf32> to vector<8x16xf32>
    %1958 = vector.broadcast %1955 : f32 to vector<8x16xf32>
    %1959 = arith.mulf %1958, %1957 : vector<8x16xf32>
    %1960 = arith.addf %1954, %1959 : vector<8x16xf32>
    %c8_1029 = arith.constant 8 : index
    %1961 = memref.load %arg7[%c8_1029] : memref<24xf32, #tpu.memory_space<smem>>
    %c2_1030 = arith.constant 2 : index
    %c0_1031 = arith.constant 0 : index
    %c0_1032 = arith.constant 0 : index
    %1962 = vector.load %arg11[%c2_1030, %c0_1031, %c0_1032] : memref<8x8x16xf32, #tpu.memory_space<vmem>>, vector<1x8x16xf32>
    %1963 = vector.shape_cast %1962 : vector<1x8x16xf32> to vector<8x16xf32>
    %1964 = vector.broadcast %1961 : f32 to vector<8x16xf32>
    %1965 = arith.mulf %1964, %1963 : vector<8x16xf32>
    %1966 = arith.addf %1960, %1965 : vector<8x16xf32>
    %c11_1033 = arith.constant 11 : index
    %1967 = memref.load %arg7[%c11_1033] : memref<24xf32, #tpu.memory_space<smem>>
    %c3_1034 = arith.constant 3 : index
    %c0_1035 = arith.constant 0 : index
    %c0_1036 = arith.constant 0 : index
    %1968 = vector.load %arg11[%c3_1034, %c0_1035, %c0_1036] : memref<8x8x16xf32, #tpu.memory_space<vmem>>, vector<1x8x16xf32>
    %1969 = vector.shape_cast %1968 : vector<1x8x16xf32> to vector<8x16xf32>
    %1970 = vector.broadcast %1967 : f32 to vector<8x16xf32>
    %1971 = arith.mulf %1970, %1969 : vector<8x16xf32>
    %1972 = arith.addf %1966, %1971 : vector<8x16xf32>
    %c14_1037 = arith.constant 14 : index
    %1973 = memref.load %arg7[%c14_1037] : memref<24xf32, #tpu.memory_space<smem>>
    %c4_1038 = arith.constant 4 : index
    %c0_1039 = arith.constant 0 : index
    %c0_1040 = arith.constant 0 : index
    %1974 = vector.load %arg11[%c4_1038, %c0_1039, %c0_1040] : memref<8x8x16xf32, #tpu.memory_space<vmem>>, vector<1x8x16xf32>
    %1975 = vector.shape_cast %1974 : vector<1x8x16xf32> to vector<8x16xf32>
    %1976 = vector.broadcast %1973 : f32 to vector<8x16xf32>
    %1977 = arith.mulf %1976, %1975 : vector<8x16xf32>
    %1978 = arith.addf %1972, %1977 : vector<8x16xf32>
    %c17_1041 = arith.constant 17 : index
    %1979 = memref.load %arg7[%c17_1041] : memref<24xf32, #tpu.memory_space<smem>>
    %c5_1042 = arith.constant 5 : index
    %c0_1043 = arith.constant 0 : index
    %c0_1044 = arith.constant 0 : index
    %1980 = vector.load %arg11[%c5_1042, %c0_1043, %c0_1044] : memref<8x8x16xf32, #tpu.memory_space<vmem>>, vector<1x8x16xf32>
    %1981 = vector.shape_cast %1980 : vector<1x8x16xf32> to vector<8x16xf32>
    %1982 = vector.broadcast %1979 : f32 to vector<8x16xf32>
    %1983 = arith.mulf %1982, %1981 : vector<8x16xf32>
    %1984 = arith.addf %1978, %1983 : vector<8x16xf32>
    %c20_1045 = arith.constant 20 : index
    %1985 = memref.load %arg7[%c20_1045] : memref<24xf32, #tpu.memory_space<smem>>
    %c6_1046 = arith.constant 6 : index
    %c0_1047 = arith.constant 0 : index
    %c0_1048 = arith.constant 0 : index
    %1986 = vector.load %arg11[%c6_1046, %c0_1047, %c0_1048] : memref<8x8x16xf32, #tpu.memory_space<vmem>>, vector<1x8x16xf32>
    %1987 = vector.shape_cast %1986 : vector<1x8x16xf32> to vector<8x16xf32>
    %1988 = vector.broadcast %1985 : f32 to vector<8x16xf32>
    %1989 = arith.mulf %1988, %1987 : vector<8x16xf32>
    %1990 = arith.addf %1984, %1989 : vector<8x16xf32>
    %c23_1049 = arith.constant 23 : index
    %1991 = memref.load %arg7[%c23_1049] : memref<24xf32, #tpu.memory_space<smem>>
    %c7_1050 = arith.constant 7 : index
    %c0_1051 = arith.constant 0 : index
    %c0_1052 = arith.constant 0 : index
    %1992 = vector.load %arg11[%c7_1050, %c0_1051, %c0_1052] : memref<8x8x16xf32, #tpu.memory_space<vmem>>, vector<1x8x16xf32>
    %1993 = vector.shape_cast %1992 : vector<1x8x16xf32> to vector<8x16xf32>
    %1994 = vector.broadcast %1991 : f32 to vector<8x16xf32>
    %1995 = arith.mulf %1994, %1993 : vector<8x16xf32>
    %1996 = arith.addf %1990, %1995 : vector<8x16xf32>
    %c2_1053 = arith.constant 2 : index
    %1997 = memref.load %arg8[%c2_1053] : memref<3xf32, #tpu.memory_space<smem>>
    %1998 = vector.broadcast %1997 : f32 to vector<8x16xf32>
    %1999 = arith.addf %1996, %1998 : vector<8x16xf32>
    %c0_1054 = arith.constant 0 : index
    %c2_1055 = arith.constant 2 : index
    %c0_1056 = arith.constant 0 : index
    %c0_1057 = arith.constant 0 : index
    %2000 = vector.load %arg9[%c0_1054, %c2_1055, %c0_1056, %c0_1057] : memref<1x3x8x16xf32, #tpu.memory_space<vmem>>, vector<1x1x8x16xf32>
    %2001 = vector.shape_cast %2000 : vector<1x1x8x16xf32> to vector<8x16xf32>
    %2002 = vector.shape_cast %1999 : vector<8x16xf32> to vector<1x1x8x16xf32>
    tpu.vector_store %arg9[%c0_1054, %c2_1055, %c0_1056, %c0_1057], %2002 {strides = array<i32>} : memref<1x3x8x16xf32, #tpu.memory_space<vmem>>, vector<1x1x8x16xf32>,
    return
  }
  func.func @transform_0(%arg0: i32, %arg1: i32) -> (i32, i32, i32, i32) {
    %c0_i32 = arith.constant 0 : i32
    %c0_i32_0 = arith.constant 0 : i32
    %c0_i32_1 = arith.constant 0 : i32
    return %arg0, %c0_i32, %arg1, %c0_i32_0 : i32, i32, i32, i32
  }
  func.func @transform_1(%arg0: i32, %arg1: i32) -> (i32, i32, i32, i32, i32) {
    %c0_i32 = arith.constant 0 : i32
    %c0_i32_0 = arith.constant 0 : i32
    %c0_i32_1 = arith.constant 0 : i32
    %c0_i32_2 = arith.constant 0 : i32
    return %arg0, %c0_i32, %arg1, %c0_i32_0, %c0_i32_1 : i32, i32, i32, i32, i32
  }
  func.func @transform_2(%arg0: i32, %arg1: i32) -> i32 {
    %c0_i32 = arith.constant 0 : i32
    %c0_i32_0 = arith.constant 0 : i32
    return %c0_i32 : i32
  }
  func.func @transform_3(%arg0: i32, %arg1: i32) -> i32 {
    %c0_i32 = arith.constant 0 : i32
    %c0_i32_0 = arith.constant 0 : i32
    return %c0_i32 : i32
  }
  func.func @transform_4(%arg0: i32, %arg1: i32) -> i32 {
    %c0_i32 = arith.constant 0 : i32
    %c0_i32_0 = arith.constant 0 : i32
    return %c0_i32 : i32
  }
  func.func @transform_5(%arg0: i32, %arg1: i32) -> i32 {
    %c0_i32 = arith.constant 0 : i32
    %c0_i32_0 = arith.constant 0 : i32
    return %c0_i32 : i32
  }
  func.func @transform_6(%arg0: i32, %arg1: i32) -> i32 {
    %c0_i32 = arith.constant 0 : i32
    %c0_i32_0 = arith.constant 0 : i32
    return %c0_i32 : i32
  }
  func.func @transform_7(%arg0: i32, %arg1: i32) -> (i32, i32, i32, i32) {
    %c0_i32 = arith.constant 0 : i32
    %c0_i32_0 = arith.constant 0 : i32
    %c0_i32_1 = arith.constant 0 : i32
    return %arg0, %c0_i32, %arg1, %c0_i32_0 : i32, i32, i32, i32
  }
}

</mosaic_0001>

<bundles_post_ra>
// kernel: tpu_custom_call.1
= control target key start
LH: loop header
LB: loop body
LE: loop exit
PB: predicated region body
PF: predicated region fallthrough
CT: control target
= control target key end

     0   :  { %s5595_s0 = inlined_call_operand.hbm [shape: f32[2,4,16,16], index: 0, kind: input, shape index: {}]   ;;  %s5596_s1 = inlined_call_operand.hbm [shape: f32[2,4,2,2,16], index: 1, kind: input, shape index: {}]   ;;  %s5597_s2 = inlined_call_operand.vmem [shape: f32[288], index: 2, kind: input, shape index: {}]   ;;  %s5598_s3 = inlined_call_operand.vmem [shape: f32[8], index: 3, kind: input, shape index: {}]   ;;  %s5599_s4 = inlined_call_operand.vmem [shape: f32[8], index: 4, kind: input, shape index: {}]   ;;  %s5600_s5 = inlined_call_operand.vmem [shape: f32[24], index: 5, kind: input, shape index: {}]   ;;  %s5601_s6 = inlined_call_operand.vmem [shape: f32[3], index: 6, kind: input, shape index: {}]   ;;  %s5602_s7 = inlined_call_operand.hbm [shape: f32[2,3,16,16], index: 7, kind: output, shape index: {}]  }
   0x1   :  { %5612 = sst [smem:[#allocation29_spill]] %s5595_s0 }
   0x2   :  { %5613 = sst [smem:[#allocation30_spill]] %s5597_s2 }
   0x3   :  { %5614 = sst [smem:[#allocation31_spill]] %s5598_s3 }
   0x4   :  { %5615 = sst [smem:[#allocation32_spill]] %s5599_s4 }
   0x5   :  { %5616 = sst [smem:[#allocation33_spill]] %s5600_s5 }
   0x6   :  { %5617 = sst [smem:[#allocation34_spill]] %s5601_s6 }
   0x7   :  { %12 = vsyncpa [#allocation5], 0 }
   0x8   :  { %14 = vsyncpa [#allocation5 + $0x1], 0 }
   0x9   :  { %15 = vsyncpa [#allocation9], 0 }
   0xa   :  { %17 = vsyncpa [#allocation9 + $0x1], 0 }
   0xb   :  { %18 = vsyncpa [#allocation7], 0 }
   0xc   :  { %19 = vsyncpa [#allocation12], 0 }
   0xd   :  { %20 = vsyncpa [#allocation15], 0 }
   0xe   :  { %21 = vsyncpa [#allocation6], 0 }
   0xf   :  { %23 = vsyncpa [#allocation6 + $0x1], 0  ;;  %s3759_s24 = smov 0   ;;  %s3761_s25 = smov 0  }
  0x10   :  { %s3763_s26 = smov 0   ;;  %s3765_s27 = smov 0  }
  0x11   :  { %s3767_s28 = smov 0   ;;  %s3769_s29 = smov 0  }
  0x12   :  { %s3771_s30 = smov 0   ;;  %s3773_s8 = smov 0  }
  0x13 LB: > { %5618 = sst [smem:[#allocation24_spill]] %s3669_s24  ;;  %s2924_s9 = sadd.s32 4294967295, %s3697_s8   ;;  %s3697_s8 = sphi %s3773_s8, %s29_s8   ;;  %s3693_s30 = sphi %s3771_s30, %s5648_s30   ;;  %s3689_s29 = sphi %s3769_s29, %s5653_s29   ;;  %s3685_s28 = sphi %s3767_s28, %s5646_s28   ;;  %s3681_s27 = sphi %s3765_s27, %s5652_s27   ;;  %s3677_s26 = sphi %s3763_s26, %s5651_s26   ;;  %s3673_s25 = sphi %s3761_s25, %s5650_s25   ;;  %s3669_s24 = sphi %s3759_s24, %s5649_s24  }
  0x14   : > { %5619 = sst [smem:[#allocation25_spill]] %s3693_s30  ;;  %s2925_s10 = sadd.s32 4294967294, %s3697_s8  }
  0x15   : > { %p63_p0 = scmp.ne.s32.totalorder %s3673_s25, %s3669_s24  ;;  %p3803_p1 = scmp.eq.s32.totalorder %s2924_s9, 0 }
  0x16   : > { %p3807_p2 = scmp.eq.s32.totalorder %s2924_s9, 3  ;;  %p228_p3 = scmp.eq.s32.totalorder %s2925_s10, 3 }
  0x17   : > { %s5620_s11 = scalar_select %p3803_p1, 1, 0 }
  0x18   : > { %s5621_s12 = scalar_select %p3807_p2, 1, 0 }
  0x19   : > { %p3813_p4 = por %p3803_p1, %p63_p0  ;;  %p2926_p5 = scmp.ge.s32.totalorder %s3697_s8, 1 }
  0x1a   : > { %p3818_p6 = por %p228_p3, %p63_p0  ;;  %p235_p7 = scmp.lt.s32.totalorder %s3697_s8, 5 }
  0x1b   : > { %s5622_s13 = scalar_select %p3813_p4, 1, 0 }
  0x1c   : > { %s5623_s14 = scalar_select %p3818_p6, 1, 0 }
  0x1d   : > { %s5625_s3 = sld [smem:[#allocation31_spill]]  ;;  %p3826_p8 = pnand %p2926_p5, %p235_p7 }
  0x1e   : > { %5624 = sst [smem:[#allocation26_spill]] %s5623_s14  ;;  %s5627_s5 = sld [smem:[#allocation33_spill]] }
  0x1f   : > { %s5626_s18 = scalar_select %p3826_p8, 1, 0 }
  0x20   : > { %p3306_p9 = pneg %p3826_p8 }
  0x22   : > { %p3837_p10 = pnand %p3306_p9, %p3803_p1 }
  0x23   : > { %s259_s17 = sshll.u32 %s5625_s3, 4  ;;  %s260_s17 = int_to_ptr.vmem [resolvable:$true] %s259_s17 }
  0x24   : > { %s281_s21 = sshll.u32 %s5627_s5, 4  ;;  %s3448_s23 = scalar_lea.vmem %s260_s17, 16  ;;  %s282_s21 = int_to_ptr.vmem [resolvable:$true] %s281_s21 }
  0x25   : > { %p3449_p11 = scmp.ne.s32.totalorder %s260_s17, %s3448_s23  ;;  %p3843_p12 = pneg %p3837_p10 }
  0x26   : > { %p3456_p3 = scmp.lt.s32.totalorder %s260_s17, %s260_s17  ;;  %p3457_p5 = scmp.lt.s32.totalorder %s3448_s23, %s3448_s23 }
  0x27   : > { %p3451_p13 = pnand %p3843_p12, %p3449_p11 }
  0x28   : > { %p3458_p7 = por %p3457_p5, %p3456_p3 }
  0x29   : > { %p3452_p0 = pneg %p3451_p13 }
  0x2b   : > { %p3459_p6 = pnand %p3458_p7, %p3452_p0 }
  0x2d   : > { %3462 = shalt.err (!%p3459_p6)
}
  0x2e   : > { %s3699_s10 = smov [#allocation11]   ;;  %s3463_s15 = scalar_lea.vmem %s282_s21, 16 }
  0x2f   : > { %3312 = dma.vmem_to_smem (!%p3837_p10), %s260_s17, 16, %s3699_s10, [#allocation12]  }
  0x30   : > { %p3464_p9 = scmp.ne.s32.totalorder %s282_s21, %s3463_s15  ;;  %p3471_p8 = scmp.lt.s32.totalorder %s282_s21, %s282_s21 }
  0x31   : > { %p3472_p2 = scmp.lt.s32.totalorder %s3463_s15, %s3463_s15 }
  0x32   : > { %p3466_p1 = pnand %p3464_p9, %p3843_p12 }
  0x33   : > { %p3473_p11 = por %p3472_p2, %p3471_p8 }
  0x34   : > { %p3467_p4 = pneg %p3466_p1 }
  0x36   : > { %p3474_p13 = pnand %p3473_p11, %p3467_p4 }
  0x38   : > { %3477 = shalt.err (!%p3474_p13)
}
  0x39   : > { %s3700_s16 = smov [#allocation14]   ;;  %s5630_s2 = sld [smem:[#allocation30_spill]] }
  0x3a   : > { %3318 = dma.vmem_to_smem (!%p3837_p10), %s282_s21, 16, %s3700_s16, [#allocation15]  }
  0x3b   : > { %s5631_s4 = sld [smem:[#allocation32_spill]] }
  0x3f   : > { %s248_s23 = sshll.u32 %s5630_s2, 4  ;;  %s249_s23 = int_to_ptr.vmem [resolvable:$true] %s248_s23 }
  0x40   : > { %s3478_s5 = scalar_lea.vmem %s249_s23, 48  ;;  %s3485_s15 = scalar_lea.vmem %s249_s23, 64 }
  0x41   : > { %s270_s3 = sshll.u32 %s5631_s4, 4  ;;  %p3479_p1 = scmp.ne.s32.totalorder %s249_s23, %s3478_s5  ;;  %s271_s3 = int_to_ptr.vmem [resolvable:$true] %s270_s3 }
  0x42   : > { %p3486_p6 = scmp.lt.s32.totalorder %s249_s23, %s249_s23  ;;  %p3487_p8 = scmp.lt.s32.totalorder %s3485_s15, %s3478_s5 }
  0x43   : > { %p3481_p2 = pnand %p3479_p1, %p3843_p12 }
  0x44   : > { %p3488_p0 = por %p3487_p8, %p3486_p6 }
  0x45   : > { %p3482_p4 = pneg %p3481_p2 }
  0x47   : > { %p3489_p3 = pnand %p3488_p0, %p3482_p4 }
  0x49   : > { %3492 = shalt.err (!%p3489_p3)
}
  0x4a   : > { %s3701_s21 = smov [#allocation10]   ;;  %s3493_s16 = scalar_lea.vmem %s271_s3, 16 }
  0x4b   : > { %3309 = dma.vmem_to_smem (!%p3837_p10), %s249_s23, 48, %s3701_s21, [#allocation7]  }
  0x4c   : > { %p3494_p5 = scmp.ne.s32.totalorder %s271_s3, %s3493_s16  ;;  %p3501_p11 = scmp.lt.s32.totalorder %s271_s3, %s271_s3 }
  0x4d   : > { %p3502_p13 = scmp.lt.s32.totalorder %s3493_s16, %s3493_s16 }
  0x4e   : > { %p3496_p7 = pnand %p3494_p5, %p3843_p12 }
  0x4f   : > { %p3503_p1 = por %p3502_p13, %p3501_p11 }
  0x50   : > { %p3497_p9 = pneg %p3496_p7 }
  0x52   : > { %p3504_p2 = pnand %p3503_p1, %p3497_p9 }
  0x54   : > { %3507 = shalt.err (!%p3504_p2)
}
  0x55   : > { %s3702_s5 = smov [#allocation13]   ;;  %s5632_s6 = sld [smem:[#allocation34_spill]] }
  0x56   : > { %3315 = dma.vmem_to_smem (!%p3837_p10), %s271_s3, 16, %s3702_s5, [#allocation12]  }
  0x5b   : > { %s292_s23 = sshll.u32 %s5632_s6, 4  ;;  %s293_s23 = int_to_ptr.vmem [resolvable:$true] %s292_s23 }
  0x5c   : > { %s3508_s17 = scalar_lea.vmem %s293_s23, 16  ;;  %p3516_p0 = scmp.lt.s32.totalorder %s293_s23, %s293_s23 }
  0x5d   : > { %p3509_p4 = scmp.ne.s32.totalorder %s293_s23, %s3508_s17  ;;  %p3517_p3 = scmp.lt.s32.totalorder %s3508_s17, %s3508_s17 }
  0x5f   : > { %p3511_p6 = pnand %p3509_p4, %p3843_p12  ;;  %p3518_p5 = por %p3517_p3, %p3516_p0 }
  0x61   : > { %p3512_p8 = pneg %p3511_p6 }
  0x63   : > { %p3519_p7 = pnand %p3518_p5, %p3512_p8 }
  0x65   : > { %3522 = shalt.err (!%p3519_p7)
}
  0x66   : > { %s3703_s10 = smov [#allocation16]   ;;  %s38_s3 = sadd.s32 1, %s3689_s29 }
  0x67   : > { %3321 = dma.vmem_to_smem (!%p3837_p10), %s293_s23, 16, %s3703_s10, [#allocation15]  }
  0x68   : > { %p39_p12 = scmp.ge.s32.totalorder %s38_s3, 2  ;;  %s41_s9 = sadd.s32 1, %s3693_s30 }
  0x69   : > { %s50_s15 = sadd.s32 1, %s3677_s26  ;;  %p57_p9 = scmp.ne.s32.totalorder %s3677_s26, %s3673_s25 }
  0x6a   : > { %s5655_s3 = smov (%p39_p12, %s38_s3), 0  ;;  %s5657_s9 = smov (!%p39_p12, %s41_s9), %s3693_s30 }
  0x6b   : > { %5633 = sst [smem:[#allocation27_spill]] %s5655_s3  ;;  %s46_s22 = ssub.s32 %s3689_s29, %s5655_s3 }
  0x6c   : > { %p58_p11 = scmp.eq.s32.totalorder %s3697_s8, 0  ;;  %p43_p13 = scmp.ge.s32.totalorder %s5657_s9, 2 }
  0x6d   : > { %p5634_p1 = scmp.ne.s32.totalorder %s5621_s12, 0  ;;  %p3338_p4 = scmp.lt.s32.totalorder %s3697_s8, 4 }
  0x6e   : > { %p3893_p10 = por %p58_p11, %p57_p9  ;;  %s5659_s9 = smov (%p43_p13, %s5657_s9), 0 }
  0x6f   : > { %p3889_p2 = por %p5634_p1, %p57_p9  ;;  %5637 = sst [smem:[#allocation28_spill]] %s5659_s9 }
  0x70   : > { %s3901_s5 = sand.u32 1, %s3677_s26   ;;  %s2934_s19 = sshll.u32 %s3693_s30, 3 }
  0x71   : > { %s45_s12 = ssub.s32 %s3693_s30, %s5659_s9  ;;  %s2933_s23 = sshll.u32 %s3901_s5, 5 }
  0x72   : > { %s47_s20 = sor.u32 %s46_s22, %s45_s12  ;;  %s3908_s17 = sadd.s32 %s3689_s29, %s2934_s19 }
  0x73   : > { %p48_p6 = scmp.eq.s32.totalorder %s47_s20, 0  ;;  %s307_s10 = scalar_lea.vmem [#allocation4], %s2933_s23 }
  0x74   : > { %s315_s2 = sshll.u32 %s307_s10, 4  ;;  %s2935_s6 = sshll.u32 %s3908_s17, 7  ;;  %s3914_s2 = int_to_ptr.vmem [resolvable:$true] %s315_s2 }
  0x75   : > { %s3911_s4 = scalar_select %p48_p6, %s3677_s26, %s50_s15  }
  0x76   : > { %s5638_s0 = sld [smem:[#allocation29_spill]]  ;;  %p3925_p8 = pnand %p3338_p4, %p3893_p10 }
  0x77   : > { %s304_s15 = scalar_lea.sflag [#allocation5], %s3901_s5 }
  0x78   : > { %p3525_p3 = pneg %p3925_p8 }
  0x7c   : > { %s3919_s24 = scalar_lea.hbm %s5638_s0, %s2935_s6  ;;  %s3528_s3 = scalar_lea.hbm %s5638_s0, 2048 }
  0x7d   : > { %s3523_s19 = scalar_lea.hbm %s3919_s24, 512  ;;  %p3529_p12 = scmp.lt.u32.totalorder %s3919_s24, %s5638_s0 }
  0x7e   : > { %p3524_p0 = scmp.ne.s32.totalorder %s3919_s24, %s3523_s19  ;;  %p3530_p9 = scmp.lt.u32.totalorder %s3528_s3, %s3523_s19 }
  0x7f   : > { %p3532_p13 = scmp.lt.u32.totalorder %s3523_s19, %s3919_s24 }
  0x80   : > { %p3526_p5 = pnand %p3525_p3, %p3524_p0  ;;  %p3531_p11 = por %p3530_p9, %p3529_p12 }
  0x82   : > { %p3527_p7 = pneg %p3526_p5  ;;  %p3533_p1 = por %p3532_p13, %p3531_p11 }
  0x84   : > { %p3534_p10 = pnand %p3533_p1, %p3527_p7 }
  0x86   : > { %3537 = shalt.err (!%p3534_p10)
}
  0x87   : > { %s3538_s20 = scalar_lea.vmem %s3914_s2, 512  ;;  %s3704_s23 = smov [#allocation4]  }
  0x88   : > { %p3539_p4 = scmp.ne.s32.totalorder %s3914_s2, %s3538_s20  ;;  %s3543_s10 = sshll.u32 %s3704_s23, 4  ;;  %s3544_s10 = int_to_ptr.vmem [resolvable:$false] %s3543_s10 }
  0x89   : > { %s3545_s6 = scalar_lea.vmem %s3544_s10, 1024  ;;  %p3546_p5 = scmp.lt.s32.totalorder %s3914_s2, %s3544_s10 }
  0x8a   : > { %p3541_p6 = pnand %p3539_p4, %p3525_p3  ;;  %p3547_p12 = scmp.lt.s32.totalorder %s3545_s6, %s3538_s20 }
  0x8c   : > { %p3542_p0 = pneg %p3541_p6  ;;  %p3548_p9 = por %p3547_p12, %p3546_p5 }
  0x8e   : > { %p3549_p11 = pnand %p3548_p9, %p3542_p0 }
  0x90   : > { %3552 = shalt.err (!%p3549_p11)
}
  0x91   : > { %s3705_s19 = smov 256   ;;  %s3706_s14 = smov 128  }
  0x92   : > { %s3707_s3 = smov 8   ;;  %s2936_s16 = sshll.u32 %s3901_s5, 3 }
  0x93   : > { %3325 = dma.hbm_to_vmem [thread:$0]  (!%p3925_p8), %s3919_s24, 512, %s3914_s2, %s304_s15, %s3705_s19, %s3706_s14, %s3707_s3  }
  0x94   : > { %s2938_s12 = sshll.u32 %s3908_s17, 5  ;;  %s329_s6 = scalar_lea.vmem [#allocation8], %s2936_s16 }
  0x95   : > { %s3962_s10 = scalar_lea.hbm %s5596_s1, %s2938_s12  ;;  %s337_s0 = sshll.u32 %s329_s6, 4  ;;  %s3964_s0 = int_to_ptr.vmem [resolvable:$true] %s337_s0 }
  0x96   : > { %s326_s9 = scalar_lea.sflag [#allocation9], %s3901_s5  ;;  %s3553_s30 = scalar_lea.hbm %s3962_s10, 128 }
  0x97   : > { %p3554_p7 = scmp.ne.s32.totalorder %s3962_s10, %s3553_s30  ;;  %s3558_s17 = scalar_lea.hbm %s5596_s1, 512 }
  0x98   : > { %p3559_p10 = scmp.lt.u32.totalorder %s3962_s10, %s5596_s1  ;;  %p3560_p4 = scmp.lt.u32.totalorder %s3558_s17, %s3553_s30 }
  0x99   : > { %p3556_p13 = pnand %p3554_p7, %p3525_p3  ;;  %p3562_p0 = scmp.lt.u32.totalorder %s3553_s30, %s3962_s10 }
  0x9a   : > { %p3561_p6 = por %p3560_p4, %p3559_p10 }
  0x9b   : > { %p3557_p1 = pneg %p3556_p13 }
  0x9c   : > { %p3563_p5 = por %p3562_p0, %p3561_p6 }
  0x9e   : > { %p3564_p12 = pnand %p3563_p5, %p3557_p1 }
  0xa0   : > { %3567 = shalt.err (!%p3564_p12)
}
  0xa1   : > { %s3568_s14 = scalar_lea.vmem %s3964_s0, 128  ;;  %s3708_s3 = smov [#allocation8]  }
  0xa2   : > { %p3569_p9 = scmp.ne.s32.totalorder %s3964_s0, %s3568_s14  ;;  %s3573_s16 = sshll.u32 %s3708_s3, 4  ;;  %s3574_s16 = int_to_ptr.vmem [resolvable:$false] %s3573_s16 }
  0xa3   : > { %s3575_s12 = scalar_lea.vmem %s3574_s16, 256  ;;  %p3576_p13 = scmp.lt.s32.totalorder %s3964_s0, %s3574_s16 }
  0xa4   : > { %p3571_p11 = pnand %p3569_p9, %p3525_p3  ;;  %p3577_p10 = scmp.lt.s32.totalorder %s3575_s12, %s3568_s14 }
  0xa6   : > { %p3572_p7 = pneg %p3571_p11  ;;  %p3578_p4 = por %p3577_p10, %p3576_p13 }
  0xa8   : > { %p3579_p6 = pnand %p3578_p4, %p3572_p7 }
  0xaa   : > { %3582 = shalt.err (!%p3579_p6)
}
  0xab   : > { %s3709_s30 = smov 64   ;;  %s3710_s20 = smov 32  }
  0xac   : > { %s3711_s23 = smov 2   ;;  %p5640_p3 = scmp.ne.s32.totalorder %s5626_s18, 0 }
  0xad   : > { %3328 = dma.hbm_to_vmem [thread:$0]  (!%p3925_p8), %s3962_s10, 128, %s3964_s0, %s326_s9, %s3709_s30, %s3710_s20, %s3711_s23  }
  0xae   : > { %349 = sbr.rel (%p5640_p3) target bundleno = 866 (0x362), region = 48  ;;  %s3995_s6 = sand.u32 (!%p5640_p3), 1, %s3673_s25  }
  0xaf   : > { %s2940_s2 = sshll.u32 (!%p5640_p3), %s3995_s6, 5  ;;  %s352_s24 = scalar_lea.sflag (!%p5640_p3), [#allocation5], %s3995_s6 }
  0xb0   : > { %s355_s17 = scalar_lea.vmem (!%p5640_p3), [#allocation4], %s2940_s2  ;;  %p5641_p1 = scmp.ne.s32.totalorder (!%p5640_p3), %s5622_s13, 0 }
  0xb5   : > { %3644 = dma.done.wait (%p5641_p1), %s352_s24, 512  }
  0xb6   : > { %3646 = vsyncadd (%p5641_p1), %s352_s24, 4294966784  ;;  %s2941_s0 = sshll.u32 %s3995_s6, 3  ;;  %s361_s18 = scalar_lea.sflag [#allocation9], %s3995_s6 }
  0xb7   : > { %s4005_s9 = scalar_lea.vmem [#allocation8], %s2941_s0 }
  0xb8   : > { %3648 = dma.done.wait (%p5641_p1), %s361_s18, 128  }
  0xb9   : > { %3650 = vsyncadd (%p5641_p1), %s361_s18, 4294967168  ;;  %p5642_p8 = scmp.ne.s32.totalorder %s5620_s11, 0 }
  0xbb   : > { %3652 = dma.done.wait (%p5642_p8), [#allocation7], 48  }
  0xbc   : > { %3654 = vsyncadd (%p5642_p8), [#allocation7], 4294967248 }
  0xbd   : > { %3656 = dma.done.wait (%p5642_p8), [#allocation12], 32  }
  0xbe   : > { %3658 = vsyncadd (%p5642_p8), [#allocation12], 4294967264 }
  0xbf   : > { %3660 = dma.done.wait (%p5642_p8), [#allocation15], 32  }
  0xc0   : > { %3662 = vsyncadd (%p5642_p8), [#allocation15], 4294967264 }
  0xc1   : > { %389 = sfence }
  0xc2   : > { %v427_v0 = vld [vmem:[%s4005_s9 + $0x4] sm:$0x1]  ;;  %v425_v1 = vld [vmem:[%s4005_s9] sm:$0x1]  ;;  %s3712_s13 = smov 1   ;;  %v423_v6 = vld [vmem:[%s355_s17 + $0x10] sm:$0xff] }
  0xc3   : > { %441 = vrot.lane.b32.xlu1 %v427_v0, %s3712_s13  ;;  %437 = vrot.lane.b32.xlu0 %v425_v1, %s3712_s13  ;;  %v428_v2 = vld [vmem:[%s4005_s9 + $0x6] sm:$0x1]  ;;  %v426_v3 = vld [vmem:[%s4005_s9 + $0x2] sm:$0x1]  ;;  %vm449_vm0 = vcmask 7168   ;;  %vm454_vm1 = vcmask 138240  }
  0xc4   : > { %v422_v4 = vld [vmem:[%s355_s17 + $0x8] sm:$0xff]  ;;  %v421_v5 = vld [vmem:[%s355_s17] sm:$0xff]  ;;  %v424_v7 = vld [vmem:[%s355_s17 + $0x18] sm:$0xff]  ;;  %vm459_vm2 = vcmask 139264   ;;  %vm488_vm3 = vcmask 146432   ;;  %s4043_s11 = sld [smem:[#allocation10 + $0x40]] }
  0xc5   : > { %v429_v8 = vld [vmem:[%s4005_s9 + $0x1] sm:$0x1]  ;;  %v430_v9 = vld [vmem:[%s4005_s9 + $0x3] sm:$0x1]  ;;  %v431_v10 = vld [vmem:[%s4005_s9 + $0x5] sm:$0x1] }
  0xc6   : > { %v432_v11 = vld [vmem:[%s4005_s9 + $0x7] sm:$0x1]  ;;  %s4045_s5 = sld [smem:[#allocation10 + $0x20]]  ;;  %s3713_s16 = smov 126   ;;  %vm783_vm4 = vcmask 130048  }
  0xc7   : > { %443 = vrot.lane.b32.xlu1 %v428_v2, %s3712_s13  ;;  %439 = vrot.lane.b32.xlu0 %v426_v3, %s3712_s13  ;;  %s4053_s22 = sld [smem:[#allocation10 + $0xa0]]  ;;  %s3714_s12 = smov 127  }
  0xc8   : > { %s4055_s10 = sld [smem:[#allocation10 + $0x80]] }
  0xc9   : > { %s4065_s15 = sld [smem:[#allocation10 + $0x100]] }
  0xca   : > { %v535_v38 = vstv %s4043_s11  ;;  %s4067_s19 = sld [smem:[#allocation10 + $0xe0]] }
  0xcb   : > { %470 = vrot.lane.b32.xlu1 %v422_v4, %s3712_s13  ;;  %468 = vrot.lane.b32.xlu0 %v421_v5, %s3712_s13  ;;  %s4083_s14 = sld [smem:[#allocation10 + $0x48]] }
  0xcc   : > { %v527_v39 = vstv %s4045_s5  ;;  %s2956_s3 = sld [smem:[#allocation10 + $0x28]] }
  0xcd   : > { %v556_v50 = vstv %s4053_s22  ;;  %s2960_s30 = sld [smem:[#allocation10 + $0xa8]] }
  0xce   : > { %v548_v51 = vstv %s4055_s10  ;;  %s2959_s20 = sld [smem:[#allocation10 + $0x88]] }
  0xcf   : > { %472 = vrot.lane.b32.xlu0 %v423_v6, %s3712_s13  ;;  %474 = vrot.lane.b32.xlu1 %v424_v7, %s3712_s13  ;;  %v577_v58 = vstv %s4065_s15  ;;  %s2963_s23 = sld [smem:[#allocation10 + $0x108]] }
  0xd0   : > { %v569_v59 = vstv %s4067_s19  ;;  %s2962_s2 = sld [smem:[#allocation10 + $0xe8]] }
  0xd1   : > { %v599_v0 = vstv %s4083_s14  ;;  %s2966_s24 = sld [smem:[#allocation10 + $0x50]]  ;;  %s2984_s14 = sld [smem:[#allocation10 + $0x41]] }
  0xd2   : > { %v591_v1 = vstv %s2956_s3  ;;  %s2965_s17 = sld [smem:[#allocation10 + $0x30]]  ;;  %s2983_s3 = sld [smem:[#allocation10 + $0x21]] }
  0xd3   : > { %497 = vrot.lane.b32.xlu0 %v429_v8, %s3712_s13  ;;  %499 = vrot.lane.b32.xlu1 %v430_v9, %s3712_s13  ;;  %v620_v5 = vstv %s2960_s30  ;;  %s2969_s0 = sld [smem:[#allocation10 + $0xb0]]  ;;  %s2987_s30 = sld [smem:[#allocation10 + $0xa1]] }
  0xd4   : > { %v612_v6 = vstv %s2959_s20  ;;  %s2968_s18 = sld [smem:[#allocation10 + $0x90]]  ;;  %s2986_s20 = sld [smem:[#allocation10 + $0x81]] }
  0xd5   : > { %s2972_s9 = sld [smem:[#allocation10 + $0x110]] }
  0xd6   : > { %s2975_s11 = sld [smem:[#allocation10 + $0x58]] }
  0xd7   : > { %501 = vrot.lane.b32.xlu0 %v431_v10, %s3712_s13  ;;  %503 = vrot.lane.b32.xlu1 %v432_v11, %s3712_s13  ;;  %v641_v10 = vstv %s2963_s23  ;;  %v633_v11 = vstv %s2962_s2  ;;  %s2971_s13 = sld [smem:[#allocation10 + $0xf0]]  ;;  %s2990_s23 = sld [smem:[#allocation10 + $0x101]] }
  0xd8   : > { %s2974_s5 = sld [smem:[#allocation10 + $0x38]]  ;;  %s2989_s2 = sld [smem:[#allocation10 + $0xe1]] }
  0xd9   : > { %s2978_s22 = sld [smem:[#allocation10 + $0xb8]] }
  0xda   : > { %s2977_s10 = sld [smem:[#allocation10 + $0x98]] }
  0xdb   : > { %s2981_s15 = sld [smem:[#allocation10 + $0x118]] }
  0xdc   : > { %s2980_s19 = sld [smem:[#allocation10 + $0xf8]] }
 0x135   : > { %v442_v12 = vpop.permute.xlu1 %441  ;;  %v438_v13 = vpop.permute.xlu0 %437 }
 0x136   : > { %v452_v14 = vsel %vm449_vm0, 0.0, %v442_v12  ;;  %v450_v15 = vsel %vm449_vm0, 0.0, %v438_v13 }
 0x137   : > { %v457_v16 = vsel %vm454_vm1, %v452_v14, 0.0  ;;  %v455_v17 = vsel %vm454_vm1, %v450_v15, 0.0  ;;  %v663_v15 = vstv %s2966_s24  ;;  %s2993_s24 = sld [smem:[#allocation10 + $0x49]] }
 0x138   : > { %462 = vst.msk [vmem:[#allocation2 + $0x20] sm:$0x1] %vm459_vm2, %v457_v16  ;;  %460 = vst.msk [vmem:[#allocation2] sm:$0x1] %vm459_vm2, %v455_v17  ;;  %v655_v16 = vstv %s2965_s17  ;;  %s2992_s17 = sld [smem:[#allocation10 + $0x29]] }
 0x139   : > { %v444_v18 = vpop.permute.xlu1 %443  ;;  %v440_v19 = vpop.permute.xlu0 %439 }
 0x13a   : > { %v453_v20 = vsel %vm449_vm0, 0.0, %v444_v18  ;;  %v451_v21 = vsel %vm449_vm0, 0.0, %v440_v19 }
 0x13b   : > { %v458_v22 = vsel %vm454_vm1, %v453_v20, 0.0  ;;  %v456_v23 = vsel %vm454_vm1, %v451_v21, 0.0  ;;  %v684_v20 = vstv %s2969_s0  ;;  %v676_v21 = vstv %s2968_s18  ;;  %s2996_s0 = sld [smem:[#allocation10 + $0xa9]] }
 0x13c   : > { %463 = vst.msk [vmem:[#allocation2 + $0x30] sm:$0x1] %vm459_vm2, %v458_v22  ;;  %461 = vst.msk [vmem:[#allocation2 + $0x10] sm:$0x1] %vm459_vm2, %v456_v23  ;;  %s2995_s18 = sld [smem:[#allocation10 + $0x89]] }
 0x13d   : > { %v471_v24 = vpop.permute.xlu1 %470  ;;  %v469_v25 = vpop.permute.xlu0 %468 }
 0x13e   : > { %v481_v26 = vsel %vm449_vm0, 0.0, %v471_v24  ;;  %v480_v27 = vsel %vm449_vm0, 0.0, %v469_v25  ;;  %v705_v25 = vstv %s2972_s9  ;;  %s2999_s9 = sld [smem:[#allocation10 + $0x109]] }
 0x13f   : > { %v485_v28 = vsel %vm454_vm1, %v481_v26, 0.0  ;;  %v484_v29 = vsel %vm454_vm1, %v480_v27, 0.0  ;;  %v697_v26 = vstv %s2971_s13  ;;  %s2998_s13 = sld [smem:[#allocation10 + $0xe9]] }
 0x140   : > { %490 = vst.msk [vmem:[#allocation2 + $0x11] sm:$0xff] %vm488_vm3, %v485_v28  ;;  %489 = vst.msk [vmem:[#allocation2 + $0x1] sm:$0xff] %vm488_vm3, %v484_v29 }
 0x141   : > { %v473_v30 = vpop.permute.xlu0 %472  ;;  %v475_v31 = vpop.permute.xlu1 %474 }
 0x142   : > { %v482_v32 = vsel %vm449_vm0, 0.0, %v473_v30  ;;  %v483_v33 = vsel %vm449_vm0, 0.0, %v475_v31  ;;  %v727_v30 = vstv %s2975_s11  ;;  %v719_v31 = vstv %s2974_s5  ;;  %s3002_s11 = sld [smem:[#allocation10 + $0x51]] }
 0x143   : > { %v486_v34 = vsel %vm454_vm1, %v482_v32, 0.0  ;;  %v487_v35 = vsel %vm454_vm1, %v483_v33, 0.0  ;;  %s3001_s5 = sld [smem:[#allocation10 + $0x31]] }
 0x144   : > { %491 = vst.msk [vmem:[#allocation2 + $0x21] sm:$0xff] %vm488_vm3, %v486_v34  ;;  %492 = vst.msk [vmem:[#allocation2 + $0x31] sm:$0xff] %vm488_vm3, %v487_v35  ;;  %v748_v35 = vstv %s2978_s22  ;;  %s3005_s22 = sld [smem:[#allocation10 + $0xb1]] }
 0x145   : > { %v498_v36 = vpop.permute.xlu0 %497  ;;  %v500_v37 = vpop.permute.xlu1 %499 }
 0x146   : > { %v509_v40 = vsel %vm449_vm0, 0.0, %v498_v36  ;;  %v510_v41 = vsel %vm449_vm0, 0.0, %v500_v37  ;;  %v740_v36 = vstv %s2977_s10  ;;  %s3004_s10 = sld [smem:[#allocation10 + $0x91]] }
 0x147   : > { %v513_v42 = vsel %vm454_vm1, %v509_v40, 0.0  ;;  %v514_v43 = vsel %vm454_vm1, %v510_v41, 0.0  ;;  %v4073_v44 = vld [vmem:[#allocation2] sm:$0xff]  ;;  %v4103_v63 = vld [vmem:[#allocation2 + $0x10] sm:$0xff]  ;;  %v769_v40 = vstv %s2981_s15  ;;  %v761_v41 = vstv %s2980_s19  ;;  %s3008_s15 = sld [smem:[#allocation10 + $0x111]] }
 0x148   : > { %517 = vst.msk [vmem:[#allocation2 + $0x9] sm:$0x1] %vm459_vm2, %v513_v42  ;;  %518 = vst.msk [vmem:[#allocation2 + $0x19] sm:$0x1] %vm459_vm2, %v514_v43  ;;  %v536_v45 = vmul.f32 %v535_v38, %v4073_v44  ;;  %v528_v46 = vmul.f32 %v527_v39, %v4073_v44  ;;  %v4079_v49 = vld [vmem:[#allocation2 + $0x1] sm:$0xff]  ;;  %v600_v2 = vmul.f32 %v599_v0, %v4103_v63  ;;  %v4110_v4 = vld [vmem:[#allocation2 + $0x11] sm:$0xff]  ;;  %v883_v0 = vstv %s2996_s0 }
 0x149   : > { %v502_v47 = vpop.permute.xlu0 %501  ;;  %v504_v48 = vpop.permute.xlu1 %503  ;;  %v557_v56 = vmul.f32 %v556_v50, %v4079_v49  ;;  %v549_v57 = vmul.f32 %v548_v51, %v4079_v49  ;;  %v592_v3 = vmul.f32 %v591_v1, %v4103_v63  ;;  %v621_v7 = vmul.f32 %v620_v5, %v4110_v4  ;;  %s3007_s19 = sld [smem:[#allocation10 + $0xf1]]  ;;  %s3025_s0 = sld [smem:[#allocation10 + $0xa2]] }
 0x14a   : > { %v511_v52 = vsel %vm449_vm0, 0.0, %v502_v47  ;;  %538 = vrot.lane.b32.xlu1 %v536_v45, %s3713_s16  ;;  %530 = vrot.lane.b32.xlu0 %v528_v46, %s3714_s12  ;;  %v512_v53 = vsel %vm449_vm0, 0.0, %v504_v48  ;;  %v613_v8 = vmul.f32 %v612_v6, %v4110_v4  ;;  %v799_v45 = vstv %s2984_s14  ;;  %s3011_s14 = sld [smem:[#allocation10 + $0x59]] }
 0x14b   : > { %v515_v54 = vsel %vm454_vm1, %v511_v52, 0.0  ;;  %v516_v55 = vsel %vm454_vm1, %v512_v53, 0.0  ;;  %v4122_v14 = vld [vmem:[#allocation2 + $0x20] sm:$0xff]  ;;  %v4140_v29 = vld [vmem:[#allocation2 + $0x30] sm:$0xff]  ;;  %v791_v46 = vstv %s2983_s3  ;;  %v800_v47 = vmul.f32 %v799_v45, %v4073_v44  ;;  %s3010_s3 = sld [smem:[#allocation10 + $0x39]] }
 0x14c   : > { %519 = vst.msk [vmem:[#allocation2 + $0x29] sm:$0x1] %vm459_vm2, %v515_v54  ;;  %520 = vst.msk [vmem:[#allocation2 + $0x39] sm:$0x1] %vm459_vm2, %v516_v55  ;;  %v664_v17 = vmul.f32 %v663_v15, %v4122_v14  ;;  %v656_v18 = vmul.f32 %v655_v16, %v4122_v14  ;;  %v4128_v19 = vld [vmem:[#allocation2 + $0x21] sm:$0xff]  ;;  %v728_v32 = vmul.f32 %v727_v30, %v4140_v29  ;;  %v4146_v34 = vld [vmem:[#allocation2 + $0x31] sm:$0xff]  ;;  %v820_v50 = vstv %s2987_s30 }
 0x14d   : > { %v685_v22 = vmul.f32 %v684_v20, %v4128_v19  ;;  %v677_v23 = vmul.f32 %v676_v21, %v4128_v19  ;;  %v720_v33 = vmul.f32 %v719_v31, %v4140_v29  ;;  %v749_v37 = vmul.f32 %v748_v35, %v4146_v34  ;;  %s3014_s30 = sld [smem:[#allocation10 + $0xb9]] }
 0x14e   : > { %559 = vrot.lane.b32.xlu1 %v557_v56, %s3713_s16  ;;  %551 = vrot.lane.b32.xlu0 %v549_v57, %s3714_s12  ;;  %v741_v38 = vmul.f32 %v740_v36, %v4146_v34  ;;  %v792_v48 = vmul.f32 %v791_v46, %v4073_v44  ;;  %v812_v51 = vstv %s2986_s20  ;;  %v821_v52 = vmul.f32 %v820_v50, %v4079_v49  ;;  %s3013_s20 = sld [smem:[#allocation10 + $0x99]] }
 0x14f   : > { %v4099_v60 = vld [vmem:[#allocation2 + $0x2] sm:$0xff]  ;;  %v4116_v9 = vld [vmem:[#allocation2 + $0x12] sm:$0xff]  ;;  %v813_v53 = vmul.f32 %v812_v51, %v4079_v49  ;;  %v841_v54 = vstv %s2990_s23  ;;  %v833_v55 = vstv %s2989_s2  ;;  %v875_v1 = vstv %s2995_s18  ;;  %s3017_s23 = sld [smem:[#allocation10 + $0x119]]  ;;  %s3024_s18 = sld [smem:[#allocation10 + $0x82]] }
 0x150   : > { %v578_v61 = vmul.f32 %v577_v58, %v4099_v60  ;;  %v570_v62 = vmul.f32 %v569_v59, %v4099_v60  ;;  %v642_v12 = vmul.f32 %v641_v10, %v4116_v9  ;;  %v634_v13 = vmul.f32 %v633_v11, %v4116_v9  ;;  %s3016_s2 = sld [smem:[#allocation10 + $0xf9]] }
 0x151   : > { %v842_v56 = vmul.f32 %v841_v54, %v4099_v60  ;;  %v834_v57 = vmul.f32 %v833_v55, %v4099_v60  ;;  %v862_v58 = vstv %s2993_s24  ;;  %v854_v59 = vstv %s2992_s17  ;;  %s3022_s24 = sld [smem:[#allocation10 + $0x42]] }
 0x152   : > { %580 = vrot.lane.b32.xlu1 %v578_v61, %s3713_s16  ;;  %572 = vrot.lane.b32.xlu0 %v570_v62, %s3714_s12  ;;  %v863_v61 = vmul.f32 %v862_v58, %v4103_v63  ;;  %v855_v62 = vmul.f32 %v854_v59, %v4103_v63  ;;  %v904_v5 = vstv %s2999_s9  ;;  %v896_v6 = vstv %s2998_s13  ;;  %s3021_s17 = sld [smem:[#allocation10 + $0x22]] }
 0x153   : > { %v4134_v24 = vld [vmem:[#allocation2 + $0x22] sm:$0xff]  ;;  %v4152_v39 = vld [vmem:[#allocation2 + $0x32] sm:$0xff]  ;;  %v925_v10 = vstv %s3002_s11  ;;  %v917_v11 = vstv %s3001_s5  ;;  %v946_v15 = vstv %s3005_s22  ;;  %v938_v16 = vstv %s3004_s10  ;;  %s3028_s9 = sld [smem:[#allocation10 + $0x102]] }
 0x154   : > { %v706_v27 = vmul.f32 %v705_v25, %v4134_v24  ;;  %v698_v28 = vmul.f32 %v697_v26, %v4134_v24  ;;  %v770_v42 = vmul.f32 %v769_v40, %v4152_v39  ;;  %v762_v43 = vmul.f32 %v761_v41, %v4152_v39  ;;  %s3027_s13 = sld [smem:[#allocation10 + $0xe2]] }
 0x155   : > { %v967_v20 = vstv %s3008_s15  ;;  %v959_v21 = vstv %s3007_s19  ;;  %v988_v25 = vstv %s3011_s14  ;;  %v980_v26 = vstv %s3010_s3  ;;  %s3031_s11 = sld [smem:[#allocation10 + $0x4a]]  ;;  %s521_s15 = sld [smem:[#allocation10]] }
 0x156   : > { %602 = vrot.lane.b32.xlu1 %v600_v2, %s3713_s16  ;;  %594 = vrot.lane.b32.xlu0 %v592_v3, %s3714_s12  ;;  %v884_v2 = vmul.f32 %v883_v0, %v4110_v4  ;;  %v876_v3 = vmul.f32 %v875_v1, %v4110_v4  ;;  %v1009_v30 = vstv %s3014_s30  ;;  %v1001_v31 = vstv %s3013_s20  ;;  %s3030_s5 = sld [smem:[#allocation10 + $0x2a]]  ;;  %s4222_s3 = sld [smem:[#allocation10 + $0x60]] }
 0x157   : > { %v1030_v35 = vstv %s3017_s23  ;;  %v1022_v36 = vstv %s3016_s2  ;;  %v1060_v40 = vstv %s3022_s24  ;;  %v1081_v45 = vstv %s3025_s0  ;;  %s3034_s22 = sld [smem:[#allocation10 + $0xaa]]  ;;  %s4238_s24 = sld [smem:[#allocation10 + $0xc0]] }
 0x158   : > { %v1052_v41 = vstv %s3021_s17  ;;  %v1073_v46 = vstv %s3024_s18  ;;  %s3033_s10 = sld [smem:[#allocation10 + $0x8a]]  ;;  %s4255_s18 = sld [smem:[#allocation10 + $0x8]] }
 0x159   : > { %v1102_v50 = vstv %s3028_s9  ;;  %s3037_s19 = sld [smem:[#allocation10 + $0x10a]] }
 0x15a   : > { %623 = vrot.lane.b32.xlu1 %v621_v7, %s3713_s16  ;;  %615 = vrot.lane.b32.xlu0 %v613_v8, %s3714_s12  ;;  %v905_v7 = vmul.f32 %v904_v5, %v4116_v9  ;;  %v897_v8 = vmul.f32 %v896_v6, %v4116_v9  ;;  %v1094_v51 = vstv %s3027_s13  ;;  %s3036_s14 = sld [smem:[#allocation10 + $0xea]] }
 0x15b   : > { %v1123_v54 = vstv %s3031_s11  ;;  %s4224_s30 = sld [smem:[#allocation10 + $0x52]]  ;;  %v523_v0 = vstv %s521_s15 }
 0x15c   : > { %v1115_v55 = vstv %s3030_s5  ;;  %s4226_s20 = sld [smem:[#allocation10 + $0x32]] }
 0x15d   : > { %v1144_v58 = vstv %s3034_s22  ;;  %s4232_s23 = sld [smem:[#allocation10 + $0xb2]]  ;;  %s4277_s22 = sld [smem:[#allocation10 + $0x68]] }
 0x15e   : > { %644 = vrot.lane.b32.xlu1 %v642_v12, %s3713_s16  ;;  %636 = vrot.lane.b32.xlu0 %v634_v13, %s3714_s12  ;;  %v926_v12 = vmul.f32 %v925_v10, %v4122_v14  ;;  %v918_v13 = vmul.f32 %v917_v11, %v4122_v14  ;;  %v1136_v59 = vstv %s3033_s10  ;;  %s4234_s2 = sld [smem:[#allocation10 + $0x92]]  ;;  %v544_v10 = vstv %s4222_s3  ;;  %s4299_s3 = sld [smem:[#allocation10 + $0x23]] }
 0x15f   : > { %v1165_v1 = vstv %s3037_s19  ;;  %s4246_s17 = sld [smem:[#allocation10 + $0x112]]  ;;  %s4293_s19 = sld [smem:[#allocation10 + $0xc8]] }
 0x160   : > { %s4248_s0 = sld [smem:[#allocation10 + $0xf2]] }
 0x161   : > { %s4259_s9 = sld [smem:[#allocation10 + $0x5a]] }
 0x162   : > { %666 = vrot.lane.b32.xlu1 %v664_v17, %s3713_s16  ;;  %658 = vrot.lane.b32.xlu0 %v656_v18, %s3714_s12  ;;  %v947_v17 = vmul.f32 %v946_v15, %v4128_v19  ;;  %v939_v18 = vmul.f32 %v938_v16, %v4128_v19  ;;  %v545_v16 = vmul.f32 %v544_v10, %v4079_v49  ;;  %s4261_s13 = sld [smem:[#allocation10 + $0x3a]] }
 0x163   : > { %s4271_s11 = sld [smem:[#allocation10 + $0xba]] }
 0x164   : > { %s4273_s5 = sld [smem:[#allocation10 + $0x9a]] }
 0x165   : > { %s4284_s10 = sld [smem:[#allocation10 + $0x11a]]  ;;  %v629_v10 = vstv %s4293_s19  ;;  %s4387_s19 = sld [smem:[#allocation10 + $0x61]] }
 0x166   : > { %687 = vrot.lane.b32.xlu1 %v685_v22, %s3713_s16  ;;  %679 = vrot.lane.b32.xlu0 %v677_v23, %s3714_s12  ;;  %v968_v22 = vmul.f32 %v967_v20, %v4134_v24  ;;  %v960_v23 = vmul.f32 %v959_v21, %v4134_v24  ;;  %s4286_s15 = sld [smem:[#allocation10 + $0xfa]] }
 0x16a   : > { %708 = vrot.lane.b32.xlu1 %v706_v27, %s3713_s16  ;;  %700 = vrot.lane.b32.xlu0 %v698_v28, %s3714_s12  ;;  %v989_v27 = vmul.f32 %v988_v25, %v4140_v29  ;;  %v981_v28 = vmul.f32 %v980_v26, %v4140_v29  ;;  %v1199_v25 = vstv %s4234_s2  ;;  %v565_v26 = vstv %s4238_s24  ;;  %s4322_s2 = sld [smem:[#allocation10 + $0x103]] }
 0x16b   : > { %s4324_s24 = sld [smem:[#allocation10 + $0xe3]] }
 0x16e   : > { %730 = vrot.lane.b32.xlu1 %v728_v32, %s3713_s16  ;;  %722 = vrot.lane.b32.xlu0 %v720_v33, %s3714_s12  ;;  %v1010_v32 = vmul.f32 %v1009_v30, %v4146_v34  ;;  %v1002_v33 = vmul.f32 %v1001_v31, %v4146_v34 }
 0x172   : > { %751 = vrot.lane.b32.xlu1 %v749_v37, %s3713_s16  ;;  %743 = vrot.lane.b32.xlu0 %v741_v38, %s3714_s12  ;;  %v1031_v37 = vmul.f32 %v1030_v35, %v4152_v39  ;;  %v1023_v38 = vmul.f32 %v1022_v36, %v4152_v39  ;;  %v566_v35 = vmul.f32 %v565_v26, %v4099_v60  ;;  %v1228_v36 = vstv %s4246_s17  ;;  %s4331_s17 = sld [smem:[#allocation10 + $0x70]] }
 0x176   : > { %772 = vrot.lane.b32.xlu1 %v770_v42, %s3713_s16  ;;  %764 = vrot.lane.b32.xlu0 %v762_v43, %s3714_s12  ;;  %v1061_v42 = vmul.f32 %v1060_v40, %v4073_v44  ;;  %v1053_v43 = vmul.f32 %v1052_v41, %v4073_v44  ;;  %v587_v41 = vstv %s4255_s18  ;;  %s4339_s18 = sld [smem:[#allocation10 + $0x2b]] }
 0x17a   : > { %802 = vrot.lane.b32.xlu1 %v800_v47, %s3713_s16  ;;  %794 = vrot.lane.b32.xlu0 %v792_v48, %s3714_s12  ;;  %v1082_v47 = vmul.f32 %v1081_v45, %v4079_v49  ;;  %v1074_v48 = vmul.f32 %v1073_v46, %v4079_v49 }
 0x17e   : > { %823 = vrot.lane.b32.xlu1 %v821_v52, %s3713_s16  ;;  %815 = vrot.lane.b32.xlu0 %v813_v53, %s3714_s12  ;;  %v1103_v52 = vmul.f32 %v1102_v50, %v4099_v60  ;;  %v1095_v53 = vmul.f32 %v1094_v51, %v4099_v60  ;;  %v588_v51 = vmul.f32 %v587_v41, %v4103_v63  ;;  %v1363_v41 = vstv %s4322_s2  ;;  %s4417_s2 = sld [smem:[#allocation10 + $0xc1]] }
 0x182   : > { %844 = vrot.lane.b32.xlu1 %v842_v56, %s3713_s16  ;;  %836 = vrot.lane.b32.xlu0 %v834_v57, %s3714_s12  ;;  %v1124_v56 = vmul.f32 %v1123_v54, %v4103_v63  ;;  %v1116_v57 = vmul.f32 %v1115_v55, %v4103_v63 }
 0x186   : > { %865 = vrot.lane.b32.xlu1 %v863_v61, %s3713_s16  ;;  %857 = vrot.lane.b32.xlu0 %v855_v62, %s3714_s12  ;;  %v1145_v61 = vmul.f32 %v1144_v58, %v4110_v4  ;;  %v1137_v62 = vmul.f32 %v1136_v59, %v4110_v4  ;;  %v1262_v58 = vstv %s4273_s5  ;;  %v608_v59 = vstv %s4277_s22  ;;  %s4368_s5 = sld [smem:[#allocation10 + $0x1]]  ;;  %s4372_s22 = sld [smem:[#allocation10 + $0x10b]] }
 0x18a   : > { %886 = vrot.lane.b32.xlu1 %v884_v2, %s3713_s16  ;;  %878 = vrot.lane.b32.xlu0 %v876_v3, %s3714_s12  ;;  %v1157_v2 = vstv %s3036_s14  ;;  %v524_v3 = vmul.f32 %v523_v0, %v4073_v44  ;;  %s4297_s14 = sld [smem:[#allocation10 + $0x43]] }
 0x18e   : > { %907 = vrot.lane.b32.xlu1 %v905_v7, %s3713_s16  ;;  %899 = vrot.lane.b32.xlu0 %v897_v8, %s3714_s12  ;;  %v1166_v7 = vmul.f32 %v1165_v1, %v4116_v9  ;;  %v1158_v8 = vmul.f32 %v1157_v2, %v4116_v9  ;;  %v1263_v2 = vmul.f32 %v1262_v58, %v4146_v34 }
 0x192   : > { %928 = vrot.lane.b32.xlu1 %v926_v12, %s3713_s16  ;;  %920 = vrot.lane.b32.xlu0 %v918_v13, %s3714_s12  ;;  %v1186_v12 = vstv %s4224_s30  ;;  %v1178_v13 = vstv %s4226_s20  ;;  %s4309_s30 = sld [smem:[#allocation10 + $0xa3]] }
 0x193   : > { %v1187_v20 = vmul.f32 %v1186_v12, %v4122_v14  ;;  %v1179_v21 = vmul.f32 %v1178_v13, %v4122_v14  ;;  %s4311_s20 = sld [smem:[#allocation10 + $0x83]] }
 0x196   : > { %949 = vrot.lane.b32.xlu1 %v947_v17, %s3713_s16  ;;  %941 = vrot.lane.b32.xlu0 %v939_v18, %s3714_s12 }
 0x19a   : > { %970 = vrot.lane.b32.xlu1 %v968_v22, %s3713_s16  ;;  %962 = vrot.lane.b32.xlu0 %v960_v23, %s3714_s12  ;;  %v1207_v23 = vstv %s4232_s23  ;;  %s4315_s23 = sld [smem:[#allocation10 + $0x10]] }
 0x19b   : > { %v1208_v31 = vmul.f32 %v1207_v23, %v4128_v19 }
 0x19e   : > { %991 = vrot.lane.b32.xlu1 %v989_v27, %s3713_s16  ;;  %983 = vrot.lane.b32.xlu0 %v981_v28, %s3714_s12 }
 0x1a2   : > { %1012 = vrot.lane.b32.xlu1 %v1010_v32, %s3713_s16  ;;  %1004 = vrot.lane.b32.xlu0 %v1002_v33, %s3714_s12  ;;  %v1200_v32 = vmul.f32 %v1199_v25, %v4128_v19 }
 0x1a6   : > { %1033 = vrot.lane.b32.xlu1 %v1031_v37, %s3713_s16  ;;  %1025 = vrot.lane.b32.xlu0 %v1023_v38, %s3714_s12  ;;  %v1220_v37 = vstv %s4248_s0  ;;  %s4337_s0 = sld [smem:[#allocation10 + $0x4b]] }
 0x1a7   : > { %v1221_v45 = vmul.f32 %v1220_v37, %v4134_v24 }
 0x1aa   : > { %1063 = vrot.lane.b32.xlu1 %v1061_v42, %s3713_s16  ;;  %1055 = vrot.lane.b32.xlu0 %v1053_v43, %s3714_s12  ;;  %v1229_v43 = vmul.f32 %v1228_v36, %v4134_v24 }
 0x1ae   : > { %1084 = vrot.lane.b32.xlu1 %v1082_v47, %s3713_s16  ;;  %1076 = vrot.lane.b32.xlu0 %v1074_v48, %s3714_s12  ;;  %v1249_v47 = vstv %s4259_s9  ;;  %v1241_v48 = vstv %s4261_s13  ;;  %s4353_s9 = sld [smem:[#allocation10 + $0xab]] }
 0x1af   : > { %v1250_v54 = vmul.f32 %v1249_v47, %v4140_v29  ;;  %v1242_v55 = vmul.f32 %v1241_v48, %v4140_v29  ;;  %s4355_s13 = sld [smem:[#allocation10 + $0x8b]]  ;;  %v1364_v48 = vmul.f32 %v1363_v41, %v4099_v60 }
 0x1b2   : > { %1105 = vrot.lane.b32.xlu1 %v1103_v52, %s3713_s16  ;;  %1097 = vrot.lane.b32.xlu0 %v1095_v53, %s3714_s12 }
 0x1b6   : > { %1126 = vrot.lane.b32.xlu1 %v1124_v56, %s3713_s16  ;;  %1118 = vrot.lane.b32.xlu0 %v1116_v57, %s3714_s12  ;;  %v1270_v57 = vstv %s4271_s11  ;;  %s4357_s11 = sld [smem:[#allocation10 + $0xd0]] }
 0x1b7   : > { %v1271_v1 = vmul.f32 %v1270_v57, %v4146_v34 }
 0x1ba   : > { %1147 = vrot.lane.b32.xlu1 %v1145_v61, %s3713_s16  ;;  %1139 = vrot.lane.b32.xlu0 %v1137_v62, %s3714_s12 }
 0x1bc   : > { %v539_v5 = vpop.permute.xlu1 %538  ;;  %v531_v6 = vpop.permute.xlu0 %530 }
 0x1bd   : > { %v533_v11 = vadd.f32 %v531_v6, %v524_v3  ;;  %v1291_v6 = vstv %s4284_s10  ;;  %s4374_s10 = sld [smem:[#allocation10 + $0xeb]] }
 0x1be   : > { %1168 = vrot.lane.b32.xlu1 %v1166_v7, %s3713_s16  ;;  %1160 = vrot.lane.b32.xlu0 %v1158_v8, %s3714_s12  ;;  %v1283_v7 = vstv %s4286_s15  ;;  %v1292_v13 = vmul.f32 %v1291_v6, %v4152_v39  ;;  %s4379_s15 = sld [smem:[#allocation10 + $0x18]] }
 0x1bf   : > { %v541_v15 = vadd.f32 %v539_v5, %v533_v11  ;;  %v609_v5 = vmul.f32 %v608_v59, %v4110_v4 }
 0x1c0   : > { %v560_v17 = vpop.permute.xlu1 %559  ;;  %v552_v18 = vpop.permute.xlu0 %551 }
 0x1c1   : > { %v546_v22 = vadd.f32 %v545_v16, %v541_v15  ;;  %v1284_v15 = vmul.f32 %v1283_v7, %v4152_v39 }
 0x1c2   : > { %1189 = vrot.lane.b32.xlu1 %v1187_v20, %s3713_s16  ;;  %1181 = vrot.lane.b32.xlu0 %v1179_v21, %s3714_s12  ;;  %v630_v21 = vmul.f32 %v629_v10, %v4116_v9 }
 0x1c3   : > { %v554_v27 = vadd.f32 %v552_v18, %v546_v22  ;;  %v1313_v18 = vstv %s4299_s3  ;;  %s4393_s3 = sld [smem:[#allocation10 + $0x33]] }
 0x1c4   : > { %v581_v28 = vpop.permute.xlu1 %580  ;;  %v573_v30 = vpop.permute.xlu0 %572  ;;  %v1314_v26 = vmul.f32 %v1313_v18, %v4073_v44 }
 0x1c5   : > { %v562_v33 = vadd.f32 %v560_v17, %v554_v27  ;;  %v1321_v17 = vstv %s4297_s14  ;;  %s4391_s14 = sld [smem:[#allocation10 + $0x53]] }
 0x1c6   : > { %1210 = vrot.lane.b32.xlu1 %v1208_v31, %s3713_s16  ;;  %1202 = vrot.lane.b32.xlu0 %v1200_v32, %s3714_s12  ;;  %v1322_v25 = vmul.f32 %v1321_v17, %v4073_v44  ;;  %v651_v31 = vstv %s4315_s23  ;;  %s4413_s23 = sld [smem:[#allocation10 + $0x78]]  ;;  %v715_v17 = vstv %s4379_s15  ;;  %s4474_s15 = sld [smem:[#allocation10 + $0x11b]] }
 0x1c7   : > { %v567_v38 = vadd.f32 %v566_v35, %v562_v33 }
 0x1c8   : > { %v603_v40 = vpop.permute.xlu1 %602  ;;  %v595_v42 = vpop.permute.xlu0 %594 }
 0x1c9   : > { %v575_v46 = vadd.f32 %v573_v30, %v567_v38  ;;  %v1334_v30 = vstv %s4311_s20  ;;  %s4411_s20 = sld [smem:[#allocation10 + $0x93]] }
 0x1ca   : > { %1231 = vrot.lane.b32.xlu1 %v1229_v43, %s3713_s16  ;;  %1223 = vrot.lane.b32.xlu0 %v1221_v45, %s3714_s12  ;;  %v1335_v37 = vmul.f32 %v1334_v30, %v4079_v49  ;;  %v672_v45 = vstv %s4331_s17  ;;  %s4426_s17 = sld [smem:[#allocation10 + $0xf3]]  ;;  %v716_v30 = vmul.f32 %v715_v17, %v4140_v29 }
 0x1cb   : > { %v583_v50 = vadd.f32 %v581_v28, %v575_v46  ;;  %v1342_v28 = vstv %s4309_s30  ;;  %s4409_s30 = sld [smem:[#allocation10 + $0xb3]] }
 0x1cc   : > { %v624_v52 = vpop.permute.xlu1 %623  ;;  %v616_v53 = vpop.permute.xlu0 %615  ;;  %v1343_v36 = vmul.f32 %v1342_v28, %v4079_v49  ;;  %v1439_v28 = vstv %s4393_s3  ;;  %s4490_s3 = sld [smem:[#allocation10 + $0xc9]] }
 0x1cd   : > { %v589_v56 = vadd.f32 %v588_v51, %v583_v50 }
 0x1ce   : > { %1252 = vrot.lane.b32.xlu1 %v1250_v54, %s3713_s16  ;;  %1244 = vrot.lane.b32.xlu0 %v1242_v55, %s3714_s12  ;;  %v673_v55 = vmul.f32 %v672_v45, %v4128_v19 }
 0x1cf   : > { %v597_v61 = vadd.f32 %v595_v42, %v589_v56  ;;  %v1355_v42 = vstv %s4324_s24  ;;  %s4424_s24 = sld [smem:[#allocation10 + $0x113]] }
 0x1d0   : > { %v645_v62 = vpop.permute.xlu1 %644  ;;  %v637_v0 = vpop.permute.xlu0 %636  ;;  %v1356_v50 = vmul.f32 %v1355_v42, %v4099_v60  ;;  %v1460_v42 = vstv %s4411_s20  ;;  %s4496_s20 = sld [smem:[#allocation10 + $0x24]] }
 0x1d1   : > { %v605_v3 = vadd.f32 %v603_v40, %v597_v61  ;;  %v652_v40 = vmul.f32 %v651_v31, %v4122_v14  ;;  %v1468_v41 = vstv %s4409_s30  ;;  %s4494_s30 = sld [smem:[#allocation10 + $0x44]] }
 0x1d2   : > { %1273 = vrot.lane.b32.xlu1 %v1271_v1, %s3713_s16  ;;  %1265 = vrot.lane.b32.xlu0 %v1263_v2, %s3714_s12  ;;  %v693_v1 = vstv %s4357_s11  ;;  %s4460_s11 = sld [smem:[#allocation10 + $0xbb]] }
 0x1d3   : > { %v610_v8 = vadd.f32 %v609_v5, %v605_v3 }
 0x1d4   : > { %v667_v11 = vpop.permute.xlu1 %666  ;;  %v659_v12 = vpop.permute.xlu0 %658 }
 0x1d5   : > { %v618_v16 = vadd.f32 %v616_v53, %v610_v8  ;;  %v1376_v53 = vstv %s4339_s18  ;;  %v787_v8 = vstv %s4368_s5  ;;  %s4440_s18 = sld [smem:[#allocation10 + $0x9]]  ;;  %s4462_s5 = sld [smem:[#allocation10 + $0x9b]] }
 0x1d6   : > { %1294 = vrot.lane.b32.xlu1 %v1292_v13, %s3713_s16  ;;  %1286 = vrot.lane.b32.xlu0 %v1284_v15, %s3714_s12  ;;  %v1377_v59 = vmul.f32 %v1376_v53, %v4103_v63  ;;  %v1418_v13 = vstv %s4374_s10  ;;  %v1489_v53 = vstv %s4424_s24  ;;  %s4469_s10 = sld [smem:[#allocation11]]  ;;  %s4516_s24 = sld [smem:[#allocation10 + $0x11]] }
 0x1d7   : > { %v626_v20 = vadd.f32 %v624_v52, %v618_v16  ;;  %v1384_v52 = vstv %s4337_s0  ;;  %v788_v16 = vmul.f32 %v787_v8, %v4073_v44  ;;  %s4436_s0 = sld [smem:[#allocation10 + $0xd8]] }
 0x1d8   : > { %v4329_v22 = vpop.permute.xlu1 %687  ;;  %v680_v23 = vpop.permute.xlu0 %679  ;;  %v1385_v58 = vmul.f32 %v1384_v52, %v4103_v63  ;;  %v1461_v52 = vmul.f32 %v1460_v42, %v4128_v19  ;;  %v4523_v42 = vld [vmem:[#allocation2] sm:$0xff] }
 0x1d9   : > { %v631_v27 = vadd.f32 %v630_v21, %v626_v20 }
 0x1da   : > { %1324 = vrot.lane.b32.xlu1 %v1322_v25, %s3713_s16  ;;  %1316 = vrot.lane.b32.xlu0 %v1314_v26, %s3714_s12 }
 0x1db   : > { %v639_v32 = vadd.f32 %v637_v0, %v631_v27  ;;  %v1397_v0 = vstv %s4355_s13  ;;  %v1447_v27 = vstv %s4391_s14  ;;  %s4446_s13 = sld [smem:[#allocation10 + $0x3b]]  ;;  %s4481_s14 = sld [smem:[#allocation13]] }
 0x1dc   : > { %v4344_v33 = vpop.permute.xlu1 %708  ;;  %v4346_v35 = vpop.permute.xlu0 %700  ;;  %v1398_v7 = vmul.f32 %v1397_v0, %v4110_v4  ;;  %v850_v0 = vstv %s4440_s18  ;;  %s4536_s18 = sld [smem:[#allocation10 + $0x71]] }
 0x1dd   : > { %v647_v38 = vadd.f32 %v645_v62, %v639_v32  ;;  %v1405_v62 = vstv %s4353_s9  ;;  %s4444_s9 = sld [smem:[#allocation10 + $0x5b]] }
 0x1de   : > { %1345 = vrot.lane.b32.xlu1 %v1343_v36, %s3713_s16  ;;  %1337 = vrot.lane.b32.xlu0 %v1335_v37, %s3714_s12  ;;  %v1406_v6 = vmul.f32 %v1405_v62, %v4110_v4  ;;  %v1448_v37 = vmul.f32 %v1447_v27, %v4122_v14 }
 0x1df   : > { %v653_v43 = vadd.f32 %v652_v40, %v647_v38  ;;  %v1440_v38 = vmul.f32 %v1439_v28, %v4122_v14 }
 0x1e0   : > { %v4362_v46 = vpop.permute.xlu1 %730  ;;  %v4364_v47 = vpop.permute.xlu0 %722 }
 0x1e1   : > { %v661_v51 = vadd.f32 %v659_v12, %v653_v43  ;;  %v1426_v12 = vstv %s4372_s22  ;;  %v829_v43 = vstv %s4417_s2  ;;  %s4466_s22 = sld [smem:[#allocation10 + $0x69]]  ;;  %s4511_s2 = sld [smem:[#allocation10 + $0x84]] }
 0x1e2   : > { %1366 = vrot.lane.b32.xlu1 %v1364_v48, %s3713_s16  ;;  %1358 = vrot.lane.b32.xlu0 %v1356_v50, %s3714_s12  ;;  %v1427_v21 = vmul.f32 %v1426_v12, %v4116_v9 }
 0x1e3   : > { %v669_v54 = vadd.f32 %v667_v11, %v661_v51  ;;  %v694_v11 = vmul.f32 %v693_v1, %v4134_v24  ;;  %v1469_v51 = vmul.f32 %v1468_v41, %v4128_v19  ;;  %v1490_v1 = vmul.f32 %v1489_v53, %v4134_v24 }
 0x1e4   : > { %v4381_v56 = vpop.permute.xlu1 %751  ;;  %v4383_v57 = vpop.permute.xlu0 %743  ;;  %v1510_v8 = vstv %s4444_s9  ;;  %s4545_s9 = sld [smem:[#allocation10 + $0x4c]] }
 0x1e5   : > { %v674_v61 = vadd.f32 %v673_v55, %v669_v54  ;;  %v1481_v54 = vstv %s4426_s17  ;;  %s4527_s17 = sld [smem:[#allocation10 + $0x104]] }
 0x1e6   : > { %1387 = vrot.lane.b32.xlu1 %v1385_v58, %s3713_s16  ;;  %1379 = vrot.lane.b32.xlu0 %v1377_v59, %s3714_s12 }
 0x1e7   : > { %v682_v2 = vadd.f32 %v680_v23, %v674_v61  ;;  %v808_v23 = vstv %s4387_s19  ;;  %v830_v61 = vmul.f32 %v829_v43, %v4099_v60  ;;  %s4479_s19 = sld [smem:[#allocation10 + $0xfb]]  ;;  %v1574_v43 = vstv %s4496_s20  ;;  %s4612_s20 = sld [smem:[#allocation10 + $0x34]] }
 0x1e8   : > { %v4398_v3 = vpop.permute.xlu1 %772  ;;  %v4400_v5 = vpop.permute.xlu0 %764  ;;  %v809_v32 = vmul.f32 %v808_v23, %v4079_v49  ;;  %v736_v49 = vstv %s4413_s23  ;;  %v777_v23 = vstv %s4469_s10  ;;  %s4509_s23 = sld [smem:[#allocation10 + $0xa4]]  ;;  %s4580_s10 = sld [smem:[#allocation10 + $0x2]] }
 0x1e9   : > { %v690_v10 = vadd.f32 %v4329_v22, %v682_v2  ;;  %v1419_v22 = vmul.f32 %v1418_v13, %v4116_v9  ;;  %v737_v58 = vmul.f32 %v736_v49, %v4146_v34  ;;  %v1482_v2 = vmul.f32 %v1481_v54, %v4134_v24  ;;  %v4541_v54 = vld [vmem:[#allocation2 + $0x1] sm:$0xff] }
 0x1ea   : > { %1408 = vrot.lane.b32.xlu1 %v1406_v6, %s3713_s16  ;;  %1400 = vrot.lane.b32.xlu0 %v1398_v7, %s3714_s12  ;;  %v1582_v49 = vstv %s4494_s30  ;;  %s4610_s30 = sld [smem:[#allocation10 + $0x54]] }
 0x1eb   : > { %v695_v15 = vadd.f32 %v694_v11, %v690_v10  ;;  %v1502_v10 = vstv %s4446_s13  ;;  %s4547_s13 = sld [smem:[#allocation10 + $0x2c]] }
 0x1ec   : > { %v803_v18 = vpop.permute.xlu1 %802  ;;  %v795_v20 = vpop.permute.xlu0 %794  ;;  %v1503_v17 = vmul.f32 %v1502_v10, %v4140_v29 }
 0x1ed   : > { %v703_v25 = vadd.f32 %v4346_v35, %v695_v15  ;;  %v797_v26 = vadd.f32 %v795_v20, %v788_v16  ;;  %v1511_v16 = vmul.f32 %v1510_v8, %v4140_v29  ;;  %v934_v8 = vstv %s4536_s18  ;;  %s4651_s18 = sld [smem:[#allocation10 + $0xf4]] }
 0x1ee   : > { %1429 = vrot.lane.b32.xlu1 %v1427_v21, %s3713_s16  ;;  %1421 = vrot.lane.b32.xlu0 %v1419_v22, %s3714_s12  ;;  %v1531_v21 = vstv %s4460_s11  ;;  %v1523_v22 = vstv %s4462_s5  ;;  %s4565_s11 = sld [smem:[#allocation10 + $0xac]] }
 0x1ef   : > { %v711_v44 = vadd.f32 %v4344_v33, %v703_v25  ;;  %v805_v31 = vadd.f32 %v803_v18, %v797_v26  ;;  %v1532_v27 = vmul.f32 %v1531_v21, %v4146_v34  ;;  %v1524_v28 = vmul.f32 %v1523_v22, %v4146_v34  ;;  %s4567_s5 = sld [smem:[#allocation10 + $0x8c]] }
 0x1f0   : > { %v824_v35 = vpop.permute.xlu1 %823  ;;  %v816_v36 = vpop.permute.xlu0 %815 }
 0x1f1   : > { %v717_v40 = vadd.f32 %v716_v30, %v711_v44  ;;  %v810_v33 = vadd.f32 %v809_v32, %v805_v31  ;;  %v1552_v44 = vstv %s4474_s15  ;;  %s4586_s15 = sld [smem:[#allocation10 + $0x10c]] }
 0x1f2   : > { %1450 = vrot.lane.b32.xlu1 %v1448_v37, %s3713_s16  ;;  %1442 = vrot.lane.b32.xlu0 %v1440_v38, %s3714_s12  ;;  %v1553_v38 = vmul.f32 %v1552_v44, %v4152_v39 }
 0x1f3   : > { %v725_v14 = vadd.f32 %v4364_v47, %v717_v40  ;;  %v818_v45 = vadd.f32 %v816_v36, %v810_v33 }
 0x1f4   : > { %v845_v48 = vpop.permute.xlu1 %844  ;;  %v837_v50 = vpop.permute.xlu0 %836 }
 0x1f5   : > { %v733_v55 = vadd.f32 %v4362_v46, %v725_v14  ;;  %v826_v59 = vadd.f32 %v824_v35, %v818_v45  ;;  %v757_v46 = vstv %s4436_s0  ;;  %v1544_v35 = vstv %s4479_s19  ;;  %s4529_s0 = sld [smem:[#allocation10 + $0xe4]] }
 0x1f6   : > { %1471 = vrot.lane.b32.xlu1 %v1469_v51, %s3713_s16  ;;  %1463 = vrot.lane.b32.xlu0 %v1461_v52, %s3714_s12  ;;  %v758_v11 = vmul.f32 %v757_v46, %v4152_v39  ;;  %v1545_v40 = vmul.f32 %v1544_v35, %v4152_v39  ;;  %v1583_v51 = vmul.f32 %v1582_v49, %v4523_v42  ;;  %s4588_s19 = sld [smem:[#allocation10 + $0xec]]  ;;  %v1048_v35 = vstv %s4580_s10  ;;  %s4701_s10 = sld [smem:[#allocation10 + $0x25]] }
 0x1f7   : > { %v738_v19 = vadd.f32 %v737_v58, %v733_v55  ;;  %v831_v47 = vadd.f32 %v830_v61, %v826_v59  ;;  %v1575_v52 = vmul.f32 %v1574_v43, %v4523_v42  ;;  %v1603_v55 = vstv %s4509_s23  ;;  %s4632_s23 = sld [smem:[#allocation10 + $0xb4]] }
 0x1f8   : > { %v866_v62 = vpop.permute.xlu1 %865  ;;  %v858_v60 = vpop.permute.xlu0 %857  ;;  %v1595_v58 = vstv %s4511_s2  ;;  %s4634_s2 = sld [smem:[#allocation10 + $0x94]] }
 0x1f9   : > { %v746_v6 = vadd.f32 %v4383_v57, %v738_v19  ;;  %v839_v7 = vadd.f32 %v837_v50, %v831_v47  ;;  %v851_v57 = vmul.f32 %v850_v0, %v4103_v63  ;;  %v871_v63 = vstv %s4466_s22  ;;  %v4558_v0 = vld [vmem:[#allocation2 + $0x20] sm:$0xff]  ;;  %s4569_s22 = sld [smem:[#allocation10 + $0xd1]] }
 0x1fa   : > { %1492 = vrot.lane.b32.xlu1 %v1490_v1, %s3713_s16  ;;  %1484 = vrot.lane.b32.xlu0 %v1482_v2, %s3714_s12  ;;  %v872_v32 = vmul.f32 %v871_v63, %v4110_v4  ;;  %v1604_v47 = vmul.f32 %v1603_v55, %v4541_v54  ;;  %v1596_v46 = vmul.f32 %v1595_v58, %v4541_v54  ;;  %v4561_v1 = vld [vmem:[#allocation2 + $0x2] sm:$0xff]  ;;  %v1624_v2 = vstv %s4527_s17  ;;  %s4640_s17 = sld [smem:[#allocation10 + $0xc2]]  ;;  %v4661_v58 = vld [vmem:[#allocation2 + $0x30] sm:$0xff] }
 0x1fb   : > { %v754_v24 = vadd.f32 %v4381_v56, %v746_v6  ;;  %v847_v12 = vadd.f32 %v845_v48, %v839_v7  ;;  %v1616_v6 = vstv %s4529_s0  ;;  %s4649_s0 = sld [smem:[#allocation10 + $0x114]] }
 0x1fc   : > { %v887_v13 = vpop.permute.xlu1 %886  ;;  %v879_v15 = vpop.permute.xlu0 %878 }
 0x1fd   : > { %v759_v18 = vadd.f32 %v758_v11, %v754_v24  ;;  %v852_v20 = vadd.f32 %v851_v57, %v847_v12  ;;  %v1625_v11 = vmul.f32 %v1624_v2, %v4561_v1  ;;  %v1617_v12 = vmul.f32 %v1616_v6, %v4561_v1 }
 0x1fe   : > { %1513 = vrot.lane.b32.xlu1 %v1511_v16, %s3713_s16  ;;  %1505 = vrot.lane.b32.xlu0 %v1503_v17, %s3714_s12  ;;  %v1637_v16 = vstv %s4547_s13  ;;  %s4671_s13 = sld [smem:[#allocation10 + $0xa]] }
 0x1ff   : > { %v767_v29 = vadd.f32 %v4400_v5, %v759_v18  ;;  %v860_v56 = vadd.f32 %v858_v60, %v852_v20  ;;  %v780_v5 = vstv %s4481_s14  ;;  %v4593_v18 = vld [vmem:[#allocation2 + $0x21] sm:$0xff]  ;;  %s4596_s14 = sld [smem:[#allocation10 + $0x19]] }
 0x200   : > { %v908_v25 = vpop.permute.xlu1 %907  ;;  %v900_v26 = vpop.permute.xlu0 %899  ;;  %v935_v20 = vmul.f32 %v4593_v18, %v934_v8  ;;  %v1729_v8 = vstv %s4632_s23  ;;  %s4739_s23 = sld [smem:[#allocation10 + $0x85]] }
 0x201   : > { %v775_v30 = vadd.f32 %v4398_v3, %v767_v29  ;;  %v868_v31 = vadd.f32 %v866_v62, %v860_v56  ;;  %v892_v3 = vstv %s4490_s3  ;;  %s4604_s3 = sld [smem:[#allocation10 + $0x62]] }
 0x202   : > { %1534 = vrot.lane.b32.xlu1 %v1532_v27, %s3713_s16  ;;  %1526 = vrot.lane.b32.xlu0 %v1524_v28, %s3714_s12  ;;  %v893_v45 = vmul.f32 %v892_v3, %v4116_v9  ;;  %v913_v9 = vstv %s4516_s24  ;;  %v955_v27 = vstv %s4569_s22  ;;  %v4628_v3 = vld [vmem:[#allocation2 + $0x12] sm:$0xff]  ;;  %s4636_s24 = sld [smem:[#allocation10 + $0x79]]  ;;  %s4699_s22 = sld [smem:[#allocation10 + $0x45]] }
 0x203   : > { %v778_v34 = vmul.f32 %v777_v23, %v775_v30  ;;  %v873_v36 = vadd.f32 %v872_v32, %v868_v31  ;;  %v914_v60 = vmul.f32 %v4558_v0, %v913_v9  ;;  %v4606_v23 = vld [vmem:[#allocation2 + $0x11] sm:$0xff] }
 0x204   : > { %v4519_v37 = vpop.permute.xlu1 %928  ;;  %v921_v4 = vpop.permute.xlu0 %920 }
 0x205   : > { %v781_v33 = vadd.f32 %v780_v5, %v778_v34  ;;  %v881_v41 = vadd.f32 %v879_v15, %v873_v36  ;;  %v1645_v15 = vstv %s4545_s9  ;;  %v4625_v34 = vld [vmem:[#allocation2 + $0x22] sm:$0xff]  ;;  %s4667_s9 = sld [smem:[#allocation10 + $0xd9]] }
 0x206   : > { %1555 = vrot.lane.b32.xlu1 %v1553_v38, %s3713_s16  ;;  %1547 = vrot.lane.b32.xlu0 %v1545_v40, %s3714_s12  ;;  %v956_v36 = vmul.f32 %v4625_v34, %v955_v27  ;;  %v4642_v40 = vld [vmem:[#allocation2] sm:$0xff]  ;;  %v4691_v27 = vld [vmem:[#allocation2 + $0x31] sm:$0xff] }
 0x207   : > { %v782_v14 = vmax.f32 %v781_v33, 0.0  ;;  %v889_v39 = vadd.f32 %v887_v13, %v881_v41  ;;  %v4582_v13 = vld [vmem:[#allocation2 + $0x10] sm:$0xff]  ;;  %v1049_v33 = vmul.f32 %v4642_v40, %v1048_v35  ;;  %v976_v41 = vstv %s4596_s14  ;;  %v4697_v35 = vld [vmem:[#allocation2 + $0x22] sm:$0xff]  ;;  %s4713_s14 = sld [smem:[#allocation10 + $0x46]] }
 0x208   : > { %v4534_v48 = vpop.permute.xlu1 %949  ;;  %v942_v50 = vpop.permute.xlu0 %941  ;;  %v1646_v63 = vmul.f32 %v1645_v15, %v4582_v13  ;;  %v1638_v29 = vmul.f32 %v1637_v16, %v4582_v13  ;;  %v977_v9 = vmul.f32 %v4661_v58, %v976_v41 }
 0x209   : > { %784 = vst.msk [vmem:[#allocation3] sm:$0xff] %vm783_vm4, %v782_v14  ;;  %v894_v53 = vadd.f32 %v893_v45, %v889_v39  ;;  %v1069_v45 = vstv %s4604_s3  ;;  %s4720_s3 = sld [smem:[#allocation10 + $0x26]] }
 0x20a   : > { %1585 = vrot.lane.b32.xlu1 %v1583_v51, %s3713_s16  ;;  %1577 = vrot.lane.b32.xlu0 %v1575_v52, %s3714_s12  ;;  %v4654_v51 = vld [vmem:[#allocation2 + $0x20] sm:$0xff]  ;;  %v1708_v52 = vstv %s4610_s30  ;;  %s4722_s30 = sld [smem:[#allocation13 + $0x1]] }
 0x20b   : > { %v902_v59 = vadd.f32 %v900_v26, %v894_v53  ;;  %v1658_v26 = vstv %s4567_s5  ;;  %v1700_v53 = vstv %s4612_s20  ;;  %s4679_s5 = sld [smem:[#allocation10 + $0x3c]]  ;;  %s4735_s20 = sld [smem:[#allocation10 + $0xca]] }
 0x20c   : > { %v4552_v61 = vpop.permute.xlu1 %970  ;;  %v4554_v19 = vpop.permute.xlu0 %962  ;;  %v1659_v32 = vmul.f32 %v1658_v26, %v4606_v23 }
 0x20d   : > { %v910_v62 = vadd.f32 %v908_v25, %v902_v59  ;;  %v1666_v25 = vstv %s4565_s11  ;;  %s4677_s11 = sld [smem:[#allocation10 + $0x5c]] }
 0x20e   : > { %1606 = vrot.lane.b32.xlu1 %v1604_v47, %s3713_s16  ;;  %1598 = vrot.lane.b32.xlu0 %v1596_v46, %s3714_s12  ;;  %v1667_v31 = vmul.f32 %v1666_v25, %v4606_v23  ;;  %v1742_v25 = vstv %s4651_s18  ;;  %s4770_s18 = sld [smem:[#allocation10 + $0xa6]] }
 0x20f   : > { %v915_v7 = vadd.f32 %v914_v60, %v910_v62  ;;  %v1709_v60 = vmul.f32 %v1708_v52, %v4654_v51  ;;  %v1743_v41 = vmul.f32 %v1742_v25, %v4697_v35  ;;  %v2096_v25 = vstv %s4720_s3  ;;  %s4825_s3 = sld [smem:[#allocation10 + $0xe6]] }
 0x210   : > { %v4574_v10 = vpop.permute.xlu1 %991  ;;  %v4576_v24 = vpop.permute.xlu0 %983 }
 0x211   : > { %v923_v57 = vadd.f32 %v921_v4, %v915_v7  ;;  %v1679_v4 = vstv %s4588_s19  ;;  %v4673_v7 = vld [vmem:[#allocation2 + $0x21] sm:$0xff]  ;;  %s4708_s19 = sld [smem:[#allocation11 + $0x1]] }
 0x212   : > { %1627 = vrot.lane.b32.xlu1 %v1625_v11, %s3713_s16  ;;  %1619 = vrot.lane.b32.xlu0 %v1617_v12, %s3714_s12  ;;  %v1680_v39 = vmul.f32 %v1679_v4, %v4628_v3  ;;  %v1721_v11 = vstv %s4634_s2  ;;  %v997_v12 = vstv %s4636_s24  ;;  %s4741_s2 = sld [smem:[#allocation10 + $0x27]]  ;;  %s4756_s24 = sld [smem:[#allocation10 + $0xa5]] }
 0x213   : > { %v931_v17 = vadd.f32 %v4519_v37, %v923_v57  ;;  %v1687_v37 = vstv %s4586_s15  ;;  %v1090_v57 = vstv %s4640_s17  ;;  %s4705_s15 = sld [smem:[#allocation10 + $0x6a]]  ;;  %v1111_v4 = vstv %s4671_s13  ;;  %s4758_s17 = sld [smem:[#allocation10 + $0x47]] }
 0x214   : > { %v4598_v21 = vpop.permute.xlu1 %1012  ;;  %v4600_v22 = vpop.permute.xlu0 %1004  ;;  %v1688_v14 = vmul.f32 %v1687_v37, %v4628_v3  ;;  %s4781_s13 = sld [smem:[#allocation10 + $0x72]] }
 0x215   : > { %v936_v56 = vadd.f32 %v935_v20, %v931_v17 }
 0x216   : > { %1648 = vrot.lane.b32.xlu1 %v1646_v63, %s3713_s16  ;;  %1640 = vrot.lane.b32.xlu0 %v1638_v29, %s3714_s12  ;;  %v1730_v63 = vmul.f32 %v1729_v8, %v4673_v7  ;;  %v1722_v29 = vmul.f32 %v1721_v11, %v4673_v7 }
 0x217   : > { %v944_v28 = vadd.f32 %v942_v50, %v936_v56  ;;  %v1750_v56 = vstv %s4649_s0  ;;  %v1038_v11 = vstv %s4708_s19  ;;  %s4763_s0 = sld [smem:[#allocation10 + $0x12]]  ;;  %s4819_s19 = sld [smem:[#allocation10 + $0x3]] }
 0x218   : > { %v4617_v44 = vpop.permute.xlu1 %1033  ;;  %v4619_v30 = vpop.permute.xlu0 %1025 }
 0x219   : > { %v952_v5 = vadd.f32 %v4534_v48, %v944_v28  ;;  %v998_v28 = vmul.f32 %v4691_v27, %v997_v12 }
 0x21a   : > { %1669 = vrot.lane.b32.xlu1 %v1667_v31, %s3713_s16  ;;  %1661 = vrot.lane.b32.xlu0 %v1659_v32, %s3714_s12  ;;  %v4694_v32 = vld [vmem:[#allocation2 + $0x2] sm:$0xff] }
 0x21b   : > { %v957_v38 = vadd.f32 %v956_v36, %v952_v5  ;;  %v1018_v36 = vstv %s4667_s9  ;;  %s4772_s9 = sld [smem:[#allocation10 + $0x86]] }
 0x21c   : > { %v1064_v49 = vpop.permute.xlu1 %1063  ;;  %v1056_v43 = vpop.permute.xlu0 %1055 }
 0x21d   : > { %v965_v48 = vadd.f32 %v4554_v19, %v957_v38  ;;  %v1058_v50 = vadd.f32 %v1056_v43, %v1049_v33  ;;  %v4664_v19 = vld [vmem:[#allocation2 + $0x1] sm:$0xff]  ;;  %v1751_v33 = vmul.f32 %v1750_v56, %v4697_v35 }
 0x21e   : > { %1690 = vrot.lane.b32.xlu1 %v1688_v14, %s3713_s16  ;;  %1682 = vrot.lane.b32.xlu0 %v1680_v39, %s3714_s12  ;;  %v1070_v47 = vmul.f32 %v4664_v19, %v1069_v45  ;;  %v4716_v14 = vld [vmem:[#allocation2 + $0x30] sm:$0xff]  ;;  %v1771_v39 = vstv %s4677_s11  ;;  %v1763_v45 = vstv %s4679_s5  ;;  %s4788_s11 = sld [smem:[#allocation10 + $0xe5]]  ;;  %s4790_s5 = sld [smem:[#allocation10 + $0x87]] }
 0x21f   : > { %v973_v55 = vadd.f32 %v4552_v61, %v965_v48  ;;  %v1066_v59 = vadd.f32 %v1064_v49, %v1058_v50  ;;  %v1701_v61 = vmul.f32 %v1700_v53, %v4654_v51  ;;  %v4727_v50 = vld [vmem:[#allocation2 + $0x32] sm:$0xff] }
 0x220   : > { %v1085_v46 = vpop.permute.xlu1 %1084  ;;  %v1077_v62 = vpop.permute.xlu0 %1076  ;;  %v4730_v53 = vld [vmem:[#allocation2 + $0x10] sm:$0xff] }
 0x221   : > { %v978_v2 = vadd.f32 %v977_v9, %v973_v55  ;;  %v1071_v6 = vadd.f32 %v1070_v47, %v1066_v59  ;;  %v1112_v55 = vmul.f32 %v4730_v53, %v1111_v4  ;;  %v1772_v47 = vmul.f32 %v1771_v39, %v4716_v14 }
 0x222   : > { %1711 = vrot.lane.b32.xlu1 %v1709_v60, %s3713_s16  ;;  %1703 = vrot.lane.b32.xlu0 %v1701_v61, %s3714_s12  ;;  %v1843_v60 = vstv %s4699_s22  ;;  %v1835_v61 = vstv %s4701_s10  ;;  %s4804_s22 = sld [smem:[#allocation10 + $0x105]]  ;;  %s4806_s10 = sld [smem:[#allocation10 + $0xa7]] }
 0x223   : > { %v986_v15 = vadd.f32 %v4576_v24, %v978_v2  ;;  %v1079_v16 = vadd.f32 %v1077_v62, %v1071_v6  ;;  %v1091_v24 = vmul.f32 %v4694_v32, %v1090_v57  ;;  %v1132_v2 = vstv %s4705_s15  ;;  %s4808_s15 = sld [smem:[#allocation10 + $0xd2]] }
 0x224   : > { %v1106_v17 = vpop.permute.xlu1 %1105  ;;  %v1098_v20 = vpop.permute.xlu0 %1097  ;;  %v1856_v4 = vstv %s4739_s23  ;;  %s4842_s23 = sld [smem:[#allocation10 + $0x2d]] }
 0x225   : > { %v994_v26 = vadd.f32 %v4574_v10, %v986_v15  ;;  %v1087_v31 = vadd.f32 %v1085_v46, %v1079_v16  ;;  %v1764_v46 = vmul.f32 %v1763_v45, %v4716_v14  ;;  %v1844_v15 = vmul.f32 %v1843_v60, %v4523_v42 }
 0x226   : > { %1732 = vrot.lane.b32.xlu1 %v1730_v63, %s3713_s16  ;;  %1724 = vrot.lane.b32.xlu0 %v1722_v29, %s3714_s12  ;;  %v1836_v16 = vmul.f32 %v1835_v61, %v4523_v42  ;;  %v4752_v29 = vld [vmem:[#allocation2 + $0x11] sm:$0xff] }
 0x227   : > { %v999_v10 = vadd.f32 %v998_v28, %v994_v26  ;;  %v1092_v5 = vadd.f32 %v1091_v24, %v1087_v31  ;;  %v1133_v56 = vmul.f32 %v4752_v29, %v1132_v2  ;;  %v1153_v28 = vstv %s4735_s20  ;;  %s4838_s20 = sld [smem:[#allocation10 + $0x63]] }
 0x228   : > { %v1127_v37 = vpop.permute.xlu1 %1126  ;;  %v1119_v38 = vpop.permute.xlu0 %1118 }
 0x229   : > { %v1007_v49 = vadd.f32 %v4600_v22, %v999_v10  ;;  %v1100_v43 = vadd.f32 %v1098_v20, %v1092_v5  ;;  %v1019_v22 = vmul.f32 %v4727_v50, %v1018_v36  ;;  %v2097_v5 = vmul.f32 %v2096_v25, %v4523_v42 }
 0x22a   : > { %1753 = vrot.lane.b32.xlu1 %v1751_v33, %s3713_s16  ;;  %1745 = vrot.lane.b32.xlu0 %v1743_v41, %s3714_s12 }
 0x22b   : > { %v1015_v48 = vadd.f32 %v4598_v21, %v1007_v49  ;;  %v1108_v52 = vadd.f32 %v1106_v17, %v1100_v43  ;;  %v2104_v17 = vstv %s4713_s14  ;;  %v4776_v49 = vld [vmem:[#allocation2 + $0x12] sm:$0xff]  ;;  %s4823_s14 = sld [smem:[#allocation10 + $0x106]] }
 0x22c   : > { %v1148_v9 = vpop.permute.xlu1 %1147  ;;  %v1140_v59 = vpop.permute.xlu0 %1139  ;;  %v2105_v10 = vmul.f32 %v2104_v17, %v4523_v42  ;;  %v1154_v43 = vmul.f32 %v4776_v49, %v1153_v28 }
 0x22d   : > { %v1020_v21 = vadd.f32 %v1019_v22, %v1015_v48  ;;  %v1113_v62 = vadd.f32 %v1112_v55, %v1108_v52  ;;  %v1857_v48 = vmul.f32 %v1856_v4, %v4541_v54  ;;  %v1864_v55 = vstv %s4756_s24  ;;  %s4860_s24 = sld [smem:[#allocation10 + $0x4d]] }
 0x22e   : > { %1774 = vrot.lane.b32.xlu1 %v1772_v47, %s3713_s16  ;;  %1766 = vrot.lane.b32.xlu0 %v1764_v46, %s3714_s12 }
 0x22f   : > { %v1028_v6 = vadd.f32 %v4619_v30, %v1020_v21  ;;  %v1121_v8 = vadd.f32 %v1119_v38, %v1113_v62  ;;  %v1041_v30 = vstv %s4722_s30  ;;  %v2357_v38 = vstv %s4741_s2  ;;  %s4830_s30 = sld [smem:[#allocation10 + $0x1a]]  ;;  %s4844_s2 = sld [smem:[#allocation10 + $0xe7]] }
 0x230   : > { %v1169_v12 = vpop.permute.xlu1 %1168  ;;  %v1161_v57 = vpop.permute.xlu0 %1160  ;;  %v2358_v22 = vmul.f32 %v2357_v38, %v4523_v42  ;;  %v1865_v62 = vmul.f32 %v1864_v55, %v4541_v54  ;;  %v2138_v55 = vstv %s4825_s3  ;;  %s4920_s3 = sld [smem:[#allocation11 + $0x2]] }
 0x231   : > { %v1036_v20 = vadd.f32 %v4617_v44, %v1028_v6  ;;  %v1129_v63 = vadd.f32 %v1127_v37, %v1121_v8  ;;  %v2125_v6 = vstv %s4770_s18  ;;  %v2117_v8 = vstv %s4772_s9  ;;  %s4868_s18 = sld [smem:[#allocation10 + $0xc3]]  ;;  %s4875_s9 = sld [smem:[#allocation10 + $0x4e]] }
 0x232   : > { %1846 = vrot.lane.b32.xlu1 %v1844_v15, %s3713_s16  ;;  %1838 = vrot.lane.b32.xlu0 %v1836_v16, %s3714_s12  ;;  %v2126_v16 = vmul.f32 %v2125_v6, %v4541_v54  ;;  %v2118_v17 = vmul.f32 %v2117_v8, %v4541_v54  ;;  %v1898_v8 = vstv %s4842_s23  ;;  %s4932_s23 = sld [smem:[#allocation13 + $0x2]] }
 0x233   : > { %v1039_v44 = vmul.f32 %v1038_v11, %v1036_v20  ;;  %v1134_v26 = vadd.f32 %v1133_v56, %v1129_v63  ;;  %v1877_v63 = vstv %s4788_s11  ;;  %v2378_v56 = vstv %s4790_s5  ;;  %s4887_s11 = sld [smem:[#allocation10 + $0xda]]  ;;  %s4891_s5 = sld [smem:[#allocation10 + $0xb]] }
 0x234   : > { %v1190_v31 = vpop.permute.xlu1 %1189  ;;  %v1182_v24 = vpop.permute.xlu0 %1181  ;;  %v1878_v28 = vmul.f32 %v1877_v63, %v4561_v1  ;;  %v1899_v63 = vmul.f32 %v1898_v8, %v4582_v13 }
 0x235   : > { %v1042_v36 = vadd.f32 %v1041_v30, %v1039_v44  ;;  %v1142_v37 = vadd.f32 %v1140_v59, %v1134_v26  ;;  %v1174_v59 = vstv %s4763_s0  ;;  %s4864_s0 = sld [smem:[#allocation10 + $0x7a]] }
 0x236   : > { %2107 = vrot.lane.b32.xlu1 %v2105_v10, %s3713_s16  ;;  %2099 = vrot.lane.b32.xlu0 %v2097_v5, %s3714_s12  ;;  %v1175_v2 = vmul.f32 %v4558_v0, %v1174_v59  ;;  %v1885_v5 = vstv %s4804_s22  ;;  %s4895_s22 = sld [smem:[#allocation10 + $0x8d]] }
 0x237   : > { %v1043_v33 = vmax.f32 %v1042_v36, 0.0  ;;  %v1150_v41 = vadd.f32 %v1148_v9, %v1142_v37  ;;  %v2365_v9 = vstv %s4758_s17  ;;  %v1216_v36 = vstv %s4808_s15  ;;  %s4862_s17 = sld [smem:[#allocation10 + $0x107]]  ;;  %s4911_s15 = sld [smem:[#allocation10 + $0xad]] }
 0x238   : > { %v4779_v39 = vpop.permute.xlu1 %1210  ;;  %v1203_v45 = vpop.permute.xlu0 %1202  ;;  %v2366_v60 = vmul.f32 %v2365_v9, %v4523_v42  ;;  %v1237_v9 = vstv %s4830_s30  ;;  %s4925_s30 = sld [smem:[#allocation10 + $0xae]] }
 0x239   : > { %1045 = vst.msk [vmem:[#allocation3 + $0x8] sm:$0xff] %vm783_vm4, %v1043_v33  ;;  %v1155_v52 = vadd.f32 %v1154_v43, %v1150_v41  ;;  %v1886_v33 = vmul.f32 %v1885_v5, %v4561_v1  ;;  %v1309_v43 = vstv %s4819_s19  ;;  %s4913_s19 = sld [smem:[#allocation10 + $0x4f]] }
 0x23a   : > { %1859 = vrot.lane.b32.xlu1 %v1857_v48, %s3714_s12  ;;  %2360 = vrot.lane.b32.xlu0 %v2358_v22, %s3714_s12  ;;  %v1217_v22 = vmul.f32 %v4625_v34, %v1216_v36 }
 0x23b   : > { %v1163_v47 = vadd.f32 %v1161_v57, %v1155_v52  ;;  %v1195_v57 = vstv %s4781_s13  ;;  %v2146_v52 = vstv %s4823_s14  ;;  %s4877_s13 = sld [smem:[#allocation10 + $0x2e]]  ;;  %s4917_s14 = sld [smem:[#allocation10 + $0x6b]] }
 0x23c   : > { %v4795_v46 = vpop.permute.xlu1 %1231  ;;  %v4797_v21 = vpop.permute.xlu0 %1223  ;;  %v1196_v30 = vmul.f32 %v4593_v18, %v1195_v57  ;;  %v1238_v57 = vmul.f32 %v4661_v58, %v1237_v9  ;;  %v1372_v9 = vstv %s4891_s5  ;;  %s4983_s5 = sld [smem:[#allocation10 + $0x73]] }
 0x23d   : > { %v1171_v61 = vadd.f32 %v1169_v12, %v1163_v47 }
 0x23e   : > { %1867 = vrot.lane.b32.xlu1 %v1865_v62, %s3713_s16  ;;  %2368 = vrot.lane.b32.xlu0 %v2366_v60, %s3713_s16  ;;  %v2147_v62 = vmul.f32 %v2146_v52, %v4561_v1  ;;  %v2139_v60 = vmul.f32 %v2138_v55, %v4561_v1 }
 0x23f   : > { %v1176_v11 = vadd.f32 %v1175_v2, %v1171_v61  ;;  %v1330_v61 = vstv %s4838_s20  ;;  %s4930_s20 = sld [smem:[#allocation10 + $0x8e]] }
 0x240   : > { %v4813_v15 = vpop.permute.xlu1 %1252  ;;  %v4815_v12 = vpop.permute.xlu0 %1244 }
 0x241   : > { %v1184_v20 = vadd.f32 %v1182_v24, %v1176_v11  ;;  %v2379_v24 = vmul.f32 %v2378_v56, %v4541_v54  ;;  %v2399_v11 = vstv %s4844_s2  ;;  %s4941_s2 = sld [smem:[#allocation10 + $0xcb]] }
 0x242   : > { %2128 = vrot.lane.b32.xlu1 %v2126_v16, %s3713_s16  ;;  %2120 = vrot.lane.b32.xlu0 %v2118_v17, %s3714_s12  ;;  %v1331_v17 = vmul.f32 %v4664_v19, %v1330_v61  ;;  %v2400_v56 = vmul.f32 %v2399_v11, %v4561_v1  ;;  %v1258_v19 = vstv %s4864_s0  ;;  %v1919_v61 = vstv %s4895_s22  ;;  %s4960_s0 = sld [smem:[#allocation10 + $0x10d]] }
 0x243   : > { %v1192_v25 = vadd.f32 %v1190_v31, %v1184_v20  ;;  %v2386_v31 = vstv %s4806_s10  ;;  %s4897_s10 = sld [smem:[#allocation10 + $0x2f]]  ;;  %s4990_s22 = sld [smem:[#allocation10 + $0x35]] }
 0x244   : > { %v4832_v44 = vpop.permute.xlu1 %1273  ;;  %v4834_v26 = vpop.permute.xlu0 %1265  ;;  %v2387_v41 = vmul.f32 %v2386_v31, %v4541_v54 }
 0x245   : > { %v1197_v10 = vadd.f32 %v1196_v30, %v1192_v25  ;;  %v1906_v30 = vstv %s4860_s24  ;;  %s4945_s24 = sld [smem:[#allocation10 + $0xed]] }
 0x246   : > { %1880 = vrot.lane.b32.xlu1 %v1878_v28, %s3714_s12  ;;  %2381 = vrot.lane.b32.xlu0 %v2379_v24, %s3714_s12  ;;  %v2407_v28 = vstv %s4862_s17  ;;  %v1351_v24 = vstv %s4868_s18  ;;  %s4947_s17 = sld [smem:[#allocation10 + $0x8f]] }
 0x247   : > { %v1205_v37 = vadd.f32 %v1203_v45, %v1197_v10  ;;  %v1310_v45 = vmul.f32 %v4642_v40, %v1309_v43  ;;  %v2159_v43 = vstv %s4877_s13  ;;  %v1352_v55 = vmul.f32 %v4694_v32, %v1351_v24  ;;  %s4962_s18 = sld [smem:[#allocation10 + $0xaf]]  ;;  %s4974_s13 = sld [smem:[#allocation10 + $0x10e]] }
 0x248   : > { %v4849_v4 = vpop.permute.xlu1 %1294  ;;  %v4851_v38 = vpop.permute.xlu0 %1286 }
 0x249   : > { %v1213_v48 = vadd.f32 %v4779_v39, %v1205_v37  ;;  %v1907_v37 = vmul.f32 %v1906_v30, %v4582_v13 }
 0x24a   : > { %1888 = vrot.lane.b32.xlu1 %v1886_v33, %s3713_s16  ;;  %2389 = vrot.lane.b32.xlu0 %v2387_v41, %s3713_s16  ;;  %v2408_v33 = vmul.f32 %v2407_v28, %v4561_v1  ;;  %v2167_v41 = vstv %s4875_s9  ;;  %s4967_s9 = sld [smem:[#allocation10 + $0x13]] }
 0x24b   : > { %v1218_v39 = vadd.f32 %v1217_v22, %v1213_v48  ;;  %v1259_v22 = vmul.f32 %v4691_v27, %v1258_v19 }
 0x24c   : > { %v1325_v59 = vpop.permute.xlu1 %1324  ;;  %v1317_v47 = vpop.permute.xlu0 %1316 }
 0x24d   : > { %v1226_v2 = vadd.f32 %v4797_v21, %v1218_v39  ;;  %v1319_v6 = vadd.f32 %v1317_v47, %v1310_v45  ;;  %v2160_v47 = vmul.f32 %v2159_v43, %v4582_v13 }
 0x24e   : > { %2149 = vrot.lane.b32.xlu1 %v2147_v62, %s3713_s16  ;;  %2141 = vrot.lane.b32.xlu0 %v2139_v60, %s3714_s12 }
 0x24f   : > { %v1234_v40 = vadd.f32 %v4795_v46, %v1226_v2  ;;  %v1327_v16 = vadd.f32 %v1325_v59, %v1319_v6  ;;  %v2168_v59 = vmul.f32 %v2167_v41, %v4582_v13  ;;  %v2420_v2 = vstv %s4897_s10  ;;  %s4992_s10 = sld [smem:[#allocation10 + $0xef]] }
 0x250   : > { %v1346_v21 = vpop.permute.xlu1 %1345  ;;  %v1338_v20 = vpop.permute.xlu0 %1337 }
 0x251   : > { %v1239_v25 = vadd.f32 %v1238_v57, %v1234_v40  ;;  %v1332_v46 = vadd.f32 %v1331_v17, %v1327_v16  ;;  %v1920_v16 = vmul.f32 %v1919_v61, %v4606_v23  ;;  %v2421_v17 = vmul.f32 %v2420_v2, %v4582_v13 }
 0x252   : > { %1901 = vrot.lane.b32.xlu1 %v1899_v63, %s3714_s12  ;;  %2402 = vrot.lane.b32.xlu0 %v2400_v56, %s3714_s12  ;;  %v1927_v63 = vstv %s4911_s15  ;;  %v2428_v56 = vstv %s4913_s19  ;;  %s5006_s15 = sld [smem:[#allocation10 + $0x55]]  ;;  %s5008_s19 = sld [smem:[#allocation10 + $0x10f]] }
 0x253   : > { %v1247_v10 = vadd.f32 %v4815_v12, %v1239_v25  ;;  %v1340_v5 = vadd.f32 %v1338_v20, %v1332_v46  ;;  %v1299_v46 = vstv %s4920_s3  ;;  %v1928_v19 = vmul.f32 %v1927_v63, %v4606_v23  ;;  %s5021_s3 = sld [smem:[#allocation10 + $0x4]] }
 0x254   : > { %v1367_v31 = vpop.permute.xlu1 %1366  ;;  %v1359_v36 = vpop.permute.xlu0 %1358  ;;  %v2429_v24 = vmul.f32 %v2428_v56, %v4582_v13  ;;  %v2449_v61 = vstv %s4962_s18  ;;  %s5064_s18 = sld [smem:[#allocation10 + $0x57]] }
 0x255   : > { %v1255_v48 = vadd.f32 %v4813_v15, %v1247_v10  ;;  %v1348_v52 = vadd.f32 %v1346_v21, %v1340_v5  ;;  %v1279_v15 = vstv %s4887_s11  ;;  %v2188_v10 = vstv %s4925_s30  ;;  %s4976_s11 = sld [smem:[#allocation10 + $0xee]] }
 0x256   : > { %1909 = vrot.lane.b32.xlu1 %v1907_v37, %s3713_s16  ;;  %2410 = vrot.lane.b32.xlu0 %v2408_v33, %s3713_s16  ;;  %v1280_v8 = vmul.f32 %v4727_v50, %v1279_v15  ;;  %v2180_v37 = vstv %s4930_s20  ;;  %s5025_s30 = sld [smem:[#allocation10 + $0x56]] }
 0x257   : > { %v1260_v12 = vadd.f32 %v1259_v22, %v1255_v48  ;;  %v1353_v39 = vadd.f32 %v1352_v55, %v1348_v52  ;;  %v2181_v48 = vmul.f32 %v2180_v37, %v4606_v23  ;;  %v1940_v55 = vstv %s4945_s24  ;;  %s5027_s20 = sld [smem:[#allocation10 + $0x36]]  ;;  %s5044_s24 = sld [smem:[#allocation10 + $0x95]] }
 0x258   : > { %v1388_v45 = vpop.permute.xlu1 %1387  ;;  %v1380_v32 = vpop.permute.xlu0 %1379 }
 0x259   : > { %v1268_v62 = vadd.f32 %v4834_v26, %v1260_v12  ;;  %v1361_v60 = vadd.f32 %v1359_v36, %v1353_v39  ;;  %v1373_v26 = vmul.f32 %v4730_v53, %v1372_v9  ;;  %v1393_v53 = vstv %s4917_s14  ;;  %s5010_s14 = sld [smem:[#allocation10 + $0xd3]] }
 0x25a   : > { %2170 = vrot.lane.b32.xlu1 %v2168_v59, %s3713_s16  ;;  %2162 = vrot.lane.b32.xlu0 %v2160_v47, %s3714_s12  ;;  %v1394_v36 = vmul.f32 %v4752_v29, %v1393_v53  ;;  %v2189_v29 = vmul.f32 %v2188_v10, %v4606_v23  ;;  %v2441_v12 = vstv %s4947_s17  ;;  %v1941_v59 = vmul.f32 %v1940_v55, %v4628_v3  ;;  %s5046_s17 = sld [smem:[#allocation10 + $0x37]] }
 0x25b   : > { %v1276_v6 = vadd.f32 %v4832_v44, %v1268_v62  ;;  %v1369_v11 = vadd.f32 %v1367_v31, %v1361_v60  ;;  %v2442_v47 = vmul.f32 %v2441_v12, %v4606_v23  ;;  %v1948_v60 = vstv %s4960_s0  ;;  %s5062_s0 = sld [smem:[#allocation10 + $0xb5]] }
 0x25c   : > { %v1409_v40 = vpop.permute.xlu1 %1408  ;;  %v1401_v57 = vpop.permute.xlu0 %1400 }
 0x25d   : > { %v1281_v21 = vadd.f32 %v1280_v8, %v1276_v6  ;;  %v1374_v20 = vadd.f32 %v1373_v26, %v1369_v11  ;;  %v1949_v11 = vmul.f32 %v1948_v60, %v4628_v3  ;;  %v2450_v26 = vmul.f32 %v2449_v61, %v4606_v23 }
 0x25e   : > { %1922 = vrot.lane.b32.xlu1 %v1920_v16, %s3714_s12  ;;  %2423 = vrot.lane.b32.xlu0 %v2421_v17, %s3714_s12  ;;  %v2209_v16 = vstv %s4974_s13  ;;  %v2201_v17 = vstv %s4976_s11  ;;  %s5070_s13 = sld [smem:[#allocation10 + $0xc4]]  ;;  %s5077_s11 = sld [smem:[#allocation10 + $0xb6]] }
 0x25f   : > { %v1289_v44 = vadd.f32 %v4851_v38, %v1281_v21  ;;  %v1382_v25 = vadd.f32 %v1380_v32, %v1374_v20  ;;  %v1302_v38 = vstv %s4932_s23  ;;  %v1456_v20 = vstv %s4983_s5  ;;  %s5032_s23 = sld [smem:[#allocation10 + $0x1b]]  ;;  %s5079_s5 = sld [smem:[#allocation10 + $0x96]] }
 0x260   : > { %v1430_v30 = vpop.permute.xlu1 %1429  ;;  %v1422_v28 = vpop.permute.xlu0 %1421  ;;  %v2202_v56 = vmul.f32 %v2201_v17, %v4628_v3 }
 0x261   : > { %v1297_v5 = vadd.f32 %v4849_v4, %v1289_v44  ;;  %v1390_v31 = vadd.f32 %v1388_v45, %v1382_v25  ;;  %v1414_v4 = vstv %s4941_s2  ;;  %v1961_v44 = vstv %s4990_s22  ;;  %s5040_s2 = sld [smem:[#allocation10 + $0x64]]  ;;  %s5089_s22 = sld [smem:[#allocation10 + $0xdb]] }
 0x262   : > { %1930 = vrot.lane.b32.xlu1 %v1928_v19, %s3713_s16  ;;  %2431 = vrot.lane.b32.xlu0 %v2429_v24, %s3713_s16  ;;  %v1415_v45 = vmul.f32 %v4776_v49, %v1414_v4  ;;  %v1435_v49 = vstv %s4967_s9  ;;  %v2462_v25 = vstv %s4992_s10  ;;  %v1962_v24 = vmul.f32 %v1961_v44, %v4654_v51  ;;  %s5066_s9 = sld [smem:[#allocation10 + $0x7b]]  ;;  %s5093_s10 = sld [smem:[#allocation10 + $0xc]] }
 0x263   : > { %v1300_v13 = vmul.f32 %v1299_v46, %v1297_v5  ;;  %v1395_v33 = vadd.f32 %v1394_v36, %v1390_v31  ;;  %v2463_v10 = vmul.f32 %v2462_v25, %v4628_v3  ;;  %v1969_v31 = vstv %s5006_s15  ;;  %s5097_s15 = sld [smem:[#allocation10 + $0xf5]] }
 0x264   : > { %v1451_v41 = vpop.permute.xlu1 %1450  ;;  %v1443_v43 = vpop.permute.xlu0 %1442  ;;  %v2470_v36 = vstv %s5008_s19  ;;  %s5099_s19 = sld [smem:[#allocation10 + $0x97]] }
 0x265   : > { %v1303_v22 = vadd.f32 %v1302_v38, %v1300_v13  ;;  %v1403_v52 = vadd.f32 %v1401_v57, %v1395_v33  ;;  %v1436_v57 = vmul.f32 %v4558_v0, %v1435_v49  ;;  %v2210_v0 = vmul.f32 %v2209_v16, %v4628_v3 }
 0x266   : > { %2191 = vrot.lane.b32.xlu1 %v2189_v29, %s3713_s16  ;;  %2183 = vrot.lane.b32.xlu0 %v2181_v48, %s3714_s12  ;;  %v1970_v33 = vmul.f32 %v1969_v31, %v4654_v51  ;;  %v2471_v4 = vmul.f32 %v2470_v36, %v4628_v3  ;;  %v2230_v48 = vstv %s5025_s30  ;;  %v2243_v44 = vstv %s5079_s5  ;;  %s5119_s30 = sld [smem:[#allocation10 + $0x6c]] }
 0x267   : > { %v1304_v39 = vmax.f32 %v1303_v22, 0.0  ;;  %v1411_v15 = vadd.f32 %v1409_v40, %v1403_v52  ;;  %v2222_v22 = vstv %s5027_s20  ;;  %v1498_v52 = vstv %s5032_s23  ;;  %s5122_s20 = sld [smem:[#allocation11 + $0x3]]  ;;  %s5127_s23 = sld [smem:[#allocation10 + $0x116]] }
 0x268   : > { %v4981_v9 = vpop.permute.xlu1 %1471  ;;  %v1464_v32 = vpop.permute.xlu0 %1463  ;;  %v2244_v31 = vmul.f32 %v2243_v44, %v4673_v7  ;;  %s5182_s5 = sld [smem:[#allocation10 + $0x9c]] }
 0x269   : > { %1306 = vst.msk [vmem:[#allocation3 + $0x10] sm:$0xff] %vm783_vm4, %v1304_v39  ;;  %v1416_v62 = vadd.f32 %v1415_v45, %v1411_v15  ;;  %v2231_v39 = vmul.f32 %v2230_v48, %v4654_v51  ;;  %v2223_v15 = vmul.f32 %v2222_v22, %v4654_v51  ;;  %v1591_v45 = vstv %s5040_s2  ;;  %s5132_s2 = sld [smem:[#allocation10 + $0xf6]] }
 0x26a   : > { %1943 = vrot.lane.b32.xlu1 %v1941_v59, %s3714_s12  ;;  %2444 = vrot.lane.b32.xlu0 %v2442_v47, %s3714_s12  ;;  %v1982_v59 = vstv %s5044_s24  ;;  %v2483_v47 = vstv %s5046_s17  ;;  %v1592_v61 = vmul.f32 %v1591_v45, %v4541_v54  ;;  %s5134_s24 = sld [smem:[#allocation13 + $0x3]]  ;;  %s5145_s17 = sld [smem:[#allocation10 + $0xcc]] }
 0x26b   : > { %v1424_v2 = vadd.f32 %v1422_v28, %v1416_v62  ;;  %v1499_v62 = vmul.f32 %v4661_v58, %v1498_v52  ;;  %v2491_v58 = vstv %s5064_s18  ;;  %v1519_v54 = vstv %s5066_s9  ;;  %s5151_s18 = sld [smem:[#allocation10 + $0xf7]]  ;;  %s5166_s9 = sld [smem:[#allocation10 + $0x5d]] }
 0x26c   : > { %v4997_v6 = vpop.permute.xlu1 %1492  ;;  %v4999_v8 = vpop.permute.xlu0 %1484 }
 0x26d   : > { %v1432_v40 = vadd.f32 %v1430_v30, %v1424_v2  ;;  %v1457_v30 = vmul.f32 %v4593_v18, %v1456_v20  ;;  %v1477_v18 = vstv %s5010_s14  ;;  %s5113_s14 = sld [smem:[#allocation10 + $0x115]]  ;;  %v1560_v45 = vstv %s5122_s20 }
 0x26e   : > { %1951 = vrot.lane.b32.xlu1 %v1949_v11, %s3713_s16  ;;  %2452 = vrot.lane.b32.xlu0 %v2450_v26, %s3713_s16  ;;  %v1478_v29 = vmul.f32 %v4625_v34, %v1477_v18  ;;  %v2484_v11 = vmul.f32 %v2483_v47, %v4654_v51  ;;  %s5221_s20 = sld [smem:[#allocation10 + $0x65]] }
 0x26f   : > { %v1437_v21 = vadd.f32 %v1436_v57, %v1432_v40  ;;  %v1990_v40 = vstv %s5062_s0  ;;  %v1612_v57 = vstv %s5070_s13  ;;  %s5149_s0 = sld [smem:[#allocation10 + $0x3d]]  ;;  %s5168_s13 = sld [smem:[#allocation10 + $0x117]] }
 0x270   : > { %v5015_v23 = vpop.permute.xlu1 %1513  ;;  %v5017_v63 = vpop.permute.xlu0 %1505 }
 0x271   : > { %v1445_v53 = vadd.f32 %v1443_v43, %v1437_v21 }
 0x272   : > { %2212 = vrot.lane.b32.xlu1 %v2210_v0, %s3713_s16  ;;  %2204 = vrot.lane.b32.xlu0 %v2202_v56, %s3714_s12  ;;  %v1991_v0 = vmul.f32 %v1990_v40, %v4673_v7  ;;  %v2492_v56 = vmul.f32 %v2491_v58, %v4654_v51 }
 0x273   : > { %v1453_v46 = vadd.f32 %v1451_v41, %v1445_v53  ;;  %v1570_v41 = vstv %s5021_s3  ;;  %v2251_v53 = vstv %s5077_s11  ;;  %s5115_s3 = sld [smem:[#allocation10 + $0xb7]]  ;;  %s5173_s11 = sld [smem:[#allocation10 + $0x14]] }
 0x274   : > { %v5034_v28 = vpop.permute.xlu1 %1534  ;;  %v5036_v19 = vpop.permute.xlu0 %1526  ;;  %v1571_v34 = vmul.f32 %v1570_v41, %v4523_v42 }
 0x275   : > { %v1458_v5 = vadd.f32 %v1457_v30, %v1453_v46  ;;  %v1520_v46 = vmul.f32 %v4691_v27, %v1519_v54 }
 0x276   : > { %1964 = vrot.lane.b32.xlu1 %v1962_v24, %s3714_s12  ;;  %2465 = vrot.lane.b32.xlu0 %v2463_v10, %s3714_s12  ;;  %v1613_v24 = vmul.f32 %v1612_v57, %v4561_v1  ;;  %v1633_v10 = vstv %s5093_s10  ;;  %v2024_v57 = vstv %s5149_s0  ;;  %s5193_s10 = sld [smem:[#allocation10 + $0x74]]  ;;  %s5248_s0 = sld [smem:[#allocation10 + $0x5f]] }
 0x277   : > { %v1466_v37 = vadd.f32 %v1464_v32, %v1458_v5  ;;  %v2252_v5 = vmul.f32 %v2251_v53, %v4673_v7  ;;  %v2025_v44 = vmul.f32 %v2024_v57, %v4716_v14 }
 0x278   : > { %v5051_v38 = vpop.permute.xlu1 %1555  ;;  %v5053_v13 = vpop.permute.xlu0 %1547 }
 0x279   : > { %v1474_v43 = vadd.f32 %v4981_v9, %v1466_v37  ;;  %v2003_v37 = vstv %s5097_s15  ;;  %s5199_s15 = sld [smem:[#allocation10 + $0x5]] }
 0x27a   : > { %1972 = vrot.lane.b32.xlu1 %v1970_v33, %s3713_s16  ;;  %2473 = vrot.lane.b32.xlu0 %v2471_v4, %s3713_s16  ;;  %v2504_v33 = vstv %s5099_s19  ;;  %s5204_s19 = sld [smem:[#allocation10 + $0x3f]] }
 0x27b   : > { %v1479_v3 = vadd.f32 %v1478_v29, %v1474_v43 }
 0x27c   : > { %v1586_v55 = vpop.permute.xlu1 %1585  ;;  %v1578_v12 = vpop.permute.xlu0 %1577 }
 0x27d   : > { %v1487_v9 = vadd.f32 %v4999_v8, %v1479_v3  ;;  %v1580_v32 = vadd.f32 %v1578_v12, %v1571_v34  ;;  %v1983_v8 = vmul.f32 %v1982_v59, %v4673_v7  ;;  %v2004_v3 = vmul.f32 %v2003_v37, %v4697_v35 }
 0x27e   : > { %2233 = vrot.lane.b32.xlu1 %v2231_v39, %s3713_s16  ;;  %2225 = vrot.lane.b32.xlu0 %v2223_v15, %s3714_s12  ;;  %v2505_v34 = vmul.f32 %v2504_v33, %v4673_v7  ;;  %v2512_v12 = vstv %s5115_s3  ;;  %s5211_s3 = sld [smem:[#allocation10 + $0xd4]]  ;;  %v1784_v37 = vstv %s5182_s5  ;;  %s5275_s5 = sld [smem:[#allocation10 + $0xc5]] }
 0x27f   : > { %v1495_v42 = vadd.f32 %v4997_v6, %v1487_v9  ;;  %v1588_v60 = vadd.f32 %v1586_v55, %v1580_v32  ;;  %v2011_v55 = vstv %s5113_s14  ;;  %v2513_v47 = vmul.f32 %v2512_v12, %v4673_v7  ;;  %s5206_s14 = sld [smem:[#allocation10 + $0x5e]] }
 0x280   : > { %v1607_v49 = vpop.permute.xlu1 %1606  ;;  %v1599_v2 = vpop.permute.xlu0 %1598  ;;  %v2012_v59 = vmul.f32 %v2011_v55, %v4697_v35  ;;  %v5263_v55 = vld [vmem:[#allocation2 + $0x21] sm:$0xff] }
 0x281   : > { %v1500_v26 = vadd.f32 %v1499_v62, %v1495_v42  ;;  %v1593_v6 = vadd.f32 %v1592_v61, %v1588_v60  ;;  %v2272_v42 = vstv %s5127_s23  ;;  %v5162_v61 = vld [vmem:[#allocation2 + $0x11] sm:$0xff]  ;;  %s5230_s23 = sld [smem:[#allocation10 + $0x9d]] }
 0x282   : > { %1985 = vrot.lane.b32.xlu1 %v1983_v8, %s3714_s12  ;;  %2486 = vrot.lane.b32.xlu0 %v2484_v11, %s3714_s12  ;;  %v1675_v8 = vstv %s5145_s17  ;;  %s5238_s17 = sld [smem:[#allocation10 + $0xbd]] }
 0x283   : > { %v1508_v16 = vadd.f32 %v5017_v63, %v1500_v26  ;;  %v1601_v17 = vadd.f32 %v1599_v2, %v1593_v6  ;;  %v2264_v2 = vstv %s5132_s2  ;;  %v2273_v6 = vmul.f32 %v2272_v42, %v4697_v35  ;;  %s5232_s2 = sld [smem:[#allocation10 + $0xbc]] }
 0x284   : > { %v1628_v21 = vpop.permute.xlu1 %1627  ;;  %v1620_v20 = vpop.permute.xlu0 %1619  ;;  %v2265_v40 = vmul.f32 %v2264_v2, %v4697_v35 }
 0x285   : > { %v1516_v25 = vadd.f32 %v5015_v23, %v1508_v16  ;;  %v1609_v30 = vadd.f32 %v1607_v49, %v1601_v17  ;;  %v1540_v23 = vstv %s5089_s22  ;;  %v2525_v16 = vstv %s5151_s18  ;;  %s5184_s22 = sld [smem:[#allocation10 + $0x3e]] }
 0x286   : > { %1993 = vrot.lane.b32.xlu1 %v1991_v0, %s3713_s16  ;;  %2494 = vrot.lane.b32.xlu0 %v2492_v56, %s3713_s16  ;;  %v1541_v41 = vmul.f32 %v4727_v50, %v1540_v23  ;;  %v1654_v50 = vstv %s5119_s30  ;;  %s5219_s30 = sld [smem:[#allocation10 + $0x6]] }
 0x287   : > { %v1521_v51 = vadd.f32 %v1520_v46, %v1516_v25  ;;  %v1614_v63 = vadd.f32 %v1613_v24, %v1609_v30  ;;  %v1655_v49 = vmul.f32 %v5162_v61, %v1654_v50  ;;  %v2526_v25 = vmul.f32 %v2525_v16, %v4697_v35  ;;  %s5250_s18 = sld [smem:[#allocation10 + $0x66]] }
 0x288   : > { %v1649_v27 = vpop.permute.xlu1 %1648  ;;  %v1641_v1 = vpop.permute.xlu0 %1640  ;;  %v2032_v30 = vstv %s5166_s9  ;;  %v2533_v24 = vstv %s5168_s13  ;;  %s5256_s9 = sld [smem:[#allocation10 + $0x1c]]  ;;  %v1738_v50 = vstv %s5211_s3  ;;  %v2045_v2 = vstv %s5230_s23  ;;  %s5310_s3 = sld [smem:[#allocation10 + $0xc6]] }
 0x289   : > { %v1529_v36 = vadd.f32 %v5036_v19, %v1521_v51  ;;  %v1622_v18 = vadd.f32 %v1620_v20, %v1614_v63  ;;  %v5140_v19 = vld [vmem:[#allocation2 + $0x10] sm:$0xff]  ;;  %v1696_v51 = vstv %s5173_s11  ;;  %s5260_s13 = sld [smem:[#allocation10 + $0xfc]]  ;;  %s5273_s11 = sld [smem:[#allocation10 + $0x9e]] }
 0x28a   : > { %2254 = vrot.lane.b32.xlu1 %v2252_v5, %s3713_s16  ;;  %2246 = vrot.lane.b32.xlu0 %v2244_v31, %s3714_s12  ;;  %v1634_v29 = vmul.f32 %v5140_v19, %v1633_v10  ;;  %v5188_v20 = vld [vmem:[#allocation2 + $0x12] sm:$0xff]  ;;  %v2033_v10 = vmul.f32 %v2032_v30, %v4716_v14  ;;  %v5223_v31 = vld [vmem:[#allocation2 + $0x20] sm:$0xff]  ;;  %s5328_s23 = sld [smem:[#allocation10 + $0xbf]] }
 0x28b   : > { %v1537_v4 = vadd.f32 %v5034_v28, %v1529_v36  ;;  %v1630_v43 = vadd.f32 %v1628_v21, %v1622_v18  ;;  %v1676_v0 = vmul.f32 %v5188_v20, %v1675_v8  ;;  %v1697_v36 = vmul.f32 %v5223_v31, %v1696_v51  ;;  %v5226_v18 = vld [vmem:[#allocation2 + $0x31] sm:$0xff] }
 0x28c   : > { %v1670_v48 = vpop.permute.xlu1 %1669  ;;  %v1662_v22 = vpop.permute.xlu0 %1661  ;;  %v2285_v33 = vstv %s5184_s22  ;;  %v2092_v42 = vstv %s5219_s30  ;;  %s5283_s22 = sld [smem:[#allocation10 + $0x67]]  ;;  %v2046_v57 = vmul.f32 %v2045_v2, %v5226_v18  ;;  %s5315_s30 = sld [smem:[#allocation10 + $0x11c]] }
 0x28d   : > { %v1542_v52 = vadd.f32 %v1541_v41, %v1537_v4  ;;  %v1635_v28 = vadd.f32 %v1634_v29, %v1630_v43  ;;  %v1717_v4 = vstv %s5193_s10  ;;  %v1785_v29 = vmul.f32 %v1784_v37, %v5226_v18  ;;  %s5286_s10 = sld [smem:[#allocation10 + $0x9f]] }
 0x28e   : > { %2006 = vrot.lane.b32.xlu1 %v2004_v3, %s3714_s12  ;;  %2507 = vrot.lane.b32.xlu0 %v2505_v34, %s3714_s12  ;;  %v5252_v34 = vld [vmem:[#allocation2 + $0x30] sm:$0xff]  ;;  %v1718_v12 = vmul.f32 %v5263_v55, %v1717_v4  ;;  %v1759_v30 = vstv %s5256_s9  ;;  %s5359_s9 = sld [smem:[#allocation10 + $0x11f]] }
 0x28f   : > { %v1550_v39 = vadd.f32 %v5053_v13, %v1542_v52  ;;  %v1643_v15 = vadd.f32 %v1641_v1, %v1635_v28  ;;  %v1563_v13 = vstv %s5134_s24  ;;  %v2534_v1 = vmul.f32 %v2533_v24, %v4697_v35  ;;  %s5236_s24 = sld [smem:[#allocation10 + $0x7]] }
 0x290   : > { %v1691_v9 = vpop.permute.xlu1 %1690  ;;  %v1683_v32 = vpop.permute.xlu0 %1682  ;;  %v2546_v52 = vstv %s5204_s19  ;;  %v2293_v28 = vstv %s5206_s14  ;;  %v1805_v24 = vstv %s5260_s13  ;;  %s5302_s19 = sld [smem:[#allocation10 + $0x7c]]  ;;  %s5308_s14 = sld [smem:[#allocation10 + $0xfd]] }
 0x291   : > { %v1558_v62 = vadd.f32 %v5051_v38, %v1550_v39  ;;  %v1651_v60 = vadd.f32 %v1649_v27, %v1643_v15  ;;  %v3443_v39 = vld [vmem:[#allocation2] sm:$0xff]  ;;  %s5361_s13 = sld [smem:[#allocation10 + $0xff]] }
 0x292   : > { %2014 = vrot.lane.b32.xlu1 %v2012_v59, %s3713_s16  ;;  %2515 = vrot.lane.b32.xlu0 %v2513_v47, %s3713_s16  ;;  %v5268_v59 = vld [vmem:[#allocation2 + $0x30] sm:$0xff] }
 0x293   : > { %v1561_v7 = vmul.f32 %v1560_v45, %v1558_v62  ;;  %v1656_v38 = vadd.f32 %v1655_v49, %v1651_v60  ;;  %v2294_v47 = vmul.f32 %v5268_v59, %v2293_v28  ;;  %v1852_v62 = vstv %s5221_s20  ;;  %s5326_s20 = sld [smem:[#allocation10 + $0x11d]] }
 0x294   : > { %v5176_v11 = vpop.permute.xlu1 %1711  ;;  %v1704_v26 = vpop.permute.xlu0 %1703 }
 0x295   : > { %v1564_v58 = vadd.f32 %v1563_v13, %v1561_v7  ;;  %v1664_v54 = vadd.f32 %v1662_v22, %v1656_v38  ;;  %v1831_v22 = vstv %s5199_s15  ;;  %v1792_v13 = vstv %s5232_s2  ;;  %s5292_s15 = sld [smem:[#allocation10 + $0xbe]]  ;;  %s5332_s2 = sld [smem:[#allocation10 + $0xd]] }
 0x296   : > { %2275 = vrot.lane.b32.xlu1 %v2273_v6, %s3713_s16  ;;  %2267 = vrot.lane.b32.xlu0 %v2265_v40, %s3714_s12  ;;  %v1832_v15 = vmul.f32 %v3443_v39, %v1831_v22  ;;  %v2353_v7 = vstv %s5236_s24  ;;  %v2053_v38 = vstv %s5238_s17  ;;  %v3445_v6 = vld [vmem:[#allocation2 + $0x1] sm:$0xff]  ;;  %v1793_v16 = vmul.f32 %v1792_v13, %v5226_v18  ;;  %v5313_v22 = vld [vmem:[#allocation2 + $0x32] sm:$0xff]  ;;  %s5334_s24 = sld [smem:[#allocation10 + $0xc7]]  ;;  %s5342_s17 = sld [smem:[#allocation10 + $0x11e]] }
 0x297   : > { %v1565_v17 = vmax.f32 %v1564_v58, 0.0  ;;  %v1672_v21 = vadd.f32 %v1670_v48, %v1664_v54  ;;  %v2286_v48 = vmul.f32 %v2285_v33, %v4716_v14  ;;  %v1853_v40 = vmul.f32 %v3445_v6, %v1852_v62 }
 0x298   : > { %v5191_v56 = vpop.permute.xlu1 %1732  ;;  %v5195_v53 = vpop.permute.xlu0 %1724  ;;  %v2306_v33 = vstv %s5273_s11  ;;  %s5374_s11 = sld [smem:[#allocation10 + $0x6d]] }
 0x299   : > { %1567 = vst.msk [vmem:[#allocation3 + $0x18] sm:$0xff] %vm783_vm4, %v1565_v17  ;;  %v1677_v46 = vadd.f32 %v1676_v0, %v1672_v21  ;;  %v2554_v17 = vstv %s5248_s0  ;;  %v2113_v21 = vstv %s5250_s18  ;;  %s5344_s0 = sld [smem:[#allocation10 + $0xfe]] }
 0x29a   : > { %2027 = vrot.lane.b32.xlu1 %v2025_v44, %s3714_s12  ;;  %2528 = vrot.lane.b32.xlu0 %v2526_v25, %s3714_s12  ;;  %v2555_v37 = vmul.f32 %v2554_v17, %v5252_v34  ;;  %s5356_s18 = sld [smem:[#allocation10 + $0xe]] }
 0x29b   : > { %v1685_v63 = vadd.f32 %v1683_v32, %v1677_v46  ;;  %v2547_v32 = vmul.f32 %v2546_v52, %v5252_v34  ;;  %v2374_v52 = vstv %s5283_s22  ;;  %s3184_s22 = sld [smem:[#allocation10 + $0x6e]] }
 0x29c   : > { %v5213_v23 = vpop.permute.xlu1 %1753  ;;  %v5215_v27 = vpop.permute.xlu0 %1745 }
 0x29d   : > { %v1693_v5 = vadd.f32 %v1691_v9, %v1685_v63 }
 0x29e   : > { %2035 = vrot.lane.b32.xlu1 %v2033_v10, %s3713_s16  ;;  %2536 = vrot.lane.b32.xlu0 %v2534_v1, %s3713_s16  ;;  %v2354_v10 = vmul.f32 %v3443_v39, %v2353_v7 }
 0x29f   : > { %v1698_v35 = vadd.f32 %v1697_v36, %v1693_v5  ;;  %v2054_v36 = vmul.f32 %v2053_v38, %v5226_v18 }
 0x2a0   : > { %v5241_v41 = vpop.permute.xlu1 %1774  ;;  %v5243_v43 = vpop.permute.xlu0 %1766 }
 0x2a1   : > { %v1706_v3 = vadd.f32 %v1704_v26, %v1698_v35  ;;  %v2093_v26 = vmul.f32 %v3443_v39, %v2092_v42  ;;  %v1873_v35 = vstv %s5275_s5  ;;  %v1806_v39 = vmul.f32 %v1805_v24, %v5313_v22  ;;  %s5376_s5 = sld [smem:[#allocation10 + $0xf]] }
 0x2a2   : > { %1787 = vrot.lane.b32.xlu1 %v1785_v29, %s3714_s12  ;;  %2288 = vrot.lane.b32.xlu0 %v2286_v48, %s3714_s12  ;;  %v2575_v24 = vstv %s5328_s23  ;;  %s3158_s23 = sld [smem:[#allocation10 + $0xd5]] }
 0x2a3   : > { %v1714_v14 = vadd.f32 %v5176_v11, %v1706_v3 }
 0x2a4   : > { %v1847_v45 = vpop.permute.xlu1 %1846  ;;  %v1839_v9 = vpop.permute.xlu0 %1838 }
 0x2a5   : > { %v1719_v60 = vadd.f32 %v1718_v12, %v1714_v14  ;;  %v1841_v49 = vadd.f32 %v1839_v9, %v1832_v15  ;;  %v1760_v14 = vmul.f32 %v5268_v59, %v1759_v30  ;;  %v2567_v12 = vstv %s5286_s10  ;;  %v3447_v9 = vld [vmem:[#allocation2 + $0x2] sm:$0xff]  ;;  %s3149_s10 = sld [smem:[#allocation10 + $0xcd]] }
 0x2a6   : > { %2549 = vrot.lane.b32.xlu1 %v2547_v32, %s3714_s12  ;;  %2296 = vrot.lane.b32.xlu0 %v2294_v47, %s3713_s16  ;;  %v2307_v15 = vmul.f32 %v2306_v33, %v5226_v18  ;;  %v1874_v32 = vmul.f32 %v3447_v9, %v1873_v35  ;;  %v2327_v33 = vstv %s5344_s0  ;;  %s3234_s0 = sld [smem:[#allocation10 + $0xd7]] }
 0x2a7   : > { %v1727_v8 = vadd.f32 %v5195_v53, %v1719_v60  ;;  %v1849_v11 = vadd.f32 %v1847_v45, %v1841_v49  ;;  %v5295_v53 = vld [vmem:[#allocation2 + $0x22] sm:$0xff]  ;;  %v2314_v45 = vstv %s5292_s15  ;;  %v1780_v60 = vstv %s5302_s19  ;;  %s3222_s15 = sld [smem:[#allocation10 + $0x6f]] }
 0x2a8   : > { %v2108_v58 = vpop.permute.xlu1 %2107  ;;  %v2100_v54 = vpop.permute.xlu0 %2099  ;;  %v1739_v44 = vmul.f32 %v5295_v53, %v1738_v50  ;;  %s3225_s19 = sld [smem:[#allocation10 + $0xcf]] }
 0x2a9   : > { %v1735_v0 = vadd.f32 %v5191_v56, %v1727_v8  ;;  %v2102_v25 = vadd.f32 %v2100_v54, %v2093_v26  ;;  %v1854_v46 = vadd.f32 %v1853_v40, %v1849_v11  ;;  %v2114_v56 = vmul.f32 %v3445_v6, %v2113_v21 }
 0x2aa   : > { %2048 = vrot.lane.b32.xlu1 %v2046_v57, %s3714_s12  ;;  %1795 = vrot.lane.b32.xlu0 %v1793_v16, %s3713_s16  ;;  %v2568_v8 = vmul.f32 %v2567_v12, %v5226_v18  ;;  %v2315_v11 = vmul.f32 %v2314_v45, %v5226_v18  ;;  %v2066_v26 = vstv %s5308_s14  ;;  %v1781_v54 = vmul.f32 %v1780_v60, %v5226_v18  ;;  %s3190_s14 = sld [smem:[#allocation10 + $0x16]] }
 0x2ab   : > { %v1740_v51 = vadd.f32 %v1739_v44, %v1735_v0  ;;  %v2110_v63 = vadd.f32 %v2108_v58, %v2102_v25  ;;  %v2067_v44 = vmul.f32 %v2066_v26, %v5313_v22  ;;  %v2074_v25 = vstv %s5326_s20  ;;  %s3193_s20 = sld [smem:[#allocation10 + $0x76]] }
 0x2ac   : > { %v1860_v1 = vpop.permute.xlu1 %1859  ;;  %v2361_v5 = vpop.permute.xlu0 %2360  ;;  %v2588_v45 = vstv %s5361_s13  ;;  %s3164_s13 = sld [smem:[#allocation10 + $0x7d]] }
 0x2ad   : > { %v1748_v4 = vadd.f32 %v5215_v27, %v1740_v51  ;;  %v1862_v29 = vadd.f32 %v1860_v1, %v1854_v46  ;;  %v2363_v48 = vadd.f32 %v2361_v5, %v2354_v10  ;;  %v2115_v3 = vadd.f32 %v2114_v56, %v2110_v63 }
 0x2ae   : > { %2056 = vrot.lane.b32.xlu1 %v2054_v36, %s3713_s16  ;;  %2557 = vrot.lane.b32.xlu0 %v2555_v37, %s3713_s16  ;;  %v1894_v63 = vstv %s5332_s2  ;;  %v2395_v10 = vstv %s5334_s24  ;;  %v2075_v5 = vmul.f32 %v2074_v25, %v5313_v22  ;;  %v2576_v36 = vmul.f32 %v2575_v24, %v5226_v18  ;;  %s3231_s2 = sld [smem:[#allocation10 + $0x77]]  ;;  %s3196_s24 = sld [smem:[#allocation10 + $0xd6]] }
 0x2af   : > { %v1756_v28 = vadd.f32 %v5213_v23, %v1748_v4  ;;  %v2375_v23 = vmul.f32 %v3445_v6, %v2374_v52  ;;  %v2134_v6 = vstv %s5310_s3  ;;  %v2335_v37 = vstv %s5342_s17  ;;  %s3155_s3 = sld [smem:[#allocation10 + $0x75]] }
 0x2b0   : > { %v1868_v50 = vpop.permute.xlu1 %1867  ;;  %v2369_v27 = vpop.permute.xlu0 %2368  ;;  %v2135_v16 = vmul.f32 %v3447_v9, %v2134_v6  ;;  %v2336_v12 = vmul.f32 %v2335_v37, %v5313_v22  ;;  %v2437_v24 = vstv %s3222_s15  ;;  %s3161_s17 = sld [smem:[#allocation10 + $0x1d]]  ;;  %s3205_s15 = sld [smem:[#allocation10 + $0xde]] }
 0x2b1   : > { %v1761_v47 = vadd.f32 %v1760_v14, %v1756_v28  ;;  %v1870_v42 = vadd.f32 %v1868_v50, %v1862_v29  ;;  %v2371_v62 = vadd.f32 %v2369_v27, %v2363_v48  ;;  %v1895_v29 = vmul.f32 %v5140_v19, %v1894_v63 }
 0x2b2   : > { %1808 = vrot.lane.b32.xlu1 %v1806_v39, %s3714_s12  ;;  %2309 = vrot.lane.b32.xlu0 %v2307_v15, %s3714_s12  ;;  %v2396_v48 = vmul.f32 %v3447_v9, %v2395_v10  ;;  %v2328_v50 = vmul.f32 %v2327_v33, %v5313_v22  ;;  %v2155_v27 = vstv %s5356_s18  ;;  %v2596_v15 = vstv %s5359_s9  ;;  %s3199_s18 = sld [smem:[#allocation10 + $0x1e]]  ;;  %s3237_s9 = sld [smem:[#allocation10 + $0x1f]] }
 0x2b3   : > { %v1769_v49 = vadd.f32 %v5243_v43, %v1761_v47  ;;  %v1875_v2 = vadd.f32 %v1874_v32, %v1870_v42  ;;  %v2376_v13 = vadd.f32 %v2375_v23, %v2371_v62  ;;  %v1813_v43 = vstv %s5315_s30  ;;  %s3228_s30 = sld [smem:[#allocation10 + $0x17]] }
 0x2b4   : > { %v2129_v7 = vpop.permute.xlu1 %2128  ;;  %v2121_v38 = vpop.permute.xlu0 %2120  ;;  %v2156_v32 = vmul.f32 %v5140_v19, %v2155_v27  ;;  %v2597_v62 = vmul.f32 %v2596_v15, %v5313_v22  ;;  %v2589_v23 = vmul.f32 %v2588_v45, %v5313_v22  ;;  %v2458_v27 = vstv %s3225_s19  ;;  %s5419_s19 = sld [smem:[#allocation10 + $0xdf]] }
 0x2b5   : > { %v1777_v40 = vadd.f32 %v5241_v41, %v1769_v49  ;;  %v2123_v58 = vadd.f32 %v2121_v38, %v2115_v3  ;;  %v1814_v41 = vmul.f32 %v1813_v43, %v5313_v22  ;;  %v1915_v49 = vstv %s5374_s11  ;;  %s3202_s11 = sld [smem:[#allocation10 + $0x7e]] }
 0x2b6   : > { %2570 = vrot.lane.b32.xlu1 %v2568_v8, %s3714_s12  ;;  %2317 = vrot.lane.b32.xlu0 %v2315_v11, %s3713_s16  ;;  %v1916_v6 = vmul.f32 %v5162_v61, %v1915_v49 }
 0x2b7   : > { %v2131_v57 = vadd.f32 %v2129_v7, %v2123_v58  ;;  %v5351_v17 = vadd.f32 %v1781_v54, %v1777_v40 }
 0x2b8   : > { %v1881_v21 = vpop.permute.xlu1 %1880  ;;  %v2382_v0 = vpop.permute.xlu0 %2381 }
 0x2b9   : > { %v1883_v46 = vadd.f32 %v1881_v21, %v1875_v2  ;;  %v2384_v30 = vadd.f32 %v2382_v0, %v2376_v13  ;;  %v2136_v51 = vadd.f32 %v2135_v16, %v2131_v57  ;;  %v2416_v2 = vstv %s5376_s5  ;;  %s3129_s5 = sld [smem:[#allocation10 + $0xdc]] }
 0x2ba   : > { %2069 = vrot.lane.b32.xlu1 %v2067_v44, %s3714_s12  ;;  %1816 = vrot.lane.b32.xlu0 %v1814_v41, %s3713_s16  ;;  %v2417_v40 = vmul.f32 %v5140_v19, %v2416_v2  ;;  %v2176_v16 = vstv %s3184_s22  ;;  %v2218_v2 = vstv %s3190_s14  ;;  %s3240_s22 = sld [smem:[#allocation10 + $0x7f]]  ;;  %s5421_s14 = sld [smem:[#allocation11 + $0x5]] }
 0x2bb   : > { %v2177_v44 = vmul.f32 %v5162_v61, %v2176_v16 }
 0x2bc   : > { %v1889_v56 = vpop.permute.xlu1 %1888  ;;  %v2390_v1 = vpop.permute.xlu0 %2389 }
 0x2bd   : > { %v1891_v35 = vadd.f32 %v1889_v56, %v1883_v46  ;;  %v2392_v4 = vadd.f32 %v2390_v1, %v2384_v30  ;;  %v1936_v30 = vstv %s3149_s10  ;;  %s3167_s10 = sld [smem:[#allocation10 + $0xdd]] }
 0x2be   : > { %2077 = vrot.lane.b32.xlu1 %v2075_v5, %s3713_s16  ;;  %2578 = vrot.lane.b32.xlu0 %v2576_v36, %s3713_s16  ;;  %v1937_v5 = vmul.f32 %v5188_v20, %v1936_v30  ;;  %v2438_v36 = vmul.f32 %v5162_v61, %v2437_v24  ;;  %v2239_v30 = vstv %s3193_s20  ;;  %s5428_s20 = sld [smem:[#allocation14 + $0x1]] }
 0x2bf   : > { %v1896_v3 = vadd.f32 %v1895_v29, %v1891_v35  ;;  %v2397_v52 = vadd.f32 %v2396_v48, %v2392_v4 }
 0x2c0   : > { %v2150_v28 = vpop.permute.xlu1 %2149  ;;  %v2142_v14 = vpop.permute.xlu0 %2141 }
 0x2c1   : > { %v2144_v39 = vadd.f32 %v2142_v14, %v2136_v51 }
 0x2c2   : > { %2338 = vrot.lane.b32.xlu1 %v2336_v12, %s3713_s16  ;;  %2330 = vrot.lane.b32.xlu0 %v2328_v50, %s3714_s12 }
 0x2c3   : > { %v2152_v9 = vadd.f32 %v2150_v28, %v2144_v39 }
 0x2c4   : > { %v1902_v47 = vpop.permute.xlu1 %1901  ;;  %v2403_v42 = vpop.permute.xlu0 %2402 }
 0x2c5   : > { %v2157_v60 = vadd.f32 %v2156_v32, %v2152_v9  ;;  %v1904_v13 = vadd.f32 %v1902_v47, %v1896_v3  ;;  %v2405_v7 = vadd.f32 %v2403_v42, %v2397_v52  ;;  %v2459_v42 = vmul.f32 %v5188_v20, %v2458_v27 }
 0x2c6   : > { %2599 = vrot.lane.b32.xlu1 %v2597_v62, %s3713_s16  ;;  %2591 = vrot.lane.b32.xlu0 %v2589_v23, %s3714_s12  ;;  %s3187_s16 = sld [smem:[#allocation10 + $0xce]]  ;;  %s3152_s12 = sld [smem:[#allocation10 + $0x15]] }
 0x2c8   : > { %v1910_v38 = vpop.permute.xlu1 %1909  ;;  %v2411_v8 = vpop.permute.xlu0 %2410 }
 0x2c9   : > { %v1912_v11 = vadd.f32 %v1910_v38, %v1904_v13  ;;  %v2413_v26 = vadd.f32 %v2411_v8, %v2405_v7  ;;  %v2219_v38 = vmul.f32 %v5223_v31, %v2218_v2 }
 0x2cb   : > { %v1917_v58 = vadd.f32 %v1916_v6, %v1912_v11  ;;  %v2418_v43 = vadd.f32 %v2417_v40, %v2413_v26  ;;  %v1978_v6 = vstv %s3155_s3  ;;  %v2479_v40 = vstv %s3228_s30  ;;  %s5424_s3 = sld [smem:[#allocation13 + $0x5]]  ;;  %s5426_s30 = sld [smem:[#allocation14]] }
 0x2cc   : > { %v2171_v54 = vpop.permute.xlu1 %2170  ;;  %v2163_v57 = vpop.permute.xlu0 %2162  ;;  %v2197_v29 = vstv %s3187_s16  ;;  %v1957_v50 = vstv %s3152_s12  ;;  %s3132_s16 = sld [smem:[#allocation11 + $0x4]] }
 0x2cd   : > { %v2165_v21 = vadd.f32 %v2163_v57, %v2157_v60  ;;  %v2198_v52 = vmul.f32 %v5188_v20, %v2197_v29  ;;  %v1958_v47 = vmul.f32 %v5223_v31, %v1957_v50  ;;  %s5417_s12 = sld [smem:[#allocation13 + $0x4]] }
 0x2cf   : > { %v2173_v0 = vadd.f32 %v2171_v54, %v2165_v21  ;;  %v1979_v21 = vmul.f32 %v5263_v55, %v1978_v6 }
 0x2d0   : > { %v1923_v41 = vpop.permute.xlu1 %1922  ;;  %v2424_v25 = vpop.permute.xlu0 %2423 }
 0x2d1   : > { %v2178_v46 = vadd.f32 %v2177_v44, %v2173_v0  ;;  %v1925_v51 = vadd.f32 %v1923_v41, %v1917_v58  ;;  %v2426_v63 = vadd.f32 %v2424_v25, %v2418_v43  ;;  %v2480_v0 = vmul.f32 %v5223_v31, %v2479_v40 }
 0x2d4   : > { %v1931_v19 = vpop.permute.xlu1 %1930  ;;  %v2432_v10 = vpop.permute.xlu0 %2431 }
 0x2d5   : > { %v1933_v56 = vadd.f32 %v1931_v19, %v1925_v51  ;;  %v2434_v1 = vadd.f32 %v2432_v10, %v2426_v63  ;;  %v2240_v63 = vmul.f32 %v5263_v55, %v2239_v30 }
 0x2d7   : > { %v1938_v37 = vadd.f32 %v1937_v5, %v1933_v56  ;;  %v2439_v33 = vadd.f32 %v2438_v36, %v2434_v1  ;;  %v1999_v1 = vstv %s3158_s23  ;;  %v2500_v5 = vstv %s3231_s2  ;;  %s5430_s23 = sld [smem:[#allocation14 + $0x2]]  ;;  %s5433_s2 = sld [smem:[#allocation11 + $0x6]] }
 0x2d8   : > { %v2192_v35 = vpop.permute.xlu1 %2191  ;;  %v2184_v4 = vpop.permute.xlu0 %2183  ;;  %v2000_v29 = vmul.f32 %v5295_v53, %v1999_v1 }
 0x2d9   : > { %v2186_v48 = vadd.f32 %v2184_v4, %v2178_v46 }
 0x2db   : > { %v2194_v3 = vadd.f32 %v2192_v35, %v2186_v48  ;;  %v2501_v48 = vmul.f32 %v5263_v55, %v2500_v5 }
 0x2dc   : > { %v1944_v28 = vpop.permute.xlu1 %1943  ;;  %v2445_v14 = vpop.permute.xlu0 %2444 }
 0x2dd   : > { %v2199_v12 = vadd.f32 %v2198_v52, %v2194_v3  ;;  %v1946_v39 = vadd.f32 %v1944_v28, %v1938_v37  ;;  %v2447_v15 = vadd.f32 %v2445_v14, %v2439_v33 }
 0x2e0   : > { %v1952_v61 = vpop.permute.xlu1 %1951  ;;  %v2453_v45 = vpop.permute.xlu0 %2452 }
 0x2e1   : > { %v1954_v9 = vadd.f32 %v1952_v61, %v1946_v39  ;;  %v2455_v32 = vadd.f32 %v2453_v45, %v2447_v15 }
 0x2e3   : > { %v1959_v62 = vadd.f32 %v1958_v47, %v1954_v9  ;;  %v2460_v23 = vadd.f32 %v2459_v42, %v2455_v32  ;;  %v2020_v9 = vstv %s3161_s17  ;;  %v2521_v32 = vstv %s3234_s0  ;;  %s5438_s17 = sld [smem:[#allocation14 + $0x4]]  ;;  %s5440_s0 = sld [smem:[#allocation14 + $0x5]] }
 0x2e4   : > { %v2213_v60 = vpop.permute.xlu1 %2212  ;;  %v2205_v49 = vpop.permute.xlu0 %2204  ;;  %v2522_v2 = vmul.f32 %v5295_v53, %v2521_v32  ;;  %v2323_v32 = vstv %s3205_s15  ;;  %s5459_s15 = sld [smem:[#allocation14 + $0xa]] }
 0x2e5   : > { %v2207_v13 = vadd.f32 %v2205_v49, %v2199_v12  ;;  %v2260_v12 = vstv %s3196_s24  ;;  %v2021_v49 = vmul.f32 %v5268_v59, %v2020_v9  ;;  %s5436_s24 = sld [smem:[#allocation14 + $0x3]] }
 0x2e6   : > { %v2261_v39 = vmul.f32 %v5295_v53, %v2260_v12 }
 0x2e7   : > { %v2215_v7 = vadd.f32 %v2213_v60, %v2207_v13 }
 0x2e8   : > { %v1965_v8 = vpop.permute.xlu1 %1964  ;;  %v2466_v11 = vpop.permute.xlu0 %2465 }
 0x2e9   : > { %v2220_v26 = vadd.f32 %v2219_v38, %v2215_v7  ;;  %v1967_v58 = vadd.f32 %v1965_v8, %v1959_v62  ;;  %v2468_v43 = vadd.f32 %v2466_v11, %v2460_v23  ;;  %v2281_v11 = vstv %s3199_s18  ;;  %s5443_s18 = sld [smem:[#allocation13 + $0x6]] }
 0x2ea   : > { %v2282_v40 = vmul.f32 %v5268_v59, %v2281_v11 }
 0x2ec   : > { %v1973_v20 = vpop.permute.xlu1 %1972  ;;  %v2474_v54 = vpop.permute.xlu0 %2473 }
 0x2ed   : > { %v1975_v57 = vadd.f32 %v1973_v20, %v1967_v58  ;;  %v2476_v16 = vadd.f32 %v2474_v54, %v2468_v43  ;;  %v2542_v54 = vstv %s3237_s9  ;;  %s5445_s9 = sld [smem:[#allocation14 + $0x6]] }
 0x2ef   : > { %v1980_v44 = vadd.f32 %v1979_v21, %v1975_v57  ;;  %v2481_v41 = vadd.f32 %v2480_v0, %v2476_v16  ;;  %v2041_v57 = vstv %s3164_s13  ;;  %s5448_s13 = sld [smem:[#allocation14 + $0x7]] }
 0x2f0   : > { %v2234_v25 = vpop.permute.xlu1 %2233  ;;  %v2226_v46 = vpop.permute.xlu0 %2225 }
 0x2f1   : > { %v2228_v24 = vadd.f32 %v2226_v46, %v2220_v26  ;;  %v2042_v46 = vmul.f32 %v2041_v57, %v5226_v18 }
 0x2f3   : > { %v2236_v51 = vadd.f32 %v2234_v25, %v2228_v24  ;;  %v2543_v25 = vmul.f32 %v2542_v54, %v5252_v34 }
 0x2f4   : > { %v1986_v19 = vpop.permute.xlu1 %1985  ;;  %v2487_v10 = vpop.permute.xlu0 %2486 }
 0x2f5   : > { %v2241_v56 = vadd.f32 %v2240_v63, %v2236_v51  ;;  %v1988_v36 = vadd.f32 %v1986_v19, %v1980_v44  ;;  %v2489_v37 = vadd.f32 %v2487_v10, %v2481_v41  ;;  %v2302_v63 = vstv %s3202_s11  ;;  %s5451_s11 = sld [smem:[#allocation11 + $0x7]] }
 0x2f6   : > { %v2303_v5 = vmul.f32 %v2302_v63, %v5226_v18  ;;  %v2619_v63 = vstv %s5436_s24  ;;  %s5496_s24 = sld [smem:[#allocation14 + $0x14]] }
 0x2f8   : > { %v1994_v31 = vpop.permute.xlu1 %1993  ;;  %v2495_v33 = vpop.permute.xlu0 %2494 }
 0x2f9   : > { %v1996_v35 = vadd.f32 %v1994_v31, %v1988_v36  ;;  %v2497_v4 = vadd.f32 %v2495_v33, %v2489_v37  ;;  %v1801_v36 = vstv %s3129_s5  ;;  %s5453_s5 = sld [smem:[#allocation14 + $0x8]] }
 0x2fb   : > { %v2001_v3 = vadd.f32 %v2000_v29, %v1996_v35  ;;  %v2502_v52 = vadd.f32 %v2501_v48, %v2497_v4  ;;  %v1802_v4 = vmul.f32 %v1801_v36, %v5313_v22  ;;  %v2563_v29 = vstv %s3240_s22  ;;  %s5455_s22 = sld [smem:[#allocation14 + $0x9]] }
 0x2fc   : > { %v2255_v28 = vpop.permute.xlu1 %2254  ;;  %v2247_v14 = vpop.permute.xlu0 %2246  ;;  %v2062_v48 = vstv %s3167_s10  ;;  %s5457_s10 = sld [smem:[#allocation13 + $0x7]]  ;;  %v2346_v36 = vstv %s5443_s18 }
 0x2fd   : > { %v2249_v50 = vadd.f32 %v2247_v14, %v2241_v56  ;;  %s5507_s18 = sld [smem:[#allocation14 + $0x17]] }
 0x2ff   : > { %v2257_v27 = vadd.f32 %v2255_v28, %v2249_v50 }
 0x300   : > { %v2007_v15 = vpop.permute.xlu1 %2006  ;;  %v2508_v61 = vpop.permute.xlu0 %2507 }
 0x301   : > { %v2262_v45 = vadd.f32 %v2261_v39, %v2257_v27  ;;  %v2009_v47 = vadd.f32 %v2007_v15, %v2001_v3  ;;  %v2510_v42 = vadd.f32 %v2508_v61, %v2502_v52  ;;  %v2564_v39 = vmul.f32 %v2563_v29, %v5226_v18 }
 0x304   : > { %v2015_v55 = vpop.permute.xlu1 %2014  ;;  %v2516_v62 = vpop.permute.xlu0 %2515 }
 0x305   : > { %v2017_v23 = vadd.f32 %v2015_v55, %v2009_v47  ;;  %v2518_v60 = vadd.f32 %v2516_v62, %v2510_v42  ;;  %v2324_v62 = vmul.f32 %v2323_v32, %v5313_v22 }
 0x307   : > { %v2022_v13 = vadd.f32 %v2021_v49, %v2017_v23  ;;  %v2523_v7 = vadd.f32 %v2522_v2, %v2518_v60  ;;  %v1821_v2 = vstv %s3132_s16  ;;  %s5466_s16 = sld [smem:[#allocation14 + $0xb]] }
 0x308   : > { %v2276_v38 = vpop.permute.xlu1 %2275  ;;  %v2268_v8 = vpop.permute.xlu0 %2267 }
 0x309   : > { %v2270_v26 = vadd.f32 %v2268_v8, %v2262_v45  ;;  %v2584_v8 = vstv %s5419_s19  ;;  %s5471_s19 = sld [smem:[#allocation14 + $0xd]] }
 0x30b   : > { %v2278_v6 = vadd.f32 %v2276_v38, %v2270_v26  ;;  %v1824_v38 = vstv %s5417_s12  ;;  %s5468_s12 = sld [smem:[#allocation14 + $0xc]] }
 0x30c   : > { %v2028_v58 = vpop.permute.xlu1 %2027  ;;  %v2529_v43 = vpop.permute.xlu0 %2528 }
 0x30d   : > { %v2283_v20 = vadd.f32 %v2282_v40, %v2278_v6  ;;  %v2030_v16 = vadd.f32 %v2028_v58, %v2022_v13  ;;  %v2531_v21 = vadd.f32 %v2529_v43, %v2523_v7  ;;  %v2082_v40 = vstv %s5421_s14  ;;  %s5477_s14 = sld [smem:[#allocation14 + $0xe]] }
 0x310   : > { %v2036_v53 = vpop.permute.xlu1 %2035  ;;  %v2537_v0 = vpop.permute.xlu0 %2536 }
 0x311   : > { %v2038_v44 = vadd.f32 %v2036_v53, %v2030_v16  ;;  %v2539_v41 = vadd.f32 %v2537_v0, %v2531_v21  ;;  %v2585_v16 = vmul.f32 %v2584_v8, %v5313_v22  ;;  %v2085_v21 = vstv %s5424_s3  ;;  %s5480_s3 = sld [smem:[#allocation14 + $0xf]] }
 0x313   : > { %v2544_v30 = vadd.f32 %v2543_v25, %v2539_v41  ;;  %v2043_v24 = vadd.f32 %v2042_v46, %v2038_v44 }
 0x314   : > { %v1788_v59 = vpop.permute.xlu1 %1787  ;;  %v2289_v51 = vpop.permute.xlu0 %2288 }
 0x315   : > { %v2291_v19 = vadd.f32 %v2289_v51, %v2283_v20  ;;  %v1790_v37 = vadd.f32 %v1788_v59, %v5351_v17  ;;  %v2063_v17 = vmul.f32 %v2062_v48, %v5313_v22  ;;  %v2343_v59 = vstv %s5433_s2  ;;  %v2618_v51 = vld [vmem:[#allocation3 + $0x8] sm:$0xff]  ;;  %v2623_v48 = vld [vmem:[#allocation3 + $0x10] sm:$0xff]  ;;  %s5494_s2 = sld [smem:[#allocation14 + $0x13]] }
 0x316   : > { %v2620_v29 = vmul.f32 %v2619_v63, %v2618_v51 }
 0x318   : > { %v2550_v10 = vpop.permute.xlu1 %2549  ;;  %v2297_v56 = vpop.permute.xlu0 %2296 }
 0x319   : > { %v2299_v1 = vadd.f32 %v2297_v56, %v2291_v19  ;;  %v2552_v3 = vadd.f32 %v2550_v10, %v2544_v30  ;;  %v2613_v30 = vld [vmem:[#allocation3] sm:$0xff]  ;;  %v2658_v19 = vstv %s5428_s20  ;;  %s5487_s20 = sld [smem:[#allocation14 + $0x11]] }
 0x31b   : > { %v2304_v34 = vadd.f32 %v2303_v5, %v2299_v1  ;;  %v2663_v1 = vstv %s5438_s17  ;;  %v2703_v5 = vstv %s5430_s23  ;;  %s5490_s23 = sld [smem:[#allocation14 + $0x12]]  ;;  %s5498_s17 = sld [smem:[#allocation14 + $0x15]] }
 0x31c   : > { %v2049_v31 = vpop.permute.xlu1 %2048  ;;  %v1796_v33 = vpop.permute.xlu0 %1795 }
 0x31d   : > { %v1798_v35 = vadd.f32 %v1796_v33, %v1790_v37  ;;  %v2051_v52 = vadd.f32 %v2049_v31, %v2043_v24  ;;  %v2614_v24 = vstv %s5426_s30  ;;  %v2624_v31 = vstv %s5445_s9  ;;  %s5483_s30 = sld [smem:[#allocation14 + $0x10]]  ;;  %s3278_s9 = smul.u32 24, %s3995_s6 }
 0x31e   : > { %v2708_v33 = vstv %s5440_s0  ;;  %s5504_s0 = sld [smem:[#allocation14 + $0x16]] }
 0x31f   : > { %v1803_v28 = vadd.f32 %v1802_v4, %v1798_v35 }
 0x320   : > { %v2057_v14 = vpop.permute.xlu1 %2056  ;;  %v2558_v12 = vpop.permute.xlu0 %2557 }
 0x321   : > { %v2059_v50 = vadd.f32 %v2057_v14, %v2051_v52  ;;  %v2560_v27 = vadd.f32 %v2558_v12, %v2552_v3  ;;  %v2668_v3 = vstv %s5448_s13  ;;  %v2659_v14 = vmul.f32 %v2658_v19, %v2613_v30  ;;  %s5515_s13 = sld [smem:[#allocation16]] }
 0x322   : > { %v2664_v12 = vmul.f32 %v2663_v1, %v2618_v51  ;;  %v2669_v32 = vmul.f32 %v2668_v3, %v2623_v48  ;;  %v2649_v1 = vstv %s5498_s17 }
 0x323   : > { %v2565_v15 = vadd.f32 %v2564_v39, %v2560_v27  ;;  %v2064_v61 = vadd.f32 %v2063_v17, %v2059_v50  ;;  %v2713_v50 = vstv %s5453_s5  ;;  %v2628_v17 = vld [vmem:[#allocation3 + $0x18] sm:$0xff]  ;;  %s5521_s5 = sld [smem:[#allocation16 + $0x2]] }
 0x324   : > { %v1809_v45 = vpop.permute.xlu1 %1808  ;;  %v2310_v9 = vpop.permute.xlu0 %2309 }
 0x325   : > { %v2312_v47 = vadd.f32 %v2310_v9, %v2304_v34  ;;  %v1811_v23 = vadd.f32 %v1809_v45, %v1803_v28  ;;  %v2615_v34 = vmul.f32 %v2614_v24, %v2613_v30  ;;  %v2604_v28 = vstv %s5451_s11  ;;  %s5518_s11 = sld [smem:[#allocation16 + $0x1]] }
 0x326   : > { %v2607_v45 = vstv %s5457_s10  ;;  %v2625_v9 = vmul.f32 %v2624_v31, %v2623_v48 }
 0x328   : > { %v2571_v42 = vpop.permute.xlu1 %2570  ;;  %v2318_v55 = vpop.permute.xlu0 %2317 }
 0x329   : > { %v2320_v18 = vadd.f32 %v2318_v55, %v2312_v47  ;;  %v2573_v11 = vadd.f32 %v2571_v42, %v2565_v15  ;;  %v2629_v15 = vstv %s5455_s22  ;;  %v2673_v47 = vstv %s5459_s15  ;;  %s3279_s22 = smul.u32 6, %s3685_s28  ;;  %s420_s28 = scalar_lea.vmem [#allocation17], %s3278_s9 }
 0x32a   : > { %v2674_v8 = vmul.f32 %v2673_v47, %v2628_v17  ;;  %s2761_s15 = sshll.u32 %s420_s28, 4  ;;  %s5533_s15 = int_to_ptr.vmem [resolvable:$true] %s2761_s15 }
 0x32b   : > { %v2325_v60 = vadd.f32 %v2324_v62, %v2320_v18  ;;  %v2621_v18 = vadd.f32 %v2620_v29, %v2615_v34  ;;  %v2704_v62 = vmul.f32 %v2703_v5, %v2613_v30  ;;  %v2738_v29 = vstv %s5507_s18  ;;  %s2758_s10 = sadd.s32 %s3681_s27, %s3279_s22 }
 0x32c   : > { %v2070_v49 = vpop.permute.xlu1 %2069  ;;  %v1817_v13 = vpop.permute.xlu0 %1816 }
 0x32d   : > { %v1819_v7 = vadd.f32 %v1817_v13, %v1811_v23  ;;  %v2072_v26 = vadd.f32 %v2070_v49, %v2064_v61  ;;  %v2709_v61 = vmul.f32 %v2708_v33, %v2618_v51  ;;  %v2630_v23 = vmul.f32 %v2629_v15, %v2628_v17 }
 0x32e   : > { %v2714_v49 = vmul.f32 %v2713_v50, %v2623_v48  ;;  %v2733_v51 = vstv %s5496_s24  ;;  %v2742_v15 = vstv %s5521_s5 }
 0x32f   : > { %v1822_v6 = vmul.f32 %v1821_v2, %v1819_v7  ;;  %v2718_v2 = vstv %s5466_s16  ;;  %s3275_s16 = sshll.u32 %s2758_s10, 7 }
 0x330   : > { %v2078_v58 = vpop.permute.xlu1 %2077  ;;  %v2579_v43 = vpop.permute.xlu0 %2578 }
 0x331   : > { %v1825_v20 = vadd.f32 %v1824_v38, %v1822_v6  ;;  %v2080_v54 = vadd.f32 %v2078_v58, %v2072_v26  ;;  %v2581_v57 = vadd.f32 %v2579_v43, %v2573_v11  ;;  %v2634_v38 = vstv %s5468_s12 }
 0x332   : > { %v2678_v11 = vstv %s5471_s19  ;;  %v2626_v26 = vadd.f32 %v2625_v9, %v2621_v18  ;;  %v2723_v58 = vstv %s5477_s14  ;;  %s5538_s19 = scalar_lea.hbm %s5602_s7, %s3275_s16  ;;  %s2747_s14 = scalar_lea.sflag [#allocation6], %s3995_s6 }
 0x333   : > { %v1826_v53 = vmax.f32 %v1825_v20, 0.0  ;;  %v2083_v0 = vmul.f32 %v2082_v40, %v2080_v54  ;;  %v2586_v44 = vadd.f32 %v2585_v16, %v2581_v57  ;;  %v2710_v40 = vadd.f32 %v2709_v61, %v2704_v62 }
 0x334   : > { %v2339_v41 = vpop.permute.xlu1 %2338  ;;  %v2331_v25 = vpop.permute.xlu0 %2330  ;;  %v2639_v54 = vstv %s5480_s3  ;;  %v2683_v57 = vstv %s5483_s30  ;;  %v2719_v16 = vmul.f32 %v2718_v2, %v2628_v17  ;;  %v2697_v17 = vstv %s5518_s11  ;;  %s3583_s3 = scalar_lea.vmem %s5533_s15, 384  ;;  %s3715_s30 = smov [#allocation17]  }
 0x335   : > { %1828 = vst.msk [vmem:[#allocation3 + $0x20] sm:$0xff] %vm783_vm4, %v1826_v53  ;;  %v2086_v22 = vadd.f32 %v2085_v21, %v2083_v0  ;;  %v2333_v46 = vadd.f32 %v2331_v25, %v2325_v60  ;;  %v2665_v60 = vadd.f32 %v2664_v12, %v2659_v14  ;;  %v2715_v0 = vadd.f32 %v2714_v49, %v2710_v40  ;;  %p3584_p0 = scmp.ne.s32.totalorder %s5533_s15, %s3583_s3 }
 0x336   : > { %v2644_v25 = vstv %s5490_s23 }
 0x337   : > { %v2087_v10 = vmax.f32 %v2086_v22, 0.0  ;;  %v2341_v56 = vadd.f32 %v2339_v41, %v2333_v46  ;;  %v2670_v6 = vadd.f32 %v2669_v32, %v2665_v60  ;;  %v2631_v41 = vadd.f32 %v2630_v23, %v2626_v26  ;;  %p3585_p5 = pnand %p3584_p0, %p3889_p2 }
 0x338   : > { %v2592_v37 = vpop.permute.xlu0 %2591  ;;  %v2600_v52 = vpop.permute.xlu1 %2599  ;;  %v2720_v63 = vadd.f32 %v2719_v16, %v2715_v0 }
 0x339   : > { %2089 = vst.msk [vmem:[#allocation3 + $0x28] sm:$0xff] %vm783_vm4, %v2087_v10  ;;  %v2344_v35 = vmul.f32 %v2343_v59, %v2341_v56  ;;  %v2594_v4 = vadd.f32 %v2592_v37, %v2586_v44  ;;  %v2728_v44 = vstv %s5487_s20  ;;  %v2675_v22 = vadd.f32 %v2674_v8, %v2670_v6  ;;  %p3586_p12 = pneg %p3585_p5  ;;  %s3587_s20 = sshll.u32 %s3715_s30, 4  ;;  %s3588_s20 = int_to_ptr.vmem [resolvable:$false] %s3587_s20 }
 0x33a   : > { %v2688_v59 = vstv %s5494_s2  ;;  %s3589_s23 = scalar_lea.vmem %s3588_s20, 768  ;;  %p3590_p9 = scmp.lt.s32.totalorder %s5533_s15, %s3588_s20 }
 0x33b   : > { %v2347_v27 = vadd.f32 %v2346_v36, %v2344_v35  ;;  %v2602_v39 = vadd.f32 %v2600_v52, %v2594_v4  ;;  %v2693_v4 = vstv %s5504_s0  ;;  %p3591_p11 = scmp.lt.s32.totalorder %s3589_s23, %s3583_s3 }
 0x33c   : > { %v2633_v7 = vld [vmem:[#allocation3 + $0x20] sm:$0xff] }
 0x33d   : > { %v2348_v42 = vmax.f32 %v2347_v27, 0.0  ;;  %v2605_v55 = vmul.f32 %v2604_v28, %v2602_v39  ;;  %v2635_v21 = vmul.f32 %v2634_v38, %v2633_v7  ;;  %v2679_v53 = vmul.f32 %v2678_v11, %v2633_v7  ;;  %p3592_p7 = por %p3591_p11, %p3590_p9 }
 0x33e   : > { %v2724_v46 = vmul.f32 %v2723_v58, %v2633_v7  ;;  %v2653_v39 = vstv %s5515_s13 }
 0x33f   : > { %2350 = vst.msk [vmem:[#allocation3 + $0x30] sm:$0xff] %vm783_vm4, %v2348_v42  ;;  %v2608_v13 = vadd.f32 %v2607_v45, %v2605_v55  ;;  %v2636_v10 = vadd.f32 %v2635_v21, %v2631_v41  ;;  %v2680_v5 = vadd.f32 %v2679_v53, %v2675_v22  ;;  %p3593_p13 = pnand %p3592_p7, %p3586_p12 }
 0x340   : > { %v2638_v20 = vld [vmem:[#allocation3 + $0x28] sm:$0xff]  ;;  %v2725_v34 = vadd.f32 %v2724_v46, %v2720_v63 }
 0x341   : > { %v2609_v43 = vmax.f32 %v2608_v13, 0.0  ;;  %v2640_v30 = vmul.f32 %v2639_v54, %v2638_v20  ;;  %v2684_v24 = vmul.f32 %v2683_v57, %v2638_v20  ;;  %v2729_v19 = vmul.f32 %v2728_v44, %v2638_v20 }
 0x343   : > { %2611 = vst.msk [vmem:[#allocation3 + $0x38] sm:$0xff] %vm783_vm4, %v2609_v43  ;;  %v2641_v33 = vadd.f32 %v2640_v30, %v2636_v10  ;;  %v2685_v35 = vadd.f32 %v2684_v24, %v2680_v5  ;;  %v2730_v48 = vadd.f32 %v2729_v19, %v2725_v34 }
 0x346   : > { %v2643_v56 = vld [vmem:[#allocation3 + $0x30] sm:$0xff] }
 0x347   : > { %v2645_v36 = vmul.f32 %v2644_v25, %v2643_v56  ;;  %v2689_v37 = vmul.f32 %v2688_v59, %v2643_v56  ;;  %v2734_v31 = vmul.f32 %v2733_v51, %v2643_v56 }
 0x349   : > { %v2646_v3 = vadd.f32 %v2645_v36, %v2641_v33  ;;  %v2690_v28 = vadd.f32 %v2689_v37, %v2685_v35  ;;  %v2735_v50 = vadd.f32 %v2734_v31, %v2730_v48 }
 0x34a   : > { %v2648_v52 = vld [vmem:[#allocation3 + $0x38] sm:$0xff] }
 0x34b   : > { %v2650_v14 = vmul.f32 %v2649_v1, %v2648_v52  ;;  %v2694_v12 = vmul.f32 %v2693_v4, %v2648_v52  ;;  %v2739_v27 = vmul.f32 %v2738_v29, %v2648_v52 }
 0x34d   : > { %v2651_v61 = vadd.f32 %v2650_v14, %v2646_v3  ;;  %v2695_v45 = vadd.f32 %v2694_v12, %v2690_v28  ;;  %v2740_v9 = vadd.f32 %v2739_v27, %v2735_v50 }
 0x34f   : > { %v2654_v32 = vadd.f32 %v2653_v39, %v2651_v61  ;;  %v2698_v47 = vadd.f32 %v2697_v17, %v2695_v45  ;;  %v2743_v42 = vadd.f32 %v2742_v15, %v2740_v9 }
 0x351   : > { %2655 = vst.msk [vmem:[%s420_s28] sm:$0xff] %vm783_vm4, %v2654_v32  ;;  %3264 = vst.msk [vmem:[%s420_s28 + $0x8] sm:$0xff] %vm783_vm4, %v2698_v47 }
 0x352   : > { %3274 = vst.msk [vmem:[%s420_s28 + $0x10] sm:$0xff] %vm783_vm4, %v2743_v42 }
 0x353   : > { %3596 = shalt.err (!%p3593_p13)
}
 0x354   : > { %s3597_s2 = scalar_lea.hbm %s5538_s19, 384  ;;  %s3601_s0 = scalar_lea.hbm %s5602_s7, 1536 }
 0x355   : > { %p3598_p10 = scmp.ne.s32.totalorder %s5538_s19, %s3597_s2  ;;  %p3602_p3 = scmp.lt.u32.totalorder %s5538_s19, %s5602_s7 }
 0x356   : > { %p3603_p1 = scmp.lt.u32.totalorder %s3601_s0, %s3597_s2  ;;  %p3605_p0 = scmp.lt.u32.totalorder %s3597_s2, %s5538_s19 }
 0x357   : > { %p3599_p4 = pnand %p3598_p10, %p3889_p2 }
 0x358   : > { %p3604_p8 = por %p3603_p1, %p3602_p3 }
 0x359   : > { %p3600_p6 = pneg %p3599_p4 }
 0x35a   : > { %p3606_p5 = por %p3605_p0, %p3604_p8 }
 0x35c   : > { %p3607_p12 = pnand %p3606_p5, %p3600_p6 }
 0x35e   : > { %3610 = shalt.err (!%p3607_p12)
}
 0x35f   : > { %s3716_s13 = smov 128   ;;  %s3717_s11 = smov 256  }
 0x360   : > { %s3718_s5 = smov 8  }
 0x361   : > { %3304 = dma.vmem_to_hbm [thread:$0]  (%p3889_p2), %s5533_s15, 384, %s5538_s19, %s2747_s14, %s3716_s13, %s3717_s11, %s3718_s5  }
 0x362 PF: > { %s5643_s22 = sld [smem:[#allocation24_spill]]  ;;  %s5644_s10 = sld [smem:[#allocation26_spill]] }
 0x363   : > { %p3344_p9 = scmp.ge.s32.totalorder %s3697_s8, 2 }
 0x368   : > { %s2776_s28 = sand.u32 1, %s5643_s22   ;;  %p5645_p11 = scmp.ne.s32.totalorder %s5644_s10, 0 }
 0x369   : > { %s2777_s16 = scalar_lea.sflag [#allocation6], %s2776_s28 }
 0x36a   : > { %p3330_p7 = pnand %p3344_p9, %p5645_p11 }
 0x36c   : > { %3664 = dma.done.wait (!%p3330_p7), %s2777_s16, 384  }
 0x36d   : > { %3666 = vsyncadd (!%p3330_p7), %s2777_s16, 4294966912  ;;  %s29_s8 = sadd.s32 1, %s3697_s8   ;;  %s5646_s28 = sld [smem:[#allocation25_spill]] }
 0x36e   : > { %p26_p13 = scmp.ge.s32.totalorder %s29_s8, 6   ;;  %s5647_s21 = sld [smem:[#allocation27_spill]] }
 0x36f   : > { %s5648_s30 = sld [smem:[#allocation28_spill]]  ;;  %s5649_s24 = smov %s3673_s25 }
 0x370   : > { %s5650_s25 = smov %s3677_s26  ;;  %s5651_s26 = smov %s3911_s4 }
 0x371   : > { %s5652_s27 = smov %s3689_s29  ;;  %28 = sbr.rel (!%p26_p13) target bundleno = 19 (0x13), region = 139 }
 0x374   : > { %s5653_s29 = smov %s5647_s21 }
 0x378   :  { %2782 = vsyncpa [#allocation5], 1 }
 0x379   :  { %2784 = vsyncpa [#allocation5 + $0x1], 1 }
 0x37a   :  { %2785 = vsyncpa [#allocation9], 1 }
 0x37b   :  { %2787 = vsyncpa [#allocation9 + $0x1], 1 }
 0x37c   :  { %2788 = vsyncpa [#allocation6], 1 }
 0x37d   :  { %2790 = vsyncpa [#allocation6 + $0x1], 1 }
 0x37e   :  { %2791 = vsyncpa [#allocation7], 1 }
 0x37f   :  { %2793 = vsyncpa [#allocation7 + $0x1], 1 }
 0x380   :  { %2794 = vsyncpa [#allocation12], 1 }
 0x381   :  { %2795 = vsyncpa [#allocation15], 1 }

</bundles_post_ra>
